<compile_context>
chip_gen: v5e
topology: v5e:2x2
jax: 0.10.0
libtpu: 0.0.40
codegen_flags: <defaults>
</compile_context>

<pallas_src>
import jax
import jax.numpy as jnp
from jax.experimental import pallas as pl
from jax.experimental.pallas import tpu as pltpu

_BN_EPS = 1e-5


# ----------------------------------------------------------------------------
# Glue: bilinear 2x upsample with align_corners=True as separable matmuls.
# ----------------------------------------------------------------------------
def _interp_matrix(out_size, in_size):
    if in_size == 1:
        return jnp.ones((out_size, 1), jnp.float32)
    if out_size == 1:
        return jnp.eye(1, in_size, dtype=jnp.float32)
    pos = jnp.arange(out_size, dtype=jnp.float32) * ((in_size - 1) / (out_size - 1))
    lo = jnp.clip(jnp.floor(pos).astype(jnp.int32), 0, in_size - 2)
    frac = pos - lo.astype(jnp.float32)
    cols = jnp.arange(in_size)[None, :]
    m = (jnp.where(cols == lo[:, None], 1.0 - frac[:, None], 0.0)
         + jnp.where(cols == lo[:, None] + 1, frac[:, None], 0.0))
    return m.astype(jnp.float32)


def _upsample2x_align_corners(x):
    _, _, h, w = x.shape
    mh = _interp_matrix(2 * h, h)
    mw = _interp_matrix(2 * w, w)
    return jnp.einsum('nchw,Hh,Ww->ncHW', x, mh, mw)


def _fold_bn(w, gamma, beta, mean, var, eps=_BN_EPS):
    scale = gamma / jnp.sqrt(var + eps)          # (Co,)
    w_f = w * scale[:, None, None, None]         # (Co, Ci, 3, 3)
    b_f = beta - mean * scale                    # (Co,)
    return w_f.astype(jnp.float32), b_f.astype(jnp.float32)


# ----------------------------------------------------------------------------
# Pallas kernel: fused  concat -> conv3x3+BN+ReLU -> conv3x3+BN+ReLU  per batch.
# Data layout: flat padded spatial grid (P = (H+2)*(W+2)) with a margin of
# M (>= W+3, rounded up to a multiple of 8) rows on each side so every
# (dy, dx) tap is an in-bounds contiguous 2-D slice. Entries in the padding
# ring are garbage and are discarded by the wrapper.
# ----------------------------------------------------------------------------
def _make_doubleconv_kernel(P, Wp, M, Cmid):
    offs = [dy * Wp + dx for dy in (-1, 0, 1) for dx in (-1, 0, 1)]  # matches weight tap order

    def kernel(x2m_ref, x1m_ref, mask_ref, w1a_ref, w1b_ref, b1_ref,
               w2_ref, b2_ref, o_ref, h1m_ref):
        # ---- conv1 (BN folded, concat fused via split weights) + ReLU ----
        acc1 = jnp.zeros((P, Cmid), jnp.float32)
        for k, o in enumerate(offs):
            acc1 = acc1 + jnp.dot(x2m_ref[0, M + o:M + o + P, :], w1a_ref[k],
                                  preferred_element_type=jnp.float32)
            acc1 = acc1 + jnp.dot(x1m_ref[0, M + o:M + o + P, :], w1b_ref[k],
                                  preferred_element_type=jnp.float32)
        # mask zeroes the spatial-padding ring so conv2 sees proper zero padding
        h1 = jnp.maximum(acc1 + b1_ref[...], 0.0) * mask_ref[...]       # (P, Cmid)

        # stage h1 in VMEM scratch for conv2's shifted reads; zero only the
        # margin strips (interior is fully overwritten by the store below)
        h1m_ref[0:M, :] = jnp.zeros((M, Cmid), jnp.float32)
        h1m_ref[M + P:M + P + M, :] = jnp.zeros((M, Cmid), jnp.float32)
        h1m_ref[M:M + P, :] = h1

        # ---- conv2 (BN folded) + ReLU ----
        cout = o_ref.shape[2]
        acc2 = jnp.zeros((P, cout), jnp.float32)
        for k, o in enumerate(offs):
            acc2 = acc2 + jnp.dot(h1m_ref[M + o:M + o + P, :], w2_ref[k],
                                  preferred_element_type=jnp.float32)
        o_ref[0] = jnp.maximum(acc2 + b2_ref[...], 0.0).astype(o_ref.dtype)

    return kernel


def up_forward(x1, x2, w1, bn1, w2, bn2):
    """Up.forward (bilinear branch), BN in inference mode.

    x1: (N, C1, H1, W1) low-res features; x2: (N, C2, H2, W2) skip connection.
    w1: (Cmid, C2+C1, 3, 3); w2: (Cout, Cmid, 3, 3); bn* = (gamma, beta, mean, var).
    Returns (N, Cout, H2, W2).
    """
    x1 = x1.astype(jnp.float32)
    x2 = x2.astype(jnp.float32)
    N, C1, _, _ = x1.shape
    _, C2, H, W = x2.shape

    # 1) bilinear 2x upsample (align_corners=True) + pad to x2's spatial size
    x1u = _upsample2x_align_corners(x1)
    dy = H - x1u.shape[2]
    dx = W - x1u.shape[3]
    x1u = jnp.pad(x1u, ((0, 0), (0, 0),
                        (dy // 2, dy - dy // 2), (dx // 2, dx - dx // 2)))

    # 2) NHWC, spatial zero pad of 1, flatten to (P, C) + sublane-aligned flat margin
    Hp, Wp = H + 2, W + 2
    P = Hp * Wp
    M = -(-(Wp + 1) // 8) * 8          # margin >= Wp+1, multiple of 8

    def to_flat_margin(x):             # (N, C, H, W) -> (N, P + 2M, C)
        xh = jnp.transpose(x, (0, 2, 3, 1))
        xp = jnp.pad(xh, ((0, 0), (1, 1), (1, 1), (0, 0)))
        xf = xp.reshape(N, P, x.shape[1])
        return jnp.pad(xf, ((0, 0), (M, M), (0, 0)))

    x2m = to_flat_margin(x2)           # (N, P+2M, C2)
    x1m = to_flat_margin(x1u)          # (N, P+2M, C1)

    # interior mask on the flat padded grid (1 inside, 0 on the padding ring)
    rr = jnp.arange(Hp)[:, None]
    cc = jnp.arange(Wp)[None, :]
    interior = (rr >= 1) & (rr <= H) & (cc >= 1) & (cc <= W)
    mask = interior.astype(jnp.float32).reshape(P, 1)

    # 3) fold BN into conv weights/bias; pack per-tap weights as (9, Cin, Cout);
    #    split conv1's weight into the x2 part and the x1u part (concat fusion)
    w1f, b1f = _fold_bn(w1.astype(jnp.float32), *bn1)
    w2f, b2f = _fold_bn(w2.astype(jnp.float32), *bn2)
    Cmid = w1.shape[0]
    Cout = w2.shape[0]
    w1k = jnp.transpose(w1f, (2, 3, 1, 0)).reshape(9, C2 + C1, Cmid)
    w1a = w1k[:, :C2, :]               # multiplies x2
    w1b = w1k[:, C2:, :]               # multiplies upsampled/padded x1
    w2k = jnp.transpose(w2f, (2, 3, 1, 0)).reshape(9, Cmid, Cout)
    b1r = b1f.reshape(1, Cmid)
    b2r = b2f.reshape(1, Cout)

    kernel = _make_doubleconv_kernel(P, Wp, M, Cmid)

    res = pl.pallas_call(
        kernel,
        out_shape=jax.ShapeDtypeStruct((N, P, Cout), jnp.float32),
        grid_spec=pltpu.PrefetchScalarGridSpec(
            num_scalar_prefetch=0,
            grid=(N,),
            in_specs=[
                pl.BlockSpec((1, P + 2 * M, C2), lambda n: (n, 0, 0)),
                pl.BlockSpec((1, P + 2 * M, C1), lambda n: (n, 0, 0)),
                pl.BlockSpec((P, 1), lambda n: (0, 0)),
                pl.BlockSpec((9, C2, Cmid), lambda n: (0, 0, 0)),
                pl.BlockSpec((9, C1, Cmid), lambda n: (0, 0, 0)),
                pl.BlockSpec((1, Cmid), lambda n: (0, 0)),
                pl.BlockSpec((9, Cmid, Cout), lambda n: (0, 0, 0)),
                pl.BlockSpec((1, Cout), lambda n: (0, 0)),
            ],
            out_specs=pl.BlockSpec((1, P, Cout), lambda n: (n, 0, 0)),
            scratch_shapes=[pltpu.VMEM((P + 2 * M, Cmid), jnp.float32)],
        ),
        compiler_params=pltpu.CompilerParams(
            dimension_semantics=("parallel",),
        ),
    )(x2m, x1m, mask, w1a, w1b, b1r, w2k, b2r)

    # 4) drop padded ring, back to NCHW
    out = res.reshape(N, Hp, Wp, Cout)[:, 1:H + 1, 1:W + 1, :]
    return jnp.transpose(out, (0, 3, 1, 2))


# ----------------------------------------------------------------------------
# Pure-JAX reference (independent formulation: gather bilinear + lax.conv).
# ----------------------------------------------------------------------------
def _bilinear_gather_align_corners(x, out_h, out_w):
    N, C, H, W = x.shape

    def coords(o, i):
        if o == 1:
            return jnp.zeros((o,), jnp.float32)
        return jnp.arange(o, dtype=jnp.float32) * ((i - 1) / (o - 1))

    ys, xs = coords(out_h, H), coords(out_w, W)
    y0 = jnp.floor(ys).astype(jnp.int32)
    x0 = jnp.floor(xs).astype(jnp.int32)
    y1 = jnp.minimum(y0 + 1, H - 1)
    x1 = jnp.minimum(x0 + 1, W - 1)
    wy = (ys - y0)[:, None]
    wx = (xs - x0)[None, :]
    g = lambda yi, xi: x[:, :, yi[:, None], xi[None, :]]
    top = g(y0, x0) * (1 - wx) + g(y0, x1) * wx
    bot = g(y1, x0) * (1 - wx) + g(y1, x1) * wx
    return top * (1 - wy) + bot * wy


def _conv_bn_relu_ref(x, w, gamma, beta, mean, var, eps=_BN_EPS):
    y = jax.lax.conv_general_dilated(
        x, w, window_strides=(1, 1), padding=((1, 1), (1, 1)),
        dimension_numbers=('NCHW', 'OIHW', 'NCHW'))
    scale = gamma / jnp.sqrt(var + eps)
    shift = beta - mean * scale
    y = y * scale[None, :, None, None] + shift[None, :, None, None]
    return jnp.maximum(y, 0.0)


def up_forward_ref(x1, x2, w1, bn1, w2, bn2):
    _, _, H2, W2 = x2.shape
    x1u = _bilinear_gather_align_corners(x1.astype(jnp.float32),
                                         2 * x1.shape[2], 2 * x1.shape[3])
    dy = H2 - x1u.shape[2]
    dx = W2 - x1u.shape[3]
    x1u = jnp.pad(x1u, ((0, 0), (0, 0),
                        (dy // 2, dy - dy // 2), (dx // 2, dx - dx // 2)))
    x = jnp.concatenate([x2.astype(jnp.float32), x1u], axis=1)
    h = _conv_bn_relu_ref(x, w1, *bn1)
    return _conv_bn_relu_ref(h, w2, *bn2)


if __name__ == "__main__":
    key = jax.random.PRNGKey(0)
    ks = jax.random.split(key, 12)

    # Up(in_channels=8, out_channels=4, bilinear=True)
    N = 2
    in_channels, out_channels = 8, 4
    H1 = W1 = 8            # x1 spatial (2x upsampled inside the module)
    H2 = W2 = 16           # x2 (skip connection) spatial
    Cmid = in_channels // 2
    Ccat = in_channels + out_channels   # conv1 input channels = in + out

    x1 = jax.random.normal(ks[0], (N, in_channels, H1, W1), jnp.float32)
    x2 = jax.random.normal(ks[1], (N, out_channels, H2, W2), jnp.float32)

    w1 = 0.2 * jax.random.normal(ks[2], (Cmid, Ccat, 3, 3), jnp.float32)
    w2 = 0.2 * jax.random.normal(ks[3], (out_channels, Cmid, 3, 3), jnp.float32)
    bn1 = (1.0 + 0.1 * jax.random.normal(ks[4], (Cmid,), jnp.float32),
           0.1 * jax.random.normal(ks[5], (Cmid,), jnp.float32),
           0.1 * jax.random.normal(ks[6], (Cmid,), jnp.float32),
           0.5 + jnp.abs(jax.random.normal(ks[7], (Cmid,), jnp.float32)))
    bn2 = (1.0 + 0.1 * jax.random.normal(ks[8], (out_channels,), jnp.float32),
           0.1 * jax.random.normal(ks[9], (out_channels,), jnp.float32),
           0.1 * jax.random.normal(ks[10], (out_channels,), jnp.float32),
           0.5 + jnp.abs(jax.random.normal(ks[11], (out_channels,), jnp.float32)))

    out = up_forward(x1, x2, w1, bn1, w2, bn2)
    out = jax.block_until_ready(out)

    ref = up_forward_ref(x1, x2, w1, bn1, w2, bn2)
    assert out.shape == (N, out_channels, H2, W2), out.shape
    assert jnp.allclose(out, ref, atol=2e-3, rtol=2e-3), \
        float(jnp.max(jnp.abs(out - ref)))

    print("KERNEL_OK")
</pallas_src>

<mosaic_0001>
module attributes {stable_mosaic.version = 11 : i64} {
  func.func @kernel(%arg0: i32, %arg1: memref<1x372x4xf32, #tpu.memory_space<vmem>>, %arg2: memref<1x372x8xf32, #tpu.memory_space<vmem>>, %arg3: memref<324x1xf32, #tpu.memory_space<vmem>>, %arg4: memref<9x4x4xf32, #tpu.memory_space<vmem>>, %arg5: memref<9x8x4xf32, #tpu.memory_space<vmem>>, %arg6: memref<1x4xf32, #tpu.memory_space<vmem>>, %arg7: memref<9x4x4xf32, #tpu.memory_space<vmem>>, %arg8: memref<1x4xf32, #tpu.memory_space<vmem>>, %arg9: memref<1x324x4xf32, #tpu.memory_space<vmem>>, %arg10: memref<372x4xf32, #tpu.memory_space<vmem>>) attributes {dimension_semantics = [#tpu.dimension_semantics<parallel>], iteration_bounds = array<i64: 2>, scalar_prefetch = 0 : i64, scratch_operands = 1 : i64, tpu.core_type = #tpu.core_type<tc>, window_params = [{transform_indices = @transform_0, window_bounds = array<i64: 1, 372, 4>}, {transform_indices = @transform_1, window_bounds = array<i64: 1, 372, 8>}, {pipeline_mode = #tpu.pipeline_mode<synchronous>, transform_indices = @transform_2, window_bounds = array<i64: 324, 1>}, {pipeline_mode = #tpu.pipeline_mode<synchronous>, transform_indices = @transform_3, window_bounds = array<i64: 9, 4, 4>}, {pipeline_mode = #tpu.pipeline_mode<synchronous>, transform_indices = @transform_4, window_bounds = array<i64: 9, 8, 4>}, {pipeline_mode = #tpu.pipeline_mode<synchronous>, transform_indices = @transform_5, window_bounds = array<i64: 1, 4>}, {pipeline_mode = #tpu.pipeline_mode<synchronous>, transform_indices = @transform_6, window_bounds = array<i64: 9, 4, 4>}, {pipeline_mode = #tpu.pipeline_mode<synchronous>, transform_indices = @transform_7, window_bounds = array<i64: 1, 4>}, {transform_indices = @transform_8, window_bounds = array<i64: 1, 324, 4>}]} {
    %cst = arith.constant 0.000000e+00 : f32
    %0 = vector.broadcast %cst : f32 to vector<324x4xf32>
    %c0 = arith.constant 0 : index
    %c5 = arith.constant 5 : index
    %c0_0 = arith.constant 0 : index
    %1 = vector.load %arg1[%c0, %c5, %c0_0] : memref<1x372x4xf32, #tpu.memory_space<vmem>>, vector<1x324x4xf32>
    %2 = vector.shape_cast %1 : vector<1x324x4xf32> to vector<324x4xf32>
    %c0_1 = arith.constant 0 : index
    %c0_2 = arith.constant 0 : index
    %c0_3 = arith.constant 0 : index
    %3 = vector.load %arg4[%c0_1, %c0_2, %c0_3] : memref<9x4x4xf32, #tpu.memory_space<vmem>>, vector<1x4x4xf32>
    %4 = vector.shape_cast %3 : vector<1x4x4xf32> to vector<4x4xf32>
    %cst_4 = arith.constant dense<0.000000e+00> : vector<324x4xf32>
    %5 = tpu.matmul %2, %4, %cst_4 {dimension_numbers = #tpu.dot_dimension_numbers<[1], [0], [0], [1], [0, 0, 1, 1], [], []>} : vector<324x4xf32>, vector<4x4xf32>, vector<324x4xf32> -> vector<324x4xf32>
    %6 = arith.addf %0, %5 : vector<324x4xf32>
    %c0_5 = arith.constant 0 : index
    %c5_6 = arith.constant 5 : index
    %c0_7 = arith.constant 0 : index
    %7 = vector.load %arg2[%c0_5, %c5_6, %c0_7] : memref<1x372x8xf32, #tpu.memory_space<vmem>>, vector<1x324x8xf32>
    %8 = vector.shape_cast %7 : vector<1x324x8xf32> to vector<324x8xf32>
    %c0_8 = arith.constant 0 : index
    %c0_9 = arith.constant 0 : index
    %c0_10 = arith.constant 0 : index
    %9 = vector.load %arg5[%c0_8, %c0_9, %c0_10] : memref<9x8x4xf32, #tpu.memory_space<vmem>>, vector<1x8x4xf32>
    %10 = vector.shape_cast %9 : vector<1x8x4xf32> to vector<8x4xf32>
    %cst_11 = arith.constant dense<0.000000e+00> : vector<324x4xf32>
    %11 = tpu.matmul %8, %10, %cst_11 {dimension_numbers = #tpu.dot_dimension_numbers<[1], [0], [0], [1], [0, 0, 1, 1], [], []>} : vector<324x8xf32>, vector<8x4xf32>, vector<324x4xf32> -> vector<324x4xf32>
    %12 = arith.addf %6, %11 : vector<324x4xf32>
    %c0_12 = arith.constant 0 : index
    %c6 = arith.constant 6 : index
    %c0_13 = arith.constant 0 : index
    %13 = vector.load %arg1[%c0_12, %c6, %c0_13] : memref<1x372x4xf32, #tpu.memory_space<vmem>>, vector<1x324x4xf32>
    %14 = vector.shape_cast %13 : vector<1x324x4xf32> to vector<324x4xf32>
    %c1 = arith.constant 1 : index
    %c0_14 = arith.constant 0 : index
    %c0_15 = arith.constant 0 : index
    %15 = vector.load %arg4[%c1, %c0_14, %c0_15] : memref<9x4x4xf32, #tpu.memory_space<vmem>>, vector<1x4x4xf32>
    %16 = vector.shape_cast %15 : vector<1x4x4xf32> to vector<4x4xf32>
    %cst_16 = arith.constant dense<0.000000e+00> : vector<324x4xf32>
    %17 = tpu.matmul %14, %16, %cst_16 {dimension_numbers = #tpu.dot_dimension_numbers<[1], [0], [0], [1], [0, 0, 1, 1], [], []>} : vector<324x4xf32>, vector<4x4xf32>, vector<324x4xf32> -> vector<324x4xf32>
    %18 = arith.addf %12, %17 : vector<324x4xf32>
    %c0_17 = arith.constant 0 : index
    %c6_18 = arith.constant 6 : index
    %c0_19 = arith.constant 0 : index
    %19 = vector.load %arg2[%c0_17, %c6_18, %c0_19] : memref<1x372x8xf32, #tpu.memory_space<vmem>>, vector<1x324x8xf32>
    %20 = vector.shape_cast %19 : vector<1x324x8xf32> to vector<324x8xf32>
    %c1_20 = arith.constant 1 : index
    %c0_21 = arith.constant 0 : index
    %c0_22 = arith.constant 0 : index
    %21 = vector.load %arg5[%c1_20, %c0_21, %c0_22] : memref<9x8x4xf32, #tpu.memory_space<vmem>>, vector<1x8x4xf32>
    %22 = vector.shape_cast %21 : vector<1x8x4xf32> to vector<8x4xf32>
    %cst_23 = arith.constant dense<0.000000e+00> : vector<324x4xf32>
    %23 = tpu.matmul %20, %22, %cst_23 {dimension_numbers = #tpu.dot_dimension_numbers<[1], [0], [0], [1], [0, 0, 1, 1], [], []>} : vector<324x8xf32>, vector<8x4xf32>, vector<324x4xf32> -> vector<324x4xf32>
    %24 = arith.addf %18, %23 : vector<324x4xf32>
    %c0_24 = arith.constant 0 : index
    %c7 = arith.constant 7 : index
    %c0_25 = arith.constant 0 : index
    %25 = vector.load %arg1[%c0_24, %c7, %c0_25] : memref<1x372x4xf32, #tpu.memory_space<vmem>>, vector<1x324x4xf32>
    %26 = vector.shape_cast %25 : vector<1x324x4xf32> to vector<324x4xf32>
    %c2 = arith.constant 2 : index
    %c0_26 = arith.constant 0 : index
    %c0_27 = arith.constant 0 : index
    %27 = vector.load %arg4[%c2, %c0_26, %c0_27] : memref<9x4x4xf32, #tpu.memory_space<vmem>>, vector<1x4x4xf32>
    %28 = vector.shape_cast %27 : vector<1x4x4xf32> to vector<4x4xf32>
    %cst_28 = arith.constant dense<0.000000e+00> : vector<324x4xf32>
    %29 = tpu.matmul %26, %28, %cst_28 {dimension_numbers = #tpu.dot_dimension_numbers<[1], [0], [0], [1], [0, 0, 1, 1], [], []>} : vector<324x4xf32>, vector<4x4xf32>, vector<324x4xf32> -> vector<324x4xf32>
    %30 = arith.addf %24, %29 : vector<324x4xf32>
    %c0_29 = arith.constant 0 : index
    %c7_30 = arith.constant 7 : index
    %c0_31 = arith.constant 0 : index
    %31 = vector.load %arg2[%c0_29, %c7_30, %c0_31] : memref<1x372x8xf32, #tpu.memory_space<vmem>>, vector<1x324x8xf32>
    %32 = vector.shape_cast %31 : vector<1x324x8xf32> to vector<324x8xf32>
    %c2_32 = arith.constant 2 : index
    %c0_33 = arith.constant 0 : index
    %c0_34 = arith.constant 0 : index
    %33 = vector.load %arg5[%c2_32, %c0_33, %c0_34] : memref<9x8x4xf32, #tpu.memory_space<vmem>>, vector<1x8x4xf32>
    %34 = vector.shape_cast %33 : vector<1x8x4xf32> to vector<8x4xf32>
    %cst_35 = arith.constant dense<0.000000e+00> : vector<324x4xf32>
    %35 = tpu.matmul %32, %34, %cst_35 {dimension_numbers = #tpu.dot_dimension_numbers<[1], [0], [0], [1], [0, 0, 1, 1], [], []>} : vector<324x8xf32>, vector<8x4xf32>, vector<324x4xf32> -> vector<324x4xf32>
    %36 = arith.addf %30, %35 : vector<324x4xf32>
    %c0_36 = arith.constant 0 : index
    %c23 = arith.constant 23 : index
    %c0_37 = arith.constant 0 : index
    %37 = vector.load %arg1[%c0_36, %c23, %c0_37] : memref<1x372x4xf32, #tpu.memory_space<vmem>>, vector<1x324x4xf32>
    %38 = vector.shape_cast %37 : vector<1x324x4xf32> to vector<324x4xf32>
    %c3 = arith.constant 3 : index
    %c0_38 = arith.constant 0 : index
    %c0_39 = arith.constant 0 : index
    %39 = vector.load %arg4[%c3, %c0_38, %c0_39] : memref<9x4x4xf32, #tpu.memory_space<vmem>>, vector<1x4x4xf32>
    %40 = vector.shape_cast %39 : vector<1x4x4xf32> to vector<4x4xf32>
    %cst_40 = arith.constant dense<0.000000e+00> : vector<324x4xf32>
    %41 = tpu.matmul %38, %40, %cst_40 {dimension_numbers = #tpu.dot_dimension_numbers<[1], [0], [0], [1], [0, 0, 1, 1], [], []>} : vector<324x4xf32>, vector<4x4xf32>, vector<324x4xf32> -> vector<324x4xf32>
    %42 = arith.addf %36, %41 : vector<324x4xf32>
    %c0_41 = arith.constant 0 : index
    %c23_42 = arith.constant 23 : index
    %c0_43 = arith.constant 0 : index
    %43 = vector.load %arg2[%c0_41, %c23_42, %c0_43] : memref<1x372x8xf32, #tpu.memory_space<vmem>>, vector<1x324x8xf32>
    %44 = vector.shape_cast %43 : vector<1x324x8xf32> to vector<324x8xf32>
    %c3_44 = arith.constant 3 : index
    %c0_45 = arith.constant 0 : index
    %c0_46 = arith.constant 0 : index
    %45 = vector.load %arg5[%c3_44, %c0_45, %c0_46] : memref<9x8x4xf32, #tpu.memory_space<vmem>>, vector<1x8x4xf32>
    %46 = vector.shape_cast %45 : vector<1x8x4xf32> to vector<8x4xf32>
    %cst_47 = arith.constant dense<0.000000e+00> : vector<324x4xf32>
    %47 = tpu.matmul %44, %46, %cst_47 {dimension_numbers = #tpu.dot_dimension_numbers<[1], [0], [0], [1], [0, 0, 1, 1], [], []>} : vector<324x8xf32>, vector<8x4xf32>, vector<324x4xf32> -> vector<324x4xf32>
    %48 = arith.addf %42, %47 : vector<324x4xf32>
    %c0_48 = arith.constant 0 : index
    %c24 = arith.constant 24 : index
    %c0_49 = arith.constant 0 : index
    %49 = vector.load %arg1[%c0_48, %c24, %c0_49] : memref<1x372x4xf32, #tpu.memory_space<vmem>>, vector<1x324x4xf32>
    %50 = vector.shape_cast %49 : vector<1x324x4xf32> to vector<324x4xf32>
    %c4 = arith.constant 4 : index
    %c0_50 = arith.constant 0 : index
    %c0_51 = arith.constant 0 : index
    %51 = vector.load %arg4[%c4, %c0_50, %c0_51] : memref<9x4x4xf32, #tpu.memory_space<vmem>>, vector<1x4x4xf32>
    %52 = vector.shape_cast %51 : vector<1x4x4xf32> to vector<4x4xf32>
    %cst_52 = arith.constant dense<0.000000e+00> : vector<324x4xf32>
    %53 = tpu.matmul %50, %52, %cst_52 {dimension_numbers = #tpu.dot_dimension_numbers<[1], [0], [0], [1], [0, 0, 1, 1], [], []>} : vector<324x4xf32>, vector<4x4xf32>, vector<324x4xf32> -> vector<324x4xf32>
    %54 = arith.addf %48, %53 : vector<324x4xf32>
    %c0_53 = arith.constant 0 : index
    %c24_54 = arith.constant 24 : index
    %c0_55 = arith.constant 0 : index
    %55 = vector.load %arg2[%c0_53, %c24_54, %c0_55] : memref<1x372x8xf32, #tpu.memory_space<vmem>>, vector<1x324x8xf32>
    %56 = vector.shape_cast %55 : vector<1x324x8xf32> to vector<324x8xf32>
    %c4_56 = arith.constant 4 : index
    %c0_57 = arith.constant 0 : index
    %c0_58 = arith.constant 0 : index
    %57 = vector.load %arg5[%c4_56, %c0_57, %c0_58] : memref<9x8x4xf32, #tpu.memory_space<vmem>>, vector<1x8x4xf32>
    %58 = vector.shape_cast %57 : vector<1x8x4xf32> to vector<8x4xf32>
    %cst_59 = arith.constant dense<0.000000e+00> : vector<324x4xf32>
    %59 = tpu.matmul %56, %58, %cst_59 {dimension_numbers = #tpu.dot_dimension_numbers<[1], [0], [0], [1], [0, 0, 1, 1], [], []>} : vector<324x8xf32>, vector<8x4xf32>, vector<324x4xf32> -> vector<324x4xf32>
    %60 = arith.addf %54, %59 : vector<324x4xf32>
    %c0_60 = arith.constant 0 : index
    %c25 = arith.constant 25 : index
    %c0_61 = arith.constant 0 : index
    %61 = vector.load %arg1[%c0_60, %c25, %c0_61] : memref<1x372x4xf32, #tpu.memory_space<vmem>>, vector<1x324x4xf32>
    %62 = vector.shape_cast %61 : vector<1x324x4xf32> to vector<324x4xf32>
    %c5_62 = arith.constant 5 : index
    %c0_63 = arith.constant 0 : index
    %c0_64 = arith.constant 0 : index
    %63 = vector.load %arg4[%c5_62, %c0_63, %c0_64] : memref<9x4x4xf32, #tpu.memory_space<vmem>>, vector<1x4x4xf32>
    %64 = vector.shape_cast %63 : vector<1x4x4xf32> to vector<4x4xf32>
    %cst_65 = arith.constant dense<0.000000e+00> : vector<324x4xf32>
    %65 = tpu.matmul %62, %64, %cst_65 {dimension_numbers = #tpu.dot_dimension_numbers<[1], [0], [0], [1], [0, 0, 1, 1], [], []>} : vector<324x4xf32>, vector<4x4xf32>, vector<324x4xf32> -> vector<324x4xf32>
    %66 = arith.addf %60, %65 : vector<324x4xf32>
    %c0_66 = arith.constant 0 : index
    %c25_67 = arith.constant 25 : index
    %c0_68 = arith.constant 0 : index
    %67 = vector.load %arg2[%c0_66, %c25_67, %c0_68] : memref<1x372x8xf32, #tpu.memory_space<vmem>>, vector<1x324x8xf32>
    %68 = vector.shape_cast %67 : vector<1x324x8xf32> to vector<324x8xf32>
    %c5_69 = arith.constant 5 : index
    %c0_70 = arith.constant 0 : index
    %c0_71 = arith.constant 0 : index
    %69 = vector.load %arg5[%c5_69, %c0_70, %c0_71] : memref<9x8x4xf32, #tpu.memory_space<vmem>>, vector<1x8x4xf32>
    %70 = vector.shape_cast %69 : vector<1x8x4xf32> to vector<8x4xf32>
    %cst_72 = arith.constant dense<0.000000e+00> : vector<324x4xf32>
    %71 = tpu.matmul %68, %70, %cst_72 {dimension_numbers = #tpu.dot_dimension_numbers<[1], [0], [0], [1], [0, 0, 1, 1], [], []>} : vector<324x8xf32>, vector<8x4xf32>, vector<324x4xf32> -> vector<324x4xf32>
    %72 = arith.addf %66, %71 : vector<324x4xf32>
    %c0_73 = arith.constant 0 : index
    %c41 = arith.constant 41 : index
    %c0_74 = arith.constant 0 : index
    %73 = vector.load %arg1[%c0_73, %c41, %c0_74] : memref<1x372x4xf32, #tpu.memory_space<vmem>>, vector<1x324x4xf32>
    %74 = vector.shape_cast %73 : vector<1x324x4xf32> to vector<324x4xf32>
    %c6_75 = arith.constant 6 : index
    %c0_76 = arith.constant 0 : index
    %c0_77 = arith.constant 0 : index
    %75 = vector.load %arg4[%c6_75, %c0_76, %c0_77] : memref<9x4x4xf32, #tpu.memory_space<vmem>>, vector<1x4x4xf32>
    %76 = vector.shape_cast %75 : vector<1x4x4xf32> to vector<4x4xf32>
    %cst_78 = arith.constant dense<0.000000e+00> : vector<324x4xf32>
    %77 = tpu.matmul %74, %76, %cst_78 {dimension_numbers = #tpu.dot_dimension_numbers<[1], [0], [0], [1], [0, 0, 1, 1], [], []>} : vector<324x4xf32>, vector<4x4xf32>, vector<324x4xf32> -> vector<324x4xf32>
    %78 = arith.addf %72, %77 : vector<324x4xf32>
    %c0_79 = arith.constant 0 : index
    %c41_80 = arith.constant 41 : index
    %c0_81 = arith.constant 0 : index
    %79 = vector.load %arg2[%c0_79, %c41_80, %c0_81] : memref<1x372x8xf32, #tpu.memory_space<vmem>>, vector<1x324x8xf32>
    %80 = vector.shape_cast %79 : vector<1x324x8xf32> to vector<324x8xf32>
    %c6_82 = arith.constant 6 : index
    %c0_83 = arith.constant 0 : index
    %c0_84 = arith.constant 0 : index
    %81 = vector.load %arg5[%c6_82, %c0_83, %c0_84] : memref<9x8x4xf32, #tpu.memory_space<vmem>>, vector<1x8x4xf32>
    %82 = vector.shape_cast %81 : vector<1x8x4xf32> to vector<8x4xf32>
    %cst_85 = arith.constant dense<0.000000e+00> : vector<324x4xf32>
    %83 = tpu.matmul %80, %82, %cst_85 {dimension_numbers = #tpu.dot_dimension_numbers<[1], [0], [0], [1], [0, 0, 1, 1], [], []>} : vector<324x8xf32>, vector<8x4xf32>, vector<324x4xf32> -> vector<324x4xf32>
    %84 = arith.addf %78, %83 : vector<324x4xf32>
    %c0_86 = arith.constant 0 : index
    %c42 = arith.constant 42 : index
    %c0_87 = arith.constant 0 : index
    %85 = vector.load %arg1[%c0_86, %c42, %c0_87] : memref<1x372x4xf32, #tpu.memory_space<vmem>>, vector<1x324x4xf32>
    %86 = vector.shape_cast %85 : vector<1x324x4xf32> to vector<324x4xf32>
    %c7_88 = arith.constant 7 : index
    %c0_89 = arith.constant 0 : index
    %c0_90 = arith.constant 0 : index
    %87 = vector.load %arg4[%c7_88, %c0_89, %c0_90] : memref<9x4x4xf32, #tpu.memory_space<vmem>>, vector<1x4x4xf32>
    %88 = vector.shape_cast %87 : vector<1x4x4xf32> to vector<4x4xf32>
    %cst_91 = arith.constant dense<0.000000e+00> : vector<324x4xf32>
    %89 = tpu.matmul %86, %88, %cst_91 {dimension_numbers = #tpu.dot_dimension_numbers<[1], [0], [0], [1], [0, 0, 1, 1], [], []>} : vector<324x4xf32>, vector<4x4xf32>, vector<324x4xf32> -> vector<324x4xf32>
    %90 = arith.addf %84, %89 : vector<324x4xf32>
    %c0_92 = arith.constant 0 : index
    %c42_93 = arith.constant 42 : index
    %c0_94 = arith.constant 0 : index
    %91 = vector.load %arg2[%c0_92, %c42_93, %c0_94] : memref<1x372x8xf32, #tpu.memory_space<vmem>>, vector<1x324x8xf32>
    %92 = vector.shape_cast %91 : vector<1x324x8xf32> to vector<324x8xf32>
    %c7_95 = arith.constant 7 : index
    %c0_96 = arith.constant 0 : index
    %c0_97 = arith.constant 0 : index
    %93 = vector.load %arg5[%c7_95, %c0_96, %c0_97] : memref<9x8x4xf32, #tpu.memory_space<vmem>>, vector<1x8x4xf32>
    %94 = vector.shape_cast %93 : vector<1x8x4xf32> to vector<8x4xf32>
    %cst_98 = arith.constant dense<0.000000e+00> : vector<324x4xf32>
    %95 = tpu.matmul %92, %94, %cst_98 {dimension_numbers = #tpu.dot_dimension_numbers<[1], [0], [0], [1], [0, 0, 1, 1], [], []>} : vector<324x8xf32>, vector<8x4xf32>, vector<324x4xf32> -> vector<324x4xf32>
    %96 = arith.addf %90, %95 : vector<324x4xf32>
    %c0_99 = arith.constant 0 : index
    %c43 = arith.constant 43 : index
    %c0_100 = arith.constant 0 : index
    %97 = vector.load %arg1[%c0_99, %c43, %c0_100] : memref<1x372x4xf32, #tpu.memory_space<vmem>>, vector<1x324x4xf32>
    %98 = vector.shape_cast %97 : vector<1x324x4xf32> to vector<324x4xf32>
    %c8 = arith.constant 8 : index
    %c0_101 = arith.constant 0 : index
    %c0_102 = arith.constant 0 : index
    %99 = vector.load %arg4[%c8, %c0_101, %c0_102] : memref<9x4x4xf32, #tpu.memory_space<vmem>>, vector<1x4x4xf32>
    %100 = vector.shape_cast %99 : vector<1x4x4xf32> to vector<4x4xf32>
    %cst_103 = arith.constant dense<0.000000e+00> : vector<324x4xf32>
    %101 = tpu.matmul %98, %100, %cst_103 {dimension_numbers = #tpu.dot_dimension_numbers<[1], [0], [0], [1], [0, 0, 1, 1], [], []>} : vector<324x4xf32>, vector<4x4xf32>, vector<324x4xf32> -> vector<324x4xf32>
    %102 = arith.addf %96, %101 : vector<324x4xf32>
    %c0_104 = arith.constant 0 : index
    %c43_105 = arith.constant 43 : index
    %c0_106 = arith.constant 0 : index
    %103 = vector.load %arg2[%c0_104, %c43_105, %c0_106] : memref<1x372x8xf32, #tpu.memory_space<vmem>>, vector<1x324x8xf32>
    %104 = vector.shape_cast %103 : vector<1x324x8xf32> to vector<324x8xf32>
    %c8_107 = arith.constant 8 : index
    %c0_108 = arith.constant 0 : index
    %c0_109 = arith.constant 0 : index
    %105 = vector.load %arg5[%c8_107, %c0_108, %c0_109] : memref<9x8x4xf32, #tpu.memory_space<vmem>>, vector<1x8x4xf32>
    %106 = vector.shape_cast %105 : vector<1x8x4xf32> to vector<8x4xf32>
    %cst_110 = arith.constant dense<0.000000e+00> : vector<324x4xf32>
    %107 = tpu.matmul %104, %106, %cst_110 {dimension_numbers = #tpu.dot_dimension_numbers<[1], [0], [0], [1], [0, 0, 1, 1], [], []>} : vector<324x8xf32>, vector<8x4xf32>, vector<324x4xf32> -> vector<324x4xf32>
    %108 = arith.addf %102, %107 : vector<324x4xf32>
    %c0_111 = arith.constant 0 : index
    %c0_112 = arith.constant 0 : index
    %109 = vector.load %arg6[%c0_111, %c0_112] : memref<1x4xf32, #tpu.memory_space<vmem>>, vector<1x4xf32>
    %110 = vector.broadcast %109 : vector<1x4xf32> to vector<324x4xf32>
    %111 = arith.addf %108, %110 : vector<324x4xf32>
    %cst_113 = arith.constant 0.000000e+00 : f32
    %112 = vector.broadcast %cst_113 : f32 to vector<324x4xf32>
    %113 = arith.maximumf %111, %112 : vector<324x4xf32>
    %c0_114 = arith.constant 0 : index
    %c0_115 = arith.constant 0 : index
    %114 = vector.load %arg3[%c0_114, %c0_115] : memref<324x1xf32, #tpu.memory_space<vmem>>, vector<324x1xf32>
    %115 = vector.broadcast %114 : vector<324x1xf32> to vector<324x4xf32>
    %116 = arith.mulf %113, %115 : vector<324x4xf32>
    %cst_116 = arith.constant 0.000000e+00 : f32
    %117 = vector.broadcast %cst_116 : f32 to vector<24x4xf32>
    %c0_117 = arith.constant 0 : index
    %c0_118 = arith.constant 0 : index
    %118 = vector.load %arg10[%c0_117, %c0_118] : memref<372x4xf32, #tpu.memory_space<vmem>>, vector<24x4xf32>
    tpu.vector_store %arg10[%c0_117, %c0_118], %117 {strides = array<i32>} : memref<372x4xf32, #tpu.memory_space<vmem>>, vector<24x4xf32>,
    %cst_119 = arith.constant 0.000000e+00 : f32
    %119 = vector.broadcast %cst_119 : f32 to vector<24x4xf32>
    %c348 = arith.constant 348 : index
    %c0_120 = arith.constant 0 : index
    %120 = vector.load %arg10[%c348, %c0_120] : memref<372x4xf32, #tpu.memory_space<vmem>>, vector<24x4xf32>
    tpu.vector_store %arg10[%c348, %c0_120], %119 {strides = array<i32>} : memref<372x4xf32, #tpu.memory_space<vmem>>, vector<24x4xf32>,
    %c24_121 = arith.constant 24 : index
    %c0_122 = arith.constant 0 : index
    %121 = vector.load %arg10[%c24_121, %c0_122] : memref<372x4xf32, #tpu.memory_space<vmem>>, vector<324x4xf32>
    tpu.vector_store %arg10[%c24_121, %c0_122], %116 {strides = array<i32>} : memref<372x4xf32, #tpu.memory_space<vmem>>, vector<324x4xf32>,
    %cst_123 = arith.constant 0.000000e+00 : f32
    %122 = vector.broadcast %cst_123 : f32 to vector<324x4xf32>
    %c5_124 = arith.constant 5 : index
    %c0_125 = arith.constant 0 : index
    %123 = vector.load %arg10[%c5_124, %c0_125] : memref<372x4xf32, #tpu.memory_space<vmem>>, vector<324x4xf32>
    %c0_126 = arith.constant 0 : index
    %c0_127 = arith.constant 0 : index
    %c0_128 = arith.constant 0 : index
    %124 = vector.load %arg7[%c0_126, %c0_127, %c0_128] : memref<9x4x4xf32, #tpu.memory_space<vmem>>, vector<1x4x4xf32>
    %125 = vector.shape_cast %124 : vector<1x4x4xf32> to vector<4x4xf32>
    %cst_129 = arith.constant dense<0.000000e+00> : vector<324x4xf32>
    %126 = tpu.matmul %123, %125, %cst_129 {dimension_numbers = #tpu.dot_dimension_numbers<[1], [0], [0], [1], [0, 0, 1, 1], [], []>} : vector<324x4xf32>, vector<4x4xf32>, vector<324x4xf32> -> vector<324x4xf32>
    %127 = arith.addf %122, %126 : vector<324x4xf32>
    %c6_130 = arith.constant 6 : index
    %c0_131 = arith.constant 0 : index
    %128 = vector.load %arg10[%c6_130, %c0_131] : memref<372x4xf32, #tpu.memory_space<vmem>>, vector<324x4xf32>
    %c1_132 = arith.constant 1 : index
    %c0_133 = arith.constant 0 : index
    %c0_134 = arith.constant 0 : index
    %129 = vector.load %arg7[%c1_132, %c0_133, %c0_134] : memref<9x4x4xf32, #tpu.memory_space<vmem>>, vector<1x4x4xf32>
    %130 = vector.shape_cast %129 : vector<1x4x4xf32> to vector<4x4xf32>
    %cst_135 = arith.constant dense<0.000000e+00> : vector<324x4xf32>
    %131 = tpu.matmul %128, %130, %cst_135 {dimension_numbers = #tpu.dot_dimension_numbers<[1], [0], [0], [1], [0, 0, 1, 1], [], []>} : vector<324x4xf32>, vector<4x4xf32>, vector<324x4xf32> -> vector<324x4xf32>
    %132 = arith.addf %127, %131 : vector<324x4xf32>
    %c7_136 = arith.constant 7 : index
    %c0_137 = arith.constant 0 : index
    %133 = vector.load %arg10[%c7_136, %c0_137] : memref<372x4xf32, #tpu.memory_space<vmem>>, vector<324x4xf32>
    %c2_138 = arith.constant 2 : index
    %c0_139 = arith.constant 0 : index
    %c0_140 = arith.constant 0 : index
    %134 = vector.load %arg7[%c2_138, %c0_139, %c0_140] : memref<9x4x4xf32, #tpu.memory_space<vmem>>, vector<1x4x4xf32>
    %135 = vector.shape_cast %134 : vector<1x4x4xf32> to vector<4x4xf32>
    %cst_141 = arith.constant dense<0.000000e+00> : vector<324x4xf32>
    %136 = tpu.matmul %133, %135, %cst_141 {dimension_numbers = #tpu.dot_dimension_numbers<[1], [0], [0], [1], [0, 0, 1, 1], [], []>} : vector<324x4xf32>, vector<4x4xf32>, vector<324x4xf32> -> vector<324x4xf32>
    %137 = arith.addf %132, %136 : vector<324x4xf32>
    %c23_142 = arith.constant 23 : index
    %c0_143 = arith.constant 0 : index
    %138 = vector.load %arg10[%c23_142, %c0_143] : memref<372x4xf32, #tpu.memory_space<vmem>>, vector<324x4xf32>
    %c3_144 = arith.constant 3 : index
    %c0_145 = arith.constant 0 : index
    %c0_146 = arith.constant 0 : index
    %139 = vector.load %arg7[%c3_144, %c0_145, %c0_146] : memref<9x4x4xf32, #tpu.memory_space<vmem>>, vector<1x4x4xf32>
    %140 = vector.shape_cast %139 : vector<1x4x4xf32> to vector<4x4xf32>
    %cst_147 = arith.constant dense<0.000000e+00> : vector<324x4xf32>
    %141 = tpu.matmul %138, %140, %cst_147 {dimension_numbers = #tpu.dot_dimension_numbers<[1], [0], [0], [1], [0, 0, 1, 1], [], []>} : vector<324x4xf32>, vector<4x4xf32>, vector<324x4xf32> -> vector<324x4xf32>
    %142 = arith.addf %137, %141 : vector<324x4xf32>
    %c24_148 = arith.constant 24 : index
    %c0_149 = arith.constant 0 : index
    %143 = vector.load %arg10[%c24_148, %c0_149] : memref<372x4xf32, #tpu.memory_space<vmem>>, vector<324x4xf32>
    %c4_150 = arith.constant 4 : index
    %c0_151 = arith.constant 0 : index
    %c0_152 = arith.constant 0 : index
    %144 = vector.load %arg7[%c4_150, %c0_151, %c0_152] : memref<9x4x4xf32, #tpu.memory_space<vmem>>, vector<1x4x4xf32>
    %145 = vector.shape_cast %144 : vector<1x4x4xf32> to vector<4x4xf32>
    %cst_153 = arith.constant dense<0.000000e+00> : vector<324x4xf32>
    %146 = tpu.matmul %143, %145, %cst_153 {dimension_numbers = #tpu.dot_dimension_numbers<[1], [0], [0], [1], [0, 0, 1, 1], [], []>} : vector<324x4xf32>, vector<4x4xf32>, vector<324x4xf32> -> vector<324x4xf32>
    %147 = arith.addf %142, %146 : vector<324x4xf32>
    %c25_154 = arith.constant 25 : index
    %c0_155 = arith.constant 0 : index
    %148 = vector.load %arg10[%c25_154, %c0_155] : memref<372x4xf32, #tpu.memory_space<vmem>>, vector<324x4xf32>
    %c5_156 = arith.constant 5 : index
    %c0_157 = arith.constant 0 : index
    %c0_158 = arith.constant 0 : index
    %149 = vector.load %arg7[%c5_156, %c0_157, %c0_158] : memref<9x4x4xf32, #tpu.memory_space<vmem>>, vector<1x4x4xf32>
    %150 = vector.shape_cast %149 : vector<1x4x4xf32> to vector<4x4xf32>
    %cst_159 = arith.constant dense<0.000000e+00> : vector<324x4xf32>
    %151 = tpu.matmul %148, %150, %cst_159 {dimension_numbers = #tpu.dot_dimension_numbers<[1], [0], [0], [1], [0, 0, 1, 1], [], []>} : vector<324x4xf32>, vector<4x4xf32>, vector<324x4xf32> -> vector<324x4xf32>
    %152 = arith.addf %147, %151 : vector<324x4xf32>
    %c41_160 = arith.constant 41 : index
    %c0_161 = arith.constant 0 : index
    %153 = vector.load %arg10[%c41_160, %c0_161] : memref<372x4xf32, #tpu.memory_space<vmem>>, vector<324x4xf32>
    %c6_162 = arith.constant 6 : index
    %c0_163 = arith.constant 0 : index
    %c0_164 = arith.constant 0 : index
    %154 = vector.load %arg7[%c6_162, %c0_163, %c0_164] : memref<9x4x4xf32, #tpu.memory_space<vmem>>, vector<1x4x4xf32>
    %155 = vector.shape_cast %154 : vector<1x4x4xf32> to vector<4x4xf32>
    %cst_165 = arith.constant dense<0.000000e+00> : vector<324x4xf32>
    %156 = tpu.matmul %153, %155, %cst_165 {dimension_numbers = #tpu.dot_dimension_numbers<[1], [0], [0], [1], [0, 0, 1, 1], [], []>} : vector<324x4xf32>, vector<4x4xf32>, vector<324x4xf32> -> vector<324x4xf32>
    %157 = arith.addf %152, %156 : vector<324x4xf32>
    %c42_166 = arith.constant 42 : index
    %c0_167 = arith.constant 0 : index
    %158 = vector.load %arg10[%c42_166, %c0_167] : memref<372x4xf32, #tpu.memory_space<vmem>>, vector<324x4xf32>
    %c7_168 = arith.constant 7 : index
    %c0_169 = arith.constant 0 : index
    %c0_170 = arith.constant 0 : index
    %159 = vector.load %arg7[%c7_168, %c0_169, %c0_170] : memref<9x4x4xf32, #tpu.memory_space<vmem>>, vector<1x4x4xf32>
    %160 = vector.shape_cast %159 : vector<1x4x4xf32> to vector<4x4xf32>
    %cst_171 = arith.constant dense<0.000000e+00> : vector<324x4xf32>
    %161 = tpu.matmul %158, %160, %cst_171 {dimension_numbers = #tpu.dot_dimension_numbers<[1], [0], [0], [1], [0, 0, 1, 1], [], []>} : vector<324x4xf32>, vector<4x4xf32>, vector<324x4xf32> -> vector<324x4xf32>
    %162 = arith.addf %157, %161 : vector<324x4xf32>
    %c43_172 = arith.constant 43 : index
    %c0_173 = arith.constant 0 : index
    %163 = vector.load %arg10[%c43_172, %c0_173] : memref<372x4xf32, #tpu.memory_space<vmem>>, vector<324x4xf32>
    %c8_174 = arith.constant 8 : index
    %c0_175 = arith.constant 0 : index
    %c0_176 = arith.constant 0 : index
    %164 = vector.load %arg7[%c8_174, %c0_175, %c0_176] : memref<9x4x4xf32, #tpu.memory_space<vmem>>, vector<1x4x4xf32>
    %165 = vector.shape_cast %164 : vector<1x4x4xf32> to vector<4x4xf32>
    %cst_177 = arith.constant dense<0.000000e+00> : vector<324x4xf32>
    %166 = tpu.matmul %163, %165, %cst_177 {dimension_numbers = #tpu.dot_dimension_numbers<[1], [0], [0], [1], [0, 0, 1, 1], [], []>} : vector<324x4xf32>, vector<4x4xf32>, vector<324x4xf32> -> vector<324x4xf32>
    %167 = arith.addf %162, %166 : vector<324x4xf32>
    %c0_178 = arith.constant 0 : index
    %c0_179 = arith.constant 0 : index
    %168 = vector.load %arg8[%c0_178, %c0_179] : memref<1x4xf32, #tpu.memory_space<vmem>>, vector<1x4xf32>
    %169 = vector.broadcast %168 : vector<1x4xf32> to vector<324x4xf32>
    %170 = arith.addf %167, %169 : vector<324x4xf32>
    %cst_180 = arith.constant 0.000000e+00 : f32
    %171 = vector.broadcast %cst_180 : f32 to vector<324x4xf32>
    %172 = arith.maximumf %170, %171 : vector<324x4xf32>
    %c0_181 = arith.constant 0 : index
    %c0_182 = arith.constant 0 : index
    %c0_183 = arith.constant 0 : index
    %173 = vector.load %arg9[%c0_181, %c0_182, %c0_183] : memref<1x324x4xf32, #tpu.memory_space<vmem>>, vector<1x324x4xf32>
    %174 = vector.shape_cast %173 : vector<1x324x4xf32> to vector<324x4xf32>
    %175 = vector.shape_cast %172 : vector<324x4xf32> to vector<1x324x4xf32>
    tpu.vector_store %arg9[%c0_181, %c0_182, %c0_183], %175 {strides = array<i32>} : memref<1x324x4xf32, #tpu.memory_space<vmem>>, vector<1x324x4xf32>,
    return
  }
  func.func @transform_0(%arg0: i32) -> (i32, i32, i32) {
    %c0_i32 = arith.constant 0 : i32
    %c0_i32_0 = arith.constant 0 : i32
    %c0_i32_1 = arith.constant 0 : i32
    return %arg0, %c0_i32, %c0_i32_0 : i32, i32, i32
  }
  func.func @transform_1(%arg0: i32) -> (i32, i32, i32) {
    %c0_i32 = arith.constant 0 : i32
    %c0_i32_0 = arith.constant 0 : i32
    %c0_i32_1 = arith.constant 0 : i32
    return %arg0, %c0_i32, %c0_i32_0 : i32, i32, i32
  }
  func.func @transform_2(%arg0: i32) -> (i32, i32) {
    %c0_i32 = arith.constant 0 : i32
    %c0_i32_0 = arith.constant 0 : i32
    %c0_i32_1 = arith.constant 0 : i32
    return %c0_i32, %c0_i32_0 : i32, i32
  }
  func.func @transform_3(%arg0: i32) -> (i32, i32, i32) {
    %c0_i32 = arith.constant 0 : i32
    %c0_i32_0 = arith.constant 0 : i32
    %c0_i32_1 = arith.constant 0 : i32
    %c0_i32_2 = arith.constant 0 : i32
    return %c0_i32, %c0_i32_0, %c0_i32_1 : i32, i32, i32
  }
  func.func @transform_4(%arg0: i32) -> (i32, i32, i32) {
    %c0_i32 = arith.constant 0 : i32
    %c0_i32_0 = arith.constant 0 : i32
    %c0_i32_1 = arith.constant 0 : i32
    %c0_i32_2 = arith.constant 0 : i32
    return %c0_i32, %c0_i32_0, %c0_i32_1 : i32, i32, i32
  }
  func.func @transform_5(%arg0: i32) -> (i32, i32) {
    %c0_i32 = arith.constant 0 : i32
    %c0_i32_0 = arith.constant 0 : i32
    %c0_i32_1 = arith.constant 0 : i32
    return %c0_i32, %c0_i32_0 : i32, i32
  }
  func.func @transform_6(%arg0: i32) -> (i32, i32, i32) {
    %c0_i32 = arith.constant 0 : i32
    %c0_i32_0 = arith.constant 0 : i32
    %c0_i32_1 = arith.constant 0 : i32
    %c0_i32_2 = arith.constant 0 : i32
    return %c0_i32, %c0_i32_0, %c0_i32_1 : i32, i32, i32
  }
  func.func @transform_7(%arg0: i32) -> (i32, i32) {
    %c0_i32 = arith.constant 0 : i32
    %c0_i32_0 = arith.constant 0 : i32
    %c0_i32_1 = arith.constant 0 : i32
    return %c0_i32, %c0_i32_0 : i32, i32
  }
  func.func @transform_8(%arg0: i32) -> (i32, i32, i32) {
    %c0_i32 = arith.constant 0 : i32
    %c0_i32_0 = arith.constant 0 : i32
    %c0_i32_1 = arith.constant 0 : i32
    return %arg0, %c0_i32, %c0_i32_0 : i32, i32, i32
  }
}

</mosaic_0001>

<bundles_post_ra>
// kernel: tpu_custom_call.1
= control target key start
LH: loop header
LB: loop body
LE: loop exit
PB: predicated region body
PF: predicated region fallthrough
CT: control target
= control target key end

     0   :  { %s11435_s27 = smov 0   ;;  %s15448_s0 = inlined_call_operand.vmem [shape: f32[2,372,4], index: 0, kind: input, shape index: {}]   ;;  %s15449_s1 = inlined_call_operand.vmem [shape: f32[2,372,8], index: 1, kind: input, shape index: {}]   ;;  %s15450_s2 = inlined_call_operand.vmem [shape: f32[324,1], index: 2, kind: input, shape index: {}]   ;;  %s15451_s3 = inlined_call_operand.vmem [shape: f32[9,4,4], index: 3, kind: input, shape index: {}]   ;;  %s15452_s4 = inlined_call_operand.vmem [shape: f32[9,8,4], index: 4, kind: input, shape index: {}]   ;;  %s15453_s5 = inlined_call_operand.vmem [shape: f32[1,4], index: 5, kind: input, shape index: {}]   ;;  %s15454_s6 = inlined_call_operand.vmem [shape: f32[9,4,4], index: 6, kind: input, shape index: {}]   ;;  %s15455_s7 = inlined_call_operand.vmem [shape: f32[1,4], index: 7, kind: input, shape index: {}]   ;;  %s15456_s8 = inlined_call_operand.vmem [shape: f32[2,324,4], index: 8, kind: output, shape index: {}]  }
   0x1 LB: > { %s10200_s28 = sadd.s32 4294967295, %s11386_s27   ;;  %p10204_p0 = scmp.ge.s32.totalorder %s11386_s27, 1  ;;  %s11386_s27 = sphi %s11435_s27, %s18_s27  }
   0x2   : > { %p272_p1 = scmp.lt.s32.totalorder %s11386_s27, 3 }
   0x4   : > { %p273_p2 = pnand %p10204_p0, %p272_p1 }
   0x6   : > { %276 = sbr.rel (%p273_p2) target bundleno = 2494 (0x9be), region = 52 }
   0xb   : > { %v409_v0 = vld [vmem:[%s15452_s4] sm:$0xff]  ;;  %vm798_vm0 = vcmask 1043456   ;;  %p311_p3 = scmp.lt.s32.totalorder %s10200_s28, 1  ;;  %v10376_v3 = vld [vmem:[%s15451_s3 + $0x8] sm:$0xf]  ;;  %v10419_v4 = vld [vmem:[%s15452_s4 + $0x10] sm:$0xff] }
   0xc   : > { %v367_v1 = vld [vmem:[%s15451_s3] sm:$0xf]  ;;  %v10291_v2 = vld [vmem:[%s15451_s3 + $0x4] sm:$0xf]  ;;  %549 = vmatpush.msra.mxu0 %v409_v0  ;;  %11359 = vmatpush.msra.mxu3 %v409_v0  ;;  %vm410_vm1 = vcmask 64512   ;;  %vm674_vm2 = vcmask 31744  }
   0xd   : > { %10249 = vmatpush.msk.msra.mxu1 %vm798_vm0, %v367_v1  ;;  %10292 = vmatpush.msk.msra.mxu2 %vm798_vm0, %v10291_v2  ;;  %s15788_s28 = smov (!%p311_p3, %s10200_s28), 1  ;;  %v10461_v57 = vld [vmem:[%s15451_s3 + $0xc] sm:$0xf]  ;;  %vm6937_vm3 = vcmask 27648  }
   0xe   : > { %11360 = vmatpush.msk.msrb.mxu3 %vm798_vm0, %v367_v1  ;;  %10377 = vmatpush.msk.msrb.mxu0 %vm798_vm0, %v10376_v3  ;;  %s11362_s17 = smul.u32 376, %s15788_s28 }
   0xf   : > { %2170 = vmatpush.msrb.mxu1 %v10419_v4  ;;  %10462 = vmatpush.msk.msrb.mxu2 %vm798_vm0, %v10461_v57  ;;  %s11363_s30 = smul.u32 328, %s15788_s28 }
  0x10   : > { %s11468_s20 = scalar_lea.vmem %s15449_s1, %s11362_s17  ;;  %s11473_s23 = scalar_lea.vmem %s15448_s0, %s11362_s17 }
  0x11   : > { %v368_v5 = vld [vmem:[%s11468_s20 + $0x5] sm:$0xff]  ;;  %v399_v6 = vld [vmem:[%s11468_s20 + $0xfd] sm:$0xff]  ;;  %v369_v9 = vld [vmem:[%s11468_s20 + $0xd] sm:$0xff]  ;;  %s15138_s11 = scalar_lea.vmem %s15456_s8, %s11363_s30 }
  0x12   : > { %v326_v7 = vld [vmem:[%s11473_s23 + $0x5] sm:$0xff]  ;;  %10208 = vmatmul.msk.f32.vlgmr.msra.gmra.mxu0 %vm410_vm1, %v368_v5  ;;  %10239 = vmatmul.msk.f32.vlgmr.msra.gmra.mxu3 %vm410_vm1, %v399_v6  ;;  %v327_v11 = vld [vmem:[%s11473_s23 + $0xd] sm:$0xff]  ;;  %v370_v13 = vld [vmem:[%s11468_s20 + $0x15] sm:$0xff] }
  0x13   : > { %v942_v8 = vld [vmem:[%s11473_s23 + $0x6] sm:$0xff]  ;;  %10250 = vmatmul.msk.f32.vlgmr.msra.gmra.mxu1 %vm674_vm2, %v326_v7  ;;  %11361 = vmatpush.msk.msra.mxu3 %vm798_vm0, %v10291_v2  ;;  %v943_v12 = vld [vmem:[%s11473_s23 + $0xe] sm:$0xff]  ;;  %v944_v16 = vld [vmem:[%s11473_s23 + $0x16] sm:$0xff] }
  0x14   : > { %10293 = vmatmul.msk.f32.vlgmr.msra.gmra.mxu2 %vm674_vm2, %v942_v8  ;;  %v400_v10 = vld [vmem:[%s11468_s20 + $0x105] sm:$0xff]  ;;  %v401_v14 = vld [vmem:[%s11468_s20 + $0x10d] sm:$0xff]  ;;  %v328_v15 = vld [vmem:[%s11473_s23 + $0x15] sm:$0xff] }
  0x15   : > { %v371_v17 = vld [vmem:[%s11468_s20 + $0x1d] sm:$0xff]  ;;  %v402_v18 = vld [vmem:[%s11468_s20 + $0x115] sm:$0xff]  ;;  %v372_v21 = vld [vmem:[%s11468_s20 + $0x25] sm:$0xff] }
  0x16   : > { %v329_v19 = vld [vmem:[%s11473_s23 + $0x1d] sm:$0xff]  ;;  %v330_v23 = vld [vmem:[%s11473_s23 + $0x25] sm:$0xff]  ;;  %v373_v25 = vld [vmem:[%s11468_s20 + $0x2d] sm:$0xff] }
  0x17   : > { %v945_v20 = vld [vmem:[%s11473_s23 + $0x1e] sm:$0xff]  ;;  %v946_v24 = vld [vmem:[%s11473_s23 + $0x26] sm:$0xff]  ;;  %v947_v28 = vld [vmem:[%s11473_s23 + $0x2e] sm:$0xff] }
  0x18   : > { %v403_v22 = vld [vmem:[%s11468_s20 + $0x11d] sm:$0xff]  ;;  %v404_v26 = vld [vmem:[%s11468_s20 + $0x125] sm:$0xff]  ;;  %v331_v27 = vld [vmem:[%s11473_s23 + $0x2d] sm:$0xff] }
  0x19   : > { %v374_v29 = vld [vmem:[%s11468_s20 + $0x35] sm:$0xff]  ;;  %v405_v30 = vld [vmem:[%s11468_s20 + $0x12d] sm:$0xff]  ;;  %v375_v33 = vld [vmem:[%s11468_s20 + $0x3d] sm:$0xff] }
  0x1a   : > { %10209 = vmatmul.msk.f32.gmra.mxu0 %vm410_vm1, %v369_v9  ;;  %10240 = vmatmul.msk.f32.gmra.mxu3 %vm410_vm1, %v400_v10  ;;  %v332_v31 = vld [vmem:[%s11473_s23 + $0x35] sm:$0xff]  ;;  %v333_v35 = vld [vmem:[%s11473_s23 + $0x3d] sm:$0xff]  ;;  %v376_v37 = vld [vmem:[%s11468_s20 + $0x45] sm:$0xff] }
  0x1b   : > { %10251 = vmatmul.msk.f32.gmra.mxu1 %vm674_vm2, %v327_v11  ;;  %v948_v32 = vld [vmem:[%s11473_s23 + $0x36] sm:$0xff]  ;;  %v949_v36 = vld [vmem:[%s11473_s23 + $0x3e] sm:$0xff]  ;;  %v950_v40 = vld [vmem:[%s11473_s23 + $0x46] sm:$0xff] }
  0x1c   : > { %10294 = vmatmul.msk.f32.gmra.mxu2 %vm674_vm2, %v943_v12  ;;  %v406_v34 = vld [vmem:[%s11468_s20 + $0x135] sm:$0xff]  ;;  %v407_v38 = vld [vmem:[%s11468_s20 + $0x13d] sm:$0xff]  ;;  %v334_v39 = vld [vmem:[%s11473_s23 + $0x45] sm:$0xff] }
  0x1d   : > { %v377_v41 = vld [vmem:[%s11468_s20 + $0x4d] sm:$0xff]  ;;  %v408_v42 = vld [vmem:[%s11468_s20 + $0x145] sm:$0xf]  ;;  %v378_v45 = vld [vmem:[%s11468_s20 + $0x55] sm:$0xff] }
  0x1e   : > { %v335_v43 = vld [vmem:[%s11473_s23 + $0x4d] sm:$0xff]  ;;  %v357_v46 = vld [vmem:[%s11473_s23 + $0xfd] sm:$0xff]  ;;  %v336_v47 = vld [vmem:[%s11473_s23 + $0x55] sm:$0xff] }
  0x1f   : > { %v951_v44 = vld [vmem:[%s11473_s23 + $0x4e] sm:$0xff]  ;;  %v952_v48 = vld [vmem:[%s11473_s23 + $0x56] sm:$0xff]  ;;  %v358_v50 = vld [vmem:[%s11473_s23 + $0x105] sm:$0xff] }
  0x20   : > { %v379_v49 = vld [vmem:[%s11468_s20 + $0x5d] sm:$0xff]  ;;  %v380_v53 = vld [vmem:[%s11468_s20 + $0x65] sm:$0xff]  ;;  %v359_v54 = vld [vmem:[%s11473_s23 + $0x10d] sm:$0xff] }
  0x21   : > { %v337_v51 = vld [vmem:[%s11473_s23 + $0x5d] sm:$0xff]  ;;  %v338_v55 = vld [vmem:[%s11473_s23 + $0x65] sm:$0xff]  ;;  %v381_v58 = vld [vmem:[%s11468_s20 + $0x6d] sm:$0xff] }
  0x22   : > { %10210 = vmatmul.msk.f32.gmra.mxu0 %vm410_vm1, %v370_v13  ;;  %10241 = vmatmul.msk.f32.gmra.mxu3 %vm410_vm1, %v401_v14  ;;  %v953_v52 = vld [vmem:[%s11473_s23 + $0x5e] sm:$0xff]  ;;  %v954_v56 = vld [vmem:[%s11473_s23 + $0x66] sm:$0xff]  ;;  %v360_v59 = vld [vmem:[%s11473_s23 + $0x115] sm:$0xff] }
  0x23   : > { %10252 = vmatmul.msk.f32.gmra.mxu1 %vm674_vm2, %v328_v15  ;;  %v339_v60 = vld [vmem:[%s11473_s23 + $0x6d] sm:$0xff]  ;;  %v382_v62 = vld [vmem:[%s11468_s20 + $0x75] sm:$0xff]  ;;  %v361_v63 = vld [vmem:[%s11473_s23 + $0x11d] sm:$0xff] }
  0x24   : > { %10295 = vmatmul.msk.f32.gmra.mxu2 %vm674_vm2, %v944_v16  ;;  %v955_v61 = vld [vmem:[%s11473_s23 + $0x6e] sm:$0xff]  ;;  %v956_v1 = vld [vmem:[%s11473_s23 + $0x76] sm:$0xff]  ;;  %v362_v3 = vld [vmem:[%s11473_s23 + $0x125] sm:$0xff] }
  0x25   : > { %v340_v0 = vld [vmem:[%s11473_s23 + $0x75] sm:$0xff]  ;;  %v383_v2 = vld [vmem:[%s11468_s20 + $0x7d] sm:$0xff]  ;;  %v384_v7 = vld [vmem:[%s11468_s20 + $0x85] sm:$0xff] }
  0x26   : > { %v341_v4 = vld [vmem:[%s11473_s23 + $0x7d] sm:$0xff]  ;;  %v363_v8 = vld [vmem:[%s11473_s23 + $0x12d] sm:$0xff]  ;;  %v342_v10 = vld [vmem:[%s11473_s23 + $0x85] sm:$0xff] }
  0x27   : > { %v957_v5 = vld [vmem:[%s11473_s23 + $0x7e] sm:$0xff]  ;;  %v958_v11 = vld [vmem:[%s11473_s23 + $0x86] sm:$0xff]  ;;  %v975_v57 = vld [vmem:[%s11473_s23 + $0x10e] sm:$0xff] }
  0x28   : > { %v10334_v12 = vld [vmem:[%s15452_s4 + $0x8] sm:$0xff] }
  0x29   : > { %v385_v16 = vld [vmem:[%s11468_s20 + $0x8d] sm:$0xff] }
  0x2a   : > { %10211 = vmatmul.msk.f32.gmra.mxu0 %vm410_vm1, %v371_v17  ;;  %10242 = vmatmul.msk.f32.gmra.mxu3 %vm410_vm1, %v402_v18  ;;  %v364_v17 = vld [vmem:[%s11473_s23 + $0x135] sm:$0xff] }
  0x2b   : > { %10253 = vmatmul.msk.f32.gmra.mxu1 %vm674_vm2, %v329_v19  ;;  %v343_v19 = vld [vmem:[%s11473_s23 + $0x8d] sm:$0xff] }
  0x2c   : > { %10296 = vmatmul.msk.f32.gmra.mxu2 %vm674_vm2, %v945_v20  ;;  %v959_v20 = vld [vmem:[%s11473_s23 + $0x8e] sm:$0xff] }
  0x32   : > { %10212 = vmatmul.msk.f32.gmra.mxu0 %vm410_vm1, %v372_v21  ;;  %10243 = vmatmul.msk.f32.gmra.mxu3 %vm410_vm1, %v403_v22 }
  0x33   : > { %10254 = vmatmul.msk.f32.gmra.mxu1 %vm674_vm2, %v330_v23 }
  0x34   : > { %10297 = vmatmul.msk.f32.gmra.mxu2 %vm674_vm2, %v946_v24  ;;  %v386_v24 = vld [vmem:[%s11468_s20 + $0x95] sm:$0xff] }
  0x3a   : > { %10213 = vmatmul.msk.f32.gmra.mxu0 %vm410_vm1, %v373_v25  ;;  %10244 = vmatmul.msk.f32.gmra.mxu3 %vm410_vm1, %v404_v26  ;;  %v365_v25 = vld [vmem:[%s11473_s23 + $0x13d] sm:$0xff] }
  0x3b   : > { %10255 = vmatmul.msk.f32.gmra.mxu1 %vm674_vm2, %v331_v27  ;;  %v344_v27 = vld [vmem:[%s11473_s23 + $0x95] sm:$0xff] }
  0x3c   : > { %10298 = vmatmul.msk.f32.gmra.mxu2 %vm674_vm2, %v947_v28  ;;  %v960_v28 = vld [vmem:[%s11473_s23 + $0x96] sm:$0xff] }
  0x42   : > { %10214 = vmatmul.msk.f32.gmra.mxu0 %vm410_vm1, %v374_v29  ;;  %10245 = vmatmul.msk.f32.gmra.mxu3 %vm410_vm1, %v405_v30 }
  0x43   : > { %10256 = vmatmul.msk.f32.gmra.mxu1 %vm674_vm2, %v332_v31 }
  0x44   : > { %10299 = vmatmul.msk.f32.gmra.mxu2 %vm674_vm2, %v948_v32  ;;  %v387_v32 = vld [vmem:[%s11468_s20 + $0x9d] sm:$0xff] }
  0x4a   : > { %10215 = vmatmul.msk.f32.gmra.mxu0 %vm410_vm1, %v375_v33  ;;  %10246 = vmatmul.msk.f32.gmra.mxu3 %vm410_vm1, %v406_v34  ;;  %v366_v33 = vld [vmem:[%s11473_s23 + $0x145] sm:$0xf] }
  0x4b   : > { %10257 = vmatmul.msk.f32.gmra.mxu1 %vm674_vm2, %v333_v35  ;;  %v345_v35 = vld [vmem:[%s11473_s23 + $0x9d] sm:$0xff] }
  0x4c   : > { %10300 = vmatmul.msk.f32.gmra.mxu2 %vm674_vm2, %v949_v36  ;;  %v961_v36 = vld [vmem:[%s11473_s23 + $0x9e] sm:$0xff] }
  0x52   : > { %10216 = vmatmul.msk.f32.gmra.mxu0 %vm410_vm1, %v376_v37  ;;  %10247 = vmatmul.msk.f32.gmra.mxu3 %vm410_vm1, %v407_v38 }
  0x53   : > { %10258 = vmatmul.msk.f32.gmra.mxu1 %vm674_vm2, %v334_v39 }
  0x54   : > { %10301 = vmatmul.msk.f32.gmra.mxu2 %vm674_vm2, %v950_v40  ;;  %v388_v40 = vld [vmem:[%s11468_s20 + $0xa5] sm:$0xff] }
  0x5a   : > { %10217 = vmatmul.msk.f32.gmra.mxu0 %vm410_vm1, %v377_v41  ;;  %10248 = vmatmul.msk.f32.gmra.mxu3 %vm410_vm1, %v408_v42  ;;  %v973_v41 = vld [vmem:[%s11473_s23 + $0xfe] sm:$0xff] }
  0x5b   : > { %10259 = vmatmul.msk.f32.gmra.mxu1 %vm674_vm2, %v335_v43  ;;  %v346_v43 = vld [vmem:[%s11473_s23 + $0xa5] sm:$0xff] }
  0x5c   : > { %10302 = vmatmul.msk.f32.gmra.mxu2 %vm674_vm2, %v951_v44  ;;  %v962_v44 = vld [vmem:[%s11473_s23 + $0xa6] sm:$0xff] }
  0x62   : > { %10218 = vmatmul.msk.f32.gmra.mxu0 %vm410_vm1, %v378_v45  ;;  %10281 = vmatmul.msk.f32.vlgmr.msrb.gmra.mxu3 %vm674_vm2, %v357_v46 }
  0x63   : > { %10260 = vmatmul.msk.f32.gmra.mxu1 %vm674_vm2, %v336_v47  ;;  %1473 = vmatpush.msrb.mxu3 %v10334_v12 }
  0x64   : > { %10303 = vmatmul.msk.f32.gmra.mxu2 %vm674_vm2, %v952_v48  ;;  %v389_v48 = vld [vmem:[%s11468_s20 + $0xad] sm:$0xff] }
  0x6a   : > { %10219 = vmatmul.msk.f32.gmra.mxu0 %vm410_vm1, %v379_v49  ;;  %10282 = vmatmul.msk.f32.gmra.mxu3 %vm674_vm2, %v358_v50  ;;  %v974_v49 = vld [vmem:[%s11473_s23 + $0x106] sm:$0xff] }
  0x6b   : > { %10261 = vmatmul.msk.f32.gmra.mxu1 %vm674_vm2, %v337_v51  ;;  %v347_v51 = vld [vmem:[%s11473_s23 + $0xad] sm:$0xff] }
  0x6c   : > { %10304 = vmatmul.msk.f32.gmra.mxu2 %vm674_vm2, %v953_v52  ;;  %v963_v52 = vld [vmem:[%s11473_s23 + $0xae] sm:$0xff] }
  0x72   : > { %10220 = vmatmul.msk.f32.gmra.mxu0 %vm410_vm1, %v380_v53  ;;  %10283 = vmatmul.msk.f32.gmra.mxu3 %vm674_vm2, %v359_v54 }
  0x73   : > { %10262 = vmatmul.msk.f32.gmra.mxu1 %vm674_vm2, %v338_v55 }
  0x74   : > { %10305 = vmatmul.msk.f32.gmra.mxu2 %vm674_vm2, %v954_v56  ;;  %v390_v56 = vld [vmem:[%s11468_s20 + $0xb5] sm:$0xff] }
  0x7a   : > { %10221 = vmatmul.msk.f32.gmra.mxu0 %vm410_vm1, %v381_v58  ;;  %10284 = vmatmul.msk.f32.gmra.mxu3 %vm674_vm2, %v360_v59  ;;  %v348_v59 = vld [vmem:[%s11473_s23 + $0xb5] sm:$0xff] }
  0x7b   : > { %10263 = vmatmul.msk.f32.gmra.mxu1 %vm674_vm2, %v339_v60  ;;  %v964_v60 = vld [vmem:[%s11473_s23 + $0xb6] sm:$0xff] }
  0x7c   : > { %10306 = vmatmul.msk.f32.gmra.mxu2 %vm674_vm2, %v955_v61 }
  0x82   : > { %10222 = vmatmul.msk.f32.gmra.mxu0 %vm410_vm1, %v382_v62  ;;  %10285 = vmatmul.msk.f32.gmra.mxu3 %vm674_vm2, %v361_v63 }
  0x83   : > { %10264 = vmatmul.msk.f32.gmra.mxu1 %vm674_vm2, %v340_v0  ;;  %v391_v0 = vld [vmem:[%s11468_s20 + $0xbd] sm:$0xff] }
  0x84   : > { %10307 = vmatmul.msk.f32.gmra.mxu2 %vm674_vm2, %v956_v1  ;;  %v976_v1 = vld [vmem:[%s11473_s23 + $0x116] sm:$0xff] }
  0x8a   : > { %10223 = vmatmul.msk.f32.gmra.mxu0 %vm410_vm1, %v383_v2  ;;  %10286 = vmatmul.msk.f32.gmra.mxu3 %vm674_vm2, %v362_v3  ;;  %v349_v3 = vld [vmem:[%s11473_s23 + $0xbd] sm:$0xff] }
  0x8b   : > { %10265 = vmatmul.msk.f32.gmra.mxu1 %vm674_vm2, %v341_v4  ;;  %v965_v4 = vld [vmem:[%s11473_s23 + $0xbe] sm:$0xff] }
  0x8c   : > { %10308 = vmatmul.msk.f32.gmra.mxu2 %vm674_vm2, %v957_v5 }
  0x8f   : > { %v11608_v6 = vpop.f32.mrf.mxu0 }
  0x90   : > { %v11612_v9 = vpop.f32.mrf.mxu1 }
  0x92   : > { %10224 = vmatmul.msk.f32.gmra.mxu0 %vm410_vm1, %v384_v7  ;;  %10287 = vmatmul.msk.f32.gmra.mxu3 %vm674_vm2, %v363_v8 }
  0x93   : > { %10266 = vmatmul.msk.f32.gmra.mxu1 %vm674_vm2, %v342_v10  ;;  %v392_v10 = vld [vmem:[%s11468_s20 + $0xc5] sm:$0xff] }
  0x94   : > { %10309 = vmatmul.msk.f32.gmra.mxu2 %vm674_vm2, %v958_v11  ;;  %v977_v11 = vld [vmem:[%s11473_s23 + $0x11e] sm:$0xff] }
  0x95   : > { %v11623_v13 = vpop.f32.mrf.mxu3 }
  0x97   : > { %v11625_v14 = vpop.f32.mrf.mxu2  ;;  %v11627_v15 = vpop.f32.mrf.mxu0 }
  0x98   : > { %v11631_v18 = vpop.f32.mrf.mxu1 }
  0x9a   : > { %10225 = vmatmul.msk.f32.gmra.mxu0 %vm410_vm1, %v385_v16  ;;  %10288 = vmatmul.msk.f32.gmra.mxu3 %vm674_vm2, %v364_v17  ;;  %v350_v16 = vld [vmem:[%s11473_s23 + $0xc5] sm:$0xff] }
  0x9b   : > { %10267 = vmatmul.msk.f32.gmra.mxu1 %vm674_vm2, %v343_v19  ;;  %v966_v17 = vld [vmem:[%s11473_s23 + $0xc6] sm:$0xff] }
  0x9c   : > { %10310 = vmatmul.msk.f32.gmra.mxu2 %vm674_vm2, %v959_v20 }
  0x9d   : > { %v11639_v21 = vpop.f32.mrf.mxu3 }
  0x9f   : > { %v11641_v22 = vpop.f32.mrf.mxu2  ;;  %v11643_v23 = vpop.f32.mrf.mxu0 }
  0xa0   : > { %v11647_v26 = vpop.f32.mrf.mxu1 }
  0xa2   : > { %10226 = vmatmul.msk.f32.gmra.mxu0 %vm410_vm1, %v386_v24  ;;  %10289 = vmatmul.msk.f32.gmra.mxu3 %vm674_vm2, %v365_v25  ;;  %v393_v25 = vld [vmem:[%s11468_s20 + $0xcd] sm:$0xff] }
  0xa3   : > { %10268 = vmatmul.msk.f32.gmra.mxu1 %vm674_vm2, %v344_v27  ;;  %v978_v27 = vld [vmem:[%s11473_s23 + $0x126] sm:$0xff] }
  0xa4   : > { %10311 = vmatmul.msk.f32.gmra.mxu2 %vm674_vm2, %v960_v28 }
  0xa5   : > { %v11655_v29 = vpop.f32.mrf.mxu3 }
  0xa7   : > { %v11657_v30 = vpop.f32.mrf.mxu2  ;;  %v11659_v31 = vpop.f32.mrf.mxu0 }
  0xa8   : > { %v11663_v34 = vpop.f32.mrf.mxu1 }
  0xaa   : > { %10227 = vmatmul.msk.f32.gmra.mxu0 %vm410_vm1, %v387_v32  ;;  %10290 = vmatmul.msk.f32.gmra.mxu3 %vm674_vm2, %v366_v33  ;;  %v351_v32 = vld [vmem:[%s11473_s23 + $0xcd] sm:$0xff] }
  0xab   : > { %10269 = vmatmul.msk.f32.gmra.mxu1 %vm674_vm2, %v345_v35  ;;  %v967_v33 = vld [vmem:[%s11473_s23 + $0xce] sm:$0xff] }
  0xac   : > { %10312 = vmatmul.msk.f32.gmra.mxu2 %vm674_vm2, %v961_v36 }
  0xad   : > { %v11671_v37 = vpop.f32.mrf.mxu3 }
  0xaf   : > { %v11673_v38 = vpop.f32.mrf.mxu2  ;;  %v11675_v39 = vpop.f32.mrf.mxu0 }
  0xb0   : > { %v11679_v42 = vpop.f32.mrf.mxu1 }
  0xb2   : > { %10228 = vmatmul.msk.f32.gmra.mxu0 %vm410_vm1, %v388_v40  ;;  %10324 = vmatmul.msk.f32.vlgmr.msra.gmra.mxu3 %vm674_vm2, %v973_v41  ;;  %v394_v41 = vld [vmem:[%s11468_s20 + $0xd5] sm:$0xff] }
  0xb3   : > { %10270 = vmatmul.msk.f32.gmra.mxu1 %vm674_vm2, %v346_v43  ;;  %v979_v43 = vld [vmem:[%s11473_s23 + $0x12e] sm:$0xff] }
  0xb4   : > { %10313 = vmatmul.msk.f32.gmra.mxu2 %vm674_vm2, %v962_v44 }
  0xb5   : > { %v11687_v45 = vpop.f32.mrf.mxu3 }
  0xb7   : > { %v11689_v46 = vpop.f32.mrf.mxu2  ;;  %v11691_v47 = vpop.f32.mrf.mxu0 }
  0xb8   : > { %v11695_v50 = vpop.f32.mrf.mxu1 }
  0xba   : > { %10229 = vmatmul.msk.f32.gmra.mxu0 %vm410_vm1, %v389_v48  ;;  %10325 = vmatmul.msk.f32.gmra.mxu3 %vm674_vm2, %v974_v49  ;;  %v352_v48 = vld [vmem:[%s11473_s23 + $0xd5] sm:$0xff] }
  0xbb   : > { %10271 = vmatmul.msk.f32.gmra.mxu1 %vm674_vm2, %v347_v51  ;;  %v968_v49 = vld [vmem:[%s11473_s23 + $0xd6] sm:$0xff] }
  0xbc   : > { %10314 = vmatmul.msk.f32.gmra.mxu2 %vm674_vm2, %v963_v52  ;;  %v10504_v51 = vld [vmem:[%s15452_s4 + $0x18] sm:$0xff] }
  0xbd   : > { %v11703_v53 = vpop.f32.mrf.mxu3  ;;  %2867 = vmatpush.msra.mxu3 %v10504_v51  ;;  %v397_v51 = vld [vmem:[%s11468_s20 + $0xed] sm:$0xff] }
  0xbf   : > { %v11705_v54 = vpop.f32.mrf.mxu2  ;;  %v11707_v55 = vpop.f32.mrf.mxu0 }
  0xc0   : > { %v11711_v58 = vpop.f32.mrf.mxu1 }
  0xc2   : > { %10230 = vmatmul.msk.f32.gmra.mxu0 %vm410_vm1, %v390_v56  ;;  %10326 = vmatmul.msk.f32.gmra.mxu3 %vm674_vm2, %v975_v57 }
  0xc3   : > { %10272 = vmatmul.msk.f32.gmra.mxu1 %vm674_vm2, %v348_v59  ;;  %v395_v59 = vld [vmem:[%s11468_s20 + $0xdd] sm:$0xff] }
  0xc4   : > { %10315 = vmatmul.msk.f32.gmra.mxu2 %vm674_vm2, %v964_v60  ;;  %v980_v60 = vld [vmem:[%s11473_s23 + $0x136] sm:$0xff] }
  0xc5   : > { %v11719_v61 = vpop.f32.mrf.mxu3 }
  0xc7   : > { %v11721_v62 = vpop.f32.mrf.mxu2  ;;  %v11723_v63 = vpop.f32.mrf.mxu0 }
  0xc8   : > { %v11727_v2 = vpop.f32.mrf.mxu1 }
  0xca   : > { %10231 = vmatmul.msk.f32.gmra.mxu0 %vm410_vm1, %v391_v0  ;;  %10327 = vmatmul.msk.f32.gmra.mxu3 %vm674_vm2, %v976_v1  ;;  %v353_v1 = vld [vmem:[%s11473_s23 + $0xdd] sm:$0xff] }
  0xcb   : > { %10273 = vmatmul.msk.f32.gmra.mxu1 %vm674_vm2, %v349_v3  ;;  %v969_v3 = vld [vmem:[%s11473_s23 + $0xde] sm:$0xff] }
  0xcc   : > { %10316 = vmatmul.msk.f32.gmra.mxu2 %vm674_vm2, %v965_v4  ;;  %v10546_v4 = vld [vmem:[%s15451_s3 + $0x10] sm:$0xf] }
  0xcd   : > { %v11735_v5 = vpop.f32.mrf.mxu3  ;;  %10547 = vmatpush.msk.msra.mxu0 %vm798_vm0, %v10546_v4 }
  0xcf   : > { %v11737_v7 = vpop.f32.mrf.mxu2  ;;  %v11739_v8 = vpop.f32.mrf.mxu0 }
  0xd0   : > { %v11743_v12 = vpop.f32.mrf.mxu1 }
  0xd2   : > { %10232 = vmatmul.msk.f32.gmra.mxu0 %vm410_vm1, %v392_v10  ;;  %10328 = vmatmul.msk.f32.gmra.mxu3 %vm674_vm2, %v977_v11  ;;  %v10589_v10 = vld [vmem:[%s15452_s4 + $0x20] sm:$0xff] }
  0xd3   : > { %10274 = vmatmul.msk.f32.gmra.mxu1 %vm674_vm2, %v350_v16 }
  0xd4   : > { %10317 = vmatmul.msk.f32.gmra.mxu2 %vm674_vm2, %v966_v17  ;;  %3564 = vmatpush.msra.mxu1 %v10589_v10 }
  0xd5   : > { %v11751_v19 = vpop.f32.mrf.mxu3 }
  0xd7   : > { %v11753_v20 = vpop.f32.mrf.mxu2  ;;  %v11755_v24 = vpop.f32.mrf.mxu0 }
  0xd8   : > { %v11759_v28 = vpop.f32.mrf.mxu1 }
  0xda   : > { %10233 = vmatmul.msk.f32.gmra.mxu0 %vm410_vm1, %v393_v25  ;;  %10329 = vmatmul.msk.f32.gmra.mxu3 %vm674_vm2, %v978_v27  ;;  %v396_v25 = vld [vmem:[%s11468_s20 + $0xe5] sm:$0xff] }
  0xdb   : > { %10275 = vmatmul.msk.f32.gmra.mxu1 %vm674_vm2, %v351_v32  ;;  %v981_v27 = vld [vmem:[%s11473_s23 + $0x13e] sm:$0xff] }
  0xdc   : > { %10318 = vmatmul.msk.f32.gmra.mxu2 %vm674_vm2, %v967_v33  ;;  %v354_v33 = vld [vmem:[%s11473_s23 + $0xe5] sm:$0xff] }
  0xdd   : > { %v11767_v35 = vpop.f32.mrf.mxu3 }
  0xdf   : > { %v11769_v36 = vpop.f32.mrf.mxu2  ;;  %v11771_v40 = vpop.f32.mrf.mxu0 }
  0xe0   : > { %v11775_v44 = vpop.f32.mrf.mxu1 }
  0xe2   : > { %10234 = vmatmul.msk.f32.gmra.mxu0 %vm410_vm1, %v394_v41  ;;  %10330 = vmatmul.msk.f32.gmra.mxu3 %vm674_vm2, %v979_v43  ;;  %v970_v41 = vld [vmem:[%s11473_s23 + $0xe6] sm:$0xff] }
  0xe3   : > { %10276 = vmatmul.msk.f32.gmra.mxu1 %vm674_vm2, %v352_v48 }
  0xe4   : > { %10319 = vmatmul.msk.f32.gmra.mxu2 %vm674_vm2, %v968_v49 }
  0xe5   : > { %v11786_v52 = vpop.f32.mrf.mxu3 }
  0xe7   : > { %v11788_v56 = vpop.f32.mrf.mxu2  ;;  %v11790_v57 = vpop.f32.mrf.mxu0 }
  0xe8   : > { %15457 = vst [vmem:[#allocation3_spill] sm:$0xff] %v11790_v57  ;;  %v11794_v0 = vpop.f32.mrf.mxu1  ;;  %v1299_v57 = vld [vmem:[%s11468_s20 + $0x3e] sm:$0xff] }
  0xe9   : > { %15458 = vst [vmem:[#allocation4_spill] sm:$0xff] %v11794_v0  ;;  %v1994_v0 = vld [vmem:[%s11468_s20 + $0x2f] sm:$0xff] }
  0xea   : > { %10235 = vmatmul.msk.f32.gmra.mxu0 %vm410_vm1, %v395_v59  ;;  %10331 = vmatmul.msk.f32.gmra.mxu3 %vm674_vm2, %v980_v60  ;;  %v982_v59 = vld [vmem:[%s11473_s23 + $0x146] sm:$0xf] }
  0xeb   : > { %10277 = vmatmul.msk.f32.gmra.mxu1 %vm674_vm2, %v353_v1  ;;  %v355_v1 = vld [vmem:[%s11473_s23 + $0xed] sm:$0xff] }
  0xec   : > { %10320 = vmatmul.msk.f32.gmra.mxu2 %vm674_vm2, %v969_v3  ;;  %v971_v3 = vld [vmem:[%s11473_s23 + $0xee] sm:$0xff] }
  0xed   : > { %v11809_v11 = vpop.f32.mrf.mxu3 }
  0xef   : > { %v11811_v16 = vpop.f32.mrf.mxu2  ;;  %v11813_v17 = vpop.f32.mrf.mxu0 }
  0xf0   : > { %15459 = vst [vmem:[#allocation5_spill] sm:$0xff] %v11811_v16  ;;  %v11817_v32 = vpop.f32.mrf.mxu1  ;;  %v1993_v16 = vld [vmem:[%s11468_s20 + $0x27] sm:$0xff] }
  0xf1   : > { %15460 = vst [vmem:[#allocation6_spill] sm:$0xff] %v11813_v17  ;;  %v1992_v17 = vld [vmem:[%s11468_s20 + $0x1f] sm:$0xff] }
  0xf2   : > { %15461 = vst [vmem:[#allocation7_spill] sm:$0xff] %v11817_v32  ;;  %10236 = vmatmul.msk.f32.gmra.mxu0 %vm410_vm1, %v396_v25  ;;  %10332 = vmatmul.msk.f32.gmra.mxu3 %vm674_vm2, %v981_v27  ;;  %v398_v27 = vld [vmem:[%s11468_s20 + $0xf5] sm:$0xff] }
  0xf3   : > { %10278 = vmatmul.msk.f32.gmra.mxu1 %vm674_vm2, %v354_v33  ;;  %v1292_v33 = vld [vmem:[%s11468_s20 + $0x6] sm:$0xff]  ;;  %v1991_v32 = vld [vmem:[%s11468_s20 + $0x17] sm:$0xff] }
  0xf4   : > { %10321 = vmatmul.msk.f32.gmra.mxu2 %vm674_vm2, %v970_v41 }
  0xf5   : > { %v11825_v43 = vpop.f32.mrf.mxu3 }
  0xf7   : > { %v11827_v48 = vpop.f32.mrf.mxu2  ;;  %v11829_v49 = vpop.f32.mrf.mxu0 }
  0xf8   : > { %15462 = vst [vmem:[#allocation8_spill] sm:$0xff] %v11827_v48  ;;  %v11833_v60 = vpop.f32.mrf.mxu1  ;;  %v2337_v48 = vld [vmem:[%s11473_s23 + $0x1f] sm:$0xff] }
  0xf9   : > { %15463 = vst [vmem:[#allocation9_spill] sm:$0xff] %v11829_v49 }
  0xfa   : > { %15464 = vst [vmem:[#allocation10_spill] sm:$0xff] %v11833_v60  ;;  %10237 = vmatmul.msk.f32.gmra.mxu0 %vm410_vm1, %v397_v51  ;;  %10333 = vmatmul.msk.f32.gmra.mxu3 %vm674_vm2, %v982_v59  ;;  %v356_v51 = vld [vmem:[%s11473_s23 + $0xf5] sm:$0xff] }
  0xfb   : > { %10279 = vmatmul.msk.f32.gmra.mxu1 %vm674_vm2, %v355_v1  ;;  %v972_v59 = vld [vmem:[%s11473_s23 + $0xf6] sm:$0xff] }
  0xfc   : > { %10322 = vmatmul.msk.f32.gmra.mxu2 %vm674_vm2, %v971_v3 }
  0xfd   : > { %v11841_v4 = vpop.f32.mrf.mxu3 }
  0xff   : > { %v11843_v10 = vpop.f32.mrf.mxu2  ;;  %v11845_v25 = vpop.f32.mrf.mxu0 }
 0x100   : > { %15465 = vst [vmem:[#allocation11_spill] sm:$0xff] %v11843_v10  ;;  %v11849_v41 = vpop.f32.mrf.mxu1  ;;  %v1639_v10 = vld [vmem:[%s11473_s23 + $0x7] sm:$0xff] }
 0x101   : > { %15466 = vst [vmem:[#allocation12_spill] sm:$0xff] %v11845_v25 }
 0x102   : > { %15467 = vst [vmem:[#allocation13_spill] sm:$0xff] %v11849_v41  ;;  %10238 = vmatmul.msk.f32.gmra.mxu0 %vm410_vm1, %v398_v27  ;;  %10335 = vmatmul.msk.f32.vlgmr.msrb.gmra.mxu3 %vm410_vm1, %v1292_v33  ;;  %v1293_v41 = vld [vmem:[%s11468_s20 + $0xe] sm:$0xff]  ;;  %v2336_v33 = vld [vmem:[%s11473_s23 + $0x17] sm:$0xff] }
 0x103   : > { %10280 = vmatmul.msk.f32.gmra.mxu1 %vm674_vm2, %v356_v51  ;;  %v1989_v27 = vld [vmem:[%s11468_s20 + $0x7] sm:$0xff] }
 0x104   : > { %10323 = vmatmul.msk.f32.gmra.mxu2 %vm674_vm2, %v972_v59 }
 0x105   : > { %v11857_v1 = vpop.f32.mrf.mxu3 }
 0x107   : > { %v11859_v3 = vpop.f32.mrf.mxu2  ;;  %v11861_v25 = vpop.f32.mrf.mxu0 }
 0x108   : > { %15468 = vst [vmem:[#allocation14_spill] sm:$0xff] %v11859_v3  ;;  %v11865_v60 = vpop.f32.mrf.mxu1  ;;  %v1640_v3 = vld [vmem:[%s11473_s23 + $0xf] sm:$0xff] }
 0x109   : > { %15469 = vst [vmem:[#allocation15_spill] sm:$0xff] %v11861_v25 }
 0x10a   : > { %15470 = vst [vmem:[#allocation16_spill] sm:$0xff] %v11865_v60  ;;  %10336 = vmatmul.msk.f32.gmra.mxu3 %vm410_vm1, %v1293_v41  ;;  %10378 = vmatmul.msk.f32.vlgmr.msrb.gmra.mxu0 %vm674_vm2, %v1639_v10  ;;  %v1294_v60 = vld [vmem:[%s11468_s20 + $0x16] sm:$0xff] }
 0x10b   : > { %10420 = vmatmul.msk.f32.vlgmr.msrb.gmra.mxu1 %vm410_vm1, %v1989_v27  ;;  %v1990_v41 = vld [vmem:[%s11468_s20 + $0xf] sm:$0xff] }
 0x10c   : > { %10463 = vmatmul.msk.f32.vlgmr.msrb.gmra.mxu2 %vm674_vm2, %v2336_v33 }
 0x10d   : > { %v11873_v51 = vpop.f32.mrf.mxu3 }
 0x10f   : > { %v11875_v59 = vpop.f32.mrf.mxu2  ;;  %v11877_v25 = vpop.f32.mrf.mxu0 }
 0x110   : > { %15471 = vst [vmem:[#allocation17_spill] sm:$0xff] %v11875_v59  ;;  %v11881_v49 = vpop.f32.mrf.mxu1 }
 0x111   : > { %15472 = vst [vmem:[#allocation18_spill] sm:$0xff] %v11877_v25 }
 0x112   : > { %15473 = vst [vmem:[#allocation19_spill] sm:$0xff] %v11881_v49  ;;  %10337 = vmatmul.msk.f32.gmra.mxu3 %vm410_vm1, %v1294_v60  ;;  %10379 = vmatmul.msk.f32.gmra.mxu0 %vm674_vm2, %v1640_v3  ;;  %v1295_v49 = vld [vmem:[%s11468_s20 + $0x1e] sm:$0xff]  ;;  %v2338_v60 = vld [vmem:[%s11473_s23 + $0x27] sm:$0xff] }
 0x113   : > { %10421 = vmatmul.msk.f32.gmra.mxu1 %vm410_vm1, %v1990_v41 }
 0x114   : > { %10464 = vmatmul.msk.f32.gmra.mxu2 %vm674_vm2, %v2337_v48 }
 0x115   : > { %v11889_v10 = vpop.f32.mrf.mxu3 }
 0x117   : > { %v11891_v27 = vpop.f32.mrf.mxu2  ;;  %v11893_v25 = vpop.f32.mrf.mxu0 }
 0x118   : > { %15474 = vst [vmem:[#allocation20_spill] sm:$0xff] %v11891_v27  ;;  %v11896_v59 = vpop.f32.mrf.mxu1 }
 0x119   : > { %15475 = vst [vmem:[#allocation21_spill] sm:$0xff] %v11893_v25 }
 0x11a   : > { %15476 = vst [vmem:[#allocation22_spill] sm:$0xff] %v11896_v59  ;;  %10338 = vmatmul.msk.f32.gmra.mxu3 %vm410_vm1, %v1295_v49  ;;  %10380 = vmatmul.msk.f32.gmra.mxu0 %vm674_vm2, %v2336_v33  ;;  %v1296_v59 = vld [vmem:[%s11468_s20 + $0x26] sm:$0xff]  ;;  %v2339_v49 = vld [vmem:[%s11473_s23 + $0x2f] sm:$0xff] }
 0x11b   : > { %10422 = vmatmul.msk.f32.gmra.mxu1 %vm410_vm1, %v1991_v32 }
 0x11c   : > { %10465 = vmatmul.msk.f32.gmra.mxu2 %vm674_vm2, %v2338_v60 }
 0x11d   : > { %v11904_v3 = vpop.f32.mrf.mxu3 }
 0x11f   : > { %v11906_v41 = vpop.f32.mrf.mxu2  ;;  %v11908_v25 = vpop.f32.mrf.mxu0 }
 0x120   : > { %15477 = vst [vmem:[#allocation23_spill] sm:$0xff] %v11906_v41  ;;  %v11911_v27 = vpop.f32.mrf.mxu1 }
 0x121   : > { %15478 = vst [vmem:[#allocation24_spill] sm:$0xff] %v11908_v25 }
 0x122   : > { %15479 = vst [vmem:[#allocation25_spill] sm:$0xff] %v11911_v27  ;;  %10339 = vmatmul.msk.f32.gmra.mxu3 %vm410_vm1, %v1296_v59  ;;  %10381 = vmatmul.msk.f32.gmra.mxu0 %vm674_vm2, %v2337_v48  ;;  %v1297_v27 = vld [vmem:[%s11468_s20 + $0x2e] sm:$0xff]  ;;  %v2340_v59 = vld [vmem:[%s11473_s23 + $0x37] sm:$0xff] }
 0x123   : > { %10423 = vmatmul.msk.f32.gmra.mxu1 %vm410_vm1, %v1992_v17 }
 0x124   : > { %10466 = vmatmul.msk.f32.gmra.mxu2 %vm674_vm2, %v2339_v49 }
 0x125   : > { %v11919_v32 = vpop.f32.mrf.mxu3 }
 0x127   : > { %v11921_v33 = vpop.f32.mrf.mxu2  ;;  %v11923_v25 = vpop.f32.mrf.mxu0 }
 0x128   : > { %15480 = vst [vmem:[#allocation26_spill] sm:$0xff] %v11921_v33  ;;  %v11926_v41 = vpop.f32.mrf.mxu1 }
 0x129   : > { %15481 = vst [vmem:[#allocation27_spill] sm:$0xff] %v11923_v25  ;;  %v1298_v25 = vld [vmem:[%s11468_s20 + $0x36] sm:$0xff] }
 0x12a   : > { %15482 = vst [vmem:[#allocation28_spill] sm:$0xff] %v11926_v41  ;;  %10340 = vmatmul.msk.f32.gmra.mxu3 %vm410_vm1, %v1297_v27  ;;  %10382 = vmatmul.msk.f32.gmra.mxu0 %vm674_vm2, %v2338_v60  ;;  %v2341_v27 = vld [vmem:[%s11473_s23 + $0x3f] sm:$0xff] }
 0x12b   : > { %10424 = vmatmul.msk.f32.gmra.mxu1 %vm410_vm1, %v1993_v16  ;;  %v913_v16 = vadd.f32 %v11786_v52, %v11623_v13  ;;  %v916_v13 = vadd.f32 %v11809_v11, %v11639_v21  ;;  %v919_v21 = vadd.f32 %v11825_v43, %v11655_v29  ;;  %v922_v29 = vadd.f32 %v11841_v4, %v11671_v37 }
 0x12c   : > { %10467 = vmatmul.msk.f32.gmra.mxu2 %vm674_vm2, %v2340_v59  ;;  %v925_v37 = vadd.f32 %v11857_v1, %v11687_v45  ;;  %v928_v45 = vadd.f32 %v11873_v51, %v11703_v53  ;;  %v931_v53 = vadd.f32 %v11889_v10, %v11719_v61  ;;  %v10631_v61 = vld [vmem:[%s15451_s3 + $0x14] sm:$0xf]  ;;  %v934_v10 = vadd.f32 %v11904_v3, %v11735_v5 }
 0x12d   : > { %v11934_v17 = vpop.f32.mrf.mxu3  ;;  %10632 = vmatpush.msk.msra.mxu2 %vm798_vm0, %v10631_v61  ;;  %v937_v5 = vadd.f32 %v11919_v32, %v11751_v19 }
 0x12e   : > { %v940_v19 = vadd.f32 %v11934_v17, %v11767_v35 }
 0x12f   : > { %v11936_v48 = vpop.f32.mrf.mxu2  ;;  %v11938_v33 = vpop.f32.mrf.mxu0 }
 0x130   : > { %15483 = vst [vmem:[#allocation29_spill] sm:$0xff] %v11936_v48  ;;  %v11941_v41 = vpop.f32.mrf.mxu1 }
 0x131   : > { %15484 = vst [vmem:[#allocation30_spill] sm:$0xff] %v11938_v33 }
 0x132   : > { %15485 = vst [vmem:[#allocation31_spill] sm:$0xff] %v11941_v41  ;;  %10341 = vmatmul.msk.f32.gmra.mxu3 %vm410_vm1, %v1298_v25  ;;  %10383 = vmatmul.msk.f32.gmra.mxu0 %vm674_vm2, %v2339_v49  ;;  %v1995_v49 = vld [vmem:[%s11468_s20 + $0x37] sm:$0xff] }
 0x133   : > { %10425 = vmatmul.msk.f32.gmra.mxu1 %vm410_vm1, %v1994_v0  ;;  %v2342_v0 = vld [vmem:[%s11473_s23 + $0x47] sm:$0xff] }
 0x134   : > { %10468 = vmatmul.msk.f32.gmra.mxu2 %vm674_vm2, %v2341_v27 }
 0x135   : > { %v1221_v60 = vpop.f32.mrf.mxu3 }
 0x136   : > { %v11953_v48 = vadd.f32 %v1221_v60, %v913_v16 }
 0x137   : > { %v11951_v33 = vpop.f32.mrf.mxu2  ;;  %v11955_v41 = vpop.f32.mrf.mxu0 }
 0x138   : > { %15486 = vst [vmem:[#allocation32_spill] sm:$0xff] %v11953_v48  ;;  %v11958_v25 = vpop.f32.mrf.mxu1 }
 0x139   : > { %15487 = vst [vmem:[#allocation33_spill] sm:$0xff] %v11958_v25  ;;  %v1300_v25 = vld [vmem:[%s11468_s20 + $0x46] sm:$0xff] }
 0x13a   : > { %10342 = vmatmul.msk.f32.gmra.mxu3 %vm410_vm1, %v1299_v57  ;;  %10384 = vmatmul.msk.f32.gmra.mxu0 %vm674_vm2, %v2340_v59  ;;  %v1996_v59 = vld [vmem:[%s11468_s20 + $0x3f] sm:$0xff] }
 0x13b   : > { %10426 = vmatmul.msk.f32.gmra.mxu1 %vm410_vm1, %v1995_v49  ;;  %v2343_v49 = vld [vmem:[%s11473_s23 + $0x4f] sm:$0xff] }
 0x13c   : > { %10469 = vmatmul.msk.f32.gmra.mxu2 %vm674_vm2, %v2342_v0 }
 0x13d   : > { %v1224_v52 = vpop.f32.mrf.mxu3 }
 0x13e   : > { %v11970_v60 = vadd.f32 %v1224_v52, %v916_v13 }
 0x13f   : > { %v11968_v16 = vpop.f32.mrf.mxu2  ;;  %v11972_v48 = vpop.f32.mrf.mxu0 }
 0x140   : > { %15488 = vst [vmem:[#allocation34_spill] sm:$0xff] %v11970_v60  ;;  %v11975_v57 = vpop.f32.mrf.mxu1 }
 0x141   : > { %15489 = vst [vmem:[#allocation35_spill] sm:$0xff] %v11975_v57  ;;  %v1301_v57 = vld [vmem:[%s11468_s20 + $0x4e] sm:$0xff] }
 0x142   : > { %10343 = vmatmul.msk.f32.gmra.mxu3 %vm410_vm1, %v1300_v25  ;;  %10385 = vmatmul.msk.f32.gmra.mxu0 %vm674_vm2, %v2341_v27  ;;  %v1997_v27 = vld [vmem:[%s11468_s20 + $0x47] sm:$0xff] }
 0x143   : > { %10427 = vmatmul.msk.f32.gmra.mxu1 %vm410_vm1, %v1996_v59  ;;  %v2344_v59 = vld [vmem:[%s11473_s23 + $0x57] sm:$0xff] }
 0x144   : > { %10470 = vmatmul.msk.f32.gmra.mxu2 %vm674_vm2, %v2343_v49 }
 0x145   : > { %v1227_v11 = vpop.f32.mrf.mxu3 }
 0x146   : > { %v11987_v52 = vadd.f32 %v1227_v11, %v919_v21 }
 0x147   : > { %v11985_v13 = vpop.f32.mrf.mxu2  ;;  %v11989_v60 = vpop.f32.mrf.mxu0 }
 0x148   : > { %15490 = vst [vmem:[#allocation36_spill] sm:$0xff] %v11987_v52  ;;  %v11992_v25 = vpop.f32.mrf.mxu1 }
 0x149   : > { %15491 = vst [vmem:[#allocation37_spill] sm:$0xff] %v11992_v25  ;;  %v1302_v25 = vld [vmem:[%s11468_s20 + $0x56] sm:$0xff] }
 0x14a   : > { %10344 = vmatmul.msk.f32.gmra.mxu3 %vm410_vm1, %v1301_v57  ;;  %10386 = vmatmul.msk.f32.gmra.mxu0 %vm674_vm2, %v2342_v0  ;;  %v1998_v0 = vld [vmem:[%s11468_s20 + $0x4f] sm:$0xff] }
 0x14b   : > { %10428 = vmatmul.msk.f32.gmra.mxu1 %vm410_vm1, %v1997_v27  ;;  %v2345_v27 = vld [vmem:[%s11473_s23 + $0x5f] sm:$0xff] }
 0x14c   : > { %10471 = vmatmul.msk.f32.gmra.mxu2 %vm674_vm2, %v2344_v59 }
 0x14d   : > { %v1230_v43 = vpop.f32.mrf.mxu3 }
 0x14e   : > { %v12004_v11 = vadd.f32 %v1230_v43, %v922_v29 }
 0x14f   : > { %v12002_v21 = vpop.f32.mrf.mxu2  ;;  %v12006_v52 = vpop.f32.mrf.mxu0 }
 0x150   : > { %15492 = vst [vmem:[#allocation38_spill] sm:$0xff] %v12004_v11  ;;  %v12009_v57 = vpop.f32.mrf.mxu1 }
 0x151   : > { %15493 = vst [vmem:[#allocation39_spill] sm:$0xff] %v12009_v57  ;;  %v1303_v57 = vld [vmem:[%s11468_s20 + $0x5e] sm:$0xff] }
 0x152   : > { %10345 = vmatmul.msk.f32.gmra.mxu3 %vm410_vm1, %v1302_v25  ;;  %10387 = vmatmul.msk.f32.gmra.mxu0 %vm674_vm2, %v2343_v49  ;;  %v1999_v49 = vld [vmem:[%s11468_s20 + $0x57] sm:$0xff] }
 0x153   : > { %10429 = vmatmul.msk.f32.gmra.mxu1 %vm410_vm1, %v1998_v0  ;;  %v2346_v0 = vld [vmem:[%s11473_s23 + $0x67] sm:$0xff] }
 0x154   : > { %10472 = vmatmul.msk.f32.gmra.mxu2 %vm674_vm2, %v2345_v27 }
 0x155   : > { %v1233_v4 = vpop.f32.mrf.mxu3 }
 0x156   : > { %v12021_v43 = vadd.f32 %v1233_v4, %v925_v37 }
 0x157   : > { %v12019_v29 = vpop.f32.mrf.mxu2  ;;  %v12023_v11 = vpop.f32.mrf.mxu0 }
 0x158   : > { %15494 = vst [vmem:[#allocation40_spill] sm:$0xff] %v12021_v43  ;;  %v12026_v25 = vpop.f32.mrf.mxu1 }
 0x159   : > { %15495 = vst [vmem:[#allocation41_spill] sm:$0xff] %v12026_v25  ;;  %v1304_v25 = vld [vmem:[%s11468_s20 + $0x66] sm:$0xff] }
 0x15a   : > { %10346 = vmatmul.msk.f32.gmra.mxu3 %vm410_vm1, %v1303_v57  ;;  %10388 = vmatmul.msk.f32.gmra.mxu0 %vm674_vm2, %v2344_v59  ;;  %v2000_v59 = vld [vmem:[%s11468_s20 + $0x5f] sm:$0xff] }
 0x15b   : > { %10430 = vmatmul.msk.f32.gmra.mxu1 %vm410_vm1, %v1999_v49  ;;  %v2347_v49 = vld [vmem:[%s11473_s23 + $0x6f] sm:$0xff] }
 0x15c   : > { %10473 = vmatmul.msk.f32.gmra.mxu2 %vm674_vm2, %v2346_v0 }
 0x15d   : > { %v1236_v1 = vpop.f32.mrf.mxu3 }
 0x15e   : > { %v12038_v4 = vadd.f32 %v1236_v1, %v928_v45 }
 0x15f   : > { %v12036_v37 = vpop.f32.mrf.mxu2  ;;  %v12040_v43 = vpop.f32.mrf.mxu0 }
 0x160   : > { %15496 = vst [vmem:[#allocation42_spill] sm:$0xff] %v12038_v4  ;;  %v12043_v57 = vpop.f32.mrf.mxu1 }
 0x161   : > { %15497 = vst [vmem:[#allocation43_spill] sm:$0xff] %v12040_v43 }
 0x162   : > { %15498 = vst [vmem:[#allocation44_spill] sm:$0xff] %v12043_v57  ;;  %10347 = vmatmul.msk.f32.gmra.mxu3 %vm410_vm1, %v1304_v25  ;;  %10389 = vmatmul.msk.f32.gmra.mxu0 %vm674_vm2, %v2345_v27  ;;  %v1305_v57 = vld [vmem:[%s11468_s20 + $0x6e] sm:$0xff]  ;;  %v2348_v25 = vld [vmem:[%s11473_s23 + $0x77] sm:$0xff] }
 0x163   : > { %10431 = vmatmul.msk.f32.gmra.mxu1 %vm410_vm1, %v2000_v59  ;;  %v2001_v27 = vld [vmem:[%s11468_s20 + $0x67] sm:$0xff] }
 0x164   : > { %10474 = vmatmul.msk.f32.gmra.mxu2 %vm674_vm2, %v2347_v49 }
 0x165   : > { %v1239_v51 = vpop.f32.mrf.mxu3 }
 0x166   : > { %v12055_v1 = vadd.f32 %v1239_v51, %v931_v53  ;;  %v1306_v51 = vld [vmem:[%s11468_s20 + $0x76] sm:$0xff] }
 0x167   : > { %v12053_v45 = vpop.f32.mrf.mxu2  ;;  %v12057_v4 = vpop.f32.mrf.mxu0 }
 0x168   : > { %15499 = vst [vmem:[#allocation45_spill] sm:$0xff] %v12055_v1  ;;  %v12060_v43 = vpop.f32.mrf.mxu1  ;;  %v2002_v1 = vld [vmem:[%s11468_s20 + $0x6f] sm:$0xff] }
 0x169   : > { %15500 = vst [vmem:[#allocation46_spill] sm:$0xff] %v12060_v43  ;;  %v2349_v43 = vld [vmem:[%s11473_s23 + $0x7f] sm:$0xff] }
 0x16a   : > { %10348 = vmatmul.msk.f32.gmra.mxu3 %vm410_vm1, %v1305_v57  ;;  %10390 = vmatmul.msk.f32.gmra.mxu0 %vm674_vm2, %v2346_v0 }
 0x16b   : > { %10432 = vmatmul.msk.f32.gmra.mxu1 %vm410_vm1, %v2001_v27 }
 0x16c   : > { %10475 = vmatmul.msk.f32.gmra.mxu2 %vm674_vm2, %v2348_v25 }
 0x16d   : > { %v1242_v59 = vpop.f32.mrf.mxu3 }
 0x16e   : > { %v12076_v57 = vadd.f32 %v1242_v59, %v934_v10 }
 0x16f   : > { %v12074_v53 = vpop.f32.mrf.mxu2  ;;  %v12078_v0 = vpop.f32.mrf.mxu0 }
 0x170   : > { %15501 = vst [vmem:[#allocation47_spill] sm:$0xff] %v12076_v57  ;;  %v12081_v27 = vpop.f32.mrf.mxu1  ;;  %v1307_v57 = vld [vmem:[%s11468_s20 + $0x7e] sm:$0xff] }
 0x172   : > { %10349 = vmatmul.msk.f32.gmra.mxu3 %vm410_vm1, %v1306_v51  ;;  %10391 = vmatmul.msk.f32.gmra.mxu0 %vm674_vm2, %v2347_v49  ;;  %v2003_v49 = vld [vmem:[%s11468_s20 + $0x77] sm:$0xff] }
 0x173   : > { %10433 = vmatmul.msk.f32.gmra.mxu1 %vm410_vm1, %v2002_v1  ;;  %v2350_v1 = vld [vmem:[%s11473_s23 + $0x87] sm:$0xff] }
 0x174   : > { %10476 = vmatmul.msk.f32.gmra.mxu2 %vm674_vm2, %v2349_v43 }
 0x175   : > { %v1245_v3 = vpop.f32.mrf.mxu3 }
 0x176   : > { %v12093_v10 = vadd.f32 %v1245_v3, %v937_v5 }
 0x177   : > { %v12091_v61 = vpop.f32.mrf.mxu2  ;;  %v12095_v59 = vpop.f32.mrf.mxu0 }
 0x178   : > { %15502 = vst [vmem:[#allocation48_spill] sm:$0xff] %v12093_v10  ;;  %v12098_v51 = vpop.f32.mrf.mxu1 }
 0x179   : > { %15503 = vst [vmem:[#allocation49_spill] sm:$0xff] %v12095_v59  ;;  %v820_v59 = vadd.f32 %v11612_v9, %v11608_v6  ;;  %v2352_v6 = vld [vmem:[%s11473_s23 + $0x97] sm:$0xff] }
 0x17a   : > { %15504 = vst [vmem:[#allocation50_spill] sm:$0xff] %v12098_v51  ;;  %10350 = vmatmul.msk.f32.gmra.mxu3 %vm410_vm1, %v1307_v57  ;;  %10392 = vmatmul.msk.f32.gmra.mxu0 %vm674_vm2, %v2348_v25  ;;  %v1308_v51 = vld [vmem:[%s11468_s20 + $0x86] sm:$0xff] }
 0x17b   : > { %10434 = vmatmul.msk.f32.gmra.mxu1 %vm410_vm1, %v2003_v49  ;;  %v2004_v25 = vld [vmem:[%s11468_s20 + $0x7f] sm:$0xff]  ;;  %v2351_v49 = vld [vmem:[%s11473_s23 + $0x8f] sm:$0xff]  ;;  %v1251_v35 = vadd.f32 %v11625_v14, %v820_v59 }
 0x17c   : > { %10477 = vmatmul.msk.f32.gmra.mxu2 %vm674_vm2, %v2350_v1 }
 0x17d   : > { %v1248_v32 = vpop.f32.mrf.mxu3 }
 0x17e   : > { %v12110_v3 = vadd.f32 %v1248_v32, %v940_v19 }
 0x17f   : > { %v12108_v5 = vpop.f32.mrf.mxu2  ;;  %v12112_v10 = vpop.f32.mrf.mxu0 }
 0x180   : > { %15505 = vst [vmem:[#allocation51_spill] sm:$0xff] %v12108_v5  ;;  %v12115_v57 = vpop.f32.mrf.mxu1  ;;  %v2005_v5 = vld [vmem:[%s11468_s20 + $0x87] sm:$0xff] }
 0x181   : > { %15506 = vst [vmem:[#allocation52_spill] sm:$0xff] %v12110_v3 }
 0x182   : > { %15507 = vst [vmem:[#allocation53_spill] sm:$0xff] %v12112_v10  ;;  %10351 = vmatmul.msk.f32.gmra.mxu3 %vm410_vm1, %v1308_v51  ;;  %10393 = vmatmul.msk.f32.gmra.mxu0 %vm674_vm2, %v2349_v43  ;;  %v823_v43 = vadd.f32 %v11631_v18, %v11627_v15  ;;  %v2006_v15 = vld [vmem:[%s11468_s20 + $0x8f] sm:$0xff]  ;;  %v2353_v18 = vld [vmem:[%s11473_s23 + $0x9f] sm:$0xff] }
 0x183   : > { %15508 = vst [vmem:[#allocation54_spill] sm:$0xff] %v12115_v57  ;;  %10435 = vmatmul.msk.f32.gmra.mxu1 %vm410_vm1, %v2004_v25  ;;  %v1309_v57 = vld [vmem:[%s11468_s20 + $0x8e] sm:$0xff] }
 0x184   : > { %10478 = vmatmul.msk.f32.gmra.mxu2 %vm674_vm2, %v2351_v49  ;;  %v1252_v14 = vadd.f32 %v11641_v22, %v823_v43 }
 0x185   : > { %v1475_v17 = vpop.f32.mrf.mxu3 }
 0x186   : > { %v1598_v32 = vadd.f32 %v1475_v17, %v1251_v35 }
 0x187   : > { %v12126_v19 = vpop.f32.mrf.mxu2  ;;  %v1825_v3 = vpop.f32.mrf.mxu0 }
 0x188   : > { %15509 = vst [vmem:[#allocation55_spill] sm:$0xff] %v12126_v19  ;;  %v2172_v10 = vpop.f32.mrf.mxu1  ;;  %v1948_v9 = vadd.f32 %v1825_v3, %v1598_v32  ;;  %v1310_v32 = vld [vmem:[%s11468_s20 + $0x96] sm:$0xff] }
 0x18a   : > { %10352 = vmatmul.msk.f32.gmra.mxu3 %vm410_vm1, %v1309_v57  ;;  %10394 = vmatmul.msk.f32.gmra.mxu0 %vm674_vm2, %v2350_v1  ;;  %v2295_v59 = vadd.f32 %v2172_v10, %v1948_v9 }
 0x18b   : > { %10436 = vmatmul.msk.f32.gmra.mxu1 %vm410_vm1, %v2005_v5  ;;  %v826_v5 = vadd.f32 %v11647_v26, %v11643_v23  ;;  %v2007_v23 = vld [vmem:[%s11468_s20 + $0x97] sm:$0xff]  ;;  %v2354_v26 = vld [vmem:[%s11473_s23 + $0xa7] sm:$0xff] }
 0x18c   : > { %10479 = vmatmul.msk.f32.gmra.mxu2 %vm674_vm2, %v2352_v6 }
 0x18d   : > { %v1478_v51 = vpop.f32.mrf.mxu3  ;;  %v1253_v22 = vadd.f32 %v11657_v30, %v826_v5 }
 0x18e   : > { %v1599_v25 = vadd.f32 %v1478_v51, %v1252_v14  ;;  %v1311_v51 = vld [vmem:[%s11468_s20 + $0x9e] sm:$0xff] }
 0x18f   : > { %v2522_v35 = vpop.f32.mrf.mxu2  ;;  %v1828_v3 = vpop.f32.mrf.mxu0 }
 0x190   : > { %v12138_v17 = vadd.f32 %v2522_v35, %v2295_v59  ;;  %v2175_v19 = vpop.f32.mrf.mxu1  ;;  %v1949_v1 = vadd.f32 %v1828_v3, %v1599_v25  ;;  %v829_v35 = vadd.f32 %v11663_v34, %v11659_v31  ;;  %v2008_v31 = vld [vmem:[%s11468_s20 + $0x9f] sm:$0xff]  ;;  %v2355_v34 = vld [vmem:[%s11473_s23 + $0xaf] sm:$0xff] }
 0x192   : > { %10353 = vmatmul.msk.f32.gmra.mxu3 %vm410_vm1, %v1310_v32  ;;  %10395 = vmatmul.msk.f32.gmra.mxu0 %vm674_vm2, %v2351_v49  ;;  %v2296_v10 = vadd.f32 %v2175_v19, %v1949_v1  ;;  %v1254_v30 = vadd.f32 %v11673_v38, %v829_v35 }
 0x193   : > { %10437 = vmatmul.msk.f32.gmra.mxu1 %vm410_vm1, %v2006_v15 }
 0x194   : > { %10480 = vmatmul.msk.f32.gmra.mxu2 %vm674_vm2, %v2353_v18 }
 0x195   : > { %v1481_v57 = vpop.f32.mrf.mxu3 }
 0x196   : > { %v1600_v9 = vadd.f32 %v1481_v57, %v1253_v22  ;;  %v1312_v22 = vld [vmem:[%s11468_s20 + $0xa6] sm:$0xff]  ;;  %v832_v57 = vadd.f32 %v11679_v42, %v11675_v39  ;;  %v2356_v42 = vld [vmem:[%s11473_s23 + $0xb7] sm:$0xff] }
 0x197   : > { %v2525_v43 = vpop.f32.mrf.mxu2  ;;  %v1831_v59 = vpop.f32.mrf.mxu0  ;;  %v2009_v39 = vld [vmem:[%s11468_s20 + $0xa7] sm:$0xff] }
 0x198   : > { %v12150_v14 = vadd.f32 %v2525_v43, %v2296_v10  ;;  %v2178_v25 = vpop.f32.mrf.mxu1  ;;  %v1950_v49 = vadd.f32 %v1831_v59, %v1600_v9  ;;  %v1255_v38 = vadd.f32 %v11689_v46, %v832_v57 }
 0x19a   : > { %10354 = vmatmul.msk.f32.gmra.mxu3 %vm410_vm1, %v1311_v51  ;;  %10396 = vmatmul.msk.f32.gmra.mxu0 %vm674_vm2, %v2352_v6  ;;  %v2297_v19 = vadd.f32 %v2178_v25, %v1950_v49  ;;  %v1313_v49 = vld [vmem:[%s11468_s20 + $0xae] sm:$0xff] }
 0x19b   : > { %10438 = vmatmul.msk.f32.gmra.mxu1 %vm410_vm1, %v2007_v23 }
 0x19c   : > { %10481 = vmatmul.msk.f32.gmra.mxu2 %vm674_vm2, %v2354_v26 }
 0x19d   : > { %v1484_v3 = vpop.f32.mrf.mxu3 }
 0x19e   : > { %v1601_v32 = vadd.f32 %v1484_v3, %v1254_v30  ;;  %v835_v30 = vadd.f32 %v11695_v50, %v11691_v47  ;;  %v2010_v47 = vld [vmem:[%s11468_s20 + $0xaf] sm:$0xff]  ;;  %v2357_v50 = vld [vmem:[%s11473_s23 + $0xbf] sm:$0xff] }
 0x19f   : > { %v2528_v15 = vpop.f32.mrf.mxu2  ;;  %v1834_v5 = vpop.f32.mrf.mxu0 }
 0x1a0   : > { %v12162_v1 = vadd.f32 %v2528_v15, %v2297_v19  ;;  %v2181_v10 = vpop.f32.mrf.mxu1  ;;  %v1951_v6 = vadd.f32 %v1834_v5, %v1601_v32  ;;  %v1256_v46 = vadd.f32 %v11705_v54, %v835_v30 }
 0x1a2   : > { %10355 = vmatmul.msk.f32.gmra.mxu3 %vm410_vm1, %v1312_v22  ;;  %10397 = vmatmul.msk.f32.gmra.mxu0 %vm674_vm2, %v2353_v18  ;;  %v2298_v9 = vadd.f32 %v2181_v10, %v1951_v6  ;;  %v1314_v10 = vld [vmem:[%s11468_s20 + $0xb6] sm:$0xff]  ;;  %v838_v6 = vadd.f32 %v11711_v58, %v11707_v55  ;;  %v2358_v58 = vld [vmem:[%s11473_s23 + $0xc7] sm:$0xff] }
 0x1a3   : > { %10439 = vmatmul.msk.f32.gmra.mxu1 %vm410_vm1, %v2008_v31  ;;  %v2011_v55 = vld [vmem:[%s11468_s20 + $0xb7] sm:$0xff] }
 0x1a4   : > { %10482 = vmatmul.msk.f32.gmra.mxu2 %vm674_vm2, %v2355_v34  ;;  %v1257_v54 = vadd.f32 %v11721_v62, %v838_v6 }
 0x1a5   : > { %v1487_v43 = vpop.f32.mrf.mxu3 }
 0x1a6   : > { %v1602_v59 = vadd.f32 %v1487_v43, %v1255_v38 }
 0x1a7   : > { %v2531_v51 = vpop.f32.mrf.mxu2  ;;  %v1837_v23 = vpop.f32.mrf.mxu0 }
 0x1a8   : > { %v12174_v25 = vadd.f32 %v2531_v51, %v2298_v9  ;;  %v2184_v35 = vpop.f32.mrf.mxu1  ;;  %v1952_v18 = vadd.f32 %v1837_v23, %v1602_v59  ;;  %v1315_v23 = vld [vmem:[%s11468_s20 + $0xbe] sm:$0xff] }
 0x1aa   : > { %10356 = vmatmul.msk.f32.gmra.mxu3 %vm410_vm1, %v1313_v49  ;;  %10398 = vmatmul.msk.f32.gmra.mxu0 %vm674_vm2, %v2354_v26  ;;  %v2299_v19 = vadd.f32 %v2184_v35, %v1952_v18  ;;  %v841_v35 = vadd.f32 %v11727_v2, %v11723_v63  ;;  %v2012_v63 = vld [vmem:[%s11468_s20 + $0xbf] sm:$0xff]  ;;  %v2359_v2 = vld [vmem:[%s11473_s23 + $0xcf] sm:$0xff] }
 0x1ab   : > { %10440 = vmatmul.msk.f32.gmra.mxu1 %vm410_vm1, %v2009_v39 }
 0x1ac   : > { %10483 = vmatmul.msk.f32.gmra.mxu2 %vm674_vm2, %v2356_v42  ;;  %v1258_v62 = vadd.f32 %v11737_v7, %v841_v35  ;;  %v1318_v35 = vld [vmem:[%s11468_s20 + $0xd6] sm:$0xff] }
 0x1ad   : > { %v1490_v3 = vpop.f32.mrf.mxu3 }
 0x1ae   : > { %v1603_v32 = vadd.f32 %v1490_v3, %v1256_v46 }
 0x1af   : > { %v2534_v15 = vpop.f32.mrf.mxu2  ;;  %v1840_v22 = vpop.f32.mrf.mxu0 }
 0x1b0   : > { %v12186_v5 = vadd.f32 %v2534_v15, %v2299_v19  ;;  %v2187_v31 = vpop.f32.mrf.mxu1  ;;  %v1953_v26 = vadd.f32 %v1840_v22, %v1603_v32  ;;  %v1316_v32 = vld [vmem:[%s11468_s20 + $0xc6] sm:$0xff]  ;;  %v844_v22 = vadd.f32 %v11743_v12, %v11739_v8  ;;  %v2360_v12 = vld [vmem:[%s11473_s23 + $0xd7] sm:$0xff] }
 0x1b1   : > { %v2013_v8 = vld [vmem:[%s11468_s20 + $0xc7] sm:$0xff] }
 0x1b2   : > { %10357 = vmatmul.msk.f32.gmra.mxu3 %vm410_vm1, %v1314_v10  ;;  %10399 = vmatmul.msk.f32.gmra.mxu0 %vm674_vm2, %v2355_v34  ;;  %v2300_v57 = vadd.f32 %v2187_v31, %v1953_v26  ;;  %v1259_v7 = vadd.f32 %v11753_v20, %v844_v22  ;;  %v15510_v22 = vld [vmem:[#allocation3_spill] sm:$0xff] }
 0x1b3   : > { %10441 = vmatmul.msk.f32.gmra.mxu1 %vm410_vm1, %v2010_v47 }
 0x1b4   : > { %10484 = vmatmul.msk.f32.gmra.mxu2 %vm674_vm2, %v2357_v50 }
 0x1b5   : > { %v1493_v38 = vpop.f32.mrf.mxu3 }
 0x1b6   : > { %v1604_v9 = vadd.f32 %v1493_v38, %v1257_v54 }
 0x1b7   : > { %v2537_v43 = vpop.f32.mrf.mxu2  ;;  %v1843_v51 = vpop.f32.mrf.mxu0 }
 0x1b8   : > { %v12198_v59 = vadd.f32 %v2537_v43, %v2300_v57  ;;  %v2190_v49 = vpop.f32.mrf.mxu1  ;;  %v1954_v34 = vadd.f32 %v1843_v51, %v1604_v9  ;;  %v1317_v57 = vld [vmem:[%s11468_s20 + $0xce] sm:$0xff]  ;;  %v847_v9 = vadd.f32 %v11759_v28, %v11755_v24  ;;  %v2361_v28 = vld [vmem:[%s11473_s23 + $0xdf] sm:$0xff] }
 0x1b9   : > { %v2014_v24 = vld [vmem:[%s11468_s20 + $0xcf] sm:$0xff] }
 0x1ba   : > { %10358 = vmatmul.msk.f32.gmra.mxu3 %vm410_vm1, %v1315_v23  ;;  %10400 = vmatmul.msk.f32.gmra.mxu0 %vm674_vm2, %v2356_v42  ;;  %v2301_v39 = vadd.f32 %v2190_v49, %v1954_v34  ;;  %v1260_v20 = vadd.f32 %v11769_v36, %v847_v9 }
 0x1bb   : > { %10442 = vmatmul.msk.f32.gmra.mxu1 %vm410_vm1, %v2011_v55 }
 0x1bc   : > { %10485 = vmatmul.msk.f32.gmra.mxu2 %vm674_vm2, %v2358_v58 }
 0x1bd   : > { %v1496_v18 = vpop.f32.mrf.mxu3 }
 0x1be   : > { %v1605_v30 = vadd.f32 %v1496_v18, %v1258_v62 }
 0x1bf   : > { %v2540_v46 = vpop.f32.mrf.mxu2  ;;  %v1846_v3 = vpop.f32.mrf.mxu0 }
 0x1c0   : > { %v12210_v19 = vadd.f32 %v2540_v46, %v2301_v39  ;;  %v2193_v15 = vpop.f32.mrf.mxu1  ;;  %v1955_v42 = vadd.f32 %v1846_v3, %v1605_v30  ;;  %v850_v39 = vadd.f32 %v11775_v44, %v11771_v40  ;;  %v2015_v40 = vld [vmem:[%s11468_s20 + $0xd7] sm:$0xff]  ;;  %v2362_v44 = vld [vmem:[%s11473_s23 + $0xe7] sm:$0xff] }
 0x1c2   : > { %10359 = vmatmul.msk.f32.gmra.mxu3 %vm410_vm1, %v1316_v32  ;;  %10401 = vmatmul.msk.f32.gmra.mxu0 %vm674_vm2, %v2357_v50  ;;  %v2302_v10 = vadd.f32 %v2193_v15, %v1955_v42  ;;  %v1261_v36 = vadd.f32 %v11788_v56, %v850_v39  ;;  %v15512_v56 = vld [vmem:[#allocation5_spill] sm:$0xff] }
 0x1c3   : > { %10443 = vmatmul.msk.f32.gmra.mxu1 %vm410_vm1, %v2012_v63  ;;  %v1319_v63 = vld [vmem:[%s11468_s20 + $0xde] sm:$0xff] }
 0x1c4   : > { %10486 = vmatmul.msk.f32.gmra.mxu2 %vm674_vm2, %v2359_v2 }
 0x1c5   : > { %v1499_v31 = vpop.f32.mrf.mxu3 }
 0x1c6   : > { %v1606_v47 = vadd.f32 %v1499_v31, %v1259_v7  ;;  %v15511_v7 = vld [vmem:[#allocation4_spill] sm:$0xff] }
 0x1c7   : > { %v2543_v26 = vpop.f32.mrf.mxu2  ;;  %v1849_v54 = vpop.f32.mrf.mxu0 }
 0x1c8   : > { %v12222_v6 = vadd.f32 %v2543_v26, %v2302_v10  ;;  %v2196_v38 = vpop.f32.mrf.mxu1  ;;  %v1956_v50 = vadd.f32 %v1849_v54, %v1606_v47  ;;  %v853_v10 = vadd.f32 %v15511_v7, %v15510_v22 }
 0x1ca   : > { %10360 = vmatmul.msk.f32.gmra.mxu3 %vm410_vm1, %v1317_v57  ;;  %10402 = vmatmul.msk.f32.gmra.mxu0 %vm674_vm2, %v2358_v58  ;;  %v2303_v43 = vadd.f32 %v2196_v38, %v1956_v50  ;;  %v1262_v31 = vadd.f32 %v15512_v56, %v853_v10  ;;  %v1320_v50 = vld [vmem:[%s11468_s20 + $0xe6] sm:$0xff] }
 0x1cb   : > { %10444 = vmatmul.msk.f32.gmra.mxu1 %vm410_vm1, %v2013_v8 }
 0x1cc   : > { %10487 = vmatmul.msk.f32.gmra.mxu2 %vm674_vm2, %v2360_v12 }
 0x1cd   : > { %v1502_v51 = vpop.f32.mrf.mxu3 }
 0x1ce   : > { %v1607_v23 = vadd.f32 %v1502_v51, %v1260_v20  ;;  %v2016_v20 = vld [vmem:[%s11468_s20 + $0xdf] sm:$0xff]  ;;  %v15513_v51 = vld [vmem:[#allocation6_spill] sm:$0xff] }
 0x1cf   : > { %v2546_v49 = vpop.f32.mrf.mxu2  ;;  %v1852_v34 = vpop.f32.mrf.mxu0 }
 0x1d0   : > { %v12234_v55 = vadd.f32 %v2546_v49, %v2303_v43  ;;  %v2199_v62 = vpop.f32.mrf.mxu1  ;;  %v1957_v58 = vadd.f32 %v1852_v34, %v1607_v23  ;;  %v2363_v43 = vld [vmem:[%s11473_s23 + $0xef] sm:$0xff]  ;;  %v15514_v23 = vld [vmem:[#allocation7_spill] sm:$0xff]  ;;  %v15515_v34 = vld [vmem:[#allocation8_spill] sm:$0xff] }
 0x1d1   : > { %v856_v49 = vadd.f32 %v15514_v23, %v15513_v51  ;;  %v15521_v51 = vld [vmem:[#allocation14_spill] sm:$0xff] }
 0x1d2   : > { %10361 = vmatmul.msk.f32.gmra.mxu3 %vm410_vm1, %v1318_v35  ;;  %10403 = vmatmul.msk.f32.gmra.mxu0 %vm674_vm2, %v2359_v2  ;;  %v2304_v18 = vadd.f32 %v2199_v62, %v1957_v58 }
 0x1d3   : > { %10445 = vmatmul.msk.f32.gmra.mxu1 %vm410_vm1, %v2014_v24  ;;  %v1263_v35 = vadd.f32 %v15515_v34, %v856_v49 }
 0x1d4   : > { %10488 = vmatmul.msk.f32.gmra.mxu2 %vm674_vm2, %v2361_v28 }
 0x1d5   : > { %v1505_v30 = vpop.f32.mrf.mxu3 }
 0x1d6   : > { %v1608_v46 = vadd.f32 %v1505_v30, %v1261_v36  ;;  %v1321_v30 = vld [vmem:[%s11468_s20 + $0xee] sm:$0xff] }
 0x1d7   : > { %v2549_v3 = vpop.f32.mrf.mxu2  ;;  %v1855_v15 = vpop.f32.mrf.mxu0 }
 0x1d8   : > { %v12246_v32 = vadd.f32 %v2549_v3, %v2304_v18  ;;  %v2202_v42 = vpop.f32.mrf.mxu1  ;;  %v1958_v2 = vadd.f32 %v1855_v15, %v1608_v46  ;;  %v2017_v3 = vld [vmem:[%s11468_s20 + $0xe7] sm:$0xff]  ;;  %v2364_v15 = vld [vmem:[%s11473_s23 + $0xf7] sm:$0xff] }
 0x1da   : > { %10362 = vmatmul.msk.f32.gmra.mxu3 %vm410_vm1, %v1319_v63  ;;  %10404 = vmatmul.msk.f32.gmra.mxu0 %vm674_vm2, %v2360_v12  ;;  %v2305_v47 = vadd.f32 %v2202_v42, %v1958_v2  ;;  %v15516_v63 = vld [vmem:[#allocation9_spill] sm:$0xff]  ;;  %v15517_v42 = vld [vmem:[#allocation10_spill] sm:$0xff]  ;;  %v15518_v2 = vld [vmem:[#allocation11_spill] sm:$0xff] }
 0x1db   : > { %10446 = vmatmul.msk.f32.gmra.mxu1 %vm410_vm1, %v2015_v40  ;;  %v859_v40 = vadd.f32 %v15517_v42, %v15516_v63  ;;  %v15524_v42 = vld [vmem:[#allocation17_spill] sm:$0xff] }
 0x1dc   : > { %10489 = vmatmul.msk.f32.gmra.mxu2 %vm674_vm2, %v2362_v44 }
 0x1dd   : > { %v1508_v26 = vpop.f32.mrf.mxu3  ;;  %v1264_v22 = vadd.f32 %v15518_v2, %v859_v40 }
 0x1de   : > { %v1609_v54 = vadd.f32 %v1508_v26, %v1262_v31 }
 0x1df   : > { %v2552_v57 = vpop.f32.mrf.mxu2  ;;  %v1858_v8 = vpop.f32.mrf.mxu0 }
 0x1e0   : > { %v12258_v38 = vadd.f32 %v2552_v57, %v2305_v47  ;;  %v2205_v9 = vpop.f32.mrf.mxu1  ;;  %v1959_v12 = vadd.f32 %v1858_v8, %v1609_v54  ;;  %v1322_v54 = vld [vmem:[%s11468_s20 + $0xf6] sm:$0xff] }
 0x1e1   : > { %v2018_v8 = vld [vmem:[%s11468_s20 + $0xef] sm:$0xff] }
 0x1e2   : > { %10363 = vmatmul.msk.f32.gmra.mxu3 %vm410_vm1, %v1320_v50  ;;  %10405 = vmatmul.msk.f32.gmra.mxu0 %vm674_vm2, %v2361_v28  ;;  %v2306_v62 = vadd.f32 %v2205_v9, %v1959_v12  ;;  %v2365_v50 = vld [vmem:[%s11473_s23 + $0xff] sm:$0xff] }
 0x1e3   : > { %10447 = vmatmul.msk.f32.gmra.mxu1 %vm410_vm1, %v2016_v20  ;;  %v15519_v9 = vld [vmem:[#allocation12_spill] sm:$0xff]  ;;  %v15520_v20 = vld [vmem:[#allocation13_spill] sm:$0xff] }
 0x1e4   : > { %10490 = vmatmul.msk.f32.gmra.mxu2 %vm674_vm2, %v2363_v43  ;;  %v862_v12 = vadd.f32 %v15520_v20, %v15519_v9  ;;  %v15526_v9 = vld [vmem:[#allocation19_spill] sm:$0xff] }
 0x1e5   : > { %v1511_v24 = vpop.f32.mrf.mxu3 }
 0x1e6   : > { %v1610_v58 = vadd.f32 %v1511_v24, %v1263_v35  ;;  %v1265_v23 = vadd.f32 %v15521_v51, %v862_v12  ;;  %v15527_v12 = vld [vmem:[#allocation20_spill] sm:$0xff] }
 0x1e7   : > { %v2555_v39 = vpop.f32.mrf.mxu2  ;;  %v1861_v18 = vpop.f32.mrf.mxu0 }
 0x1e8   : > { %v12270_v36 = vadd.f32 %v2555_v39, %v2306_v62  ;;  %v2208_v46 = vpop.f32.mrf.mxu1  ;;  %v1960_v28 = vadd.f32 %v1861_v18, %v1610_v58  ;;  %v1323_v39 = vld [vmem:[%s11468_s20 + $0xfe] sm:$0xff] }
 0x1ea   : > { %10364 = vmatmul.msk.f32.gmra.mxu3 %vm410_vm1, %v1321_v30  ;;  %10406 = vmatmul.msk.f32.gmra.mxu0 %vm674_vm2, %v2362_v44  ;;  %v2307_v7 = vadd.f32 %v2208_v46, %v1960_v28  ;;  %v2019_v30 = vld [vmem:[%s11468_s20 + $0xf7] sm:$0xff]  ;;  %v2366_v46 = vld [vmem:[%s11473_s23 + $0x107] sm:$0xff] }
 0x1eb   : > { %10448 = vmatmul.msk.f32.gmra.mxu1 %vm410_vm1, %v2017_v3  ;;  %v15522_v3 = vld [vmem:[#allocation15_spill] sm:$0xff]  ;;  %v15523_v28 = vld [vmem:[#allocation16_spill] sm:$0xff] }
 0x1ec   : > { %10491 = vmatmul.msk.f32.gmra.mxu2 %vm674_vm2, %v2364_v15  ;;  %v865_v63 = vadd.f32 %v15523_v28, %v15522_v3  ;;  %v15528_v3 = vld [vmem:[#allocation21_spill] sm:$0xff]  ;;  %v15529_v28 = vld [vmem:[#allocation22_spill] sm:$0xff] }
 0x1ed   : > { %v1514_v10 = vpop.f32.mrf.mxu3 }
 0x1ee   : > { %v1611_v56 = vadd.f32 %v1514_v10, %v1264_v22  ;;  %v1266_v40 = vadd.f32 %v15524_v42, %v865_v63  ;;  %v871_v63 = vadd.f32 %v15529_v28, %v15528_v3  ;;  %v15530_v42 = vld [vmem:[#allocation23_spill] sm:$0xff]  ;;  %v2370_v28 = vld [vmem:[%s11473_s23 + $0x127] sm:$0xff] }
 0x1ef   : > { %v2558_v31 = vpop.f32.mrf.mxu2  ;;  %v1864_v26 = vpop.f32.mrf.mxu0  ;;  %v2023_v3 = vld [vmem:[%s11468_s20 + $0x117] sm:$0xff] }
 0x1f0   : > { %v12282_v47 = vadd.f32 %v2558_v31, %v2307_v7  ;;  %v2211_v57 = vpop.f32.mrf.mxu1  ;;  %v1961_v44 = vadd.f32 %v1864_v26, %v1611_v56  ;;  %v1324_v26 = vld [vmem:[%s11468_s20 + $0x106] sm:$0xff] }
 0x1f2   : > { %10365 = vmatmul.msk.f32.gmra.mxu3 %vm410_vm1, %v1322_v54  ;;  %10407 = vmatmul.msk.f32.gmra.mxu0 %vm674_vm2, %v2363_v43  ;;  %v2308_v49 = vadd.f32 %v2211_v57, %v1961_v44  ;;  %v2020_v57 = vld [vmem:[%s11468_s20 + $0xff] sm:$0xff]  ;;  %v15525_v44 = vld [vmem:[#allocation18_spill] sm:$0xff] }
 0x1f3   : > { %10449 = vmatmul.msk.f32.gmra.mxu1 %vm410_vm1, %v2018_v8  ;;  %v2367_v8 = vld [vmem:[%s11473_s23 + $0x10f] sm:$0xff]  ;;  %v868_v20 = vadd.f32 %v15526_v9, %v15525_v44  ;;  %v2369_v44 = vld [vmem:[%s11473_s23 + $0x11f] sm:$0xff] }
 0x1f4   : > { %10492 = vmatmul.msk.f32.gmra.mxu2 %vm674_vm2, %v2365_v50  ;;  %v15531_v9 = vld [vmem:[#allocation24_spill] sm:$0xff] }
 0x1f5   : > { %v1517_v34 = vpop.f32.mrf.mxu3  ;;  %v1267_v51 = vadd.f32 %v15527_v12, %v868_v20  ;;  %v15532_v20 = vld [vmem:[#allocation25_spill] sm:$0xff] }
 0x1f6   : > { %v1612_v35 = vadd.f32 %v1517_v34, %v1265_v23  ;;  %v874_v12 = vadd.f32 %v15532_v20, %v15531_v9  ;;  %v2024_v20 = vld [vmem:[%s11468_s20 + $0x11f] sm:$0xff] }
 0x1f7   : > { %v2561_v62 = vpop.f32.mrf.mxu2  ;;  %v1867_v58 = vpop.f32.mrf.mxu0 }
 0x1f8   : > { %v12294_v24 = vadd.f32 %v2561_v62, %v2308_v49  ;;  %v2214_v18 = vpop.f32.mrf.mxu1  ;;  %v1962_v43 = vadd.f32 %v1867_v58, %v1612_v35 }
 0x1fa   : > { %10366 = vmatmul.msk.f32.gmra.mxu3 %vm410_vm1, %v1323_v39  ;;  %10408 = vmatmul.msk.f32.gmra.mxu0 %vm674_vm2, %v2364_v15  ;;  %v2309_v2 = vadd.f32 %v2214_v18, %v1962_v43  ;;  %v1325_v39 = vld [vmem:[%s11468_s20 + $0x10e] sm:$0xff]  ;;  %v2368_v43 = vld [vmem:[%s11473_s23 + $0x117] sm:$0xff] }
 0x1fb   : > { %10450 = vmatmul.msk.f32.gmra.mxu1 %vm410_vm1, %v2019_v30  ;;  %v2021_v30 = vld [vmem:[%s11468_s20 + $0x107] sm:$0xff] }
 0x1fc   : > { %10493 = vmatmul.msk.f32.gmra.mxu2 %vm674_vm2, %v2366_v46 }
 0x1fd   : > { %v1520_v22 = vpop.f32.mrf.mxu3 }
 0x1fe   : > { %v1613_v7 = vadd.f32 %v1520_v22, %v1266_v40  ;;  %v1268_v40 = vadd.f32 %v15530_v42, %v871_v63  ;;  %v15534_v63 = vld [vmem:[#allocation27_spill] sm:$0xff]  ;;  %v15535_v42 = vld [vmem:[#allocation28_spill] sm:$0xff] }
 0x1ff   : > { %v2564_v10 = vpop.f32.mrf.mxu2  ;;  %v1870_v31 = vpop.f32.mrf.mxu0 }
 0x200   : > { %v12306_v56 = vadd.f32 %v2564_v10, %v2309_v2  ;;  %v2217_v54 = vpop.f32.mrf.mxu1  ;;  %v1963_v15 = vadd.f32 %v1870_v31, %v1613_v7 }
 0x202   : > { %10367 = vmatmul.msk.f32.gmra.mxu3 %vm410_vm1, %v1324_v26  ;;  %10409 = vmatmul.msk.f32.gmra.mxu0 %vm674_vm2, %v2365_v50  ;;  %v2310_v23 = vadd.f32 %v2217_v54, %v1963_v15  ;;  %v1326_v54 = vld [vmem:[%s11468_s20 + $0x116] sm:$0xff] }
 0x203   : > { %10451 = vmatmul.msk.f32.gmra.mxu1 %vm410_vm1, %v2020_v57  ;;  %v2022_v15 = vld [vmem:[%s11468_s20 + $0x10f] sm:$0xff] }
 0x204   : > { %10494 = vmatmul.msk.f32.gmra.mxu2 %vm674_vm2, %v2367_v8 }
 0x205   : > { %v1523_v49 = vpop.f32.mrf.mxu3 }
 0x206   : > { %v1614_v34 = vadd.f32 %v1523_v49, %v1267_v51  ;;  %v15533_v51 = vld [vmem:[#allocation26_spill] sm:$0xff] }
 0x207   : > { %v2567_v35 = vpop.f32.mrf.mxu2  ;;  %v1873_v58 = vpop.f32.mrf.mxu0 }
 0x208   : > { %v12318_v62 = vadd.f32 %v2567_v35, %v2310_v23  ;;  %v2220_v18 = vpop.f32.mrf.mxu1  ;;  %v1964_v50 = vadd.f32 %v1873_v58, %v1614_v34  ;;  %v1269_v23 = vadd.f32 %v15533_v51, %v874_v12  ;;  %v2371_v12 = vld [vmem:[%s11473_s23 + $0x12f] sm:$0xff] }
 0x209   : > { %v15537_v51 = vld [vmem:[#allocation30_spill] sm:$0xff] }
 0x20a   : > { %10368 = vmatmul.msk.f32.gmra.mxu3 %vm410_vm1, %v1325_v39  ;;  %10410 = vmatmul.msk.f32.gmra.mxu0 %vm674_vm2, %v2366_v46  ;;  %v2311_v2 = vadd.f32 %v2220_v18, %v1964_v50 }
 0x20b   : > { %10452 = vmatmul.msk.f32.gmra.mxu1 %vm410_vm1, %v2021_v30  ;;  %v1327_v30 = vld [vmem:[%s11468_s20 + $0x11e] sm:$0xff] }
 0x20c   : > { %10495 = vmatmul.msk.f32.gmra.mxu2 %vm674_vm2, %v2368_v43 }
 0x20d   : > { %v1526_v22 = vpop.f32.mrf.mxu3 }
 0x20e   : > { %v1615_v7 = vadd.f32 %v1526_v22, %v1268_v40  ;;  %v877_v40 = vadd.f32 %v15535_v42, %v15534_v63  ;;  %v2025_v42 = vld [vmem:[%s11468_s20 + $0x127] sm:$0xff] }
 0x20f   : > { %v2570_v10 = vpop.f32.mrf.mxu2  ;;  %v1876_v26 = vpop.f32.mrf.mxu0 }
 0x210   : > { %v12330_v31 = vadd.f32 %v2570_v10, %v2311_v2  ;;  %v2223_v57 = vpop.f32.mrf.mxu1  ;;  %v1965_v46 = vadd.f32 %v1876_v26, %v1615_v7  ;;  %v15536_v2 = vld [vmem:[#allocation29_spill] sm:$0xff] }
 0x211   : > { %v1270_v22 = vadd.f32 %v15536_v2, %v877_v40  ;;  %v2372_v40 = vld [vmem:[%s11473_s23 + $0x137] sm:$0xff] }
 0x212   : > { %10369 = vmatmul.msk.f32.gmra.mxu3 %vm410_vm1, %v1326_v54  ;;  %10411 = vmatmul.msk.f32.gmra.mxu0 %vm674_vm2, %v2367_v8  ;;  %v2312_v49 = vadd.f32 %v2223_v57, %v1965_v46  ;;  %v1328_v46 = vld [vmem:[%s11468_s20 + $0x126] sm:$0xff] }
 0x213   : > { %10453 = vmatmul.msk.f32.gmra.mxu1 %vm410_vm1, %v2022_v15 }
 0x214   : > { %10496 = vmatmul.msk.f32.gmra.mxu2 %vm674_vm2, %v2369_v44 }
 0x215   : > { %v1529_v34 = vpop.f32.mrf.mxu3 }
 0x216   : > { %v1616_v35 = vadd.f32 %v1529_v34, %v1269_v23  ;;  %v15538_v23 = vld [vmem:[#allocation31_spill] sm:$0xff] }
 0x217   : > { %v2573_v58 = vpop.f32.mrf.mxu2  ;;  %v1879_v18 = vpop.f32.mrf.mxu0 }
 0x218   : > { %v12342_v39 = vadd.f32 %v2573_v58, %v2312_v49  ;;  %v2226_v50 = vpop.f32.mrf.mxu1  ;;  %v1966_v8 = vadd.f32 %v1879_v18, %v1616_v35  ;;  %v880_v49 = vadd.f32 %v15538_v23, %v15537_v51  ;;  %v15540_v23 = vld [vmem:[#allocation35_spill] sm:$0xff] }
 0x21a   : > { %10370 = vmatmul.msk.f32.gmra.mxu3 %vm410_vm1, %v1327_v30  ;;  %10412 = vmatmul.msk.f32.gmra.mxu0 %vm674_vm2, %v2368_v43  ;;  %v2313_v7 = vadd.f32 %v2226_v50, %v1966_v8  ;;  %v1271_v34 = vadd.f32 %v11951_v33, %v880_v49  ;;  %v1329_v8 = vld [vmem:[%s11468_s20 + $0x12e] sm:$0xff]  ;;  %v886_v49 = vadd.f32 %v15540_v23, %v11972_v48 }
 0x21b   : > { %10454 = vmatmul.msk.f32.gmra.mxu1 %vm410_vm1, %v2023_v3  ;;  %v10674_v33 = vld [vmem:[%s15452_s4 + $0x28] sm:$0xff] }
 0x21c   : > { %10497 = vmatmul.msk.f32.gmra.mxu2 %vm674_vm2, %v2370_v28  ;;  %4261 = vmatpush.msrb.mxu3 %v10674_v33  ;;  %v1273_v48 = vadd.f32 %v11985_v13, %v886_v49 }
 0x21d   : > { %v1532_v10 = vpop.f32.mrf.mxu3 }
 0x21e   : > { %v1617_v26 = vadd.f32 %v1532_v10, %v1270_v22 }
 0x21f   : > { %v2576_v54 = vpop.f32.mrf.mxu2  ;;  %v1882_v15 = vpop.f32.mrf.mxu0 }
 0x220   : > { %v12354_v57 = vadd.f32 %v2576_v54, %v2313_v7  ;;  %v2229_v9 = vpop.f32.mrf.mxu1  ;;  %v1967_v43 = vadd.f32 %v1882_v15, %v1617_v26 }
 0x222   : > { %10371 = vmatmul.msk.f32.gmra.mxu3 %vm410_vm1, %v1328_v46  ;;  %10413 = vmatmul.msk.f32.gmra.mxu0 %vm674_vm2, %v2369_v44  ;;  %v2314_v35 = vadd.f32 %v2229_v9, %v1967_v43  ;;  %v15539_v44 = vld [vmem:[#allocation33_spill] sm:$0xff]  ;;  %v1330_v9 = vld [vmem:[%s11468_s20 + $0x136] sm:$0xff]  ;;  %v2373_v43 = vld [vmem:[%s11473_s23 + $0x13f] sm:$0xff] }
 0x223   : > { %10455 = vmatmul.msk.f32.gmra.mxu1 %vm410_vm1, %v2024_v20  ;;  %v883_v22 = vadd.f32 %v15539_v44, %v11955_v41  ;;  %v2026_v20 = vld [vmem:[%s11468_s20 + $0x12f] sm:$0xff] }
 0x224   : > { %10498 = vmatmul.msk.f32.gmra.mxu2 %vm674_vm2, %v2371_v12 }
 0x225   : > { %v1535_v58 = vpop.f32.mrf.mxu3  ;;  %v1272_v7 = vadd.f32 %v11968_v16, %v883_v22  ;;  %v10716_v16 = vld [vmem:[%s15451_s3 + $0x18] sm:$0xf]  ;;  %v15541_v22 = vld [vmem:[#allocation37_spill] sm:$0xff] }
 0x226   : > { %v1618_v18 = vadd.f32 %v1535_v58, %v1271_v34  ;;  %v10759_v34 = vld [vmem:[%s15452_s4 + $0x30] sm:$0xff]  ;;  %10717 = vmatpush.msk.msrb.mxu0 %vm798_vm0, %v10716_v16  ;;  %v889_v13 = vadd.f32 %v15541_v22, %v11989_v60  ;;  %v2028_v60 = vld [vmem:[%s11468_s20 + $0x13f] sm:$0xff] }
 0x227   : > { %v2579_v30 = vpop.f32.mrf.mxu2  ;;  %v1885_v3 = vpop.f32.mrf.mxu0  ;;  %4958 = vmatpush.msrb.mxu1 %v10759_v34 }
 0x228   : > { %v12366_v50 = vadd.f32 %v2579_v30, %v2314_v35  ;;  %v2232_v63 = vpop.f32.mrf.mxu1  ;;  %v1968_v2 = vadd.f32 %v1885_v3, %v1618_v18  ;;  %v1274_v33 = vadd.f32 %v12002_v21, %v889_v13 }
 0x22a   : > { %10372 = vmatmul.msk.f32.gmra.mxu3 %vm410_vm1, %v1329_v8  ;;  %10414 = vmatmul.msk.f32.gmra.mxu0 %vm674_vm2, %v2370_v28  ;;  %v2315_v10 = vadd.f32 %v2232_v63, %v1968_v2  ;;  %v1331_v8 = vld [vmem:[%s11468_s20 + $0x13e] sm:$0xff]  ;;  %v2374_v2 = vld [vmem:[%s11473_s23 + $0x147] sm:$0xff] }
 0x22b   : > { %10456 = vmatmul.msk.f32.gmra.mxu1 %vm410_vm1, %v2025_v42  ;;  %v2027_v42 = vld [vmem:[%s11468_s20 + $0x137] sm:$0xff] }
 0x22c   : > { %10499 = vmatmul.msk.f32.gmra.mxu2 %vm674_vm2, %v2372_v40 }
 0x22d   : > { %v1538_v26 = vpop.f32.mrf.mxu3 }
 0x22e   : > { %v1619_v41 = vadd.f32 %v1538_v26, %v1272_v7 }
 0x22f   : > { %v2582_v54 = vpop.f32.mrf.mxu2  ;;  %v1888_v46 = vpop.f32.mrf.mxu0 }
 0x230   : > { %v12381_v15 = vadd.f32 %v2582_v54, %v2315_v10  ;;  %v2235_v28 = vpop.f32.mrf.mxu1  ;;  %v1969_v51 = vadd.f32 %v1888_v46, %v1619_v41 }
 0x232   : > { %10373 = vmatmul.msk.f32.gmra.mxu3 %vm410_vm1, %v1330_v9  ;;  %10415 = vmatmul.msk.f32.gmra.mxu0 %vm674_vm2, %v2371_v12  ;;  %v2316_v12 = vadd.f32 %v2235_v28, %v1969_v51  ;;  %v1332_v9 = vld [vmem:[%s11468_s20 + $0x146] sm:$0xf]  ;;  %v15542_v51 = vld [vmem:[#allocation39_spill] sm:$0xff] }
 0x233   : > { %10457 = vmatmul.msk.f32.gmra.mxu1 %vm410_vm1, %v2026_v20  ;;  %v2375_v20 = vld [vmem:[%s11473_s23 + $0x14f] sm:$0xff]  ;;  %v892_v23 = vadd.f32 %v15542_v51, %v12006_v52  ;;  %v2686_v52 = vld [vmem:[%s11468_s20 + $0x17] sm:$0xff] }
 0x234   : > { %10500 = vmatmul.msk.f32.gmra.mxu2 %vm674_vm2, %v2373_v43 }
 0x235   : > { %v1541_v35 = vpop.f32.mrf.mxu3  ;;  %v1275_v21 = vadd.f32 %v12019_v29, %v892_v23 }
 0x236   : > { %v1620_v58 = vadd.f32 %v1541_v35, %v1273_v48 }
 0x237   : > { %v2585_v18 = vpop.f32.mrf.mxu2  ;;  %v1891_v3 = vpop.f32.mrf.mxu0 }
 0x238   : > { %v12400_v30 = vadd.f32 %v2585_v18, %v2316_v12  ;;  %v2238_v63 = vpop.f32.mrf.mxu1  ;;  %v1970_v44 = vadd.f32 %v1891_v3, %v1620_v58  ;;  %v1679_v58 = vld [vmem:[%s11473_s23 + $0x147] sm:$0xf] }
 0x239   : > { %v2029_v3 = vld [vmem:[%s11468_s20 + $0x147] sm:$0xf] }
 0x23a   : > { %10374 = vmatmul.msk.f32.gmra.mxu3 %vm410_vm1, %v1331_v8  ;;  %10416 = vmatmul.msk.f32.gmra.mxu0 %vm674_vm2, %v2372_v40  ;;  %v2317_v7 = vadd.f32 %v2238_v63, %v1970_v44  ;;  %v15543_v63 = vld [vmem:[#allocation41_spill] sm:$0xff] }
 0x23b   : > { %10458 = vmatmul.msk.f32.gmra.mxu1 %vm410_vm1, %v2027_v42  ;;  %v895_v42 = vadd.f32 %v15543_v63, %v12023_v11  ;;  %v3033_v11 = vld [vmem:[%s11473_s23 + $0x18] sm:$0xff] }
 0x23c   : > { %10501 = vmatmul.msk.f32.gmra.mxu2 %vm674_vm2, %v2374_v2 }
 0x23d   : > { %v1544_v10 = vpop.f32.mrf.mxu3  ;;  %v1276_v29 = vadd.f32 %v12036_v37, %v895_v42 }
 0x23e   : > { %v1621_v26 = vadd.f32 %v1544_v10, %v1274_v33  ;;  %v2687_v10 = vld [vmem:[%s11468_s20 + $0x1f] sm:$0xff] }
 0x23f   : > { %v2588_v41 = vpop.f32.mrf.mxu2  ;;  %v1894_v46 = vpop.f32.mrf.mxu0 }
 0x240   : > { %v12412_v54 = vadd.f32 %v2588_v41, %v2317_v7  ;;  %v2241_v28 = vpop.f32.mrf.mxu1  ;;  %v1971_v40 = vadd.f32 %v1894_v46, %v1621_v26  ;;  %v3383_v41 = vld [vmem:[%s11468_s20 + $0x18] sm:$0xff] }
 0x241   : > { %v3730_v46 = vld [vmem:[%s11473_s23 + $0x19] sm:$0xff] }
 0x242   : > { %10375 = vmatmul.msk.f32.gmra.mxu3 %vm410_vm1, %v1332_v9  ;;  %10417 = vmatmul.msk.f32.gmra.mxu0 %vm674_vm2, %v2373_v43  ;;  %v2318_v49 = vadd.f32 %v2241_v28, %v1971_v40  ;;  %v2376_v43 = vld [vmem:[%s11473_s23 + $0x157] sm:$0xf] }
 0x243   : > { %10459 = vmatmul.msk.f32.gmra.mxu1 %vm410_vm1, %v2028_v60  ;;  %v15544_v28 = vld [vmem:[#allocation43_spill] sm:$0xff]  ;;  %v15545_v60 = vld [vmem:[#allocation44_spill] sm:$0xff] }
 0x244   : > { %10502 = vmatmul.msk.f32.gmra.mxu2 %vm674_vm2, %v2375_v20  ;;  %v898_v20 = vadd.f32 %v15545_v60, %v15544_v28 }
 0x245   : > { %v1547_v16 = vpop.f32.mrf.mxu3 }
 0x246   : > { %v1622_v34 = vadd.f32 %v1547_v16, %v1275_v21  ;;  %v1277_v37 = vadd.f32 %v12053_v45, %v898_v20 }
 0x247   : > { %v2591_v48 = vpop.f32.mrf.mxu2  ;;  %v1897_v35 = vpop.f32.mrf.mxu0 }
 0x248   : > { %v12424_v12 = vadd.f32 %v2591_v48, %v2318_v49  ;;  %v2244_v18 = vpop.f32.mrf.mxu1  ;;  %v1972_v8 = vadd.f32 %v1897_v35, %v1622_v34  ;;  %v2688_v34 = vld [vmem:[%s11468_s20 + $0x27] sm:$0xff] }
 0x249   : > { %v3034_v48 = vld [vmem:[%s11473_s23 + $0x20] sm:$0xff] }
 0x24a   : > { %10418 = vmatmul.msk.f32.gmra.mxu0 %vm674_vm2, %v1679_v58  ;;  %10505 = vmatmul.msk.f32.vlgmr.msra.gmra.mxu3 %vm410_vm1, %v2686_v52  ;;  %v2319_v2 = vadd.f32 %v2244_v18, %v1972_v8  ;;  %v3384_v58 = vld [vmem:[%s11468_s20 + $0x20] sm:$0xff] }
 0x24b   : > { %10460 = vmatmul.msk.f32.gmra.mxu1 %vm410_vm1, %v2029_v3  ;;  %v3731_v52 = vld [vmem:[%s11473_s23 + $0x21] sm:$0xff]  ;;  %v15546_v3 = vld [vmem:[#allocation46_spill] sm:$0xff] }
 0x24c   : > { %10503 = vmatmul.msk.f32.gmra.mxu2 %vm674_vm2, %v2376_v43  ;;  %v901_v43 = vadd.f32 %v15546_v3, %v12057_v4  ;;  %v3035_v4 = vld [vmem:[%s11473_s23 + $0x28] sm:$0xff] }
 0x24d   : > { %v1550_v44 = vpop.f32.mrf.mxu3 }
 0x24e   : > { %v1623_v22 = vadd.f32 %v1550_v44, %v1276_v29  ;;  %v1278_v45 = vadd.f32 %v12074_v53, %v901_v43 }
 0x24f   : > { %v2594_v13 = vpop.f32.mrf.mxu2  ;;  %v1900_v7 = vpop.f32.mrf.mxu0 }
 0x250   : > { %v12437_v33 = vadd.f32 %v2594_v13, %v2319_v2  ;;  %v2247_v26 = vpop.f32.mrf.mxu1  ;;  %v1973_v9 = vadd.f32 %v1900_v7, %v1623_v22  ;;  %v2689_v22 = vld [vmem:[%s11468_s20 + $0x2f] sm:$0xff] }
 0x251   : > { %v3385_v7 = vld [vmem:[%s11468_s20 + $0x28] sm:$0xff] }
 0x252   : > { %10506 = vmatmul.msk.f32.gmra.mxu3 %vm410_vm1, %v2687_v10  ;;  %10548 = vmatmul.msk.f32.vlgmr.msra.gmra.mxu0 %vm674_vm2, %v3033_v11  ;;  %v2320_v40 = vadd.f32 %v2247_v26, %v1973_v9  ;;  %v3732_v10 = vld [vmem:[%s11473_s23 + $0x29] sm:$0xff]  ;;  %v904_v26 = vadd.f32 %v12081_v27, %v12078_v0 }
 0x253   : > { %10590 = vmatmul.msk.f32.vlgmr.msra.gmra.mxu1 %vm410_vm1, %v3383_v41  ;;  %v3036_v0 = vld [vmem:[%s11473_s23 + $0x30] sm:$0xff] }
 0x254   : > { %10633 = vmatmul.msk.f32.vlgmr.msra.gmra.mxu2 %vm674_vm2, %v3730_v46  ;;  %v1279_v53 = vadd.f32 %v12091_v61, %v904_v26  ;;  %v15549_v61 = vld [vmem:[#allocation51_spill] sm:$0xff] }
 0x255   : > { %v1553_v51 = vpop.f32.mrf.mxu3 }
 0x256   : > { %v1624_v23 = vadd.f32 %v1553_v51, %v1277_v37  ;;  %v2690_v37 = vld [vmem:[%s11468_s20 + $0x37] sm:$0xff] }
 0x257   : > { %v2597_v21 = vpop.f32.mrf.mxu2  ;;  %v1903_v16 = vpop.f32.mrf.mxu0  ;;  %v3733_v51 = vld [vmem:[%s11473_s23 + $0x31] sm:$0xff] }
 0x258   : > { %v12450_v49 = vadd.f32 %v2597_v21, %v2320_v40  ;;  %v2250_v35 = vpop.f32.mrf.mxu1  ;;  %v1974_v18 = vadd.f32 %v1903_v16, %v1624_v23  ;;  %v3386_v40 = vld [vmem:[%s11468_s20 + $0x30] sm:$0xff]  ;;  %v15547_v21 = vld [vmem:[#allocation49_spill] sm:$0xff] }
 0x259   : > { %v15548_v16 = vld [vmem:[#allocation50_spill] sm:$0xff] }
 0x25a   : > { %10507 = vmatmul.msk.f32.gmra.mxu3 %vm410_vm1, %v2688_v34  ;;  %10549 = vmatmul.msk.f32.gmra.mxu0 %vm674_vm2, %v3034_v48  ;;  %v2321_v8 = vadd.f32 %v2250_v35, %v1974_v18  ;;  %v907_v34 = vadd.f32 %v15548_v16, %v15547_v21  ;;  %v15553_v21 = vld [vmem:[#allocation32_spill] sm:$0xff] }
 0x25b   : > { %10591 = vmatmul.msk.f32.gmra.mxu1 %vm410_vm1, %v3384_v58 }
 0x25c   : > { %10634 = vmatmul.msk.f32.gmra.mxu2 %vm674_vm2, %v3731_v52  ;;  %v1280_v48 = vadd.f32 %v15549_v61, %v907_v34 }
 0x25d   : > { %v1556_v63 = vpop.f32.mrf.mxu3 }
 0x25e   : > { %v1625_v42 = vadd.f32 %v1556_v63, %v1278_v45  ;;  %v2691_v45 = vld [vmem:[%s11468_s20 + $0x3f] sm:$0xff] }
 0x25f   : > { %v2600_v29 = vpop.f32.mrf.mxu2  ;;  %v1906_v44 = vpop.f32.mrf.mxu0 }
 0x260   : > { %v12463_v2 = vadd.f32 %v2600_v29, %v2321_v8  ;;  %v2253_v13 = vpop.f32.mrf.mxu1  ;;  %v1975_v11 = vadd.f32 %v1906_v44, %v1625_v42  ;;  %v3037_v8 = vld [vmem:[%s11473_s23 + $0x38] sm:$0xff] }
 0x261   : > { %v3387_v42 = vld [vmem:[%s11468_s20 + $0x38] sm:$0xff] }
 0x262   : > { %10508 = vmatmul.msk.f32.gmra.mxu3 %vm410_vm1, %v2689_v22  ;;  %10550 = vmatmul.msk.f32.gmra.mxu0 %vm674_vm2, %v3035_v4  ;;  %v2322_v41 = vadd.f32 %v2253_v13, %v1975_v11  ;;  %v3734_v29 = vld [vmem:[%s11473_s23 + $0x39] sm:$0xff]  ;;  %v15550_v22 = vld [vmem:[#allocation53_spill] sm:$0xff]  ;;  %v15551_v4 = vld [vmem:[#allocation54_spill] sm:$0xff] }
 0x263   : > { %10592 = vmatmul.msk.f32.gmra.mxu1 %vm410_vm1, %v3385_v7  ;;  %v910_v13 = vadd.f32 %v15551_v4, %v15550_v22  ;;  %v15552_v7 = vld [vmem:[#allocation55_spill] sm:$0xff] }
 0x264   : > { %10635 = vmatmul.msk.f32.gmra.mxu2 %vm674_vm2, %v3732_v10 }
 0x265   : > { %v1559_v46 = vpop.f32.mrf.mxu3  ;;  %v1281_v10 = vadd.f32 %v15552_v7, %v910_v13  ;;  %v2694_v13 = vld [vmem:[%s11468_s20 + $0x57] sm:$0xff] }
 0x266   : > { %v1626_v9 = vadd.f32 %v1559_v46, %v1279_v53  ;;  %v3040_v7 = vld [vmem:[%s11473_s23 + $0x50] sm:$0xff] }
 0x267   : > { %v2603_v28 = vpop.f32.mrf.mxu2  ;;  %v1909_v20 = vpop.f32.mrf.mxu0 }
 0x268   : > { %v12476_v60 = vadd.f32 %v2603_v28, %v2322_v41  ;;  %v2256_v27 = vpop.f32.mrf.mxu1  ;;  %v1976_v23 = vadd.f32 %v1909_v20, %v1626_v9  ;;  %v2692_v28 = vld [vmem:[%s11468_s20 + $0x47] sm:$0xff] }
 0x269   : > { %v3038_v20 = vld [vmem:[%s11473_s23 + $0x40] sm:$0xff] }
 0x26a   : > { %10509 = vmatmul.msk.f32.gmra.mxu3 %vm410_vm1, %v2690_v37  ;;  %10551 = vmatmul.msk.f32.gmra.mxu0 %vm674_vm2, %v3036_v0  ;;  %v2323_v35 = vadd.f32 %v2256_v27, %v1976_v23  ;;  %v3388_v0 = vld [vmem:[%s11468_s20 + $0x40] sm:$0xff] }
 0x26b   : > { %10593 = vmatmul.msk.f32.gmra.mxu1 %vm410_vm1, %v3386_v40  ;;  %v3735_v27 = vld [vmem:[%s11473_s23 + $0x41] sm:$0xff] }
 0x26c   : > { %10636 = vmatmul.msk.f32.gmra.mxu2 %vm674_vm2, %v3733_v51 }
 0x26d   : > { %v1562_v58 = vpop.f32.mrf.mxu3 }
 0x26e   : > { %v1627_v52 = vadd.f32 %v1562_v58, %v1280_v48  ;;  %v3039_v58 = vld [vmem:[%s11473_s23 + $0x48] sm:$0xff] }
 0x26f   : > { %v2606_v18 = vpop.f32.mrf.mxu2  ;;  %v1912_v43 = vpop.f32.mrf.mxu0 }
 0x270   : > { %v12489_v3 = vadd.f32 %v2606_v18, %v2323_v35  ;;  %v2259_v63 = vpop.f32.mrf.mxu1  ;;  %v1977_v44 = vadd.f32 %v1912_v43, %v1627_v52  ;;  %v2693_v35 = vld [vmem:[%s11468_s20 + $0x4f] sm:$0xff] }
 0x271   : > { %v3389_v18 = vld [vmem:[%s11468_s20 + $0x48] sm:$0xff] }
 0x272   : > { %10510 = vmatmul.msk.f32.gmra.mxu3 %vm410_vm1, %v2691_v45  ;;  %10552 = vmatmul.msk.f32.gmra.mxu0 %vm674_vm2, %v3037_v8  ;;  %v2324_v11 = vadd.f32 %v2259_v63, %v1977_v44  ;;  %v3736_v43 = vld [vmem:[%s11473_s23 + $0x49] sm:$0xff] }
 0x273   : > { %10594 = vmatmul.msk.f32.gmra.mxu1 %vm410_vm1, %v3387_v42  ;;  %v15554_v42 = vld [vmem:[#allocation34_spill] sm:$0xff] }
 0x274   : > { %10637 = vmatmul.msk.f32.gmra.mxu2 %vm674_vm2, %v3734_v29 }
 0x275   : > { %v1565_v26 = vpop.f32.mrf.mxu3 }
 0x276   : > { %v1628_v53 = vadd.f32 %v1565_v26, %v1281_v10  ;;  %v3737_v26 = vld [vmem:[%s11473_s23 + $0x51] sm:$0xff] }
 0x277   : > { %v2609_v41 = vpop.f32.mrf.mxu2  ;;  %v1915_v9 = vpop.f32.mrf.mxu0 }
 0x278   : > { %v12502_v46 = vadd.f32 %v2609_v41, %v2324_v11  ;;  %v2262_v37 = vpop.f32.mrf.mxu1  ;;  %v1978_v40 = vadd.f32 %v1915_v9, %v1628_v53  ;;  %v3390_v11 = vld [vmem:[%s11468_s20 + $0x50] sm:$0xff] }
 0x27a   : > { %10511 = vmatmul.msk.f32.gmra.mxu3 %vm410_vm1, %v2692_v28  ;;  %10553 = vmatmul.msk.f32.gmra.mxu0 %vm674_vm2, %v3038_v20  ;;  %v2325_v51 = vadd.f32 %v2262_v37, %v1978_v40  ;;  %v15555_v28 = vld [vmem:[#allocation36_spill] sm:$0xff] }
 0x27b   : > { %10595 = vmatmul.msk.f32.gmra.mxu1 %vm410_vm1, %v3388_v0  ;;  %v2695_v40 = vld [vmem:[%s11468_s20 + $0x5f] sm:$0xff] }
 0x27c   : > { %10638 = vmatmul.msk.f32.gmra.mxu2 %vm674_vm2, %v3735_v27 }
 0x27d   : > { %v1568_v23 = vpop.f32.mrf.mxu3 }
 0x27e   : > { %v1629_v16 = vadd.f32 %v1568_v23, %v15553_v21  ;;  %v3391_v21 = vld [vmem:[%s11468_s20 + $0x58] sm:$0xff] }
 0x27f   : > { %v2612_v34 = vpop.f32.mrf.mxu2  ;;  %v1918_v48 = vpop.f32.mrf.mxu0 }
 0x280   : > { %v12513_v61 = vadd.f32 %v2612_v34, %v2325_v51  ;;  %v2265_v52 = vpop.f32.mrf.mxu1  ;;  %v1979_v45 = vadd.f32 %v1918_v48, %v1629_v16  ;;  %v3041_v51 = vld [vmem:[%s11473_s23 + $0x58] sm:$0xff] }
 0x281   : > { %v3738_v16 = vld [vmem:[%s11473_s23 + $0x59] sm:$0xff] }
 0x282   : > { %10512 = vmatmul.msk.f32.gmra.mxu3 %vm410_vm1, %v2693_v35  ;;  %10554 = vmatmul.msk.f32.gmra.mxu0 %vm674_vm2, %v3039_v58  ;;  %v2326_v8 = vadd.f32 %v2265_v52, %v1979_v45  ;;  %v15556_v58 = vld [vmem:[#allocation38_spill] sm:$0xff] }
 0x283   : > { %10596 = vmatmul.msk.f32.gmra.mxu1 %vm410_vm1, %v3389_v18 }
 0x284   : > { %10639 = vmatmul.msk.f32.gmra.mxu2 %vm674_vm2, %v3736_v43 }
 0x285   : > { %v1571_v63 = vpop.f32.mrf.mxu3 }
 0x286   : > { %v1630_v29 = vadd.f32 %v1571_v63, %v15554_v42  ;;  %v3042_v63 = vld [vmem:[%s11473_s23 + $0x60] sm:$0xff] }
 0x287   : > { %v2615_v44 = vpop.f32.mrf.mxu2  ;;  %v1921_v4 = vpop.f32.mrf.mxu0 }
 0x288   : > { %v12524_v22 = vadd.f32 %v2615_v44, %v2326_v8  ;;  %v2268_v10 = vpop.f32.mrf.mxu1  ;;  %v1980_v53 = vadd.f32 %v1921_v4, %v1630_v29  ;;  %v2696_v8 = vld [vmem:[%s11468_s20 + $0x67] sm:$0xff] }
 0x289   : > { %v3392_v29 = vld [vmem:[%s11468_s20 + $0x60] sm:$0xff] }
 0x28a   : > { %10513 = vmatmul.msk.f32.gmra.mxu3 %vm410_vm1, %v2694_v13  ;;  %10555 = vmatmul.msk.f32.gmra.mxu0 %vm674_vm2, %v3040_v7  ;;  %v2327_v41 = vadd.f32 %v2268_v10, %v1980_v53  ;;  %v3739_v44 = vld [vmem:[%s11473_s23 + $0x61] sm:$0xff] }
 0x28b   : > { %10597 = vmatmul.msk.f32.gmra.mxu1 %vm410_vm1, %v3390_v11  ;;  %v15557_v10 = vld [vmem:[#allocation40_spill] sm:$0xff] }
 0x28c   : > { %10640 = vmatmul.msk.f32.gmra.mxu2 %vm674_vm2, %v3737_v26 }
 0x28d   : > { %v1574_v9 = vpop.f32.mrf.mxu3 }
 0x28e   : > { %v1631_v20 = vadd.f32 %v1574_v9, %v15555_v28  ;;  %v2697_v9 = vld [vmem:[%s11468_s20 + $0x6f] sm:$0xff] }
 0x28f   : > { %v2618_v37 = vpop.f32.mrf.mxu2  ;;  %v1924_v27 = vpop.f32.mrf.mxu0  ;;  %v3043_v28 = vld [vmem:[%s11473_s23 + $0x68] sm:$0xff] }
 0x290   : > { %v12535_v0 = vadd.f32 %v2618_v37, %v2327_v41  ;;  %v2271_v23 = vpop.f32.mrf.mxu1  ;;  %v1981_v34 = vadd.f32 %v1924_v27, %v1631_v20  ;;  %v3393_v37 = vld [vmem:[%s11468_s20 + $0x68] sm:$0xff] }
 0x291   : > { %v3740_v27 = vld [vmem:[%s11473_s23 + $0x69] sm:$0xff] }
 0x292   : > { %10514 = vmatmul.msk.f32.gmra.mxu3 %vm410_vm1, %v2695_v40  ;;  %10556 = vmatmul.msk.f32.gmra.mxu0 %vm674_vm2, %v3041_v51  ;;  %v2328_v48 = vadd.f32 %v2271_v23, %v1981_v34 }
 0x293   : > { %10598 = vmatmul.msk.f32.gmra.mxu1 %vm410_vm1, %v3391_v21  ;;  %v15558_v21 = vld [vmem:[#allocation42_spill] sm:$0xff] }
 0x294   : > { %10641 = vmatmul.msk.f32.gmra.mxu2 %vm674_vm2, %v3738_v16 }
 0x295   : > { %v1577_v35 = vpop.f32.mrf.mxu3 }
 0x296   : > { %v1632_v52 = vadd.f32 %v1577_v35, %v15556_v58  ;;  %v2698_v58 = vld [vmem:[%s11468_s20 + $0x77] sm:$0xff] }
 0x297   : > { %v2621_v18 = vpop.f32.mrf.mxu2  ;;  %v1927_v45 = vpop.f32.mrf.mxu0 }
 0x298   : > { %v12546_v43 = vadd.f32 %v2621_v18, %v2328_v48  ;;  %v2274_v42 = vpop.f32.mrf.mxu1  ;;  %v1982_v4 = vadd.f32 %v1927_v45, %v1632_v52  ;;  %v3044_v52 = vld [vmem:[%s11473_s23 + $0x70] sm:$0xff] }
 0x299   : > { %v3394_v45 = vld [vmem:[%s11468_s20 + $0x70] sm:$0xff] }
 0x29a   : > { %10515 = vmatmul.msk.f32.gmra.mxu3 %vm410_vm1, %v2696_v8  ;;  %10557 = vmatmul.msk.f32.gmra.mxu0 %vm674_vm2, %v3042_v63  ;;  %v2329_v13 = vadd.f32 %v2274_v42, %v1982_v4  ;;  %v3741_v8 = vld [vmem:[%s11473_s23 + $0x71] sm:$0xff] }
 0x29b   : > { %10599 = vmatmul.msk.f32.gmra.mxu1 %vm410_vm1, %v3392_v29 }
 0x29c   : > { %10642 = vmatmul.msk.f32.gmra.mxu2 %vm674_vm2, %v3739_v44  ;;  %v15559_v44 = vld [vmem:[#allocation45_spill] sm:$0xff] }
 0x29d   : > { %v1580_v7 = vpop.f32.mrf.mxu3 }
 0x29e   : > { %v1633_v11 = vadd.f32 %v1580_v7, %v15557_v10 }
 0x29f   : > { %v2624_v26 = vpop.f32.mrf.mxu2  ;;  %v1930_v41 = vpop.f32.mrf.mxu0 }
 0x2a0   : > { %v12557_v53 = vadd.f32 %v2624_v26, %v2329_v13  ;;  %v2277_v20 = vpop.f32.mrf.mxu1  ;;  %v1983_v40 = vadd.f32 %v1930_v41, %v1633_v11  ;;  %v2699_v11 = vld [vmem:[%s11468_s20 + $0x7f] sm:$0xff] }
 0x2a1   : > { %v3045_v26 = vld [vmem:[%s11473_s23 + $0x78] sm:$0xff] }
 0x2a2   : > { %10516 = vmatmul.msk.f32.gmra.mxu3 %vm410_vm1, %v2697_v9  ;;  %10558 = vmatmul.msk.f32.gmra.mxu0 %vm674_vm2, %v3043_v28  ;;  %v2330_v51 = vadd.f32 %v2277_v20, %v1983_v40  ;;  %v3395_v9 = vld [vmem:[%s11468_s20 + $0x78] sm:$0xff] }
 0x2a3   : > { %10600 = vmatmul.msk.f32.gmra.mxu1 %vm410_vm1, %v3393_v37  ;;  %v3742_v28 = vld [vmem:[%s11473_s23 + $0x79] sm:$0xff] }
 0x2a4   : > { %10643 = vmatmul.msk.f32.gmra.mxu2 %vm674_vm2, %v3740_v27  ;;  %v10801_v37 = vld [vmem:[%s15451_s3 + $0x1c] sm:$0xf] }
 0x2a5   : > { %v1583_v23 = vpop.f32.mrf.mxu3  ;;  %10802 = vmatpush.msk.msrb.mxu2 %vm798_vm0, %v10801_v37 }
 0x2a6   : > { %v1634_v16 = vadd.f32 %v1583_v23, %v15558_v21 }
 0x2a7   : > { %v2627_v34 = vpop.f32.mrf.mxu2  ;;  %v1933_v35 = vpop.f32.mrf.mxu0 }
 0x2a8   : > { %v12568_v48 = vadd.f32 %v2627_v34, %v2330_v51  ;;  %v2280_v18 = vpop.f32.mrf.mxu1  ;;  %v1984_v63 = vadd.f32 %v1933_v35, %v1634_v16  ;;  %v15560_v51 = vld [vmem:[#allocation47_spill] sm:$0xff]  ;;  %v2700_v35 = vld [vmem:[%s11468_s20 + $0x87] sm:$0xff] }
 0x2aa   : > { %10517 = vmatmul.msk.f32.gmra.mxu3 %vm410_vm1, %v2698_v58  ;;  %10559 = vmatmul.msk.f32.gmra.mxu0 %vm674_vm2, %v3044_v52  ;;  %v2331_v42 = vadd.f32 %v2280_v18, %v1984_v63  ;;  %v3046_v58 = vld [vmem:[%s11473_s23 + $0x80] sm:$0xff] }
 0x2ab   : > { %10601 = vmatmul.msk.f32.gmra.mxu1 %vm410_vm1, %v3394_v45  ;;  %v3396_v18 = vld [vmem:[%s11468_s20 + $0x80] sm:$0xff] }
 0x2ac   : > { %10644 = vmatmul.msk.f32.gmra.mxu2 %vm674_vm2, %v3741_v8  ;;  %v3743_v45 = vld [vmem:[%s11473_s23 + $0x81] sm:$0xff] }
 0x2ad   : > { %v1586_v29 = vpop.f32.mrf.mxu3 }
 0x2ae   : > { %v1635_v4 = vadd.f32 %v1586_v29, %v15559_v44  ;;  %v15561_v29 = vld [vmem:[#allocation48_spill] sm:$0xff] }
 0x2af   : > { %v2630_v13 = vpop.f32.mrf.mxu2  ;;  %v1936_v10 = vpop.f32.mrf.mxu0 }
 0x2b0   : > { %v12579_v7 = vadd.f32 %v2630_v13, %v2331_v42  ;;  %v2283_v41 = vpop.f32.mrf.mxu1  ;;  %v1985_v20 = vadd.f32 %v1936_v10, %v1635_v4 }
 0x2b2   : > { %10518 = vmatmul.msk.f32.gmra.mxu3 %vm410_vm1, %v2699_v11  ;;  %10560 = vmatmul.msk.f32.gmra.mxu0 %vm674_vm2, %v3045_v26  ;;  %v2332_v27 = vadd.f32 %v2283_v41, %v1985_v20  ;;  %v2701_v11 = vld [vmem:[%s11468_s20 + $0x8f] sm:$0xff] }
 0x2b3   : > { %10602 = vmatmul.msk.f32.gmra.mxu1 %vm410_vm1, %v3395_v9  ;;  %v3047_v26 = vld [vmem:[%s11473_s23 + $0x88] sm:$0xff] }
 0x2b4   : > { %10645 = vmatmul.msk.f32.gmra.mxu2 %vm674_vm2, %v3742_v28  ;;  %v3397_v9 = vld [vmem:[%s11468_s20 + $0x88] sm:$0xff] }
 0x2b5   : > { %v1589_v40 = vpop.f32.mrf.mxu3  ;;  %v3744_v28 = vld [vmem:[%s11473_s23 + $0x89] sm:$0xff] }
 0x2b6   : > { %v1636_v23 = vadd.f32 %v1589_v40, %v15560_v51  ;;  %v15562_v40 = vld [vmem:[#allocation52_spill] sm:$0xff] }
 0x2b7   : > { %v2633_v21 = vpop.f32.mrf.mxu2  ;;  %v1939_v34 = vpop.f32.mrf.mxu0 }
 0x2b8   : > { %v12594_v16 = vadd.f32 %v2633_v21, %v2332_v27  ;;  %v2286_v52 = vpop.f32.mrf.mxu1  ;;  %v1986_v8 = vadd.f32 %v1939_v34, %v1636_v23 }
 0x2ba   : > { %10519 = vmatmul.msk.f32.gmra.mxu3 %vm410_vm1, %v2700_v35  ;;  %10561 = vmatmul.msk.f32.gmra.mxu0 %vm674_vm2, %v3046_v58  ;;  %v2333_v63 = vadd.f32 %v2286_v52, %v1986_v8  ;;  %v2702_v35 = vld [vmem:[%s11468_s20 + $0x97] sm:$0xff] }
 0x2bb   : > { %10603 = vmatmul.msk.f32.gmra.mxu1 %vm410_vm1, %v3396_v18  ;;  %v3048_v58 = vld [vmem:[%s11473_s23 + $0x90] sm:$0xff] }
 0x2bc   : > { %10646 = vmatmul.msk.f32.gmra.mxu2 %vm674_vm2, %v3743_v45  ;;  %v3398_v18 = vld [vmem:[%s11468_s20 + $0x90] sm:$0xff] }
 0x2bd   : > { %v1592_v42 = vpop.f32.mrf.mxu3  ;;  %v3745_v45 = vld [vmem:[%s11473_s23 + $0x91] sm:$0xff] }
 0x2be   : > { %v1637_v44 = vadd.f32 %v1592_v42, %v15561_v29 }
 0x2bf   : > { %v2636_v4 = vpop.f32.mrf.mxu2  ;;  %v1942_v10 = vpop.f32.mrf.mxu0 }
 0x2c0   : > { %v12605_v13 = vadd.f32 %v2636_v4, %v2333_v63  ;;  %v2289_v41 = vpop.f32.mrf.mxu1  ;;  %v1987_v20 = vadd.f32 %v1942_v10, %v1637_v44 }
 0x2c2   : > { %10520 = vmatmul.msk.f32.gmra.mxu3 %vm410_vm1, %v2701_v11  ;;  %10562 = vmatmul.msk.f32.gmra.mxu0 %vm674_vm2, %v3047_v26  ;;  %v2334_v37 = vadd.f32 %v2289_v41, %v1987_v20  ;;  %v2703_v11 = vld [vmem:[%s11468_s20 + $0x9f] sm:$0xff] }
 0x2c3   : > { %10604 = vmatmul.msk.f32.gmra.mxu1 %vm410_vm1, %v3397_v9  ;;  %v3049_v26 = vld [vmem:[%s11473_s23 + $0x98] sm:$0xff] }
 0x2c4   : > { %10647 = vmatmul.msk.f32.gmra.mxu2 %vm674_vm2, %v3744_v28  ;;  %v3399_v9 = vld [vmem:[%s11468_s20 + $0x98] sm:$0xff] }
 0x2c5   : > { %v1595_v27 = vpop.f32.mrf.mxu3  ;;  %v3746_v28 = vld [vmem:[%s11473_s23 + $0x99] sm:$0xff] }
 0x2c6   : > { %v1638_v51 = vadd.f32 %v1595_v27, %v15562_v40 }
 0x2c7   : > { %v2639_v23 = vpop.f32.mrf.mxu2  ;;  %v1945_v34 = vpop.f32.mrf.mxu0 }
 0x2c8   : > { %v12616_v21 = vadd.f32 %v2639_v23, %v2334_v37  ;;  %v2292_v52 = vpop.f32.mrf.mxu1  ;;  %v1988_v8 = vadd.f32 %v1945_v34, %v1638_v51  ;;  %v2704_v34 = vld [vmem:[%s11468_s20 + $0xa7] sm:$0xff] }
 0x2ca   : > { %10521 = vmatmul.msk.f32.gmra.mxu3 %vm410_vm1, %v2702_v35  ;;  %10563 = vmatmul.msk.f32.gmra.mxu0 %vm674_vm2, %v3048_v58  ;;  %v2335_v63 = vadd.f32 %v2292_v52, %v1988_v8  ;;  %v3050_v35 = vld [vmem:[%s11473_s23 + $0xa0] sm:$0xff] }
 0x2cb   : > { %10605 = vmatmul.msk.f32.gmra.mxu1 %vm410_vm1, %v3398_v18  ;;  %v3400_v52 = vld [vmem:[%s11468_s20 + $0xa0] sm:$0xff] }
 0x2cc   : > { %10648 = vmatmul.msk.f32.gmra.mxu2 %vm674_vm2, %v3745_v45  ;;  %v3747_v18 = vld [vmem:[%s11473_s23 + $0xa1] sm:$0xff] }
 0x2cd   : > { %v2869_v42 = vpop.f32.mrf.mxu3 }
 0x2ce   : > { %v2992_v44 = vadd.f32 %v2869_v42, %v12138_v17 }
 0x2cf   : > { %v2642_v29 = vpop.f32.mrf.mxu2  ;;  %v3219_v10 = vpop.f32.mrf.mxu0 }
 0x2d0   : > { %v12627_v4 = vadd.f32 %v2642_v29, %v2335_v63  ;;  %v3566_v41 = vpop.f32.mrf.mxu1  ;;  %v3342_v20 = vadd.f32 %v3219_v10, %v2992_v44  ;;  %v2705_v10 = vld [vmem:[%s11468_s20 + $0xaf] sm:$0xff] }
 0x2d2   : > { %10522 = vmatmul.msk.f32.gmra.mxu3 %vm410_vm1, %v2703_v11  ;;  %10564 = vmatmul.msk.f32.gmra.mxu0 %vm674_vm2, %v3049_v26  ;;  %v3689_v17 = vadd.f32 %v3566_v41, %v3342_v20  ;;  %v3051_v11 = vld [vmem:[%s11473_s23 + $0xa8] sm:$0xff] }
 0x2d3   : > { %10606 = vmatmul.msk.f32.gmra.mxu1 %vm410_vm1, %v3399_v9  ;;  %v3401_v41 = vld [vmem:[%s11468_s20 + $0xa8] sm:$0xff] }
 0x2d4   : > { %10649 = vmatmul.msk.f32.gmra.mxu2 %vm674_vm2, %v3746_v28  ;;  %v3748_v9 = vld [vmem:[%s11473_s23 + $0xa9] sm:$0xff] }
 0x2d5   : > { %v2872_v37 = vpop.f32.mrf.mxu3 }
 0x2d6   : > { %v2993_v27 = vadd.f32 %v2872_v37, %v12150_v14 }
 0x2d7   : > { %v3916_v40 = vpop.f32.mrf.mxu2  ;;  %v3222_v23 = vpop.f32.mrf.mxu0 }
 0x2d8   : > { %v12638_v51 = vadd.f32 %v3916_v40, %v3689_v17  ;;  %v3569_v58 = vpop.f32.mrf.mxu1  ;;  %v3343_v45 = vadd.f32 %v3222_v23, %v2993_v27  ;;  %v2706_v23 = vld [vmem:[%s11468_s20 + $0xb7] sm:$0xff] }
 0x2da   : > { %10523 = vmatmul.msk.f32.gmra.mxu3 %vm410_vm1, %v2704_v34  ;;  %10565 = vmatmul.msk.f32.gmra.mxu0 %vm674_vm2, %v3050_v35  ;;  %v3690_v14 = vadd.f32 %v3569_v58, %v3343_v45  ;;  %v3052_v34 = vld [vmem:[%s11473_s23 + $0xb0] sm:$0xff] }
 0x2db   : > { %10607 = vmatmul.msk.f32.gmra.mxu1 %vm410_vm1, %v3400_v52  ;;  %v3402_v58 = vld [vmem:[%s11468_s20 + $0xb0] sm:$0xff] }
 0x2dc   : > { %10650 = vmatmul.msk.f32.gmra.mxu2 %vm674_vm2, %v3747_v18  ;;  %v3749_v52 = vld [vmem:[%s11473_s23 + $0xb1] sm:$0xff] }
 0x2dd   : > { %v2875_v8 = vpop.f32.mrf.mxu3 }
 0x2de   : > { %v2994_v63 = vadd.f32 %v2875_v8, %v12162_v1 }
 0x2df   : > { %v3919_v42 = vpop.f32.mrf.mxu2  ;;  %v3225_v44 = vpop.f32.mrf.mxu0 }
 0x2e0   : > { %v12649_v29 = vadd.f32 %v3919_v42, %v3690_v14  ;;  %v3572_v26 = vpop.f32.mrf.mxu1  ;;  %v3344_v28 = vadd.f32 %v3225_v44, %v2994_v63  ;;  %v2707_v44 = vld [vmem:[%s11468_s20 + $0xbf] sm:$0xff] }
 0x2e2   : > { %10524 = vmatmul.msk.f32.gmra.mxu3 %vm410_vm1, %v2705_v10  ;;  %10566 = vmatmul.msk.f32.gmra.mxu0 %vm674_vm2, %v3051_v11  ;;  %v3691_v1 = vadd.f32 %v3572_v26, %v3344_v28  ;;  %v3053_v10 = vld [vmem:[%s11473_s23 + $0xb8] sm:$0xff] }
 0x2e3   : > { %10608 = vmatmul.msk.f32.gmra.mxu1 %vm410_vm1, %v3401_v41  ;;  %v3403_v26 = vld [vmem:[%s11468_s20 + $0xb8] sm:$0xff] }
 0x2e4   : > { %10651 = vmatmul.msk.f32.gmra.mxu2 %vm674_vm2, %v3748_v9  ;;  %v3750_v41 = vld [vmem:[%s11473_s23 + $0xb9] sm:$0xff] }
 0x2e5   : > { %v2878_v20 = vpop.f32.mrf.mxu3 }
 0x2e6   : > { %v2995_v17 = vadd.f32 %v2878_v20, %v12174_v25 }
 0x2e7   : > { %v3922_v37 = vpop.f32.mrf.mxu2  ;;  %v3228_v40 = vpop.f32.mrf.mxu0 }
 0x2e8   : > { %v12660_v27 = vadd.f32 %v3922_v37, %v3691_v1  ;;  %v3575_v35 = vpop.f32.mrf.mxu1  ;;  %v3345_v18 = vadd.f32 %v3228_v40, %v2995_v17  ;;  %v2708_v40 = vld [vmem:[%s11468_s20 + $0xc7] sm:$0xff] }
 0x2ea   : > { %10525 = vmatmul.msk.f32.gmra.mxu3 %vm410_vm1, %v2706_v23  ;;  %10567 = vmatmul.msk.f32.gmra.mxu0 %vm674_vm2, %v3052_v34  ;;  %v3692_v25 = vadd.f32 %v3575_v35, %v3345_v18  ;;  %v3054_v23 = vld [vmem:[%s11473_s23 + $0xc0] sm:$0xff] }
 0x2eb   : > { %10609 = vmatmul.msk.f32.gmra.mxu1 %vm410_vm1, %v3402_v58  ;;  %v3404_v35 = vld [vmem:[%s11468_s20 + $0xc0] sm:$0xff] }
 0x2ec   : > { %10652 = vmatmul.msk.f32.gmra.mxu2 %vm674_vm2, %v3749_v52  ;;  %v3751_v58 = vld [vmem:[%s11473_s23 + $0xc1] sm:$0xff] }
 0x2ed   : > { %v2881_v45 = vpop.f32.mrf.mxu3 }
 0x2ee   : > { %v2996_v14 = vadd.f32 %v2881_v45, %v12186_v5 }
 0x2ef   : > { %v3925_v8 = vpop.f32.mrf.mxu2  ;;  %v3231_v42 = vpop.f32.mrf.mxu0 }
 0x2f0   : > { %v12671_v63 = vadd.f32 %v3925_v8, %v3692_v25  ;;  %v3578_v11 = vpop.f32.mrf.mxu1  ;;  %v3346_v9 = vadd.f32 %v3231_v42, %v2996_v14  ;;  %v2709_v42 = vld [vmem:[%s11468_s20 + $0xcf] sm:$0xff] }
 0x2f2   : > { %10526 = vmatmul.msk.f32.gmra.mxu3 %vm410_vm1, %v2707_v44  ;;  %10568 = vmatmul.msk.f32.gmra.mxu0 %vm674_vm2, %v3053_v10  ;;  %v3693_v5 = vadd.f32 %v3578_v11, %v3346_v9  ;;  %v3055_v44 = vld [vmem:[%s11473_s23 + $0xc8] sm:$0xff] }
 0x2f3   : > { %10610 = vmatmul.msk.f32.gmra.mxu1 %vm410_vm1, %v3403_v26  ;;  %v3405_v11 = vld [vmem:[%s11468_s20 + $0xc8] sm:$0xff] }
 0x2f4   : > { %10653 = vmatmul.msk.f32.gmra.mxu2 %vm674_vm2, %v3750_v41  ;;  %v3752_v26 = vld [vmem:[%s11473_s23 + $0xc9] sm:$0xff] }
 0x2f5   : > { %v2884_v28 = vpop.f32.mrf.mxu3 }
 0x2f6   : > { %v2997_v1 = vadd.f32 %v2884_v28, %v12198_v59 }
 0x2f7   : > { %v3928_v20 = vpop.f32.mrf.mxu2  ;;  %v3234_v37 = vpop.f32.mrf.mxu0 }
 0x2f8   : > { %v12682_v17 = vadd.f32 %v3928_v20, %v3693_v5  ;;  %v3581_v34 = vpop.f32.mrf.mxu1  ;;  %v3347_v52 = vadd.f32 %v3234_v37, %v2997_v1  ;;  %v2710_v37 = vld [vmem:[%s11468_s20 + $0xd7] sm:$0xff] }
 0x2fa   : > { %10527 = vmatmul.msk.f32.gmra.mxu3 %vm410_vm1, %v2708_v40  ;;  %10569 = vmatmul.msk.f32.gmra.mxu0 %vm674_vm2, %v3054_v23  ;;  %v3694_v59 = vadd.f32 %v3581_v34, %v3347_v52  ;;  %v3056_v40 = vld [vmem:[%s11473_s23 + $0xd0] sm:$0xff] }
 0x2fb   : > { %10611 = vmatmul.msk.f32.gmra.mxu1 %vm410_vm1, %v3404_v35  ;;  %v3406_v34 = vld [vmem:[%s11468_s20 + $0xd0] sm:$0xff] }
 0x2fc   : > { %10654 = vmatmul.msk.f32.gmra.mxu2 %vm674_vm2, %v3751_v58  ;;  %v3753_v35 = vld [vmem:[%s11473_s23 + $0xd1] sm:$0xff] }
 0x2fd   : > { %v2887_v18 = vpop.f32.mrf.mxu3 }
 0x2fe   : > { %v2998_v25 = vadd.f32 %v2887_v18, %v12210_v19 }
 0x2ff   : > { %v3931_v45 = vpop.f32.mrf.mxu2  ;;  %v3237_v8 = vpop.f32.mrf.mxu0 }
 0x300   : > { %v12693_v14 = vadd.f32 %v3931_v45, %v3694_v59  ;;  %v3584_v10 = vpop.f32.mrf.mxu1  ;;  %v3348_v41 = vadd.f32 %v3237_v8, %v2998_v25  ;;  %v2711_v8 = vld [vmem:[%s11468_s20 + $0xdf] sm:$0xff] }
 0x302   : > { %10528 = vmatmul.msk.f32.gmra.mxu3 %vm410_vm1, %v2709_v42  ;;  %10570 = vmatmul.msk.f32.gmra.mxu0 %vm674_vm2, %v3055_v44  ;;  %v3695_v19 = vadd.f32 %v3584_v10, %v3348_v41  ;;  %v3057_v42 = vld [vmem:[%s11473_s23 + $0xd8] sm:$0xff] }
 0x303   : > { %10612 = vmatmul.msk.f32.gmra.mxu1 %vm410_vm1, %v3405_v11  ;;  %v3407_v10 = vld [vmem:[%s11468_s20 + $0xd8] sm:$0xff] }
 0x304   : > { %10655 = vmatmul.msk.f32.gmra.mxu2 %vm674_vm2, %v3752_v26  ;;  %v3754_v11 = vld [vmem:[%s11473_s23 + $0xd9] sm:$0xff] }
 0x305   : > { %v2890_v9 = vpop.f32.mrf.mxu3 }
 0x306   : > { %v2999_v5 = vadd.f32 %v2890_v9, %v12222_v6 }
 0x307   : > { %v3934_v28 = vpop.f32.mrf.mxu2  ;;  %v3240_v20 = vpop.f32.mrf.mxu0 }
 0x308   : > { %v12704_v1 = vadd.f32 %v3934_v28, %v3695_v19  ;;  %v3587_v23 = vpop.f32.mrf.mxu1  ;;  %v3349_v58 = vadd.f32 %v3240_v20, %v2999_v5  ;;  %v2712_v20 = vld [vmem:[%s11468_s20 + $0xe7] sm:$0xff] }
 0x30a   : > { %10529 = vmatmul.msk.f32.gmra.mxu3 %vm410_vm1, %v2710_v37  ;;  %10571 = vmatmul.msk.f32.gmra.mxu0 %vm674_vm2, %v3056_v40  ;;  %v3696_v6 = vadd.f32 %v3587_v23, %v3349_v58  ;;  %v3058_v37 = vld [vmem:[%s11473_s23 + $0xe0] sm:$0xff] }
 0x30b   : > { %10613 = vmatmul.msk.f32.gmra.mxu1 %vm410_vm1, %v3406_v34  ;;  %v3408_v23 = vld [vmem:[%s11468_s20 + $0xe0] sm:$0xff] }
 0x30c   : > { %10656 = vmatmul.msk.f32.gmra.mxu2 %vm674_vm2, %v3753_v35  ;;  %v3755_v34 = vld [vmem:[%s11473_s23 + $0xe1] sm:$0xff] }
 0x30d   : > { %v2893_v52 = vpop.f32.mrf.mxu3 }
 0x30e   : > { %v3000_v59 = vadd.f32 %v2893_v52, %v12234_v55 }
 0x30f   : > { %v3937_v18 = vpop.f32.mrf.mxu2  ;;  %v3243_v45 = vpop.f32.mrf.mxu0 }
 0x310   : > { %v12715_v25 = vadd.f32 %v3937_v18, %v3696_v6  ;;  %v3590_v44 = vpop.f32.mrf.mxu1  ;;  %v3350_v26 = vadd.f32 %v3243_v45, %v3000_v59  ;;  %v2713_v45 = vld [vmem:[%s11468_s20 + $0xef] sm:$0xff] }
 0x312   : > { %10530 = vmatmul.msk.f32.gmra.mxu3 %vm410_vm1, %v2711_v8  ;;  %10572 = vmatmul.msk.f32.gmra.mxu0 %vm674_vm2, %v3057_v42  ;;  %v3697_v55 = vadd.f32 %v3590_v44, %v3350_v26  ;;  %v3059_v8 = vld [vmem:[%s11473_s23 + $0xe8] sm:$0xff] }
 0x313   : > { %10614 = vmatmul.msk.f32.gmra.mxu1 %vm410_vm1, %v3407_v10  ;;  %v3409_v44 = vld [vmem:[%s11468_s20 + $0xe8] sm:$0xff] }
 0x314   : > { %10657 = vmatmul.msk.f32.gmra.mxu2 %vm674_vm2, %v3754_v11  ;;  %v3756_v10 = vld [vmem:[%s11473_s23 + $0xe9] sm:$0xff] }
 0x315   : > { %v2896_v41 = vpop.f32.mrf.mxu3 }
 0x316   : > { %v3001_v19 = vadd.f32 %v2896_v41, %v12246_v32 }
 0x317   : > { %v3940_v9 = vpop.f32.mrf.mxu2  ;;  %v3246_v28 = vpop.f32.mrf.mxu0 }
 0x318   : > { %v12726_v5 = vadd.f32 %v3940_v9, %v3697_v55  ;;  %v3593_v40 = vpop.f32.mrf.mxu1  ;;  %v3351_v35 = vadd.f32 %v3246_v28, %v3001_v19  ;;  %v2714_v28 = vld [vmem:[%s11468_s20 + $0xf7] sm:$0xff] }
 0x31a   : > { %10531 = vmatmul.msk.f32.gmra.mxu3 %vm410_vm1, %v2712_v20  ;;  %10573 = vmatmul.msk.f32.gmra.mxu0 %vm674_vm2, %v3058_v37  ;;  %v3698_v32 = vadd.f32 %v3593_v40, %v3351_v35  ;;  %v3060_v20 = vld [vmem:[%s11473_s23 + $0xf0] sm:$0xff] }
 0x31b   : > { %10615 = vmatmul.msk.f32.gmra.mxu1 %vm410_vm1, %v3408_v23  ;;  %v3410_v40 = vld [vmem:[%s11468_s20 + $0xf0] sm:$0xff] }
 0x31c   : > { %10658 = vmatmul.msk.f32.gmra.mxu2 %vm674_vm2, %v3755_v34  ;;  %v3757_v23 = vld [vmem:[%s11473_s23 + $0xf1] sm:$0xff] }
 0x31d   : > { %v2899_v58 = vpop.f32.mrf.mxu3 }
 0x31e   : > { %v3002_v6 = vadd.f32 %v2899_v58, %v12258_v38 }
 0x31f   : > { %v3943_v52 = vpop.f32.mrf.mxu2  ;;  %v3249_v18 = vpop.f32.mrf.mxu0 }
 0x320   : > { %v12737_v59 = vadd.f32 %v3943_v52, %v3698_v32  ;;  %v3596_v42 = vpop.f32.mrf.mxu1  ;;  %v3352_v11 = vadd.f32 %v3249_v18, %v3002_v6  ;;  %v2715_v18 = vld [vmem:[%s11468_s20 + $0xff] sm:$0xff] }
 0x322   : > { %10532 = vmatmul.msk.f32.gmra.mxu3 %vm410_vm1, %v2713_v45  ;;  %10574 = vmatmul.msk.f32.gmra.mxu0 %vm674_vm2, %v3059_v8  ;;  %v3699_v38 = vadd.f32 %v3596_v42, %v3352_v11  ;;  %v3061_v45 = vld [vmem:[%s11473_s23 + $0xf8] sm:$0xff] }
 0x323   : > { %10616 = vmatmul.msk.f32.gmra.mxu1 %vm410_vm1, %v3409_v44  ;;  %v3411_v42 = vld [vmem:[%s11468_s20 + $0xf8] sm:$0xff] }
 0x324   : > { %10659 = vmatmul.msk.f32.gmra.mxu2 %vm674_vm2, %v3756_v10  ;;  %v3758_v44 = vld [vmem:[%s11473_s23 + $0xf9] sm:$0xff] }
 0x325   : > { %v2902_v26 = vpop.f32.mrf.mxu3 }
 0x326   : > { %v3003_v55 = vadd.f32 %v2902_v26, %v12270_v36 }
 0x327   : > { %v3946_v41 = vpop.f32.mrf.mxu2  ;;  %v3252_v9 = vpop.f32.mrf.mxu0 }
 0x328   : > { %v12748_v19 = vadd.f32 %v3946_v41, %v3699_v38  ;;  %v3599_v37 = vpop.f32.mrf.mxu1  ;;  %v3353_v34 = vadd.f32 %v3252_v9, %v3003_v55  ;;  %v2716_v9 = vld [vmem:[%s11468_s20 + $0x107] sm:$0xff] }
 0x32a   : > { %10533 = vmatmul.msk.f32.gmra.mxu3 %vm410_vm1, %v2714_v28  ;;  %10575 = vmatmul.msk.f32.gmra.mxu0 %vm674_vm2, %v3060_v20  ;;  %v3700_v36 = vadd.f32 %v3599_v37, %v3353_v34  ;;  %v3062_v28 = vld [vmem:[%s11473_s23 + $0x100] sm:$0xff] }
 0x32b   : > { %10617 = vmatmul.msk.f32.gmra.mxu1 %vm410_vm1, %v3410_v40  ;;  %v3412_v37 = vld [vmem:[%s11468_s20 + $0x100] sm:$0xff] }
 0x32c   : > { %10660 = vmatmul.msk.f32.gmra.mxu2 %vm674_vm2, %v3757_v23  ;;  %v3759_v40 = vld [vmem:[%s11473_s23 + $0x101] sm:$0xff] }
 0x32d   : > { %v2905_v35 = vpop.f32.mrf.mxu3 }
 0x32e   : > { %v3004_v32 = vadd.f32 %v2905_v35, %v12282_v47 }
 0x32f   : > { %v3949_v58 = vpop.f32.mrf.mxu2  ;;  %v3255_v52 = vpop.f32.mrf.mxu0 }
 0x330   : > { %v12759_v6 = vadd.f32 %v3949_v58, %v3700_v36  ;;  %v3602_v8 = vpop.f32.mrf.mxu1  ;;  %v3354_v10 = vadd.f32 %v3255_v52, %v3004_v32  ;;  %v2717_v52 = vld [vmem:[%s11468_s20 + $0x10f] sm:$0xff] }
 0x332   : > { %10534 = vmatmul.msk.f32.gmra.mxu3 %vm410_vm1, %v2715_v18  ;;  %10576 = vmatmul.msk.f32.gmra.mxu0 %vm674_vm2, %v3061_v45  ;;  %v3701_v47 = vadd.f32 %v3602_v8, %v3354_v10  ;;  %v3063_v18 = vld [vmem:[%s11473_s23 + $0x108] sm:$0xff] }
 0x333   : > { %10618 = vmatmul.msk.f32.gmra.mxu1 %vm410_vm1, %v3411_v42  ;;  %v3413_v8 = vld [vmem:[%s11468_s20 + $0x108] sm:$0xff] }
 0x334   : > { %10661 = vmatmul.msk.f32.gmra.mxu2 %vm674_vm2, %v3758_v44  ;;  %v3760_v42 = vld [vmem:[%s11473_s23 + $0x109] sm:$0xff] }
 0x335   : > { %v2908_v11 = vpop.f32.mrf.mxu3 }
 0x336   : > { %v3005_v38 = vadd.f32 %v2908_v11, %v12294_v24 }
 0x337   : > { %v3952_v26 = vpop.f32.mrf.mxu2  ;;  %v3258_v41 = vpop.f32.mrf.mxu0 }
 0x338   : > { %v12770_v55 = vadd.f32 %v3952_v26, %v3701_v47  ;;  %v3605_v20 = vpop.f32.mrf.mxu1  ;;  %v3355_v23 = vadd.f32 %v3258_v41, %v3005_v38  ;;  %v2718_v41 = vld [vmem:[%s11468_s20 + $0x117] sm:$0xff] }
 0x33a   : > { %10535 = vmatmul.msk.f32.gmra.mxu3 %vm410_vm1, %v2716_v9  ;;  %10577 = vmatmul.msk.f32.gmra.mxu0 %vm674_vm2, %v3062_v28  ;;  %v3702_v24 = vadd.f32 %v3605_v20, %v3355_v23  ;;  %v3064_v9 = vld [vmem:[%s11473_s23 + $0x110] sm:$0xff] }
 0x33b   : > { %10619 = vmatmul.msk.f32.gmra.mxu1 %vm410_vm1, %v3412_v37  ;;  %v3414_v20 = vld [vmem:[%s11468_s20 + $0x110] sm:$0xff] }
 0x33c   : > { %10662 = vmatmul.msk.f32.gmra.mxu2 %vm674_vm2, %v3759_v40  ;;  %v3761_v37 = vld [vmem:[%s11473_s23 + $0x111] sm:$0xff] }
 0x33d   : > { %v2911_v34 = vpop.f32.mrf.mxu3 }
 0x33e   : > { %v3006_v36 = vadd.f32 %v2911_v34, %v12306_v56 }
 0x33f   : > { %v3955_v35 = vpop.f32.mrf.mxu2  ;;  %v3261_v58 = vpop.f32.mrf.mxu0 }
 0x340   : > { %v12781_v32 = vadd.f32 %v3955_v35, %v3702_v24  ;;  %v3608_v45 = vpop.f32.mrf.mxu1  ;;  %v3356_v44 = vadd.f32 %v3261_v58, %v3006_v36  ;;  %v2719_v58 = vld [vmem:[%s11468_s20 + $0x11f] sm:$0xff] }
 0x342   : > { %10536 = vmatmul.msk.f32.gmra.mxu3 %vm410_vm1, %v2717_v52  ;;  %10578 = vmatmul.msk.f32.gmra.mxu0 %vm674_vm2, %v3063_v18  ;;  %v3703_v56 = vadd.f32 %v3608_v45, %v3356_v44  ;;  %v3065_v52 = vld [vmem:[%s11473_s23 + $0x118] sm:$0xff] }
 0x343   : > { %10620 = vmatmul.msk.f32.gmra.mxu1 %vm410_vm1, %v3413_v8  ;;  %v3415_v45 = vld [vmem:[%s11468_s20 + $0x118] sm:$0xff] }
 0x344   : > { %10663 = vmatmul.msk.f32.gmra.mxu2 %vm674_vm2, %v3760_v42  ;;  %v3762_v8 = vld [vmem:[%s11473_s23 + $0x119] sm:$0xff] }
 0x345   : > { %v2914_v10 = vpop.f32.mrf.mxu3 }
 0x346   : > { %v3007_v47 = vadd.f32 %v2914_v10, %v12318_v62 }
 0x347   : > { %v3958_v11 = vpop.f32.mrf.mxu2  ;;  %v3264_v26 = vpop.f32.mrf.mxu0 }
 0x348   : > { %v12792_v38 = vadd.f32 %v3958_v11, %v3703_v56  ;;  %v3611_v28 = vpop.f32.mrf.mxu1  ;;  %v3357_v40 = vadd.f32 %v3264_v26, %v3007_v47  ;;  %v2720_v26 = vld [vmem:[%s11468_s20 + $0x127] sm:$0xff] }
 0x34a   : > { %10537 = vmatmul.msk.f32.gmra.mxu3 %vm410_vm1, %v2718_v41  ;;  %10579 = vmatmul.msk.f32.gmra.mxu0 %vm674_vm2, %v3064_v9  ;;  %v3704_v62 = vadd.f32 %v3611_v28, %v3357_v40  ;;  %v3066_v41 = vld [vmem:[%s11473_s23 + $0x120] sm:$0xff] }
 0x34b   : > { %10621 = vmatmul.msk.f32.gmra.mxu1 %vm410_vm1, %v3414_v20  ;;  %v3416_v28 = vld [vmem:[%s11468_s20 + $0x120] sm:$0xff] }
 0x34c   : > { %10664 = vmatmul.msk.f32.gmra.mxu2 %vm674_vm2, %v3761_v37  ;;  %v3763_v20 = vld [vmem:[%s11473_s23 + $0x121] sm:$0xff] }
 0x34d   : > { %v2917_v23 = vpop.f32.mrf.mxu3 }
 0x34e   : > { %v3008_v24 = vadd.f32 %v2917_v23, %v12330_v31 }
 0x34f   : > { %v3961_v34 = vpop.f32.mrf.mxu2  ;;  %v3267_v35 = vpop.f32.mrf.mxu0 }
 0x350   : > { %v12803_v36 = vadd.f32 %v3961_v34, %v3704_v62  ;;  %v3614_v18 = vpop.f32.mrf.mxu1  ;;  %v3358_v42 = vadd.f32 %v3267_v35, %v3008_v24  ;;  %v2721_v35 = vld [vmem:[%s11468_s20 + $0x12f] sm:$0xff] }
 0x352   : > { %10538 = vmatmul.msk.f32.gmra.mxu3 %vm410_vm1, %v2719_v58  ;;  %10580 = vmatmul.msk.f32.gmra.mxu0 %vm674_vm2, %v3065_v52  ;;  %v3705_v31 = vadd.f32 %v3614_v18, %v3358_v42  ;;  %v3067_v58 = vld [vmem:[%s11473_s23 + $0x128] sm:$0xff] }
 0x353   : > { %10622 = vmatmul.msk.f32.gmra.mxu1 %vm410_vm1, %v3415_v45  ;;  %v3417_v18 = vld [vmem:[%s11468_s20 + $0x128] sm:$0xff] }
 0x354   : > { %10665 = vmatmul.msk.f32.gmra.mxu2 %vm674_vm2, %v3762_v8  ;;  %v3764_v45 = vld [vmem:[%s11473_s23 + $0x129] sm:$0xff] }
 0x355   : > { %v2920_v44 = vpop.f32.mrf.mxu3 }
 0x356   : > { %v3009_v56 = vadd.f32 %v2920_v44, %v12342_v39 }
 0x357   : > { %v3964_v10 = vpop.f32.mrf.mxu2  ;;  %v3270_v11 = vpop.f32.mrf.mxu0 }
 0x358   : > { %v12814_v47 = vadd.f32 %v3964_v10, %v3705_v31  ;;  %v3617_v9 = vpop.f32.mrf.mxu1  ;;  %v3359_v37 = vadd.f32 %v3270_v11, %v3009_v56  ;;  %v2722_v11 = vld [vmem:[%s11468_s20 + $0x137] sm:$0xff] }
 0x35a   : > { %10539 = vmatmul.msk.f32.gmra.mxu3 %vm410_vm1, %v2720_v26  ;;  %10581 = vmatmul.msk.f32.gmra.mxu0 %vm674_vm2, %v3066_v41  ;;  %v3706_v39 = vadd.f32 %v3617_v9, %v3359_v37  ;;  %v3068_v26 = vld [vmem:[%s11473_s23 + $0x130] sm:$0xff] }
 0x35b   : > { %10623 = vmatmul.msk.f32.gmra.mxu1 %vm410_vm1, %v3416_v28  ;;  %v3418_v9 = vld [vmem:[%s11468_s20 + $0x130] sm:$0xff] }
 0x35c   : > { %10666 = vmatmul.msk.f32.gmra.mxu2 %vm674_vm2, %v3763_v20  ;;  %v3765_v28 = vld [vmem:[%s11473_s23 + $0x131] sm:$0xff] }
 0x35d   : > { %v2923_v40 = vpop.f32.mrf.mxu3 }
 0x35e   : > { %v3010_v62 = vadd.f32 %v2923_v40, %v12354_v57 }
 0x35f   : > { %v3967_v23 = vpop.f32.mrf.mxu2  ;;  %v3273_v34 = vpop.f32.mrf.mxu0 }
 0x360   : > { %v12825_v24 = vadd.f32 %v3967_v23, %v3706_v39  ;;  %v3620_v52 = vpop.f32.mrf.mxu1  ;;  %v3360_v8 = vadd.f32 %v3273_v34, %v3010_v62  ;;  %v2723_v34 = vld [vmem:[%s11468_s20 + $0x13f] sm:$0xff] }
 0x362   : > { %10540 = vmatmul.msk.f32.gmra.mxu3 %vm410_vm1, %v2721_v35  ;;  %10582 = vmatmul.msk.f32.gmra.mxu0 %vm674_vm2, %v3067_v58  ;;  %v3707_v57 = vadd.f32 %v3620_v52, %v3360_v8  ;;  %v3069_v35 = vld [vmem:[%s11473_s23 + $0x138] sm:$0xff] }
 0x363   : > { %10624 = vmatmul.msk.f32.gmra.mxu1 %vm410_vm1, %v3417_v18  ;;  %v3419_v52 = vld [vmem:[%s11468_s20 + $0x138] sm:$0xff] }
 0x364   : > { %10667 = vmatmul.msk.f32.gmra.mxu2 %vm674_vm2, %v3764_v45  ;;  %v3766_v18 = vld [vmem:[%s11473_s23 + $0x139] sm:$0xff] }
 0x365   : > { %v2926_v42 = vpop.f32.mrf.mxu3 }
 0x366   : > { %v3011_v31 = vadd.f32 %v2926_v42, %v12366_v50 }
 0x367   : > { %v3970_v44 = vpop.f32.mrf.mxu2  ;;  %v3276_v10 = vpop.f32.mrf.mxu0 }
 0x368   : > { %v12836_v56 = vadd.f32 %v3970_v44, %v3707_v57  ;;  %v3623_v41 = vpop.f32.mrf.mxu1  ;;  %v3361_v20 = vadd.f32 %v3276_v10, %v3011_v31 }
 0x36a   : > { %10541 = vmatmul.msk.f32.gmra.mxu3 %vm410_vm1, %v2722_v11  ;;  %10583 = vmatmul.msk.f32.gmra.mxu0 %vm674_vm2, %v3068_v26  ;;  %v3708_v50 = vadd.f32 %v3623_v41, %v3361_v20  ;;  %v2724_v11 = vld [vmem:[%s11468_s20 + $0x147] sm:$0xff] }
 0x36b   : > { %10625 = vmatmul.msk.f32.gmra.mxu1 %vm410_vm1, %v3418_v9  ;;  %v3070_v26 = vld [vmem:[%s11473_s23 + $0x140] sm:$0xff] }
 0x36c   : > { %10668 = vmatmul.msk.f32.gmra.mxu2 %vm674_vm2, %v3765_v28  ;;  %v3420_v9 = vld [vmem:[%s11468_s20 + $0x140] sm:$0xff] }
 0x36d   : > { %v2929_v37 = vpop.f32.mrf.mxu3  ;;  %v3767_v28 = vld [vmem:[%s11473_s23 + $0x141] sm:$0xff] }
 0x36e   : > { %v3012_v39 = vadd.f32 %v2929_v37, %v12381_v15  ;;  %v10844_v15 = vld [vmem:[%s15452_s4 + $0x38] sm:$0xff] }
 0x36f   : > { %v3973_v40 = vpop.f32.mrf.mxu2  ;;  %v3279_v23 = vpop.f32.mrf.mxu0  ;;  %5655 = vmatpush.msra.mxu3 %v10844_v15  ;;  %v3768_v15 = vld [vmem:[%s11473_s23 + $0x149] sm:$0xff] }
 0x370   : > { %v12847_v62 = vadd.f32 %v3973_v40, %v3708_v50  ;;  %v3626_v58 = vpop.f32.mrf.mxu1  ;;  %v3362_v45 = vadd.f32 %v3279_v23, %v3012_v39  ;;  %v10929_v50 = vld [vmem:[%s15452_s4 + $0x40] sm:$0xff] }
 0x371   : > { %6352 = vmatpush.msra.mxu1 %v10929_v50 }
 0x372   : > { %10542 = vmatmul.msk.f32.gmra.mxu3 %vm410_vm1, %v2723_v34  ;;  %10584 = vmatmul.msk.f32.gmra.mxu0 %vm674_vm2, %v3069_v35  ;;  %v3709_v8 = vadd.f32 %v3626_v58, %v3362_v45  ;;  %v2725_v58 = vld [vmem:[%s11468_s20 + $0x14f] sm:$0xff] }
 0x373   : > { %10626 = vmatmul.msk.f32.gmra.mxu1 %vm410_vm1, %v3419_v52  ;;  %v3071_v52 = vld [vmem:[%s11473_s23 + $0x148] sm:$0xff] }
 0x374   : > { %10669 = vmatmul.msk.f32.gmra.mxu2 %vm674_vm2, %v3766_v18  ;;  %v3421_v45 = vld [vmem:[%s11468_s20 + $0x148] sm:$0xff] }
 0x375   : > { %v2932_v57 = vpop.f32.mrf.mxu3 }
 0x376   : > { %v3013_v42 = vadd.f32 %v2932_v57, %v12400_v30  ;;  %v10886_v30 = vld [vmem:[%s15451_s3 + $0x20] sm:$0xf] }
 0x377   : > { %v3976_v31 = vpop.f32.mrf.mxu2  ;;  %v3282_v10 = vpop.f32.mrf.mxu0  ;;  %10887 = vmatpush.msk.msra.mxu0 %vm798_vm0, %v10886_v30 }
 0x378   : > { %v12861_v44 = vadd.f32 %v3976_v31, %v3709_v8  ;;  %v3629_v41 = vpop.f32.mrf.mxu1  ;;  %v3363_v20 = vadd.f32 %v3282_v10, %v3013_v42 }
 0x37a   : > { %10543 = vmatmul.msk.f32.gmra.mxu3 %vm410_vm1, %v2724_v11  ;;  %10585 = vmatmul.msk.f32.gmra.mxu0 %vm674_vm2, %v3070_v26  ;;  %v3710_v37 = vadd.f32 %v3629_v41, %v3363_v20  ;;  %v2726_v26 = vld [vmem:[%s11468_s20 + $0x157] sm:$0xf] }
 0x37b   : > { %10627 = vmatmul.msk.f32.gmra.mxu1 %vm410_vm1, %v3420_v9  ;;  %v3072_v41 = vld [vmem:[%s11473_s23 + $0x150] sm:$0xff] }
 0x37c   : > { %10670 = vmatmul.msk.f32.gmra.mxu2 %vm674_vm2, %v3767_v28  ;;  %v3422_v28 = vld [vmem:[%s11468_s20 + $0x150] sm:$0xff] }
 0x37d   : > { %v2935_v39 = vpop.f32.mrf.mxu3  ;;  %v3769_v20 = vld [vmem:[%s11473_s23 + $0x151] sm:$0xff] }
 0x37e   : > { %v3014_v40 = vadd.f32 %v2935_v39, %v12412_v54 }
 0x37f   : > { %v3979_v23 = vpop.f32.mrf.mxu2  ;;  %v3285_v35 = vpop.f32.mrf.mxu0 }
 0x380   : > { %v12879_v34 = vadd.f32 %v3979_v23, %v3710_v37  ;;  %v3632_v18 = vpop.f32.mrf.mxu1  ;;  %v3364_v8 = vadd.f32 %v3285_v35, %v3014_v40  ;;  %v3073_v35 = vld [vmem:[%s11473_s23 + $0x158] sm:$0xf] }
 0x382   : > { %10544 = vmatmul.msk.f32.gmra.mxu3 %vm410_vm1, %v2725_v58  ;;  %10586 = vmatmul.msk.f32.gmra.mxu0 %vm674_vm2, %v3071_v52  ;;  %v3711_v54 = vadd.f32 %v3632_v18, %v3364_v8  ;;  %v4080_v58 = vld [vmem:[%s11468_s20 + $0x19] sm:$0xff] }
 0x383   : > { %10628 = vmatmul.msk.f32.gmra.mxu1 %vm410_vm1, %v3421_v45  ;;  %v3423_v18 = vld [vmem:[%s11468_s20 + $0x158] sm:$0xf] }
 0x384   : > { %10671 = vmatmul.msk.f32.gmra.mxu2 %vm674_vm2, %v3768_v15  ;;  %v3770_v45 = vld [vmem:[%s11473_s23 + $0x159] sm:$0xf] }
 0x385   : > { %v2938_v57 = vpop.f32.mrf.mxu3 }
 0x386   : > { %v3015_v42 = vadd.f32 %v2938_v57, %v12424_v12 }
 0x387   : > { %v3982_v31 = vpop.f32.mrf.mxu2  ;;  %v3288_v11 = vpop.f32.mrf.mxu0 }
 0x388   : > { %v12890_v10 = vadd.f32 %v3982_v31, %v3711_v54  ;;  %v3635_v9 = vpop.f32.mrf.mxu1  ;;  %v3365_v30 = vadd.f32 %v3288_v11, %v3015_v42  ;;  %v4081_v11 = vld [vmem:[%s11468_s20 + $0x21] sm:$0xff] }
 0x38a   : > { %10545 = vmatmul.msk.f32.gmra.mxu3 %vm410_vm1, %v2726_v26  ;;  %10587 = vmatmul.msk.f32.gmra.mxu0 %vm674_vm2, %v3072_v41  ;;  %v3712_v12 = vadd.f32 %v3635_v9, %v3365_v30  ;;  %v4427_v26 = vld [vmem:[%s11473_s23 + $0x29] sm:$0xff] }
 0x38b   : > { %10629 = vmatmul.msk.f32.gmra.mxu1 %vm410_vm1, %v3422_v28  ;;  %v4777_v9 = vld [vmem:[%s11468_s20 + $0x29] sm:$0xff] }
 0x38c   : > { %10672 = vmatmul.msk.f32.gmra.mxu2 %vm674_vm2, %v3769_v20  ;;  %v5124_v28 = vld [vmem:[%s11473_s23 + $0x2a] sm:$0xff] }
 0x38d   : > { %v2941_v50 = vpop.f32.mrf.mxu3 }
 0x38e   : > { %v3016_v37 = vadd.f32 %v2941_v50, %v12437_v33 }
 0x38f   : > { %v3985_v39 = vpop.f32.mrf.mxu2  ;;  %v3291_v23 = vpop.f32.mrf.mxu0 }
 0x390   : > { %v12901_v40 = vadd.f32 %v3985_v39, %v3712_v12  ;;  %v3638_v52 = vpop.f32.mrf.mxu1  ;;  %v3366_v15 = vadd.f32 %v3291_v23, %v3016_v37  ;;  %v4428_v23 = vld [vmem:[%s11473_s23 + $0x31] sm:$0xff] }
 0x392   : > { %10588 = vmatmul.msk.f32.gmra.mxu0 %vm674_vm2, %v3073_v35  ;;  %10675 = vmatmul.msk.f32.vlgmr.msrb.gmra.mxu3 %vm410_vm1, %v4080_v58  ;;  %v3713_v33 = vadd.f32 %v3638_v52, %v3366_v15  ;;  %v4778_v58 = vld [vmem:[%s11468_s20 + $0x31] sm:$0xff] }
 0x393   : > { %10630 = vmatmul.msk.f32.gmra.mxu1 %vm410_vm1, %v3423_v18  ;;  %v5125_v52 = vld [vmem:[%s11473_s23 + $0x32] sm:$0xff] }
 0x394   : > { %10673 = vmatmul.msk.f32.gmra.mxu2 %vm674_vm2, %v3770_v45 }
 0x395   : > { %v2944_v8 = vpop.f32.mrf.mxu3 }
 0x396   : > { %v3017_v54 = vadd.f32 %v2944_v8, %v12450_v49 }
 0x397   : > { %v3988_v57 = vpop.f32.mrf.mxu2  ;;  %v3294_v31 = vpop.f32.mrf.mxu0 }
 0x398   : > { %v12912_v42 = vadd.f32 %v3988_v57, %v3713_v33  ;;  %v3641_v41 = vpop.f32.mrf.mxu1  ;;  %v3367_v20 = vadd.f32 %v3294_v31, %v3017_v54  ;;  %v4429_v57 = vld [vmem:[%s11473_s23 + $0x39] sm:$0xff] }
 0x39a   : > { %10676 = vmatmul.msk.f32.gmra.mxu3 %vm410_vm1, %v4081_v11  ;;  %10718 = vmatmul.msk.f32.vlgmr.msrb.gmra.mxu0 %vm674_vm2, %v4427_v26  ;;  %v3714_v49 = vadd.f32 %v3641_v41, %v3367_v20  ;;  %v4779_v11 = vld [vmem:[%s11468_s20 + $0x39] sm:$0xff] }
 0x39b   : > { %10760 = vmatmul.msk.f32.vlgmr.msrb.gmra.mxu1 %vm410_vm1, %v4777_v9  ;;  %v5126_v26 = vld [vmem:[%s11473_s23 + $0x3a] sm:$0xff] }
 0x39c   : > { %10803 = vmatmul.msk.f32.vlgmr.msrb.gmra.mxu2 %vm674_vm2, %v5124_v28 }
 0x39d   : > { %v2947_v30 = vpop.f32.mrf.mxu3 }
 0x39e   : > { %v3018_v12 = vadd.f32 %v2947_v30, %v12463_v2 }
 0x39f   : > { %v3991_v50 = vpop.f32.mrf.mxu2  ;;  %v3297_v39 = vpop.f32.mrf.mxu0 }
 0x3a0   : > { %v12923_v37 = vadd.f32 %v3991_v50, %v3714_v49  ;;  %v3644_v35 = vpop.f32.mrf.mxu1  ;;  %v3368_v18 = vadd.f32 %v3297_v39, %v3018_v12  ;;  %v4430_v12 = vld [vmem:[%s11473_s23 + $0x41] sm:$0xff] }
 0x3a1   : > { %v4780_v39 = vld [vmem:[%s11468_s20 + $0x41] sm:$0xff] }
 0x3a2   : > { %10677 = vmatmul.msk.f32.gmra.mxu3 %vm410_vm1, %v4777_v9  ;;  %10719 = vmatmul.msk.f32.gmra.mxu0 %vm674_vm2, %v4428_v23  ;;  %v3715_v2 = vadd.f32 %v3644_v35, %v3368_v18  ;;  %v5127_v23 = vld [vmem:[%s11473_s23 + $0x42] sm:$0xff] }
 0x3a3   : > { %10761 = vmatmul.msk.f32.gmra.mxu1 %vm410_vm1, %v4778_v58 }
 0x3a4   : > { %10804 = vmatmul.msk.f32.gmra.mxu2 %vm674_vm2, %v5125_v52 }
 0x3a5   : > { %v2950_v45 = vpop.f32.mrf.mxu3 }
 0x3a6   : > { %v3019_v15 = vadd.f32 %v2950_v45, %v12476_v60 }
 0x3a7   : > { %v3994_v33 = vpop.f32.mrf.mxu2  ;;  %v3300_v54 = vpop.f32.mrf.mxu0 }
 0x3a8   : > { %v12933_v8 = vadd.f32 %v3994_v33, %v3715_v2  ;;  %v3647_v31 = vpop.f32.mrf.mxu1  ;;  %v3369_v41 = vadd.f32 %v3300_v54, %v3019_v15  ;;  %v4431_v15 = vld [vmem:[%s11473_s23 + $0x49] sm:$0xff] }
 0x3a9   : > { %v4781_v54 = vld [vmem:[%s11468_s20 + $0x49] sm:$0xff] }
 0x3aa   : > { %10678 = vmatmul.msk.f32.gmra.mxu3 %vm410_vm1, %v4778_v58  ;;  %10720 = vmatmul.msk.f32.gmra.mxu0 %vm674_vm2, %v4429_v57  ;;  %v3716_v60 = vadd.f32 %v3647_v31, %v3369_v41  ;;  %v5128_v57 = vld [vmem:[%s11473_s23 + $0x4a] sm:$0xff] }
 0x3ab   : > { %10762 = vmatmul.msk.f32.gmra.mxu1 %vm410_vm1, %v4779_v11 }
 0x3ac   : > { %10805 = vmatmul.msk.f32.gmra.mxu2 %vm674_vm2, %v5126_v26 }
 0x3ad   : > { %v2953_v9 = vpop.f32.mrf.mxu3 }
 0x3ae   : > { %v3020_v28 = vadd.f32 %v2953_v9, %v12489_v3 }
 0x3af   : > { %v3997_v20 = vpop.f32.mrf.mxu2  ;;  %v3303_v30 = vpop.f32.mrf.mxu0 }
 0x3b0   : > { %v12943_v49 = vadd.f32 %v3997_v20, %v3716_v60  ;;  %v3650_v50 = vpop.f32.mrf.mxu1  ;;  %v3370_v35 = vadd.f32 %v3303_v30, %v3020_v28  ;;  %v4432_v28 = vld [vmem:[%s11473_s23 + $0x51] sm:$0xff] }
 0x3b1   : > { %v4782_v30 = vld [vmem:[%s11468_s20 + $0x51] sm:$0xff] }
 0x3b2   : > { %10679 = vmatmul.msk.f32.gmra.mxu3 %vm410_vm1, %v4779_v11  ;;  %10721 = vmatmul.msk.f32.gmra.mxu0 %vm674_vm2, %v4430_v12  ;;  %v3717_v3 = vadd.f32 %v3650_v50, %v3370_v35  ;;  %v5129_v12 = vld [vmem:[%s11473_s23 + $0x52] sm:$0xff] }
 0x3b3   : > { %10763 = vmatmul.msk.f32.gmra.mxu1 %vm410_vm1, %v4780_v39 }
 0x3b4   : > { %10806 = vmatmul.msk.f32.gmra.mxu2 %vm674_vm2, %v5127_v23 }
 0x3b5   : > { %v2956_v58 = vpop.f32.mrf.mxu3 }
 0x3b6   : > { %v3021_v52 = vadd.f32 %v2956_v58, %v12502_v46 }
 0x3b7   : > { %v4000_v18 = vpop.f32.mrf.mxu2  ;;  %v3306_v45 = vpop.f32.mrf.mxu0 }
 0x3b8   : > { %v12953_v2 = vadd.f32 %v4000_v18, %v3717_v3  ;;  %v3653_v33 = vpop.f32.mrf.mxu1  ;;  %v3371_v31 = vadd.f32 %v3306_v45, %v3021_v52  ;;  %v4433_v52 = vld [vmem:[%s11473_s23 + $0x59] sm:$0xff] }
 0x3b9   : > { %v4783_v45 = vld [vmem:[%s11468_s20 + $0x59] sm:$0xff] }
 0x3ba   : > { %10680 = vmatmul.msk.f32.gmra.mxu3 %vm410_vm1, %v4780_v39  ;;  %10722 = vmatmul.msk.f32.gmra.mxu0 %vm674_vm2, %v4431_v15  ;;  %v3718_v46 = vadd.f32 %v3653_v33, %v3371_v31  ;;  %v5130_v15 = vld [vmem:[%s11473_s23 + $0x5a] sm:$0xff] }
 0x3bb   : > { %10764 = vmatmul.msk.f32.gmra.mxu1 %vm410_vm1, %v4781_v54 }
 0x3bc   : > { %10807 = vmatmul.msk.f32.gmra.mxu2 %vm674_vm2, %v5128_v57 }
 0x3bd   : > { %v2959_v11 = vpop.f32.mrf.mxu3 }
 0x3be   : > { %v3022_v26 = vadd.f32 %v2959_v11, %v12513_v61 }
 0x3bf   : > { %v4003_v41 = vpop.f32.mrf.mxu2  ;;  %v3309_v9 = vpop.f32.mrf.mxu0 }
 0x3c0   : > { %v12963_v60 = vadd.f32 %v4003_v41, %v3718_v46  ;;  %v3656_v20 = vpop.f32.mrf.mxu1  ;;  %v3372_v50 = vadd.f32 %v3309_v9, %v3022_v26  ;;  %v4434_v26 = vld [vmem:[%s11473_s23 + $0x61] sm:$0xff] }
 0x3c1   : > { %v4784_v9 = vld [vmem:[%s11468_s20 + $0x61] sm:$0xff] }
 0x3c2   : > { %10681 = vmatmul.msk.f32.gmra.mxu3 %vm410_vm1, %v4781_v54  ;;  %10723 = vmatmul.msk.f32.gmra.mxu0 %vm674_vm2, %v4432_v28  ;;  %v3719_v61 = vadd.f32 %v3656_v20, %v3372_v50  ;;  %v5131_v28 = vld [vmem:[%s11473_s23 + $0x62] sm:$0xff] }
 0x3c3   : > { %10765 = vmatmul.msk.f32.gmra.mxu1 %vm410_vm1, %v4782_v30 }
 0x3c4   : > { %10808 = vmatmul.msk.f32.gmra.mxu2 %vm674_vm2, %v5129_v12 }
 0x3c5   : > { %v2962_v39 = vpop.f32.mrf.mxu3 }
 0x3c6   : > { %v3023_v23 = vadd.f32 %v2962_v39, %v12524_v22 }
 0x3c7   : > { %v4006_v35 = vpop.f32.mrf.mxu2  ;;  %v3312_v58 = vpop.f32.mrf.mxu0 }
 0x3c8   : > { %v12973_v3 = vadd.f32 %v4006_v35, %v3719_v61  ;;  %v3659_v18 = vpop.f32.mrf.mxu1  ;;  %v3373_v33 = vadd.f32 %v3312_v58, %v3023_v23  ;;  %v4435_v23 = vld [vmem:[%s11473_s23 + $0x69] sm:$0xff] }
 0x3c9   : > { %v4785_v58 = vld [vmem:[%s11468_s20 + $0x69] sm:$0xff] }
 0x3ca   : > { %10682 = vmatmul.msk.f32.gmra.mxu3 %vm410_vm1, %v4782_v30  ;;  %10724 = vmatmul.msk.f32.gmra.mxu0 %vm674_vm2, %v4433_v52  ;;  %v3720_v22 = vadd.f32 %v3659_v18, %v3373_v33  ;;  %v5132_v52 = vld [vmem:[%s11473_s23 + $0x6a] sm:$0xff] }
 0x3cb   : > { %10766 = vmatmul.msk.f32.gmra.mxu1 %vm410_vm1, %v4783_v45 }
 0x3cc   : > { %10809 = vmatmul.msk.f32.gmra.mxu2 %vm674_vm2, %v5130_v15 }
 0x3cd   : > { %v2965_v54 = vpop.f32.mrf.mxu3 }
 0x3ce   : > { %v3024_v57 = vadd.f32 %v2965_v54, %v12535_v0 }
 0x3cf   : > { %v4009_v31 = vpop.f32.mrf.mxu2  ;;  %v3315_v11 = vpop.f32.mrf.mxu0 }
 0x3d0   : > { %v12983_v46 = vadd.f32 %v4009_v31, %v3720_v22  ;;  %v3662_v41 = vpop.f32.mrf.mxu1  ;;  %v3374_v20 = vadd.f32 %v3315_v11, %v3024_v57  ;;  %v4436_v57 = vld [vmem:[%s11473_s23 + $0x71] sm:$0xff] }
 0x3d1   : > { %v4786_v11 = vld [vmem:[%s11468_s20 + $0x71] sm:$0xff] }
 0x3d2   : > { %10683 = vmatmul.msk.f32.gmra.mxu3 %vm410_vm1, %v4783_v45  ;;  %10725 = vmatmul.msk.f32.gmra.mxu0 %vm674_vm2, %v4434_v26  ;;  %v3721_v0 = vadd.f32 %v3662_v41, %v3374_v20  ;;  %v5133_v26 = vld [vmem:[%s11473_s23 + $0x72] sm:$0xff] }
 0x3d3   : > { %10767 = vmatmul.msk.f32.gmra.mxu1 %vm410_vm1, %v4784_v9 }
 0x3d4   : > { %10810 = vmatmul.msk.f32.gmra.mxu2 %vm674_vm2, %v5131_v28 }
 0x3d5   : > { %v2968_v30 = vpop.f32.mrf.mxu3 }
 0x3d6   : > { %v3025_v12 = vadd.f32 %v2968_v30, %v12546_v43 }
 0x3d7   : > { %v4012_v50 = vpop.f32.mrf.mxu2  ;;  %v3318_v39 = vpop.f32.mrf.mxu0 }
 0x3d8   : > { %v12993_v61 = vadd.f32 %v4012_v50, %v3721_v0  ;;  %v3665_v35 = vpop.f32.mrf.mxu1  ;;  %v3375_v18 = vadd.f32 %v3318_v39, %v3025_v12  ;;  %v4437_v12 = vld [vmem:[%s11473_s23 + $0x79] sm:$0xff] }
 0x3d9   : > { %v4787_v39 = vld [vmem:[%s11468_s20 + $0x79] sm:$0xff] }
 0x3da   : > { %10684 = vmatmul.msk.f32.gmra.mxu3 %vm410_vm1, %v4784_v9  ;;  %10726 = vmatmul.msk.f32.gmra.mxu0 %vm674_vm2, %v4435_v23  ;;  %v3722_v43 = vadd.f32 %v3665_v35, %v3375_v18  ;;  %v5134_v23 = vld [vmem:[%s11473_s23 + $0x7a] sm:$0xff] }
 0x3db   : > { %10768 = vmatmul.msk.f32.gmra.mxu1 %vm410_vm1, %v4785_v58 }
 0x3dc   : > { %10811 = vmatmul.msk.f32.gmra.mxu2 %vm674_vm2, %v5132_v52 }
 0x3dd   : > { %v2971_v45 = vpop.f32.mrf.mxu3 }
 0x3de   : > { %v3026_v15 = vadd.f32 %v2971_v45, %v12557_v53 }
 0x3df   : > { %v4015_v33 = vpop.f32.mrf.mxu2  ;;  %v3321_v54 = vpop.f32.mrf.mxu0 }
 0x3e0   : > { %v13003_v22 = vadd.f32 %v4015_v33, %v3722_v43  ;;  %v3668_v31 = vpop.f32.mrf.mxu1  ;;  %v3376_v41 = vadd.f32 %v3321_v54, %v3026_v15  ;;  %v4438_v15 = vld [vmem:[%s11473_s23 + $0x81] sm:$0xff] }
 0x3e1   : > { %v4788_v54 = vld [vmem:[%s11468_s20 + $0x81] sm:$0xff] }
 0x3e2   : > { %10685 = vmatmul.msk.f32.gmra.mxu3 %vm410_vm1, %v4785_v58  ;;  %10727 = vmatmul.msk.f32.gmra.mxu0 %vm674_vm2, %v4436_v57  ;;  %v3723_v53 = vadd.f32 %v3668_v31, %v3376_v41  ;;  %v5135_v57 = vld [vmem:[%s11473_s23 + $0x82] sm:$0xff] }
 0x3e3   : > { %10769 = vmatmul.msk.f32.gmra.mxu1 %vm410_vm1, %v4786_v11 }
 0x3e4   : > { %10812 = vmatmul.msk.f32.gmra.mxu2 %vm674_vm2, %v5133_v26 }
 0x3e5   : > { %v2974_v9 = vpop.f32.mrf.mxu3 }
 0x3e6   : > { %v3027_v28 = vadd.f32 %v2974_v9, %v12568_v48 }
 0x3e7   : > { %v4018_v20 = vpop.f32.mrf.mxu2  ;;  %v3324_v30 = vpop.f32.mrf.mxu0 }
 0x3e8   : > { %v13013_v0 = vadd.f32 %v4018_v20, %v3723_v53  ;;  %v3671_v50 = vpop.f32.mrf.mxu1  ;;  %v3377_v35 = vadd.f32 %v3324_v30, %v3027_v28  ;;  %v4439_v28 = vld [vmem:[%s11473_s23 + $0x89] sm:$0xff] }
 0x3e9   : > { %v4789_v30 = vld [vmem:[%s11468_s20 + $0x89] sm:$0xff] }
 0x3ea   : > { %10686 = vmatmul.msk.f32.gmra.mxu3 %vm410_vm1, %v4786_v11  ;;  %10728 = vmatmul.msk.f32.gmra.mxu0 %vm674_vm2, %v4437_v12  ;;  %v3724_v48 = vadd.f32 %v3671_v50, %v3377_v35  ;;  %v5136_v12 = vld [vmem:[%s11473_s23 + $0x8a] sm:$0xff] }
 0x3eb   : > { %10770 = vmatmul.msk.f32.gmra.mxu1 %vm410_vm1, %v4787_v39 }
 0x3ec   : > { %10813 = vmatmul.msk.f32.gmra.mxu2 %vm674_vm2, %v5134_v23 }
 0x3ed   : > { %v2977_v58 = vpop.f32.mrf.mxu3 }
 0x3ee   : > { %v3028_v52 = vadd.f32 %v2977_v58, %v12579_v7 }
 0x3ef   : > { %v4021_v18 = vpop.f32.mrf.mxu2  ;;  %v3327_v45 = vpop.f32.mrf.mxu0 }
 0x3f0   : > { %v13023_v43 = vadd.f32 %v4021_v18, %v3724_v48  ;;  %v3674_v33 = vpop.f32.mrf.mxu1  ;;  %v3378_v31 = vadd.f32 %v3327_v45, %v3028_v52  ;;  %v4440_v18 = vld [vmem:[%s11473_s23 + $0x91] sm:$0xff] }
 0x3f2   : > { %10687 = vmatmul.msk.f32.gmra.mxu3 %vm410_vm1, %v4787_v39  ;;  %10729 = vmatmul.msk.f32.gmra.mxu0 %vm674_vm2, %v4438_v15  ;;  %v3725_v7 = vadd.f32 %v3674_v33, %v3378_v31  ;;  %v4790_v15 = vld [vmem:[%s11468_s20 + $0x91] sm:$0xff] }
 0x3f3   : > { %10771 = vmatmul.msk.f32.gmra.mxu1 %vm410_vm1, %v4788_v54  ;;  %v5137_v33 = vld [vmem:[%s11473_s23 + $0x92] sm:$0xff] }
 0x3f4   : > { %10814 = vmatmul.msk.f32.gmra.mxu2 %vm674_vm2, %v5135_v57 }
 0x3f5   : > { %v2980_v11 = vpop.f32.mrf.mxu3 }
 0x3f6   : > { %v3029_v26 = vadd.f32 %v2980_v11, %v12594_v16  ;;  %v10971_v16 = vld [vmem:[%s15454_s6 + $0x4] sm:$0xf] }
 0x3f7   : > { %v4024_v41 = vpop.f32.mrf.mxu2  ;;  %v3330_v9 = vpop.f32.mrf.mxu0  ;;  %10972 = vmatpush.msk.msra.mxu2 %vm798_vm0, %v10971_v16 }
 0x3f8   : > { %v13033_v53 = vadd.f32 %v4024_v41, %v3725_v7  ;;  %v3677_v20 = vpop.f32.mrf.mxu1  ;;  %v3379_v50 = vadd.f32 %v3330_v9, %v3029_v26  ;;  %v4441_v41 = vld [vmem:[%s11473_s23 + $0x99] sm:$0xff] }
 0x3fa   : > { %10688 = vmatmul.msk.f32.gmra.mxu3 %vm410_vm1, %v4788_v54  ;;  %10730 = vmatmul.msk.f32.gmra.mxu0 %vm674_vm2, %v4439_v28  ;;  %v3726_v39 = vadd.f32 %v3677_v20, %v3379_v50  ;;  %v4791_v28 = vld [vmem:[%s11468_s20 + $0x99] sm:$0xff] }
 0x3fb   : > { %10772 = vmatmul.msk.f32.gmra.mxu1 %vm410_vm1, %v4789_v30  ;;  %v5138_v20 = vld [vmem:[%s11473_s23 + $0x9a] sm:$0xff] }
 0x3fc   : > { %10815 = vmatmul.msk.f32.gmra.mxu2 %vm674_vm2, %v5136_v12 }
 0x3fd   : > { %v2983_v23 = vpop.f32.mrf.mxu3 }
 0x3fe   : > { %v3030_v35 = vadd.f32 %v2983_v23, %v12605_v13 }
 0x3ff   : > { %v4027_v48 = vpop.f32.mrf.mxu2  ;;  %v3333_v52 = vpop.f32.mrf.mxu0 }
 0x400   : > { %v13047_v58 = vadd.f32 %v4027_v48, %v3726_v39  ;;  %v3680_v45 = vpop.f32.mrf.mxu1  ;;  %v3380_v54 = vadd.f32 %v3333_v52, %v3030_v35  ;;  %v4442_v35 = vld [vmem:[%s11473_s23 + $0xa1] sm:$0xff] }
 0x401   : > { %v4792_v52 = vld [vmem:[%s11468_s20 + $0xa1] sm:$0xff] }
 0x402   : > { %10689 = vmatmul.msk.f32.gmra.mxu3 %vm410_vm1, %v4789_v30  ;;  %10731 = vmatmul.msk.f32.gmra.mxu0 %vm674_vm2, %v4440_v18  ;;  %v3727_v13 = vadd.f32 %v3680_v45, %v3380_v54  ;;  %v5139_v18 = vld [vmem:[%s11473_s23 + $0xa2] sm:$0xff] }
 0x403   : > { %10773 = vmatmul.msk.f32.gmra.mxu1 %vm410_vm1, %v4790_v15 }
 0x404   : > { %10816 = vmatmul.msk.f32.gmra.mxu2 %vm674_vm2, %v5137_v33 }
 0x405   : > { %v2986_v57 = vpop.f32.mrf.mxu3 }
 0x406   : > { %v3031_v31 = vadd.f32 %v2986_v57, %v12616_v21 }
 0x407   : > { %v4030_v7 = vpop.f32.mrf.mxu2  ;;  %v3336_v26 = vpop.f32.mrf.mxu0 }
 0x408   : > { %v13057_v11 = vadd.f32 %v4030_v7, %v3727_v13  ;;  %v3683_v9 = vpop.f32.mrf.mxu1  ;;  %v3381_v30 = vadd.f32 %v3336_v26, %v3031_v31  ;;  %v4443_v31 = vld [vmem:[%s11473_s23 + $0xa9] sm:$0xff] }
 0x409   : > { %v4793_v26 = vld [vmem:[%s11468_s20 + $0xa9] sm:$0xff] }
 0x40a   : > { %10690 = vmatmul.msk.f32.gmra.mxu3 %vm410_vm1, %v4790_v15  ;;  %10732 = vmatmul.msk.f32.gmra.mxu0 %vm674_vm2, %v4441_v41  ;;  %v3728_v21 = vadd.f32 %v3683_v9, %v3381_v30  ;;  %v5140_v41 = vld [vmem:[%s11473_s23 + $0xaa] sm:$0xff] }
 0x40b   : > { %10774 = vmatmul.msk.f32.gmra.mxu1 %vm410_vm1, %v4791_v28 }
 0x40c   : > { %10817 = vmatmul.msk.f32.gmra.mxu2 %vm674_vm2, %v5138_v20 }
 0x40d   : > { %v2989_v12 = vpop.f32.mrf.mxu3 }
 0x40e   : > { %v3032_v50 = vadd.f32 %v2989_v12, %v12627_v4 }
 0x40f   : > { %v4033_v16 = vpop.f32.mrf.mxu2  ;;  %v3339_v23 = vpop.f32.mrf.mxu0 }
 0x410   : > { %v13067_v39 = vadd.f32 %v4033_v16, %v3728_v21  ;;  %v3686_v48 = vpop.f32.mrf.mxu1  ;;  %v3382_v45 = vadd.f32 %v3339_v23, %v3032_v50  ;;  %v4444_v50 = vld [vmem:[%s11473_s23 + $0xb1] sm:$0xff] }
 0x411   : > { %v4794_v23 = vld [vmem:[%s11468_s20 + $0xb1] sm:$0xff] }
 0x412   : > { %10691 = vmatmul.msk.f32.gmra.mxu3 %vm410_vm1, %v4791_v28  ;;  %10733 = vmatmul.msk.f32.gmra.mxu0 %vm674_vm2, %v4442_v35  ;;  %v3729_v4 = vadd.f32 %v3686_v48, %v3382_v45  ;;  %v5141_v35 = vld [vmem:[%s11473_s23 + $0xb2] sm:$0xff] }
 0x413   : > { %10775 = vmatmul.msk.f32.gmra.mxu1 %vm410_vm1, %v4792_v52 }
 0x414   : > { %10818 = vmatmul.msk.f32.gmra.mxu2 %vm674_vm2, %v5139_v18 }
 0x415   : > { %v4263_v15 = vpop.f32.mrf.mxu3 }
 0x416   : > { %v4386_v54 = vadd.f32 %v4263_v15, %v12638_v51 }
 0x417   : > { %v4036_v33 = vpop.f32.mrf.mxu2  ;;  %v4613_v57 = vpop.f32.mrf.mxu0 }
 0x418   : > { %v13077_v13 = vadd.f32 %v4036_v33, %v3729_v4  ;;  %v4960_v7 = vpop.f32.mrf.mxu1  ;;  %v4736_v9 = vadd.f32 %v4613_v57, %v4386_v54  ;;  %v4445_v33 = vld [vmem:[%s11473_s23 + $0xb9] sm:$0xff] }
 0x419   : > { %v4795_v57 = vld [vmem:[%s11468_s20 + $0xb9] sm:$0xff] }
 0x41a   : > { %10692 = vmatmul.msk.f32.gmra.mxu3 %vm410_vm1, %v4792_v52  ;;  %10734 = vmatmul.msk.f32.gmra.mxu0 %vm674_vm2, %v4443_v31  ;;  %v5083_v51 = vadd.f32 %v4960_v7, %v4736_v9  ;;  %v5142_v31 = vld [vmem:[%s11473_s23 + $0xba] sm:$0xff] }
 0x41b   : > { %10776 = vmatmul.msk.f32.gmra.mxu1 %vm410_vm1, %v4793_v26 }
 0x41c   : > { %10819 = vmatmul.msk.f32.gmra.mxu2 %vm674_vm2, %v5140_v41 }
 0x41d   : > { %v4266_v28 = vpop.f32.mrf.mxu3 }
 0x41e   : > { %v4387_v20 = vadd.f32 %v4266_v28, %v12649_v29 }
 0x41f   : > { %v5310_v30 = vpop.f32.mrf.mxu2  ;;  %v4616_v12 = vpop.f32.mrf.mxu0 }
 0x420   : > { %v13087_v21 = vadd.f32 %v5310_v30, %v5083_v51  ;;  %v4963_v16 = vpop.f32.mrf.mxu1  ;;  %v4737_v48 = vadd.f32 %v4616_v12, %v4387_v20  ;;  %v4446_v20 = vld [vmem:[%s11473_s23 + $0xc1] sm:$0xff] }
 0x421   : > { %v4796_v12 = vld [vmem:[%s11468_s20 + $0xc1] sm:$0xff] }
 0x422   : > { %10693 = vmatmul.msk.f32.gmra.mxu3 %vm410_vm1, %v4793_v26  ;;  %10735 = vmatmul.msk.f32.gmra.mxu0 %vm674_vm2, %v4444_v50  ;;  %v5084_v29 = vadd.f32 %v4963_v16, %v4737_v48  ;;  %v5143_v50 = vld [vmem:[%s11473_s23 + $0xc2] sm:$0xff] }
 0x423   : > { %10777 = vmatmul.msk.f32.gmra.mxu1 %vm410_vm1, %v4794_v23 }
 0x424   : > { %10820 = vmatmul.msk.f32.gmra.mxu2 %vm674_vm2, %v5141_v35 }
 0x425   : > { %v4269_v52 = vpop.f32.mrf.mxu3 }
 0x426   : > { %v4388_v18 = vadd.f32 %v4269_v52, %v12660_v27 }
 0x427   : > { %v5313_v45 = vpop.f32.mrf.mxu2  ;;  %v4619_v15 = vpop.f32.mrf.mxu0 }
 0x428   : > { %v13097_v4 = vadd.f32 %v5313_v45, %v5084_v29  ;;  %v4966_v54 = vpop.f32.mrf.mxu1  ;;  %v4738_v7 = vadd.f32 %v4619_v15, %v4388_v18  ;;  %v4447_v18 = vld [vmem:[%s11473_s23 + $0xc9] sm:$0xff] }
 0x429   : > { %v4797_v15 = vld [vmem:[%s11468_s20 + $0xc9] sm:$0xff] }
 0x42a   : > { %10694 = vmatmul.msk.f32.gmra.mxu3 %vm410_vm1, %v4794_v23  ;;  %10736 = vmatmul.msk.f32.gmra.mxu0 %vm674_vm2, %v4445_v33  ;;  %v5085_v27 = vadd.f32 %v4966_v54, %v4738_v7  ;;  %v5144_v33 = vld [vmem:[%s11473_s23 + $0xca] sm:$0xff] }
 0x42b   : > { %10778 = vmatmul.msk.f32.gmra.mxu1 %vm410_vm1, %v4795_v57 }
 0x42c   : > { %10821 = vmatmul.msk.f32.gmra.mxu2 %vm674_vm2, %v5142_v31 }
 0x42d   : > { %v4272_v26 = vpop.f32.mrf.mxu3 }
 0x42e   : > { %v4389_v41 = vadd.f32 %v4272_v26, %v12671_v63 }
 0x42f   : > { %v5316_v9 = vpop.f32.mrf.mxu2  ;;  %v4622_v28 = vpop.f32.mrf.mxu0 }
 0x430   : > { %v13107_v51 = vadd.f32 %v5316_v9, %v5085_v27  ;;  %v4969_v30 = vpop.f32.mrf.mxu1  ;;  %v4739_v16 = vadd.f32 %v4622_v28, %v4389_v41  ;;  %v4448_v41 = vld [vmem:[%s11473_s23 + $0xd1] sm:$0xff] }
 0x431   : > { %v4798_v28 = vld [vmem:[%s11468_s20 + $0xd1] sm:$0xff] }
 0x432   : > { %10695 = vmatmul.msk.f32.gmra.mxu3 %vm410_vm1, %v4795_v57  ;;  %10737 = vmatmul.msk.f32.gmra.mxu0 %vm674_vm2, %v4446_v20  ;;  %v5086_v63 = vadd.f32 %v4969_v30, %v4739_v16  ;;  %v5145_v20 = vld [vmem:[%s11473_s23 + $0xd2] sm:$0xff] }
 0x433   : > { %10779 = vmatmul.msk.f32.gmra.mxu1 %vm410_vm1, %v4796_v12 }
 0x434   : > { %10822 = vmatmul.msk.f32.gmra.mxu2 %vm674_vm2, %v5143_v50 }
 0x435   : > { %v4275_v23 = vpop.f32.mrf.mxu3 }
 0x436   : > { %v4390_v35 = vadd.f32 %v4275_v23, %v12682_v17 }
 0x437   : > { %v5319_v48 = vpop.f32.mrf.mxu2  ;;  %v4625_v52 = vpop.f32.mrf.mxu0 }
 0x438   : > { %v13117_v29 = vadd.f32 %v5319_v48, %v5086_v63  ;;  %v4972_v45 = vpop.f32.mrf.mxu1  ;;  %v4740_v54 = vadd.f32 %v4625_v52, %v4390_v35  ;;  %v4449_v35 = vld [vmem:[%s11473_s23 + $0xd9] sm:$0xff] }
 0x439   : > { %v4799_v52 = vld [vmem:[%s11468_s20 + $0xd9] sm:$0xff] }
 0x43a   : > { %10696 = vmatmul.msk.f32.gmra.mxu3 %vm410_vm1, %v4796_v12  ;;  %10738 = vmatmul.msk.f32.gmra.mxu0 %vm674_vm2, %v4447_v18  ;;  %v5087_v17 = vadd.f32 %v4972_v45, %v4740_v54  ;;  %v5146_v18 = vld [vmem:[%s11473_s23 + $0xda] sm:$0xff] }
 0x43b   : > { %10780 = vmatmul.msk.f32.gmra.mxu1 %vm410_vm1, %v4797_v15 }
 0x43c   : > { %10823 = vmatmul.msk.f32.gmra.mxu2 %vm674_vm2, %v5144_v33 }
 0x43d   : > { %v4278_v57 = vpop.f32.mrf.mxu3 }
 0x43e   : > { %v4391_v31 = vadd.f32 %v4278_v57, %v12693_v14 }
 0x43f   : > { %v5322_v7 = vpop.f32.mrf.mxu2  ;;  %v4628_v26 = vpop.f32.mrf.mxu0 }
 0x440   : > { %v13127_v27 = vadd.f32 %v5322_v7, %v5087_v17  ;;  %v4975_v9 = vpop.f32.mrf.mxu1  ;;  %v4741_v30 = vadd.f32 %v4628_v26, %v4391_v31  ;;  %v4450_v31 = vld [vmem:[%s11473_s23 + $0xe1] sm:$0xff] }
 0x441   : > { %v4800_v26 = vld [vmem:[%s11468_s20 + $0xe1] sm:$0xff] }
 0x442   : > { %10697 = vmatmul.msk.f32.gmra.mxu3 %vm410_vm1, %v4797_v15  ;;  %10739 = vmatmul.msk.f32.gmra.mxu0 %vm674_vm2, %v4448_v41  ;;  %v5088_v14 = vadd.f32 %v4975_v9, %v4741_v30  ;;  %v5147_v41 = vld [vmem:[%s11473_s23 + $0xe2] sm:$0xff] }
 0x443   : > { %10781 = vmatmul.msk.f32.gmra.mxu1 %vm410_vm1, %v4798_v28 }
 0x444   : > { %10824 = vmatmul.msk.f32.gmra.mxu2 %vm674_vm2, %v5145_v20 }
 0x445   : > { %v4281_v12 = vpop.f32.mrf.mxu3 }
 0x446   : > { %v4392_v50 = vadd.f32 %v4281_v12, %v12704_v1 }
 0x447   : > { %v5325_v16 = vpop.f32.mrf.mxu2  ;;  %v4631_v23 = vpop.f32.mrf.mxu0 }
 0x448   : > { %v13137_v63 = vadd.f32 %v5325_v16, %v5088_v14  ;;  %v4978_v48 = vpop.f32.mrf.mxu1  ;;  %v4742_v45 = vadd.f32 %v4631_v23, %v4392_v50  ;;  %v4451_v50 = vld [vmem:[%s11473_s23 + $0xe9] sm:$0xff] }
 0x449   : > { %v4801_v23 = vld [vmem:[%s11468_s20 + $0xe9] sm:$0xff] }
 0x44a   : > { %10698 = vmatmul.msk.f32.gmra.mxu3 %vm410_vm1, %v4798_v28  ;;  %10740 = vmatmul.msk.f32.gmra.mxu0 %vm674_vm2, %v4449_v35  ;;  %v5089_v1 = vadd.f32 %v4978_v48, %v4742_v45  ;;  %v5148_v35 = vld [vmem:[%s11473_s23 + $0xea] sm:$0xff] }
 0x44b   : > { %10782 = vmatmul.msk.f32.gmra.mxu1 %vm410_vm1, %v4799_v52 }
 0x44c   : > { %10825 = vmatmul.msk.f32.gmra.mxu2 %vm674_vm2, %v5146_v18 }
 0x44d   : > { %v4284_v15 = vpop.f32.mrf.mxu3 }
 0x44e   : > { %v4393_v33 = vadd.f32 %v4284_v15, %v12715_v25 }
 0x44f   : > { %v5328_v54 = vpop.f32.mrf.mxu2  ;;  %v4634_v57 = vpop.f32.mrf.mxu0 }
 0x450   : > { %v13147_v17 = vadd.f32 %v5328_v54, %v5089_v1  ;;  %v4981_v7 = vpop.f32.mrf.mxu1  ;;  %v4743_v9 = vadd.f32 %v4634_v57, %v4393_v33  ;;  %v4452_v33 = vld [vmem:[%s11473_s23 + $0xf1] sm:$0xff] }
 0x451   : > { %v4802_v57 = vld [vmem:[%s11468_s20 + $0xf1] sm:$0xff] }
 0x452   : > { %10699 = vmatmul.msk.f32.gmra.mxu3 %vm410_vm1, %v4799_v52  ;;  %10741 = vmatmul.msk.f32.gmra.mxu0 %vm674_vm2, %v4450_v31  ;;  %v5090_v25 = vadd.f32 %v4981_v7, %v4743_v9  ;;  %v5149_v31 = vld [vmem:[%s11473_s23 + $0xf2] sm:$0xff] }
 0x453   : > { %10783 = vmatmul.msk.f32.gmra.mxu1 %vm410_vm1, %v4800_v26 }
 0x454   : > { %10826 = vmatmul.msk.f32.gmra.mxu2 %vm674_vm2, %v5147_v41 }
 0x455   : > { %v4287_v28 = vpop.f32.mrf.mxu3 }
 0x456   : > { %v4394_v20 = vadd.f32 %v4287_v28, %v12726_v5 }
 0x457   : > { %v5331_v30 = vpop.f32.mrf.mxu2  ;;  %v4637_v12 = vpop.f32.mrf.mxu0 }
 0x458   : > { %v13157_v14 = vadd.f32 %v5331_v30, %v5090_v25  ;;  %v4984_v16 = vpop.f32.mrf.mxu1  ;;  %v4744_v48 = vadd.f32 %v4637_v12, %v4394_v20  ;;  %v4453_v20 = vld [vmem:[%s11473_s23 + $0xf9] sm:$0xff] }
 0x459   : > { %v4803_v12 = vld [vmem:[%s11468_s20 + $0xf9] sm:$0xff] }
 0x45a   : > { %10700 = vmatmul.msk.f32.gmra.mxu3 %vm410_vm1, %v4800_v26  ;;  %10742 = vmatmul.msk.f32.gmra.mxu0 %vm674_vm2, %v4451_v50  ;;  %v5091_v5 = vadd.f32 %v4984_v16, %v4744_v48  ;;  %v5150_v50 = vld [vmem:[%s11473_s23 + $0xfa] sm:$0xff] }
 0x45b   : > { %10784 = vmatmul.msk.f32.gmra.mxu1 %vm410_vm1, %v4801_v23 }
 0x45c   : > { %10827 = vmatmul.msk.f32.gmra.mxu2 %vm674_vm2, %v5148_v35 }
 0x45d   : > { %v4290_v52 = vpop.f32.mrf.mxu3 }
 0x45e   : > { %v4395_v18 = vadd.f32 %v4290_v52, %v12737_v59 }
 0x45f   : > { %v5334_v45 = vpop.f32.mrf.mxu2  ;;  %v4640_v15 = vpop.f32.mrf.mxu0 }
 0x460   : > { %v13167_v1 = vadd.f32 %v5334_v45, %v5091_v5  ;;  %v4987_v54 = vpop.f32.mrf.mxu1  ;;  %v4745_v7 = vadd.f32 %v4640_v15, %v4395_v18  ;;  %v4454_v15 = vld [vmem:[%s11473_s23 + $0x101] sm:$0xff] }
 0x462   : > { %10701 = vmatmul.msk.f32.gmra.mxu3 %vm410_vm1, %v4801_v23  ;;  %10743 = vmatmul.msk.f32.gmra.mxu0 %vm674_vm2, %v4452_v33  ;;  %v5092_v59 = vadd.f32 %v4987_v54, %v4745_v7  ;;  %v11388_v23 = vmov 0   ;;  %v4804_v54 = vld [vmem:[%s11468_s20 + $0x101] sm:$0xff] }
 0x463   : > { %10785 = vmatmul.msk.f32.gmra.mxu1 %vm410_vm1, %v4802_v57  ;;  %11374 = vset.pattern.permute.xlu0 %v11388_v23 }
 0x464   : > { %10828 = vmatmul.msk.f32.gmra.mxu2 %vm674_vm2, %v5149_v31  ;;  %11375 = vset.pattern.permute.xlu1 %v11388_v23 }
 0x465   : > { %v4293_v26 = vpop.f32.mrf.mxu3  ;;  %11376 = vset.pattern.permute.xlu2 %v11388_v23 }
 0x466   : > { %v4396_v41 = vadd.f32 %v4293_v26, %v12748_v19  ;;  %v6604_v19 = vld [vmem:[%s15450_s2] sm:$0xff] }
 0x467   : > { %v5337_v9 = vpop.f32.mrf.mxu2  ;;  %v4643_v28 = vpop.f32.mrf.mxu0  ;;  %6647 = vperm.xlu0 %11374, %v6604_v19   ;;  %v6610_v19 = vld [vmem:[%s15450_s2 + $0x30] sm:$0xff] }
 0x468   : > { %v13177_v25 = vadd.f32 %v5337_v9, %v5092_v59  ;;  %v4990_v30 = vpop.f32.mrf.mxu1  ;;  %v4746_v16 = vadd.f32 %v4643_v28, %v4396_v41 }
 0x46a   : > { %10702 = vmatmul.msk.f32.gmra.mxu3 %vm410_vm1, %v4802_v57  ;;  %10744 = vmatmul.msk.f32.gmra.mxu0 %vm674_vm2, %v4453_v20  ;;  %v5093_v35 = vadd.f32 %v4990_v30, %v4746_v16  ;;  %v5151_v57 = vld [vmem:[%s11473_s23 + $0x102] sm:$0xff] }
 0x46b   : > { %10786 = vmatmul.msk.f32.gmra.mxu1 %vm410_vm1, %v4803_v12  ;;  %v4455_v20 = vld [vmem:[%s11473_s23 + $0x109] sm:$0xff] }
 0x46c   : > { %10829 = vmatmul.msk.f32.gmra.mxu2 %vm674_vm2, %v5150_v50  ;;  %v5152_v50 = vld [vmem:[%s11473_s23 + $0x10a] sm:$0xff] }
 0x46d   : > { %v4296_v48 = vpop.f32.mrf.mxu3 }
 0x46e   : > { %v4397_v5 = vadd.f32 %v4296_v48, %v12759_v6  ;;  %v6605_v6 = vld [vmem:[%s15450_s2 + $0x8] sm:$0xff] }
 0x46f   : > { %v5340_v52 = vpop.f32.mrf.mxu2  ;;  %v4646_v45 = vpop.f32.mrf.mxu0  ;;  %6652 = vperm.xlu0 %11374, %v6605_v6   ;;  %v6613_v6 = vld [vmem:[%s15450_s2 + $0x48] sm:$0xff] }
 0x470   : > { %v13190_v18 = vadd.f32 %v5340_v52, %v5093_v35  ;;  %v4993_v33 = vpop.f32.mrf.mxu1  ;;  %v4747_v31 = vadd.f32 %v4646_v45, %v4397_v5 }
 0x472   : > { %10703 = vmatmul.msk.f32.gmra.mxu3 %vm410_vm1, %v4803_v12  ;;  %10745 = vmatmul.msk.f32.gmra.mxu0 %vm674_vm2, %v4454_v15  ;;  %v5094_v7 = vadd.f32 %v4993_v33, %v4747_v31  ;;  %v4805_v12 = vld [vmem:[%s11468_s20 + $0x109] sm:$0xff]  ;;  %v4456_v15 = vld [vmem:[%s11473_s23 + $0x111] sm:$0xff] }
 0x473   : > { %10787 = vmatmul.msk.f32.gmra.mxu1 %vm410_vm1, %v4804_v54 }
 0x474   : > { %10830 = vmatmul.msk.f32.gmra.mxu2 %vm674_vm2, %v5151_v57  ;;  %v5153_v57 = vld [vmem:[%s11473_s23 + $0x112] sm:$0xff] }
 0x475   : > { %v4299_v59 = vpop.f32.mrf.mxu3 }
 0x476   : > { %v4398_v26 = vadd.f32 %v4299_v59, %v12770_v55  ;;  %v6606_v55 = vld [vmem:[%s15450_s2 + $0x10] sm:$0xff] }
 0x477   : > { %v5343_v41 = vpop.f32.mrf.mxu2  ;;  %v4649_v28 = vpop.f32.mrf.mxu0  ;;  %6657 = vperm.xlu1 %11375, %v6606_v55   ;;  %6677 = vperm.xlu0 %11374, %v6610_v19   ;;  %v6616_v19 = vld [vmem:[%s15450_s2 + $0x60] sm:$0xff] }
 0x478   : > { %v13203_v9 = vadd.f32 %v5343_v41, %v5094_v7  ;;  %v4996_v30 = vpop.f32.mrf.mxu1  ;;  %v4748_v16 = vadd.f32 %v4649_v28, %v4398_v26 }
 0x47a   : > { %10704 = vmatmul.msk.f32.gmra.mxu3 %vm410_vm1, %v4804_v54  ;;  %10746 = vmatmul.msk.f32.gmra.mxu0 %vm674_vm2, %v4455_v20  ;;  %v5095_v23 = vadd.f32 %v4996_v30, %v4748_v16  ;;  %v4806_v54 = vld [vmem:[%s11468_s20 + $0x111] sm:$0xff]  ;;  %v4457_v30 = vld [vmem:[%s11473_s23 + $0x119] sm:$0xff] }
 0x47b   : > { %10788 = vmatmul.msk.f32.gmra.mxu1 %vm410_vm1, %v4805_v12  ;;  %v5154_v16 = vld [vmem:[%s11473_s23 + $0x11a] sm:$0xff] }
 0x47c   : > { %10831 = vmatmul.msk.f32.gmra.mxu2 %vm674_vm2, %v5152_v50  ;;  %v4807_v50 = vld [vmem:[%s11468_s20 + $0x119] sm:$0xff] }
 0x47d   : > { %v4302_v35 = vpop.f32.mrf.mxu3 }
 0x47e   : > { %v4399_v48 = vadd.f32 %v4302_v35, %v12781_v32  ;;  %v6607_v32 = vld [vmem:[%s15450_s2 + $0x18] sm:$0xff] }
 0x47f   : > { %v5346_v5 = vpop.f32.mrf.mxu2  ;;  %v4652_v45 = vpop.f32.mrf.mxu0  ;;  %6662 = vperm.xlu1 %11375, %v6607_v32   ;;  %6692 = vperm.xlu0 %11374, %v6613_v6   ;;  %v6619_v6 = vld [vmem:[%s15450_s2 + $0x78] sm:$0xff] }
 0x480   : > { %v13219_v52 = vadd.f32 %v5346_v5, %v5095_v23  ;;  %v4999_v33 = vpop.f32.mrf.mxu1  ;;  %v4749_v31 = vadd.f32 %v4652_v45, %v4399_v48 }
 0x482   : > { %10705 = vmatmul.msk.f32.gmra.mxu3 %vm410_vm1, %v4805_v12  ;;  %10747 = vmatmul.msk.f32.gmra.mxu0 %vm674_vm2, %v4456_v15  ;;  %v5096_v7 = vadd.f32 %v4999_v33, %v4749_v31  ;;  %v4458_v33 = vld [vmem:[%s11473_s23 + $0x121] sm:$0xff] }
 0x483   : > { %10789 = vmatmul.msk.f32.gmra.mxu1 %vm410_vm1, %v4806_v54  ;;  %v5155_v31 = vld [vmem:[%s11473_s23 + $0x122] sm:$0xff] }
 0x484   : > { %10832 = vmatmul.msk.f32.gmra.mxu2 %vm674_vm2, %v5153_v57  ;;  %v4808_v57 = vld [vmem:[%s11468_s20 + $0x121] sm:$0xff] }
 0x485   : > { %v4305_v59 = vpop.f32.mrf.mxu3 }
 0x486   : > { %v4400_v26 = vadd.f32 %v4305_v59, %v12792_v38  ;;  %v6611_v38 = vld [vmem:[%s15450_s2 + $0x38] sm:$0xff] }
 0x487   : > { %v5349_v41 = vpop.f32.mrf.mxu2  ;;  %v4655_v20 = vpop.f32.mrf.mxu0  ;;  %6682 = vperm.xlu1 %11375, %v6611_v38   ;;  %6707 = vperm.xlu0 %11374, %v6616_v19   ;;  %v6622_v19 = vld [vmem:[%s15450_s2 + $0x90] sm:$0xff] }
 0x488   : > { %v13235_v28 = vadd.f32 %v5349_v41, %v5096_v7  ;;  %v5002_v12 = vpop.f32.mrf.mxu1  ;;  %v4750_v55 = vadd.f32 %v4655_v20, %v4400_v26 }
 0x48a   : > { %10706 = vmatmul.msk.f32.gmra.mxu3 %vm410_vm1, %v4806_v54  ;;  %10748 = vmatmul.msk.f32.gmra.mxu0 %vm674_vm2, %v4457_v30  ;;  %v5097_v23 = vadd.f32 %v5002_v12, %v4750_v55  ;;  %v4459_v12 = vld [vmem:[%s11473_s23 + $0x129] sm:$0xff] }
 0x48b   : > { %10790 = vmatmul.msk.f32.gmra.mxu1 %vm410_vm1, %v4807_v50  ;;  %v5156_v55 = vld [vmem:[%s11473_s23 + $0x12a] sm:$0xff] }
 0x48c   : > { %10833 = vmatmul.msk.f32.gmra.mxu2 %vm674_vm2, %v5154_v16  ;;  %v4809_v16 = vld [vmem:[%s11468_s20 + $0x129] sm:$0xff] }
 0x48d   : > { %v4308_v35 = vpop.f32.mrf.mxu3 }
 0x48e   : > { %v4401_v48 = vadd.f32 %v4308_v35, %v12803_v36  ;;  %v6614_v36 = vld [vmem:[%s15450_s2 + $0x50] sm:$0xff] }
 0x48f   : > { %v5352_v5 = vpop.f32.mrf.mxu2  ;;  %v4658_v15 = vpop.f32.mrf.mxu0  ;;  %6697 = vperm.xlu1 %11375, %v6614_v36   ;;  %6722 = vperm.xlu0 %11374, %v6619_v6   ;;  %v6625_v36 = vld [vmem:[%s15450_s2 + $0xa8] sm:$0xff] }
 0x490   : > { %v13251_v45 = vadd.f32 %v5352_v5, %v5097_v23  ;;  %v5005_v54 = vpop.f32.mrf.mxu1  ;;  %v4751_v32 = vadd.f32 %v4658_v15, %v4401_v48 }
 0x492   : > { %10707 = vmatmul.msk.f32.gmra.mxu3 %vm410_vm1, %v4807_v50  ;;  %10749 = vmatmul.msk.f32.gmra.mxu0 %vm674_vm2, %v4458_v33  ;;  %v5098_v7 = vadd.f32 %v5005_v54, %v4751_v32  ;;  %v4460_v54 = vld [vmem:[%s11473_s23 + $0x131] sm:$0xff] }
 0x493   : > { %10791 = vmatmul.msk.f32.gmra.mxu1 %vm410_vm1, %v4808_v57  ;;  %v5157_v32 = vld [vmem:[%s11473_s23 + $0x132] sm:$0xff] }
 0x494   : > { %10834 = vmatmul.msk.f32.gmra.mxu2 %vm674_vm2, %v5155_v31  ;;  %v4810_v31 = vld [vmem:[%s11468_s20 + $0x131] sm:$0xff] }
 0x495   : > { %v4311_v59 = vpop.f32.mrf.mxu3 }
 0x496   : > { %v4402_v26 = vadd.f32 %v4311_v59, %v12814_v47  ;;  %v6617_v47 = vld [vmem:[%s15450_s2 + $0x68] sm:$0xff] }
 0x497   : > { %v5355_v41 = vpop.f32.mrf.mxu2  ;;  %v4661_v30 = vpop.f32.mrf.mxu0  ;;  %6712 = vperm.xlu1 %11375, %v6617_v47   ;;  %6737 = vperm.xlu0 %11374, %v6622_v19   ;;  %v4462_v19 = vld [vmem:[%s11473_s23 + $0x141] sm:$0xff] }
 0x498   : > { %v13267_v20 = vadd.f32 %v5355_v41, %v5098_v7  ;;  %v5008_v50 = vpop.f32.mrf.mxu1  ;;  %v4752_v38 = vadd.f32 %v4661_v30, %v4402_v26  ;;  %v4461_v26 = vld [vmem:[%s11473_s23 + $0x139] sm:$0xff] }
 0x499   : > { %v4811_v30 = vld [vmem:[%s11468_s20 + $0x139] sm:$0xff] }
 0x49a   : > { %10708 = vmatmul.msk.f32.gmra.mxu3 %vm410_vm1, %v4808_v57  ;;  %10750 = vmatmul.msk.f32.gmra.mxu0 %vm674_vm2, %v4459_v12  ;;  %v5099_v23 = vadd.f32 %v5008_v50, %v4752_v38  ;;  %v5158_v12 = vld [vmem:[%s11473_s23 + $0x13a] sm:$0xff] }
 0x49b   : > { %10792 = vmatmul.msk.f32.gmra.mxu1 %vm410_vm1, %v4809_v16  ;;  %v6623_v50 = vld [vmem:[%s15450_s2 + $0x98] sm:$0xff] }
 0x49c   : > { %10835 = vmatmul.msk.f32.gmra.mxu2 %vm674_vm2, %v5156_v55 }
 0x49d   : > { %v4314_v35 = vpop.f32.mrf.mxu3 }
 0x49e   : > { %v13283_v48 = vadd.f32 %v4314_v35, %v12825_v24  ;;  %v6620_v24 = vld [vmem:[%s15450_s2 + $0x80] sm:$0xff] }
 0x49f   : > { %v5358_v5 = vpop.f32.mrf.mxu2  ;;  %v13287_v33 = vpop.f32.mrf.mxu0  ;;  %6727 = vperm.xlu1 %11375, %v6620_v24   ;;  %6752 = vperm.xlu0 %11374, %v6625_v36   ;;  %v4812_v35 = vld [vmem:[%s11468_s20 + $0x141] sm:$0xff] }
 0x4a0   : > { %v13285_v15 = vadd.f32 %v5358_v5, %v5099_v23  ;;  %v13290_v57 = vpop.f32.mrf.mxu1  ;;  %v5159_v5 = vld [vmem:[%s11473_s23 + $0x142] sm:$0xff] }
 0x4a2   : > { %10709 = vmatmul.msk.f32.gmra.mxu3 %vm410_vm1, %v4809_v16  ;;  %10751 = vmatmul.msk.f32.gmra.mxu0 %vm674_vm2, %v4460_v54  ;;  %v6628_v16 = vld [vmem:[%s15450_s2 + $0xc0] sm:$0xff]  ;;  %v6626_v54 = vld [vmem:[%s15450_s2 + $0xb0] sm:$0xff] }
 0x4a3   : > { %10793 = vmatmul.msk.f32.gmra.mxu1 %vm410_vm1, %v4810_v31 }
 0x4a4   : > { %10836 = vmatmul.msk.f32.gmra.mxu2 %vm674_vm2, %v5157_v32 }
 0x4a5   : > { %v4317_v6 = vpop.f32.mrf.mxu3 }
 0x4a6   : > { %v13305_v7 = vadd.f32 %v4317_v6, %v12836_v56  ;;  %v6608_v56 = vld [vmem:[%s15450_s2 + $0x20] sm:$0xff]  ;;  %v4463_v6 = vld [vmem:[%s11473_s23 + $0x149] sm:$0xff] }
 0x4a7   : > { %v13307_v59 = vpop.f32.mrf.mxu0  ;;  %6667 = vperm.xlu2 %11376, %v6608_v56   ;;  %6742 = vperm.xlu1 %11375, %v6623_v50   ;;  %v6629_v56 = vld [vmem:[%s15450_s2 + $0xc8] sm:$0xff]  ;;  %v6634_v50 = vld [vmem:[%s15450_s2 + $0xf0] sm:$0xff] }
 0x4a8   : > { %v13310_v41 = vpop.f32.mrf.mxu1  ;;  %6767 = vperm.xlu0 %11374, %v6628_v16  }
 0x4aa   : > { %10710 = vmatmul.msk.f32.gmra.mxu3 %vm410_vm1, %v4810_v31  ;;  %10752 = vmatmul.msk.f32.gmra.mxu0 %vm674_vm2, %v4461_v26  ;;  %v6631_v31 = vld [vmem:[%s15450_s2 + $0xd8] sm:$0xff] }
 0x4ab   : > { %10794 = vmatmul.msk.f32.gmra.mxu1 %vm410_vm1, %v4811_v30 }
 0x4ac   : > { %10837 = vmatmul.msk.f32.gmra.mxu2 %vm674_vm2, %v5158_v12  ;;  %v5160_v12 = vld [vmem:[%s11473_s23 + $0x14a] sm:$0xff] }
 0x4ad   : > { %v4320_v55 = vpop.f32.mrf.mxu3 }
 0x4ae   : > { %v13328_v38 = vadd.f32 %v4320_v55, %v12847_v62  ;;  %v6609_v62 = vld [vmem:[%s15450_s2 + $0x28] sm:$0xff] }
 0x4af   : > { %v13330_v47 = vpop.f32.mrf.mxu0  ;;  %6672 = vperm.xlu2 %11376, %v6609_v62   ;;  %6757 = vperm.xlu1 %11375, %v6626_v54   ;;  %v4814_v62 = vld [vmem:[%s11468_s20 + $0x151] sm:$0xff] }
 0x4b0   : > { %v13333_v23 = vpop.f32.mrf.mxu1  ;;  %6782 = vperm.xlu0 %11374, %v6631_v31   ;;  %v5161_v54 = vld [vmem:[%s11473_s23 + $0x152] sm:$0xff]  ;;  %v6632_v31 = vld [vmem:[%s15450_s2 + $0xe0] sm:$0xff] }
 0x4b2   : > { %10711 = vmatmul.msk.f32.gmra.mxu3 %vm410_vm1, %v4811_v30  ;;  %10753 = vmatmul.msk.f32.gmra.mxu0 %vm674_vm2, %v4462_v19  ;;  %v4813_v30 = vld [vmem:[%s11468_s20 + $0x149] sm:$0xff] }
 0x4b3   : > { %10795 = vmatmul.msk.f32.gmra.mxu1 %vm410_vm1, %v4812_v35 }
 0x4b4   : > { %10838 = vmatmul.msk.f32.gmra.mxu2 %vm674_vm2, %v5159_v5 }
 0x4b5   : > { %v4323_v32 = vpop.f32.mrf.mxu3 }
 0x4b6   : > { %v13351_v24 = vadd.f32 %v4323_v32, %v12861_v44  ;;  %v6612_v44 = vld [vmem:[%s15450_s2 + $0x40] sm:$0xff]  ;;  %v6637_v32 = vld [vmem:[%s15450_s2 + $0x108] sm:$0xff] }
 0x4b7   : > { %v13353_v36 = vpop.f32.mrf.mxu0  ;;  %6687 = vperm.xlu2 %11376, %v6612_v44   ;;  %6772 = vperm.xlu1 %11375, %v6629_v56   ;;  %v4465_v44 = vld [vmem:[%s11473_s23 + $0x159] sm:$0xff] }
 0x4b8   : > { %v13356_v26 = vpop.f32.mrf.mxu1  ;;  %6797 = vperm.xlu0 %11374, %v6634_v50   ;;  %v4815_v50 = vld [vmem:[%s11468_s20 + $0x159] sm:$0xff] }
 0x4ba   : > { %10712 = vmatmul.msk.f32.gmra.mxu3 %vm410_vm1, %v4812_v35  ;;  %10754 = vmatmul.msk.f32.gmra.mxu0 %vm674_vm2, %v4463_v6  ;;  %v4464_v35 = vld [vmem:[%s11473_s23 + $0x151] sm:$0xff] }
 0x4bb   : > { %10796 = vmatmul.msk.f32.gmra.mxu1 %vm410_vm1, %v4813_v30 }
 0x4bc   : > { %10839 = vmatmul.msk.f32.gmra.mxu2 %vm674_vm2, %v5160_v12 }
 0x4bd   : > { %v4326_v16 = vpop.f32.mrf.mxu3 }
 0x4be   : > { %v13374_v55 = vadd.f32 %v4326_v16, %v12879_v34  ;;  %v6615_v34 = vld [vmem:[%s15450_s2 + $0x58] sm:$0xff] }
 0x4bf   : > { %v13376_v19 = vpop.f32.mrf.mxu0  ;;  %6702 = vperm.xlu2 %11376, %v6615_v34   ;;  %6787 = vperm.xlu1 %11375, %v6632_v31   ;;  %v5162_v16 = vld [vmem:[%s11473_s23 + $0x15a] sm:$0xff] }
 0x4c0   : > { %v13379_v5 = vpop.f32.mrf.mxu1  ;;  %6812 = vperm.xlu0 %11374, %v6637_v32   ;;  %v4120_v32 = vld [vmem:[%s11468_s20 + $0x159] sm:$0xf] }
 0x4c2   : > { %10713 = vmatmul.msk.f32.gmra.mxu3 %vm410_vm1, %v4813_v30  ;;  %10755 = vmatmul.msk.f32.gmra.mxu0 %vm674_vm2, %v4464_v35  ;;  %v6635_v35 = vld [vmem:[%s15450_s2 + $0xf8] sm:$0xff] }
 0x4c3   : > { %10797 = vmatmul.msk.f32.gmra.mxu1 %vm410_vm1, %v4814_v62 }
 0x4c4   : > { %10840 = vmatmul.msk.f32.gmra.mxu2 %vm674_vm2, %v5161_v54 }
 0x4c5   : > { %v4329_v6 = vpop.f32.mrf.mxu3 }
 0x4c6   : > { %v13397_v30 = vadd.f32 %v4329_v6, %v12890_v10  ;;  %v6618_v10 = vld [vmem:[%s15450_s2 + $0x70] sm:$0xff]  ;;  %v4466_v6 = vld [vmem:[%s11473_s23 + $0x161] sm:$0xff] }
 0x4c7   : > { %v13399_v12 = vpop.f32.mrf.mxu0  ;;  %6717 = vperm.xlu2 %11376, %v6618_v10   ;;  %6802 = vperm.xlu1 %11375, %v6635_v35   ;;  %v6638_v10 = vld [vmem:[%s15450_s2 + $0x110] sm:$0xff]  ;;  %v6643_v35 = vld [vmem:[%s15450_s2 + $0x138] sm:$0xff] }
 0x4c8   : > { %v13402_v56 = vpop.f32.mrf.mxu1 }
 0x4ca   : > { %10714 = vmatmul.msk.f32.gmra.mxu3 %vm410_vm1, %v4814_v62  ;;  %10756 = vmatmul.msk.f32.gmra.mxu0 %vm674_vm2, %v4465_v44  ;;  %v6640_v62 = vld [vmem:[%s15450_s2 + $0x120] sm:$0xff] }
 0x4cb   : > { %10798 = vmatmul.msk.f32.gmra.mxu1 %vm410_vm1, %v4815_v50  ;;  %6827 = vperm.xlu0 %11374, %v6640_v62   ;;  %v4816_v50 = vld [vmem:[%s11468_s20 + $0x161] sm:$0xff] }
 0x4cc   : > { %10841 = vmatmul.msk.f32.gmra.mxu2 %vm674_vm2, %v5162_v16  ;;  %v5163_v16 = vld [vmem:[%s11473_s23 + $0x162] sm:$0xff] }
 0x4cd   : > { %v4332_v54 = vpop.f32.mrf.mxu3 }
 0x4ce   : > { %v13420_v34 = vadd.f32 %v4332_v54, %v12901_v40  ;;  %v6621_v40 = vld [vmem:[%s15450_s2 + $0x88] sm:$0xff] }
 0x4cf   : > { %v13422_v31 = vpop.f32.mrf.mxu0  ;;  %6732 = vperm.xlu2 %11376, %v6621_v40   ;;  %6817 = vperm.xlu1 %11375, %v6638_v10   ;;  %v6641_v40 = vld [vmem:[%s15450_s2 + $0x128] sm:$0xff] }
 0x4d0   : > { %15563 = vst [vmem:[#allocation3_spill] sm:$0xff] %v13422_v31  ;;  %v13426_v44 = vpop.f32.mrf.mxu1  ;;  %v5164_v31 = vld [vmem:[%s11473_s23 + $0x16a] sm:$0xf] }
 0x4d1   : > { %15564 = vst [vmem:[#allocation4_spill] sm:$0xff] %v13426_v44  ;;  %v4817_v44 = vld [vmem:[%s11468_s20 + $0x169] sm:$0xf] }
 0x4d2   : > { %10715 = vmatmul.msk.f32.gmra.mxu3 %vm410_vm1, %v4120_v32  ;;  %10757 = vmatmul.msk.f32.gmra.mxu0 %vm674_vm2, %v4466_v6  ;;  %v4467_v6 = vld [vmem:[%s11473_s23 + $0x169] sm:$0xf] }
 0x4d3   : > { %10799 = vmatmul.msk.f32.gmra.mxu1 %vm410_vm1, %v4816_v50  ;;  %6842 = vperm.xlu0 %11374, %v6643_v35   ;;  %v5474_v50 = vld [vmem:[%s11468_s20 + $0x2a] sm:$0xff] }
 0x4d4   : > { %10842 = vmatmul.msk.f32.gmra.mxu2 %vm674_vm2, %v5163_v16 }
 0x4d5   : > { %v4335_v62 = vpop.f32.mrf.mxu3 }
 0x4d6   : > { %v13444_v54 = vadd.f32 %v4335_v62, %v12912_v42  ;;  %v6624_v42 = vld [vmem:[%s15450_s2 + $0xa0] sm:$0xff] }
 0x4d7   : > { %v13446_v32 = vpop.f32.mrf.mxu0  ;;  %6747 = vperm.xlu2 %11376, %v6624_v42   ;;  %6832 = vperm.xlu1 %11375, %v6641_v40   ;;  %v6644_v42 = vld [vmem:[%s15450_s2 + $0x140] sm:$0xf] }
 0x4d8   : > { %v13450_v16 = vpop.f32.mrf.mxu1 }
 0x4da   : > { %10758 = vmatmul.msk.f32.gmra.mxu0 %vm674_vm2, %v4467_v6  ;;  %10845 = vmatmul.msk.f32.vlgmr.msra.gmra.mxu3 %vm410_vm1, %v5474_v50  ;;  %v6171_v50 = vld [vmem:[%s11468_s20 + $0x2b] sm:$0xff] }
 0x4db   : > { %10800 = vmatmul.msk.f32.gmra.mxu1 %vm410_vm1, %v4817_v44  ;;  %v5475_v44 = vld [vmem:[%s11468_s20 + $0x32] sm:$0xff] }
 0x4dc   : > { %10843 = vmatmul.msk.f32.gmra.mxu2 %vm674_vm2, %v5164_v31  ;;  %v5821_v31 = vld [vmem:[%s11473_s23 + $0x2b] sm:$0xff] }
 0x4dd   : > { %v4338_v10 = vpop.f32.mrf.mxu3 }
 0x4de   : > { %v13465_v35 = vadd.f32 %v4338_v10, %v12923_v37  ;;  %v6627_v37 = vld [vmem:[%s15450_s2 + $0xb8] sm:$0xff] }
 0x4df   : > { %v13467_v62 = vpop.f32.mrf.mxu0  ;;  %6762 = vperm.xlu2 %11376, %v6627_v37   ;;  %6847 = vperm.xlu1 %11375, %v6644_v42   ;;  %v6630_v37 = vld [vmem:[%s15450_s2 + $0xd0] sm:$0xff] }
 0x4e0   : > { %15565 = vst [vmem:[#allocation5_spill] sm:$0xff] %v13467_v62  ;;  %v13471_v6 = vpop.f32.mrf.mxu1  ;;  %v6172_v62 = vld [vmem:[%s11468_s20 + $0x33] sm:$0xff] }
 0x4e1   : > { %15566 = vst [vmem:[#allocation6_spill] sm:$0xff] %v13471_v6 }
 0x4e2   : > { %10846 = vmatmul.msk.f32.gmra.mxu3 %vm410_vm1, %v5475_v44  ;;  %10888 = vmatmul.msk.f32.vlgmr.msra.gmra.mxu0 %vm674_vm2, %v5821_v31  ;;  %v5476_v31 = vld [vmem:[%s11468_s20 + $0x3a] sm:$0xff] }
 0x4e3   : > { %10930 = vmatmul.msk.f32.vlgmr.msra.gmra.mxu1 %vm410_vm1, %v6171_v50  ;;  %v5822_v50 = vld [vmem:[%s11473_s23 + $0x33] sm:$0xff] }
 0x4e5   : > { %v4341_v40 = vpop.f32.mrf.mxu3 }
 0x4e6   : > { %v13484_v10 = vadd.f32 %v4341_v40, %v12933_v8 }
 0x4e7   : > { %v13486_v44 = vpop.f32.mrf.mxu0  ;;  %6777 = vperm.xlu2 %11376, %v6630_v37  }
 0x4e8   : > { %15567 = vst [vmem:[#allocation7_spill] sm:$0xff] %v13484_v10  ;;  %v13490_v6 = vpop.f32.mrf.mxu1  ;;  %v5838_v10 = vld [vmem:[%s11473_s23 + $0xb3] sm:$0xff] }
 0x4e9   : > { %15568 = vst [vmem:[#allocation8_spill] sm:$0xff] %v13486_v44 }
 0x4ea   : > { %15569 = vst [vmem:[#allocation9_spill] sm:$0xff] %v13490_v6  ;;  %10847 = vmatmul.msk.f32.gmra.mxu3 %vm410_vm1, %v5476_v31  ;;  %10889 = vmatmul.msk.f32.gmra.mxu0 %vm674_vm2, %v5822_v50  ;;  %v5477_v6 = vld [vmem:[%s11468_s20 + $0x42] sm:$0xff] }
 0x4eb   : > { %10931 = vmatmul.msk.f32.gmra.mxu1 %vm410_vm1, %v6172_v62  ;;  %v5823_v31 = vld [vmem:[%s11473_s23 + $0x3b] sm:$0xff]  ;;  %v13515_v62 = vpop.f32.mrf.mxu2 }
 0x4ec   : > { %v6173_v50 = vld [vmem:[%s11468_s20 + $0x3b] sm:$0xff] }
 0x4ed   : > { %v4344_v8 = vpop.f32.mrf.mxu3 }
 0x4ee   : > { %v13500_v42 = vadd.f32 %v4344_v8, %v12943_v49  ;;  %v6633_v49 = vld [vmem:[%s15450_s2 + $0xe8] sm:$0xff] }
 0x4ef   : > { %v13502_v40 = vpop.f32.mrf.mxu0  ;;  %6792 = vperm.xlu2 %11376, %v6633_v49  }
 0x4f0   : > { %15570 = vst [vmem:[#allocation10_spill] sm:$0xff] %v13500_v42  ;;  %v13506_v44 = vpop.f32.mrf.mxu1  ;;  %v6178_v42 = vld [vmem:[%s11468_s20 + $0x63] sm:$0xff] }
 0x4f1   : > { %15571 = vst [vmem:[#allocation11_spill] sm:$0xff] %v13502_v40 }
 0x4f2   : > { %15572 = vst [vmem:[#allocation12_spill] sm:$0xff] %v13506_v44  ;;  %10848 = vmatmul.msk.f32.gmra.mxu3 %vm410_vm1, %v5477_v6  ;;  %10890 = vmatmul.msk.f32.gmra.mxu0 %vm674_vm2, %v5823_v31  ;;  %v5478_v6 = vld [vmem:[%s11468_s20 + $0x4a] sm:$0xff] }
 0x4f3   : > { %10932 = vmatmul.msk.f32.gmra.mxu1 %vm410_vm1, %v6173_v50  ;;  %v5824_v31 = vld [vmem:[%s11473_s23 + $0x43] sm:$0xff] }
 0x4f4   : > { %v6174_v50 = vld [vmem:[%s11468_s20 + $0x43] sm:$0xff] }
 0x4f5   : > { %v4347_v37 = vpop.f32.mrf.mxu3 }
 0x4f6   : > { %v13518_v8 = vadd.f32 %v4347_v37, %v12953_v2  ;;  %v6636_v2 = vld [vmem:[%s15450_s2 + $0x100] sm:$0xff]  ;;  %v13533_v37 = vpop.f32.mrf.mxu2 }
 0x4f7   : > { %v13520_v44 = vpop.f32.mrf.mxu0  ;;  %6807 = vperm.xlu2 %11376, %v6636_v2   ;;  %v6639_v2 = vld [vmem:[%s15450_s2 + $0x118] sm:$0xff] }
 0x4f8   : > { %15573 = vst [vmem:[#allocation13_spill] sm:$0xff] %v13518_v8  ;;  %v13524_v40 = vpop.f32.mrf.mxu1 }
 0x4f9   : > { %15574 = vst [vmem:[#allocation14_spill] sm:$0xff] %v13520_v44 }
 0x4fa   : > { %15575 = vst [vmem:[#allocation15_spill] sm:$0xff] %v13524_v40  ;;  %10849 = vmatmul.msk.f32.gmra.mxu3 %vm410_vm1, %v5478_v6  ;;  %10891 = vmatmul.msk.f32.gmra.mxu0 %vm674_vm2, %v5824_v31  ;;  %v5479_v6 = vld [vmem:[%s11468_s20 + $0x52] sm:$0xff] }
 0x4fb   : > { %10933 = vmatmul.msk.f32.gmra.mxu1 %vm410_vm1, %v6174_v50  ;;  %v5825_v31 = vld [vmem:[%s11473_s23 + $0x4b] sm:$0xff] }
 0x4fc   : > { %v6175_v50 = vld [vmem:[%s11468_s20 + $0x4b] sm:$0xff] }
 0x4fd   : > { %v4350_v49 = vpop.f32.mrf.mxu3 }
 0x4fe   : > { %v13536_v44 = vadd.f32 %v4350_v49, %v12963_v60 }
 0x4ff   : > { %v13538_v40 = vpop.f32.mrf.mxu0  ;;  %6822 = vperm.xlu2 %11376, %v6639_v2  }
 0x500   : > { %15576 = vst [vmem:[#allocation16_spill] sm:$0xff] %v13536_v44  ;;  %v13542_v8 = vpop.f32.mrf.mxu1  ;;  %v13558_v44 = vpop.f32.mrf.mxu2 }
 0x501   : > { %15577 = vst [vmem:[#allocation17_spill] sm:$0xff] %v13538_v40 }
 0x502   : > { %15578 = vst [vmem:[#allocation18_spill] sm:$0xff] %v13542_v8  ;;  %10850 = vmatmul.msk.f32.gmra.mxu3 %vm410_vm1, %v5479_v6  ;;  %10892 = vmatmul.msk.f32.gmra.mxu0 %vm674_vm2, %v5825_v31  ;;  %v5480_v8 = vld [vmem:[%s11468_s20 + $0x5a] sm:$0xff] }
 0x503   : > { %10934 = vmatmul.msk.f32.gmra.mxu1 %vm410_vm1, %v6175_v50  ;;  %v5826_v6 = vld [vmem:[%s11473_s23 + $0x53] sm:$0xff] }
 0x504   : > { %v6176_v50 = vld [vmem:[%s11468_s20 + $0x53] sm:$0xff] }
 0x505   : > { %v4353_v60 = vpop.f32.mrf.mxu3 }
 0x506   : > { %v13552_v49 = vadd.f32 %v4353_v60, %v12973_v3  ;;  %v6642_v3 = vld [vmem:[%s15450_s2 + $0x130] sm:$0xff] }
 0x507   : > { %v13554_v40 = vpop.f32.mrf.mxu0  ;;  %6837 = vperm.xlu2 %11376, %v6642_v3  }
 0x508   : > { %15579 = vst [vmem:[#allocation19_spill] sm:$0xff] %v13552_v49  ;;  %v13560_v31 = vpop.f32.mrf.mxu1 }
 0x509   : > { %15580 = vst [vmem:[#allocation20_spill] sm:$0xff] %v13554_v40  ;;  %v5481_v40 = vld [vmem:[%s11468_s20 + $0x62] sm:$0xff] }
 0x50a   : > { %15581 = vst [vmem:[#allocation21_spill] sm:$0xff] %v13560_v31  ;;  %10851 = vmatmul.msk.f32.gmra.mxu3 %vm410_vm1, %v5480_v8  ;;  %10893 = vmatmul.msk.f32.gmra.mxu0 %vm674_vm2, %v5826_v6  ;;  %v5827_v8 = vld [vmem:[%s11473_s23 + $0x5b] sm:$0xff] }
 0x50b   : > { %10935 = vmatmul.msk.f32.gmra.mxu1 %vm410_vm1, %v6176_v50  ;;  %v6177_v6 = vld [vmem:[%s11468_s20 + $0x5b] sm:$0xff]  ;;  %v13579_v50 = vpop.f32.mrf.mxu2 }
 0x50d   : > { %v4356_v2 = vpop.f32.mrf.mxu3 }
 0x50e   : > { %v13570_v60 = vadd.f32 %v4356_v2, %v12983_v46 }
 0x50f   : > { %v13572_v31 = vpop.f32.mrf.mxu0 }
 0x510   : > { %15582 = vst [vmem:[#allocation22_spill] sm:$0xff] %v13570_v60  ;;  %v13576_v49 = vpop.f32.mrf.mxu1 }
 0x511   : > { %15583 = vst [vmem:[#allocation23_spill] sm:$0xff] %v13572_v31  ;;  %v5482_v31 = vld [vmem:[%s11468_s20 + $0x6a] sm:$0xff] }
 0x512   : > { %15584 = vst [vmem:[#allocation24_spill] sm:$0xff] %v13576_v49  ;;  %10852 = vmatmul.msk.f32.gmra.mxu3 %vm410_vm1, %v5481_v40  ;;  %10894 = vmatmul.msk.f32.gmra.mxu0 %vm674_vm2, %v5827_v8  ;;  %v5828_v49 = vld [vmem:[%s11473_s23 + $0x63] sm:$0xff] }
 0x513   : > { %10936 = vmatmul.msk.f32.gmra.mxu1 %vm410_vm1, %v6177_v6  ;;  %v13597_v40 = vpop.f32.mrf.mxu2 }
 0x515   : > { %v4359_v46 = vpop.f32.mrf.mxu3 }
 0x516   : > { %v13585_v3 = vadd.f32 %v4359_v46, %v12993_v61  ;;  %v5483_v46 = vld [vmem:[%s11468_s20 + $0x72] sm:$0xff] }
 0x517   : > { %v13587_v2 = vpop.f32.mrf.mxu0 }
 0x518   : > { %15585 = vst [vmem:[#allocation25_spill] sm:$0xff] %v13585_v3  ;;  %v13591_v60 = vpop.f32.mrf.mxu1  ;;  %v6182_v3 = vld [vmem:[%s11468_s20 + $0x83] sm:$0xff] }
 0x519   : > { %15586 = vst [vmem:[#allocation26_spill] sm:$0xff] %v13587_v2 }
 0x51a   : > { %15587 = vst [vmem:[#allocation27_spill] sm:$0xff] %v13591_v60  ;;  %10853 = vmatmul.msk.f32.gmra.mxu3 %vm410_vm1, %v5482_v31  ;;  %10895 = vmatmul.msk.f32.gmra.mxu0 %vm674_vm2, %v5828_v49  ;;  %v5829_v60 = vld [vmem:[%s11473_s23 + $0x6b] sm:$0xff] }
 0x51b   : > { %10937 = vmatmul.msk.f32.gmra.mxu1 %vm410_vm1, %v6178_v42  ;;  %v6179_v31 = vld [vmem:[%s11468_s20 + $0x6b] sm:$0xff]  ;;  %v13612_v49 = vpop.f32.mrf.mxu2 }
 0x51d   : > { %v4362_v61 = vpop.f32.mrf.mxu3 }
 0x51e   : > { %v13600_v8 = vadd.f32 %v4362_v61, %v13003_v22 }
 0x51f   : > { %v13602_v6 = vpop.f32.mrf.mxu0 }
 0x520   : > { %15588 = vst [vmem:[#allocation28_spill] sm:$0xff] %v13600_v8  ;;  %v13606_v2 = vpop.f32.mrf.mxu1 }
 0x521   : > { %15589 = vst [vmem:[#allocation29_spill] sm:$0xff] %v13602_v6  ;;  %v5484_v6 = vld [vmem:[%s11468_s20 + $0x7a] sm:$0xff] }
 0x522   : > { %15590 = vst [vmem:[#allocation30_spill] sm:$0xff] %v13606_v2  ;;  %10854 = vmatmul.msk.f32.gmra.mxu3 %vm410_vm1, %v5483_v46  ;;  %10896 = vmatmul.msk.f32.gmra.mxu0 %vm674_vm2, %v5829_v60  ;;  %v5830_v2 = vld [vmem:[%s11473_s23 + $0x73] sm:$0xff] }
 0x523   : > { %10938 = vmatmul.msk.f32.gmra.mxu1 %vm410_vm1, %v6179_v31  ;;  %v6180_v46 = vld [vmem:[%s11468_s20 + $0x73] sm:$0xff] }
 0x525   : > { %v4365_v42 = vpop.f32.mrf.mxu3 }
 0x526   : > { %v13615_v22 = vadd.f32 %v4365_v42, %v13013_v0  ;;  %v5485_v42 = vld [vmem:[%s11468_s20 + $0x82] sm:$0xff] }
 0x527   : > { %v13617_v61 = vpop.f32.mrf.mxu0 }
 0x528   : > { %15591 = vst [vmem:[#allocation31_spill] sm:$0xff] %v13615_v22  ;;  %v13621_v8 = vpop.f32.mrf.mxu1  ;;  %v13634_v22 = vpop.f32.mrf.mxu2 }
 0x529   : > { %15592 = vst [vmem:[#allocation33_spill] sm:$0xff] %v13617_v61  ;;  %v5831_v61 = vld [vmem:[%s11473_s23 + $0x7b] sm:$0xff] }
 0x52a   : > { %15593 = vst [vmem:[#allocation35_spill] sm:$0xff] %v13621_v8  ;;  %10855 = vmatmul.msk.f32.gmra.mxu3 %vm410_vm1, %v5484_v6  ;;  %10897 = vmatmul.msk.f32.gmra.mxu0 %vm674_vm2, %v5830_v2  ;;  %v6181_v6 = vld [vmem:[%s11468_s20 + $0x7b] sm:$0xff] }
 0x52b   : > { %10939 = vmatmul.msk.f32.gmra.mxu1 %vm410_vm1, %v6180_v46 }
 0x52d   : > { %v4368_v60 = vpop.f32.mrf.mxu3 }
 0x52e   : > { %v13628_v0 = vadd.f32 %v4368_v60, %v13023_v43  ;;  %v5486_v60 = vld [vmem:[%s11468_s20 + $0x8a] sm:$0xff] }
 0x52f   : > { %v13630_v31 = vpop.f32.mrf.mxu0 }
 0x530   : > { %15594 = vst [vmem:[#allocation37_spill] sm:$0xff] %v13628_v0  ;;  %v13636_v8 = vpop.f32.mrf.mxu1 }
 0x531   : > { %15595 = vst [vmem:[#allocation39_spill] sm:$0xff] %v13630_v31  ;;  %v5832_v31 = vld [vmem:[%s11473_s23 + $0x83] sm:$0xff] }
 0x532   : > { %15596 = vst [vmem:[#allocation41_spill] sm:$0xff] %v13636_v8  ;;  %10856 = vmatmul.msk.f32.gmra.mxu3 %vm410_vm1, %v5485_v42  ;;  %10898 = vmatmul.msk.f32.gmra.mxu0 %vm674_vm2, %v5831_v61  ;;  %v13652_v8 = vpop.f32.mrf.mxu2  ;;  %v11389_v61 = vmov 0.0  }
 0x533   : > { %10940 = vmatmul.msk.f32.gmra.mxu1 %vm410_vm1, %v6181_v6  ;;  %6891 = vst.msk [vmem:[#allocation2] sm:$0xff] %vm674_vm2, %v11389_v61 }
 0x534   : > { %6892 = vst.msk [vmem:[#allocation2 + $0x8] sm:$0xff] %vm674_vm2, %v11389_v61 }
 0x535   : > { %v4371_v2 = vpop.f32.mrf.mxu3  ;;  %6893 = vst.msk [vmem:[#allocation2 + $0x10] sm:$0xff] %vm674_vm2, %v11389_v61 }
 0x536   : > { %v13643_v43 = vadd.f32 %v4371_v2, %v13033_v53  ;;  %v6980_v53 = vld [vmem:[%s15454_s6] sm:$0xf]  ;;  %6894 = vst.msk [vmem:[#allocation2 + $0x15c] sm:$0xff] %vm674_vm2, %v11389_v61  ;;  %v5833_v2 = vld [vmem:[%s11473_s23 + $0x8b] sm:$0xff] }
 0x537   : > { %v13645_v46 = vpop.f32.mrf.mxu0  ;;  %11014 = vmatpush.msk.msrb.mxu3 %vm798_vm0, %v6980_v53  ;;  %6895 = vst.msk [vmem:[#allocation2 + $0x164] sm:$0xff] %vm674_vm2, %v11389_v61  ;;  %v6183_v53 = vld [vmem:[%s11468_s20 + $0x8b] sm:$0xff] }
 0x538   : > { %15597 = vst [vmem:[#allocation43_spill] sm:$0xff] %v13643_v43  ;;  %v13649_v0 = vpop.f32.mrf.mxu1 }
 0x539   : > { %15598 = vst [vmem:[#allocation44_spill] sm:$0xff] %v13645_v46  ;;  %v5834_v46 = vld [vmem:[%s11473_s23 + $0x93] sm:$0xff] }
 0x53a   : > { %15599 = vst [vmem:[#allocation46_spill] sm:$0xff] %v13649_v0  ;;  %10857 = vmatmul.msk.f32.gmra.mxu3 %vm410_vm1, %v5486_v60  ;;  %10899 = vmatmul.msk.f32.gmra.mxu0 %vm674_vm2, %v5832_v31  ;;  %v5487_v31 = vld [vmem:[%s11468_s20 + $0x92] sm:$0xff] }
 0x53b   : > { %10941 = vmatmul.msk.f32.gmra.mxu1 %vm410_vm1, %v6182_v3  ;;  %6896 = vst.msk [vmem:[#allocation2 + $0x16c] sm:$0xff] %vm674_vm2, %v11389_v61 }
 0x53d   : > { %v4374_v42 = vpop.f32.mrf.mxu3 }
 0x53e   : > { %v13665_v6 = vadd.f32 %v4374_v42, %v13047_v58  ;;  %v6981_v58 = vld [vmem:[#allocation2 + $0x6] sm:$0xff]  ;;  %v13680_v42 = vpop.f32.mrf.mxu2 }
 0x53f   : > { %v13668_v3 = vpop.f32.mrf.mxu0  ;;  %15603 = vst [vmem:[#allocation53_spill] sm:$0xff] %v13680_v42  ;;  %10973 = vmatmul.msk.f32.vlgmr.msra.gmra.mxu2 %vm674_vm2, %v6981_v58 }
 0x540   : > { %15600 = vst [vmem:[#allocation49_spill] sm:$0xff] %v13665_v6  ;;  %v13673_v60 = vpop.f32.mrf.mxu1 }
 0x541   : > { %15601 = vst [vmem:[#allocation50_spill] sm:$0xff] %v13668_v3 }
 0x542   : > { %15602 = vst [vmem:[#allocation51_spill] sm:$0xff] %v13673_v60  ;;  %10858 = vmatmul.msk.f32.gmra.mxu3 %vm410_vm1, %v5487_v31  ;;  %10900 = vmatmul.msk.f32.gmra.mxu0 %vm674_vm2, %v5833_v2  ;;  %v5488_v60 = vld [vmem:[%s11468_s20 + $0x9a] sm:$0xff]  ;;  %v11142_v2 = vld [vmem:[%s15454_s6 + $0x10] sm:$0xf] }
 0x543   : > { %10942 = vmatmul.msk.f32.gmra.mxu1 %vm410_vm1, %v6183_v53  ;;  %v6184_v31 = vld [vmem:[%s11468_s20 + $0x93] sm:$0xff]  ;;  %11143 = vmatpush.msk.msrb.mxu2 %vm798_vm0, %v11142_v2  ;;  %v5835_v2 = vld [vmem:[%s11473_s23 + $0x9b] sm:$0xff] }
 0x545   : > { %v4377_v3 = vpop.f32.mrf.mxu3 }
 0x546   : > { %v13684_v6 = vadd.f32 %v4377_v3, %v13057_v11  ;;  %v11056_v11 = vld [vmem:[%s15454_s6 + $0x8] sm:$0xf]  ;;  %v11099_v3 = vld [vmem:[%s15454_s6 + $0xc] sm:$0xf]  ;;  %v13709_v53 = vpop.f32.mrf.mxu2 }
 0x547   : > { %v13686_v0 = vpop.f32.mrf.mxu0  ;;  %11057 = vmatpush.msk.msrb.mxu0 %vm798_vm0, %v11056_v11  ;;  %11100 = vmatpush.msk.msrb.mxu1 %vm798_vm0, %v11099_v3  ;;  %15607 = vst [vmem:[#allocation34_spill] sm:$0xff] %v13709_v53  ;;  %v6185_v11 = vld [vmem:[%s11468_s20 + $0x9b] sm:$0xff] }
 0x548   : > { %15604 = vst [vmem:[#allocation54_spill] sm:$0xff] %v13684_v6  ;;  %v13690_v61 = vpop.f32.mrf.mxu1  ;;  %v5492_v53 = vld [vmem:[%s11468_s20 + $0xba] sm:$0xff] }
 0x549   : > { %15605 = vst [vmem:[#allocation55_spill] sm:$0xff] %v13686_v0 }
 0x54a   : > { %15606 = vst [vmem:[#allocation32_spill] sm:$0xff] %v13690_v61  ;;  %10859 = vmatmul.msk.f32.gmra.mxu3 %vm410_vm1, %v5488_v60  ;;  %10901 = vmatmul.msk.f32.gmra.mxu0 %vm674_vm2, %v5834_v46  ;;  %v6982_v46 = vld [vmem:[#allocation2 + $0xe] sm:$0xff] }
 0x54b   : > { %10943 = vmatmul.msk.f32.gmra.mxu1 %vm410_vm1, %v6184_v31  ;;  %10974 = vmatmul.msk.f32.gmra.mxu2 %vm674_vm2, %v6982_v46  ;;  %v5489_v31 = vld [vmem:[%s11468_s20 + $0xa2] sm:$0xff] }
 0x54d   : > { %v4380_v60 = vpop.f32.mrf.mxu3 }
 0x54e   : > { %v13712_v58 = vadd.f32 %v4380_v60, %v13067_v39  ;;  %v5490_v60 = vld [vmem:[%s11468_s20 + $0xaa] sm:$0xff] }
 0x54f   : > { %v13714_v61 = vpop.f32.mrf.mxu0 }
 0x550   : > { %15608 = vst [vmem:[#allocation36_spill] sm:$0xff] %v13712_v58  ;;  %v13718_v0 = vpop.f32.mrf.mxu1  ;;  %v13731_v58 = vpop.f32.mrf.mxu2 }
 0x551   : > { %15609 = vst [vmem:[#allocation38_spill] sm:$0xff] %v13714_v61  ;;  %v5836_v61 = vld [vmem:[%s11473_s23 + $0xa3] sm:$0xff] }
 0x552   : > { %15610 = vst [vmem:[#allocation40_spill] sm:$0xff] %v13718_v0  ;;  %10860 = vmatmul.msk.f32.gmra.mxu3 %vm410_vm1, %v5489_v31  ;;  %10902 = vmatmul.msk.f32.gmra.mxu0 %vm674_vm2, %v5835_v2  ;;  %v6186_v31 = vld [vmem:[%s11468_s20 + $0xa3] sm:$0xff] }
 0x553   : > { %10944 = vmatmul.msk.f32.gmra.mxu1 %vm410_vm1, %v6185_v11  ;;  %15613 = vst [vmem:[#allocation47_spill] sm:$0xff] %v13731_v58 }
 0x555   : > { %v4383_v3 = vpop.f32.mrf.mxu3 }
 0x556   : > { %v13725_v39 = vadd.f32 %v4383_v3, %v13077_v13  ;;  %v5491_v3 = vld [vmem:[%s11468_s20 + $0xb2] sm:$0xff] }
 0x557   : > { %v13727_v46 = vpop.f32.mrf.mxu0 }
 0x558   : > { %15611 = vst [vmem:[#allocation42_spill] sm:$0xff] %v13725_v39  ;;  %v13733_v0 = vpop.f32.mrf.mxu1  ;;  %v13748_v43 = vpop.f32.mrf.mxu2 }
 0x559   : > { %15612 = vst [vmem:[#allocation45_spill] sm:$0xff] %v13727_v46  ;;  %v5837_v46 = vld [vmem:[%s11473_s23 + $0xab] sm:$0xff] }
 0x55a   : > { %15614 = vst [vmem:[#allocation48_spill] sm:$0xff] %v13733_v0  ;;  %10861 = vmatmul.msk.f32.gmra.mxu3 %vm410_vm1, %v5490_v60  ;;  %10903 = vmatmul.msk.f32.gmra.mxu0 %vm674_vm2, %v5836_v61  ;;  %v13745_v0 = vld [vmem:[%s15453_s5] ss:$0 sm:$0xff]  ;;  %v6187_v60 = vld [vmem:[%s11468_s20 + $0xab] sm:$0xff] }
 0x55b   : > { %10945 = vmatmul.msk.f32.gmra.mxu1 %vm410_vm1, %v6186_v31  ;;  %15615 = vst [vmem:[#allocation52_spill] sm:$0xff] %v13748_v43  ;;  %v6648_v31 = vpop.permute.xlu0 %6647 }
 0x55d   : > { %v5657_v2 = vpop.f32.mrf.mxu3 }
 0x55e   : > { %v5780_v13 = vadd.f32 %v5657_v2, %v13087_v21 }
 0x55f   : > { %v6007_v11 = vpop.f32.mrf.mxu0 }
 0x560   : > { %v6130_v39 = vadd.f32 %v6007_v11, %v5780_v13  ;;  %v6354_v6 = vpop.f32.mrf.mxu1 }
 0x562   : > { %v6477_v61 = vadd.f32 %v6354_v6, %v6130_v39  ;;  %10862 = vmatmul.msk.f32.gmra.mxu3 %vm410_vm1, %v5491_v3  ;;  %10904 = vmatmul.msk.f32.gmra.mxu0 %vm674_vm2, %v5837_v46  ;;  %v6188_v39 = vld [vmem:[%s11468_s20 + $0xb3] sm:$0xff] }
 0x563   : > { %10946 = vmatmul.msk.f32.gmra.mxu1 %vm410_vm1, %v6187_v60 }
 0x564   : > { %v6522_v21 = vadd.f32 %v13745_v0, %v6477_v61 }
 0x565   : > { %v5660_v2 = vpop.f32.mrf.mxu3 }
 0x566   : > { %v6563_v13 = vmax.f32 %v6522_v21, 0.0  ;;  %v5781_v11 = vadd.f32 %v5660_v2, %v13097_v4  ;;  %v13762_v4 = vpop.f32.mrf.mxu2  ;;  %v6653_v21 = vpop.permute.xlu0 %6652  ;;  %v5493_v2 = vld [vmem:[%s11468_s20 + $0xc2] sm:$0xff] }
 0x567   : > { %v6010_v58 = vpop.f32.mrf.mxu0 }
 0x568   : > { %v6850_v42 = vmul.f32 %v6648_v31, %v6563_v13  ;;  %v6131_v43 = vadd.f32 %v6010_v58, %v5781_v11  ;;  %v6357_v6 = vpop.f32.mrf.mxu1 }
 0x56a   : > { %6897 = vst.msk [vmem:[#allocation2 + $0x18] sm:$0xff] %vm674_vm2, %v6850_v42  ;;  %v6478_v46 = vadd.f32 %v6357_v6, %v6131_v43  ;;  %10863 = vmatmul.msk.f32.gmra.mxu3 %vm410_vm1, %v5492_v53  ;;  %10905 = vmatmul.msk.f32.gmra.mxu0 %vm674_vm2, %v5838_v10  ;;  %v5839_v42 = vld [vmem:[%s11473_s23 + $0xbb] sm:$0xff] }
 0x56b   : > { %10947 = vmatmul.msk.f32.gmra.mxu1 %vm410_vm1, %v6188_v39  ;;  %v6189_v53 = vld [vmem:[%s11468_s20 + $0xbb] sm:$0xff]  ;;  %v6658_v39 = vpop.permute.xlu1 %6657 }
 0x56c   : > { %v6523_v3 = vadd.f32 %v13745_v0, %v6478_v46 }
 0x56d   : > { %v5663_v60 = vpop.f32.mrf.mxu3 }
 0x56e   : > { %v6564_v61 = vmax.f32 %v6523_v3, 0.0  ;;  %v5782_v58 = vadd.f32 %v5663_v60, %v13107_v51  ;;  %v13775_v3 = vpop.f32.mrf.mxu2 }
 0x56f   : > { %v6013_v31 = vpop.f32.mrf.mxu0 }
 0x570   : > { %v6851_v43 = vmul.f32 %v6653_v21, %v6564_v61  ;;  %v6132_v13 = vadd.f32 %v6013_v31, %v5782_v58  ;;  %v6360_v11 = vpop.f32.mrf.mxu1  ;;  %v5494_v21 = vld [vmem:[%s11468_s20 + $0xca] sm:$0xff] }
 0x571   : > { %v6983_v10 = vld [vmem:[#allocation2 + $0x16] sm:$0xff]  ;;  %v5840_v31 = vld [vmem:[%s11473_s23 + $0xc3] sm:$0xff] }
 0x572   : > { %6898 = vst.msk [vmem:[#allocation2 + $0x20] sm:$0xff] %vm674_vm2, %v6851_v43  ;;  %v6479_v6 = vadd.f32 %v6360_v11, %v6132_v13  ;;  %10864 = vmatmul.msk.f32.gmra.mxu3 %vm410_vm1, %v5493_v2  ;;  %10906 = vmatmul.msk.f32.gmra.mxu0 %vm674_vm2, %v5839_v42  ;;  %v6190_v13 = vld [vmem:[%s11468_s20 + $0xc3] sm:$0xff] }
 0x573   : > { %10948 = vmatmul.msk.f32.gmra.mxu1 %vm410_vm1, %v6189_v53  ;;  %10975 = vmatmul.msk.f32.gmra.mxu2 %vm674_vm2, %v6983_v10 }
 0x574   : > { %v6524_v51 = vadd.f32 %v13745_v0, %v6479_v6 }
 0x575   : > { %v5666_v46 = vpop.f32.mrf.mxu3 }
 0x576   : > { %v6565_v60 = vmax.f32 %v6524_v51, 0.0  ;;  %v5783_v61 = vadd.f32 %v5666_v46, %v13117_v29 }
 0x577   : > { %v6016_v58 = vpop.f32.mrf.mxu0 }
 0x578   : > { %v6852_v2 = vmul.f32 %v6658_v39, %v6565_v60  ;;  %v6133_v43 = vadd.f32 %v6016_v58, %v5783_v61  ;;  %v6363_v42 = vpop.f32.mrf.mxu1  ;;  %v6663_v39 = vpop.permute.xlu1 %6662  ;;  %v5495_v60 = vld [vmem:[%s11468_s20 + $0xd2] sm:$0xff] }
 0x579   : > { %v6984_v11 = vld [vmem:[#allocation2 + $0x1e] sm:$0xff]  ;;  %v5841_v61 = vld [vmem:[%s11473_s23 + $0xcb] sm:$0xff]  ;;  %v13790_v58 = vpop.f32.mrf.mxu2 }
 0x57a   : > { %6899 = vst.msk [vmem:[#allocation2 + $0x28] sm:$0xff] %vm674_vm2, %v6852_v2  ;;  %v6480_v53 = vadd.f32 %v6363_v42, %v6133_v43  ;;  %10865 = vmatmul.msk.f32.gmra.mxu3 %vm410_vm1, %v5494_v21  ;;  %10907 = vmatmul.msk.f32.gmra.mxu0 %vm674_vm2, %v5840_v31  ;;  %v6191_v43 = vld [vmem:[%s11468_s20 + $0xcb] sm:$0xff] }
 0x57b   : > { %10949 = vmatmul.msk.f32.gmra.mxu1 %vm410_vm1, %v6190_v13  ;;  %10976 = vmatmul.msk.f32.gmra.mxu2 %vm674_vm2, %v6984_v11  ;;  %v6668_v11 = vpop.permute.xlu2 %6667 }
 0x57c   : > { %v6525_v29 = vadd.f32 %v13745_v0, %v6480_v53 }
 0x57d   : > { %v5669_v10 = vpop.f32.mrf.mxu3 }
 0x57e   : > { %v6566_v6 = vmax.f32 %v6525_v29, 0.0  ;;  %v5784_v51 = vadd.f32 %v5669_v10, %v13127_v27 }
 0x57f   : > { %v6019_v46 = vpop.f32.mrf.mxu0 }
 0x580   : > { %v6853_v21 = vmul.f32 %v6663_v39, %v6566_v6  ;;  %v6134_v2 = vadd.f32 %v6019_v46, %v5784_v51  ;;  %v6366_v31 = vpop.f32.mrf.mxu1  ;;  %v5496_v51 = vld [vmem:[%s11468_s20 + $0xda] sm:$0xff] }
 0x581   : > { %v6985_v42 = vld [vmem:[#allocation2 + $0x26] sm:$0xff]  ;;  %v5842_v39 = vld [vmem:[%s11473_s23 + $0xd3] sm:$0xff] }
 0x582   : > { %6900 = vst.msk [vmem:[#allocation2 + $0x30] sm:$0xff] %vm674_vm2, %v6853_v21  ;;  %v6481_v13 = vadd.f32 %v6366_v31, %v6134_v2  ;;  %10866 = vmatmul.msk.f32.gmra.mxu3 %vm410_vm1, %v5495_v60  ;;  %10908 = vmatmul.msk.f32.gmra.mxu0 %vm674_vm2, %v5841_v61  ;;  %v6192_v60 = vld [vmem:[%s11468_s20 + $0xd3] sm:$0xff]  ;;  %v13803_v31 = vpop.f32.mrf.mxu2 }
 0x583   : > { %10950 = vmatmul.msk.f32.gmra.mxu1 %vm410_vm1, %v6191_v43  ;;  %10977 = vmatmul.msk.f32.gmra.mxu2 %vm674_vm2, %v6985_v42 }
 0x584   : > { %v6526_v27 = vadd.f32 %v13745_v0, %v6481_v13 }
 0x585   : > { %v5672_v53 = vpop.f32.mrf.mxu3 }
 0x586   : > { %v6567_v29 = vmax.f32 %v6526_v27, 0.0  ;;  %v5785_v10 = vadd.f32 %v5672_v53, %v13137_v63 }
 0x587   : > { %v6022_v6 = vpop.f32.mrf.mxu0 }
 0x588   : > { %v6854_v46 = vmul.f32 %v6668_v11, %v6567_v29  ;;  %v6135_v21 = vadd.f32 %v6022_v6, %v5785_v10  ;;  %v6369_v2 = vpop.f32.mrf.mxu1  ;;  %v6673_v11 = vpop.permute.xlu2 %6672  ;;  %v5497_v29 = vld [vmem:[%s11468_s20 + $0xe2] sm:$0xff] }
 0x589   : > { %v6986_v61 = vld [vmem:[#allocation2 + $0x2e] sm:$0xff]  ;;  %v5843_v10 = vld [vmem:[%s11473_s23 + $0xdb] sm:$0xff] }
 0x58a   : > { %6901 = vst.msk [vmem:[#allocation2 + $0x38] sm:$0xff] %vm674_vm2, %v6854_v46  ;;  %v6482_v43 = vadd.f32 %v6369_v2, %v6135_v21  ;;  %10867 = vmatmul.msk.f32.gmra.mxu3 %vm410_vm1, %v5496_v51  ;;  %10909 = vmatmul.msk.f32.gmra.mxu0 %vm674_vm2, %v5842_v39  ;;  %v6193_v51 = vld [vmem:[%s11468_s20 + $0xdb] sm:$0xff] }
 0x58b   : > { %10951 = vmatmul.msk.f32.gmra.mxu1 %vm410_vm1, %v6192_v60  ;;  %10978 = vmatmul.msk.f32.gmra.mxu2 %vm674_vm2, %v6986_v61 }
 0x58c   : > { %v6527_v63 = vadd.f32 %v13745_v0, %v6482_v43 }
 0x58d   : > { %v5675_v42 = vpop.f32.mrf.mxu3 }
 0x58e   : > { %v6568_v13 = vmax.f32 %v6527_v63, 0.0  ;;  %v5786_v27 = vadd.f32 %v5675_v42, %v13147_v17  ;;  %v13820_v17 = vpop.f32.mrf.mxu2  ;;  %v6678_v42 = vpop.permute.xlu0 %6677 }
 0x58f   : > { %v6025_v53 = vpop.f32.mrf.mxu0 }
 0x590   : > { %v6855_v6 = vmul.f32 %v6673_v11, %v6568_v13  ;;  %v6136_v46 = vadd.f32 %v6025_v53, %v5786_v27  ;;  %v6372_v21 = vpop.f32.mrf.mxu1  ;;  %v5498_v27 = vld [vmem:[%s11468_s20 + $0xea] sm:$0xff] }
 0x591   : > { %v6987_v39 = vld [vmem:[#allocation2 + $0x36] sm:$0xff]  ;;  %v5844_v11 = vld [vmem:[%s11473_s23 + $0xe3] sm:$0xff] }
 0x592   : > { %6902 = vst.msk [vmem:[#allocation2 + $0x40] sm:$0xff] %vm674_vm2, %v6855_v6  ;;  %v6483_v2 = vadd.f32 %v6372_v21, %v6136_v46  ;;  %10868 = vmatmul.msk.f32.gmra.mxu3 %vm410_vm1, %v5497_v29  ;;  %10910 = vmatmul.msk.f32.gmra.mxu0 %vm674_vm2, %v5843_v10  ;;  %v6194_v10 = vld [vmem:[%s11468_s20 + $0xe3] sm:$0xff] }
 0x593   : > { %10952 = vmatmul.msk.f32.gmra.mxu1 %vm410_vm1, %v6193_v51  ;;  %10979 = vmatmul.msk.f32.gmra.mxu2 %vm674_vm2, %v6987_v39 }
 0x594   : > { %v6528_v60 = vadd.f32 %v13745_v0, %v6483_v2 }
 0x595   : > { %v5678_v61 = vpop.f32.mrf.mxu3 }
 0x596   : > { %v6569_v43 = vmax.f32 %v6528_v60, 0.0  ;;  %v5787_v63 = vadd.f32 %v5678_v61, %v13157_v14  ;;  %v13833_v39 = vpop.f32.mrf.mxu2  ;;  %v6683_v61 = vpop.permute.xlu1 %6682 }
 0x597   : > { %v6028_v13 = vpop.f32.mrf.mxu0 }
 0x598   : > { %v6856_v53 = vmul.f32 %v6678_v42, %v6569_v43  ;;  %v6137_v29 = vadd.f32 %v6028_v13, %v5787_v63  ;;  %v6375_v6 = vpop.f32.mrf.mxu1  ;;  %v5499_v63 = vld [vmem:[%s11468_s20 + $0xf2] sm:$0xff] }
 0x599   : > { %v6988_v46 = vld [vmem:[#allocation2 + $0x3e] sm:$0xff]  ;;  %v5845_v42 = vld [vmem:[%s11473_s23 + $0xeb] sm:$0xff] }
 0x59a   : > { %6903 = vst.msk [vmem:[#allocation2 + $0x48] sm:$0xff] %vm674_vm2, %v6856_v53  ;;  %v6484_v21 = vadd.f32 %v6375_v6, %v6137_v29  ;;  %10869 = vmatmul.msk.f32.gmra.mxu3 %vm410_vm1, %v5498_v27  ;;  %10911 = vmatmul.msk.f32.gmra.mxu0 %vm674_vm2, %v5844_v11  ;;  %v6195_v53 = vld [vmem:[%s11468_s20 + $0xeb] sm:$0xff] }
 0x59b   : > { %10953 = vmatmul.msk.f32.gmra.mxu1 %vm410_vm1, %v6194_v10  ;;  %10980 = vmatmul.msk.f32.gmra.mxu2 %vm674_vm2, %v6988_v46 }
 0x59c   : > { %v6529_v14 = vadd.f32 %v13745_v0, %v6484_v21 }
 0x59d   : > { %v5681_v51 = vpop.f32.mrf.mxu3 }
 0x59e   : > { %v6570_v2 = vmax.f32 %v6529_v14, 0.0  ;;  %v5788_v60 = vadd.f32 %v5681_v51, %v13167_v1  ;;  %v6688_v14 = vpop.permute.xlu2 %6687 }
 0x59f   : > { %v6031_v43 = vpop.f32.mrf.mxu0 }
 0x5a0   : > { %v6857_v13 = vmul.f32 %v6683_v61, %v6570_v2  ;;  %v6138_v27 = vadd.f32 %v6031_v43, %v5788_v60  ;;  %v6378_v11 = vpop.f32.mrf.mxu1  ;;  %v5500_v2 = vld [vmem:[%s11468_s20 + $0xfa] sm:$0xff]  ;;  %v13848_v61 = vpop.f32.mrf.mxu2 }
 0x5a1   : > { %v6989_v29 = vld [vmem:[#allocation2 + $0x46] sm:$0xff]  ;;  %v5846_v60 = vld [vmem:[%s11473_s23 + $0xf3] sm:$0xff] }
 0x5a2   : > { %6904 = vst.msk [vmem:[#allocation2 + $0x50] sm:$0xff] %vm674_vm2, %v6857_v13  ;;  %v6485_v6 = vadd.f32 %v6378_v11, %v6138_v27  ;;  %10870 = vmatmul.msk.f32.gmra.mxu3 %vm410_vm1, %v5499_v63  ;;  %10912 = vmatmul.msk.f32.gmra.mxu0 %vm674_vm2, %v5845_v42  ;;  %v6196_v13 = vld [vmem:[%s11468_s20 + $0xf3] sm:$0xff] }
 0x5a3   : > { %10954 = vmatmul.msk.f32.gmra.mxu1 %vm410_vm1, %v6195_v53  ;;  %10981 = vmatmul.msk.f32.gmra.mxu2 %vm674_vm2, %v6989_v29 }
 0x5a4   : > { %v6530_v1 = vadd.f32 %v13745_v0, %v6485_v6 }
 0x5a5   : > { %v5684_v10 = vpop.f32.mrf.mxu3 }
 0x5a6   : > { %v6571_v46 = vmax.f32 %v6530_v1, 0.0  ;;  %v5789_v21 = vadd.f32 %v5684_v10, %v13177_v25  ;;  %v6693_v1 = vpop.permute.xlu0 %6692 }
 0x5a7   : > { %v6034_v51 = vpop.f32.mrf.mxu0 }
 0x5a8   : > { %v6858_v43 = vmul.f32 %v6688_v14, %v6571_v46  ;;  %v6139_v63 = vadd.f32 %v6034_v51, %v5789_v21  ;;  %v6381_v42 = vpop.f32.mrf.mxu1  ;;  %v5501_v46 = vld [vmem:[%s11468_s20 + $0x102] sm:$0xff] }
 0x5a9   : > { %v6990_v27 = vld [vmem:[#allocation2 + $0x4e] sm:$0xff]  ;;  %v5847_v21 = vld [vmem:[%s11473_s23 + $0xfb] sm:$0xff] }
 0x5aa   : > { %6905 = vst.msk [vmem:[#allocation2 + $0x58] sm:$0xff] %vm674_vm2, %v6858_v43  ;;  %v6486_v11 = vadd.f32 %v6381_v42, %v6139_v63  ;;  %10871 = vmatmul.msk.f32.gmra.mxu3 %vm410_vm1, %v5500_v2  ;;  %10913 = vmatmul.msk.f32.gmra.mxu0 %vm674_vm2, %v5846_v60  ;;  %v6197_v2 = vld [vmem:[%s11468_s20 + $0xfb] sm:$0xff]  ;;  %v13861_v63 = vpop.f32.mrf.mxu2 }
 0x5ab   : > { %10955 = vmatmul.msk.f32.gmra.mxu1 %vm410_vm1, %v6196_v13  ;;  %10982 = vmatmul.msk.f32.gmra.mxu2 %vm674_vm2, %v6990_v27 }
 0x5ac   : > { %v6531_v25 = vadd.f32 %v13745_v0, %v6486_v11 }
 0x5ad   : > { %v5687_v53 = vpop.f32.mrf.mxu3 }
 0x5ae   : > { %v6572_v29 = vmax.f32 %v6531_v25, 0.0  ;;  %v5790_v6 = vadd.f32 %v5687_v53, %v13190_v18  ;;  %v6698_v25 = vpop.permute.xlu1 %6697 }
 0x5af   : > { %v6037_v10 = vpop.f32.mrf.mxu0 }
 0x5b0   : > { %v6859_v14 = vmul.f32 %v6693_v1, %v6572_v29  ;;  %v6140_v51 = vadd.f32 %v6037_v10, %v5790_v6  ;;  %v6384_v43 = vpop.f32.mrf.mxu1  ;;  %v5502_v29 = vld [vmem:[%s11468_s20 + $0x10a] sm:$0xff] }
 0x5b1   : > { %v6991_v60 = vld [vmem:[#allocation2 + $0x56] sm:$0xff]  ;;  %v5848_v6 = vld [vmem:[%s11473_s23 + $0x103] sm:$0xff] }
 0x5b2   : > { %6906 = vst.msk [vmem:[#allocation2 + $0x60] sm:$0xff] %vm674_vm2, %v6859_v14  ;;  %v6487_v42 = vadd.f32 %v6384_v43, %v6140_v51  ;;  %10872 = vmatmul.msk.f32.gmra.mxu3 %vm410_vm1, %v5501_v46  ;;  %10914 = vmatmul.msk.f32.gmra.mxu0 %vm674_vm2, %v5847_v21  ;;  %v6198_v46 = vld [vmem:[%s11468_s20 + $0x103] sm:$0xff] }
 0x5b3   : > { %10956 = vmatmul.msk.f32.gmra.mxu1 %vm410_vm1, %v6197_v2  ;;  %10983 = vmatmul.msk.f32.gmra.mxu2 %vm674_vm2, %v6991_v60 }
 0x5b4   : > { %v6532_v18 = vadd.f32 %v13745_v0, %v6487_v42 }
 0x5b5   : > { %v5690_v13 = vpop.f32.mrf.mxu3 }
 0x5b6   : > { %v6573_v27 = vmax.f32 %v6532_v18, 0.0  ;;  %v5791_v11 = vadd.f32 %v5690_v13, %v13203_v9  ;;  %v13878_v9 = vpop.f32.mrf.mxu2  ;;  %v6703_v18 = vpop.permute.xlu2 %6702 }
 0x5b7   : > { %v6040_v53 = vpop.f32.mrf.mxu0 }
 0x5b8   : > { %v6860_v1 = vmul.f32 %v6698_v25, %v6573_v27  ;;  %v6141_v10 = vadd.f32 %v6040_v53, %v5791_v11  ;;  %v6387_v14 = vpop.f32.mrf.mxu1  ;;  %v5503_v27 = vld [vmem:[%s11468_s20 + $0x112] sm:$0xff] }
 0x5b9   : > { %v6992_v21 = vld [vmem:[#allocation2 + $0x5e] sm:$0xff]  ;;  %v5849_v11 = vld [vmem:[%s11473_s23 + $0x10b] sm:$0xff] }
 0x5ba   : > { %6907 = vst.msk [vmem:[#allocation2 + $0x68] sm:$0xff] %vm674_vm2, %v6860_v1  ;;  %v6488_v51 = vadd.f32 %v6387_v14, %v6141_v10  ;;  %10873 = vmatmul.msk.f32.gmra.mxu3 %vm410_vm1, %v5502_v29  ;;  %10915 = vmatmul.msk.f32.gmra.mxu0 %vm674_vm2, %v5848_v6  ;;  %v6199_v6 = vld [vmem:[%s11468_s20 + $0x10b] sm:$0xff] }
 0x5bb   : > { %10957 = vmatmul.msk.f32.gmra.mxu1 %vm410_vm1, %v6198_v46  ;;  %10984 = vmatmul.msk.f32.gmra.mxu2 %vm674_vm2, %v6992_v21 }
 0x5bc   : > { %v6533_v43 = vadd.f32 %v13745_v0, %v6488_v51 }
 0x5bd   : > { %v5693_v2 = vpop.f32.mrf.mxu3 }
 0x5be   : > { %v6574_v60 = vmax.f32 %v6533_v43, 0.0  ;;  %v5792_v42 = vadd.f32 %v5693_v2, %v13219_v52  ;;  %v13891_v46 = vpop.f32.mrf.mxu2  ;;  %v6708_v43 = vpop.permute.xlu0 %6707 }
 0x5bf   : > { %v6043_v13 = vpop.f32.mrf.mxu0 }
 0x5c0   : > { %v6861_v25 = vmul.f32 %v6703_v18, %v6574_v60  ;;  %v6142_v53 = vadd.f32 %v6043_v13, %v5792_v42  ;;  %v6390_v29 = vpop.f32.mrf.mxu1  ;;  %v5504_v60 = vld [vmem:[%s11468_s20 + $0x11a] sm:$0xff] }
 0x5c1   : > { %v6993_v1 = vld [vmem:[#allocation2 + $0x66] sm:$0xff]  ;;  %v5850_v42 = vld [vmem:[%s11473_s23 + $0x113] sm:$0xff] }
 0x5c2   : > { %6908 = vst.msk [vmem:[#allocation2 + $0x70] sm:$0xff] %vm674_vm2, %v6861_v25  ;;  %v6489_v10 = vadd.f32 %v6390_v29, %v6142_v53  ;;  %10874 = vmatmul.msk.f32.gmra.mxu3 %vm410_vm1, %v5503_v27  ;;  %10916 = vmatmul.msk.f32.gmra.mxu0 %vm674_vm2, %v5849_v11  ;;  %v6200_v11 = vld [vmem:[%s11468_s20 + $0x113] sm:$0xff] }
 0x5c3   : > { %10958 = vmatmul.msk.f32.gmra.mxu1 %vm410_vm1, %v6199_v6  ;;  %10985 = vmatmul.msk.f32.gmra.mxu2 %vm674_vm2, %v6993_v1 }
 0x5c4   : > { %v6534_v52 = vadd.f32 %v13745_v0, %v6489_v10  ;;  %v6713_v10 = vpop.permute.xlu1 %6712 }
 0x5c5   : > { %v5696_v14 = vpop.f32.mrf.mxu3 }
 0x5c6   : > { %v6575_v21 = vmax.f32 %v6534_v52, 0.0  ;;  %v5793_v51 = vadd.f32 %v5696_v14, %v13235_v28  ;;  %v5505_v14 = vld [vmem:[%s11468_s20 + $0x122] sm:$0xff] }
 0x5c7   : > { %v6046_v2 = vpop.f32.mrf.mxu0 }
 0x5c8   : > { %v6862_v18 = vmul.f32 %v6708_v43, %v6575_v21  ;;  %v6143_v13 = vadd.f32 %v6046_v2, %v5793_v51  ;;  %v6393_v27 = vpop.f32.mrf.mxu1  ;;  %v5851_v21 = vld [vmem:[%s11473_s23 + $0x11b] sm:$0xff]  ;;  %v13906_v51 = vpop.f32.mrf.mxu2 }
 0x5c9   : > { %v6994_v25 = vld [vmem:[#allocation2 + $0x6e] sm:$0xff] }
 0x5ca   : > { %6909 = vst.msk [vmem:[#allocation2 + $0x78] sm:$0xff] %vm674_vm2, %v6862_v18  ;;  %v6490_v53 = vadd.f32 %v6393_v27, %v6143_v13  ;;  %10875 = vmatmul.msk.f32.gmra.mxu3 %vm410_vm1, %v5504_v60  ;;  %10917 = vmatmul.msk.f32.gmra.mxu0 %vm674_vm2, %v5850_v42  ;;  %v6201_v42 = vld [vmem:[%s11468_s20 + $0x11b] sm:$0xff] }
 0x5cb   : > { %10959 = vmatmul.msk.f32.gmra.mxu1 %vm410_vm1, %v6200_v11  ;;  %10986 = vmatmul.msk.f32.gmra.mxu2 %vm674_vm2, %v6994_v25 }
 0x5cc   : > { %v6535_v28 = vadd.f32 %v13745_v0, %v6490_v53  ;;  %v6718_v53 = vpop.permute.xlu2 %6717 }
 0x5cd   : > { %v5699_v29 = vpop.f32.mrf.mxu3 }
 0x5ce   : > { %v6576_v6 = vmax.f32 %v6535_v28, 0.0  ;;  %v5794_v1 = vadd.f32 %v5699_v29, %v13251_v45  ;;  %v5506_v29 = vld [vmem:[%s11468_s20 + $0x12a] sm:$0xff] }
 0x5cf   : > { %v6049_v52 = vpop.f32.mrf.mxu0 }
 0x5d0   : > { %v6863_v43 = vmul.f32 %v6713_v10, %v6576_v6  ;;  %v6144_v2 = vadd.f32 %v6049_v52, %v5794_v1  ;;  %v6396_v60 = vpop.f32.mrf.mxu1  ;;  %v5852_v6 = vld [vmem:[%s11473_s23 + $0x123] sm:$0xff] }
 0x5d1   : > { %v6995_v18 = vld [vmem:[#allocation2 + $0x76] sm:$0xff] }
 0x5d2   : > { %6910 = vst.msk [vmem:[#allocation2 + $0x80] sm:$0xff] %vm674_vm2, %v6863_v43  ;;  %v6491_v13 = vadd.f32 %v6396_v60, %v6144_v2  ;;  %10876 = vmatmul.msk.f32.gmra.mxu3 %vm410_vm1, %v5505_v14  ;;  %10918 = vmatmul.msk.f32.gmra.mxu0 %vm674_vm2, %v5851_v21  ;;  %v6202_v14 = vld [vmem:[%s11468_s20 + $0x123] sm:$0xff]  ;;  %v13919_v43 = vpop.f32.mrf.mxu2 }
 0x5d3   : > { %10960 = vmatmul.msk.f32.gmra.mxu1 %vm410_vm1, %v6201_v42  ;;  %10987 = vmatmul.msk.f32.gmra.mxu2 %vm674_vm2, %v6995_v18  ;;  %v4753_v42 = vadd.f32 %v13287_v33, %v13283_v48 }
 0x5d4   : > { %v6536_v45 = vadd.f32 %v13745_v0, %v6491_v13 }
 0x5d5   : > { %v5702_v27 = vpop.f32.mrf.mxu3 }
 0x5d6   : > { %v6577_v11 = vmax.f32 %v6536_v45, 0.0  ;;  %v5795_v25 = vadd.f32 %v5702_v27, %v13267_v20  ;;  %v6723_v45 = vpop.permute.xlu0 %6722 }
 0x5d7   : > { %v6052_v28 = vpop.f32.mrf.mxu0 }
 0x5d8   : > { %v6864_v1 = vmul.f32 %v6718_v53, %v6577_v11  ;;  %v6145_v10 = vadd.f32 %v6052_v28, %v5795_v25  ;;  %v6399_v52 = vpop.f32.mrf.mxu1  ;;  %v5507_v11 = vld [vmem:[%s11468_s20 + $0x132] sm:$0xff] }
 0x5d9   : > { %v6996_v21 = vld [vmem:[#allocation2 + $0x7e] sm:$0xff]  ;;  %v5853_v25 = vld [vmem:[%s11473_s23 + $0x12b] sm:$0xff] }
 0x5da   : > { %6911 = vst.msk [vmem:[#allocation2 + $0x88] sm:$0xff] %vm674_vm2, %v6864_v1  ;;  %v6492_v2 = vadd.f32 %v6399_v52, %v6145_v10  ;;  %10877 = vmatmul.msk.f32.gmra.mxu3 %vm410_vm1, %v5506_v29  ;;  %10919 = vmatmul.msk.f32.gmra.mxu0 %vm674_vm2, %v5852_v6  ;;  %v6203_v6 = vld [vmem:[%s11468_s20 + $0x12b] sm:$0xff]  ;;  %v5100_v10 = vadd.f32 %v13290_v57, %v4753_v42  ;;  %v13937_v48 = vpop.f32.mrf.mxu2  ;;  %v5508_v42 = vld [vmem:[%s11468_s20 + $0x13a] sm:$0xff] }
 0x5db   : > { %10961 = vmatmul.msk.f32.gmra.mxu1 %vm410_vm1, %v6202_v14  ;;  %10988 = vmatmul.msk.f32.gmra.mxu2 %vm674_vm2, %v6996_v21  ;;  %v4754_v14 = vadd.f32 %v13307_v59, %v13305_v7 }
 0x5dc   : > { %v6537_v20 = vadd.f32 %v13745_v0, %v6492_v2 }
 0x5dd   : > { %v5705_v60 = vpop.f32.mrf.mxu3 }
 0x5de   : > { %v6578_v18 = vmax.f32 %v6537_v20, 0.0  ;;  %v5796_v13 = vadd.f32 %v5705_v60, %v13285_v15  ;;  %v5450_v15 = vadd.f32 %v13515_v62, %v5100_v10  ;;  %v6728_v20 = vpop.permute.xlu1 %6727  ;;  %v6733_v10 = vpop.permute.xlu2 %6732 }
 0x5df   : > { %v6055_v27 = vpop.f32.mrf.mxu0 }
 0x5e0   : > { %v6865_v53 = vmul.f32 %v6723_v45, %v6578_v18  ;;  %v6146_v28 = vadd.f32 %v6055_v27, %v5796_v13  ;;  %v6402_v29 = vpop.f32.mrf.mxu1  ;;  %v5854_v18 = vld [vmem:[%s11473_s23 + $0x133] sm:$0xff] }
 0x5e1   : > { %v6997_v1 = vld [vmem:[#allocation2 + $0x86] sm:$0xff] }
 0x5e2   : > { %6912 = vst.msk [vmem:[#allocation2 + $0x90] sm:$0xff] %vm674_vm2, %v6865_v53  ;;  %v6493_v52 = vadd.f32 %v6402_v29, %v6146_v28  ;;  %10878 = vmatmul.msk.f32.gmra.mxu3 %vm410_vm1, %v5507_v11  ;;  %10920 = vmatmul.msk.f32.gmra.mxu0 %vm674_vm2, %v5853_v25  ;;  %v6204_v11 = vld [vmem:[%s11468_s20 + $0x133] sm:$0xff]  ;;  %v5101_v53 = vadd.f32 %v13310_v41, %v4754_v14  ;;  %v13956_v28 = vpop.f32.mrf.mxu2 }
 0x5e3   : > { %10962 = vmatmul.msk.f32.gmra.mxu1 %vm410_vm1, %v6203_v6  ;;  %10989 = vmatmul.msk.f32.gmra.mxu2 %vm674_vm2, %v6997_v1  ;;  %v4755_v29 = vadd.f32 %v13330_v47, %v13328_v38 }
 0x5e4   : > { %v6538_v33 = vadd.f32 %v13745_v0, %v6493_v52  ;;  %v5451_v7 = vadd.f32 %v13533_v37, %v5101_v53  ;;  %v5856_v53 = vld [vmem:[%s11473_s23 + $0x143] sm:$0xff] }
 0x5e5   : > { %v5708_v57 = vpop.f32.mrf.mxu3  ;;  %v5102_v37 = vadd.f32 %v13333_v23, %v4755_v29  ;;  %v4756_v23 = vadd.f32 %v13353_v36, %v13351_v24 }
 0x5e6   : > { %v6579_v21 = vmax.f32 %v6538_v33, 0.0  ;;  %v5797_v2 = vadd.f32 %v5708_v57, %v5450_v15  ;;  %v5509_v15 = vld [vmem:[%s11468_s20 + $0x142] sm:$0xff] }
 0x5e7   : > { %v6058_v60 = vpop.f32.mrf.mxu0  ;;  %v5855_v33 = vld [vmem:[%s11473_s23 + $0x13b] sm:$0xff]  ;;  %v5452_v38 = vadd.f32 %v13558_v44, %v5102_v37  ;;  %v5103_v44 = vadd.f32 %v13356_v26, %v4756_v23  ;;  %v4757_v26 = vadd.f32 %v13376_v19, %v13374_v55 }
 0x5e8   : > { %v6866_v13 = vmul.f32 %v6728_v20, %v6579_v21  ;;  %v6147_v45 = vadd.f32 %v6058_v60, %v5797_v2  ;;  %v6405_v27 = vpop.f32.mrf.mxu1  ;;  %v6205_v2 = vld [vmem:[%s11468_s20 + $0x13b] sm:$0xff] }
 0x5e9   : > { %v6998_v25 = vld [vmem:[#allocation2 + $0x8e] sm:$0xff]  ;;  %v5453_v36 = vadd.f32 %v13579_v50, %v5103_v44  ;;  %v5104_v50 = vadd.f32 %v13379_v5, %v4757_v26  ;;  %v4758_v5 = vadd.f32 %v13399_v12, %v13397_v30 }
 0x5ea   : > { %6913 = vst.msk [vmem:[#allocation2 + $0x98] sm:$0xff] %vm674_vm2, %v6866_v13  ;;  %v6494_v62 = vadd.f32 %v6405_v27, %v6147_v45  ;;  %10879 = vmatmul.msk.f32.gmra.mxu3 %vm410_vm1, %v5508_v42  ;;  %10921 = vmatmul.msk.f32.gmra.mxu0 %vm674_vm2, %v5854_v18  ;;  %v6738_v27 = vpop.permute.xlu0 %6737 }
 0x5eb   : > { %10963 = vmatmul.msk.f32.gmra.mxu1 %vm410_vm1, %v6204_v11  ;;  %10990 = vmatmul.msk.f32.gmra.mxu2 %vm674_vm2, %v6998_v25  ;;  %v5510_v25 = vld [vmem:[%s11468_s20 + $0x14a] sm:$0xff]  ;;  %v5454_v19 = vadd.f32 %v13597_v40, %v5104_v50  ;;  %v5105_v40 = vadd.f32 %v13402_v56, %v4758_v5  ;;  %v15616_v56 = vld [vmem:[#allocation3_spill] sm:$0xff] }
 0x5ec   : > { %v6539_v59 = vadd.f32 %v13745_v0, %v6494_v62 }
 0x5ed   : > { %v5711_v41 = vpop.f32.mrf.mxu3  ;;  %v5455_v12 = vadd.f32 %v13612_v49, %v5105_v40  ;;  %v15617_v49 = vld [vmem:[#allocation4_spill] sm:$0xff] }
 0x5ee   : > { %v6580_v6 = vmax.f32 %v6539_v59, 0.0  ;;  %v5798_v1 = vadd.f32 %v5711_v41, %v5451_v7  ;;  %v6206_v41 = vld [vmem:[%s11468_s20 + $0x143] sm:$0xff] }
 0x5ef   : > { %v6061_v52 = vpop.f32.mrf.mxu0 }
 0x5f0   : > { %v6867_v57 = vmul.f32 %v6733_v10, %v6580_v6  ;;  %v6148_v14 = vadd.f32 %v6061_v52, %v5798_v1  ;;  %v6408_v21 = vpop.f32.mrf.mxu1 }
 0x5f1   : > { %v6999_v20 = vld [vmem:[#allocation2 + $0x96] sm:$0xff] }
 0x5f2   : > { %6914 = vst.msk [vmem:[#allocation2 + $0xa0] sm:$0xff] %vm674_vm2, %v6867_v57  ;;  %v6495_v60 = vadd.f32 %v6408_v21, %v6148_v14  ;;  %10880 = vmatmul.msk.f32.gmra.mxu3 %vm410_vm1, %v5509_v15  ;;  %10922 = vmatmul.msk.f32.gmra.mxu0 %vm674_vm2, %v5855_v33  ;;  %v6743_v33 = vpop.permute.xlu1 %6742  ;;  %v5511_v14 = vld [vmem:[%s11468_s20 + $0x152] sm:$0xff] }
 0x5f3   : > { %10964 = vmatmul.msk.f32.gmra.mxu1 %vm410_vm1, %v6205_v2  ;;  %10991 = vmatmul.msk.f32.gmra.mxu2 %vm674_vm2, %v6999_v20  ;;  %v5857_v21 = vld [vmem:[%s11473_s23 + $0x14b] sm:$0xff] }
 0x5f4   : > { %v6540_v47 = vadd.f32 %v13745_v0, %v6495_v60  ;;  %v6207_v60 = vld [vmem:[%s11468_s20 + $0x14b] sm:$0xff] }
 0x5f5   : > { %v5714_v42 = vpop.f32.mrf.mxu3 }
 0x5f6   : > { %v6581_v18 = vmax.f32 %v6540_v47, 0.0  ;;  %v5799_v13 = vadd.f32 %v5714_v42, %v5452_v38  ;;  %v13973_v45 = vpop.f32.mrf.mxu2 }
 0x5f7   : > { %v6064_v11 = vpop.f32.mrf.mxu0 }
 0x5f8   : > { %v6868_v62 = vmul.f32 %v6738_v27, %v6581_v18  ;;  %v6149_v7 = vadd.f32 %v6064_v11, %v5799_v13  ;;  %v6411_v59 = vpop.f32.mrf.mxu1  ;;  %v6748_v27 = vpop.permute.xlu2 %6747 }
 0x5f9   : > { %v7000_v29 = vld [vmem:[#allocation2 + $0x9e] sm:$0xff] }
 0x5fa   : > { %6915 = vst.msk [vmem:[#allocation2 + $0xa8] sm:$0xff] %vm674_vm2, %v6868_v62  ;;  %v6496_v24 = vadd.f32 %v6411_v59, %v6149_v7  ;;  %10881 = vmatmul.msk.f32.gmra.mxu3 %vm410_vm1, %v5510_v25  ;;  %10923 = vmatmul.msk.f32.gmra.mxu0 %vm674_vm2, %v5856_v53  ;;  %v5512_v25 = vld [vmem:[%s11468_s20 + $0x15a] sm:$0xff] }
 0x5fb   : > { %10965 = vmatmul.msk.f32.gmra.mxu1 %vm410_vm1, %v6206_v41  ;;  %10992 = vmatmul.msk.f32.gmra.mxu2 %vm674_vm2, %v7000_v29  ;;  %v5858_v53 = vld [vmem:[%s11473_s23 + $0x153] sm:$0xff] }
 0x5fc   : > { %v6541_v6 = vadd.f32 %v13745_v0, %v6496_v24  ;;  %v6208_v41 = vld [vmem:[%s11468_s20 + $0x153] sm:$0xff] }
 0x5fd   : > { %v5717_v1 = vpop.f32.mrf.mxu3 }
 0x5fe   : > { %v6582_v10 = vmax.f32 %v6541_v6, 0.0  ;;  %v5800_v52 = vadd.f32 %v5717_v1, %v5453_v36  ;;  %v13988_v15 = vpop.f32.mrf.mxu2  ;;  %v4759_v36 = vadd.f32 %v15616_v56, %v13420_v34 }
 0x5ff   : > { %v6067_v57 = vpop.f32.mrf.mxu0 }
 0x600   : > { %v6869_v2 = vmul.f32 %v6743_v33, %v6582_v10  ;;  %v6150_v20 = vadd.f32 %v6067_v57, %v5800_v52  ;;  %v6414_v37 = vpop.f32.mrf.mxu1  ;;  %v6753_v10 = vpop.permute.xlu0 %6752  ;;  %v5513_v33 = vld [vmem:[%s11468_s20 + $0x162] sm:$0xff] }
 0x601   : > { %v7001_v38 = vld [vmem:[#allocation2 + $0xa6] sm:$0xff]  ;;  %v5859_v57 = vld [vmem:[%s11473_s23 + $0x15b] sm:$0xff] }
 0x602   : > { %6916 = vst.msk [vmem:[#allocation2 + $0xb0] sm:$0xff] %vm674_vm2, %v6869_v2  ;;  %v6497_v55 = vadd.f32 %v6414_v37, %v6150_v20  ;;  %10882 = vmatmul.msk.f32.gmra.mxu3 %vm410_vm1, %v5511_v14  ;;  %10924 = vmatmul.msk.f32.gmra.mxu0 %vm674_vm2, %v5857_v21  ;;  %v6209_v20 = vld [vmem:[%s11468_s20 + $0x15b] sm:$0xff] }
 0x603   : > { %10966 = vmatmul.msk.f32.gmra.mxu1 %vm410_vm1, %v6207_v60  ;;  %10993 = vmatmul.msk.f32.gmra.mxu2 %vm674_vm2, %v7001_v38  ;;  %v5106_v60 = vadd.f32 %v15617_v49, %v4759_v36  ;;  %v5861_v36 = vld [vmem:[%s11473_s23 + $0x16b] sm:$0xf]  ;;  %v15621_v49 = vld [vmem:[#allocation7_spill] sm:$0xff] }
 0x604   : > { %v6542_v47 = vadd.f32 %v13745_v0, %v6497_v55 }
 0x605   : > { %v5720_v42 = vpop.f32.mrf.mxu3  ;;  %v5456_v38 = vadd.f32 %v13634_v22, %v5106_v60  ;;  %v15622_v60 = vld [vmem:[#allocation8_spill] sm:$0xff] }
 0x606   : > { %v6583_v23 = vmax.f32 %v6542_v47, 0.0  ;;  %v5801_v18 = vadd.f32 %v5720_v42, %v5454_v19  ;;  %v14003_v13 = vpop.f32.mrf.mxu2  ;;  %v4760_v19 = vadd.f32 %v13446_v32, %v13444_v54 }
 0x607   : > { %v6070_v11 = vpop.f32.mrf.mxu0 }
 0x608   : > { %v6870_v62 = vmul.f32 %v6748_v27, %v6583_v23  ;;  %v6151_v7 = vadd.f32 %v6070_v11, %v5801_v18  ;;  %v6417_v59 = vpop.f32.mrf.mxu1  ;;  %v6758_v23 = vpop.permute.xlu1 %6757  ;;  %v5514_v27 = vld [vmem:[%s11468_s20 + $0x16a] sm:$0xf]  ;;  %v5107_v22 = vadd.f32 %v13450_v16, %v4760_v19 }
 0x609   : > { %v7002_v29 = vld [vmem:[#allocation2 + $0xae] sm:$0xff]  ;;  %v5860_v11 = vld [vmem:[%s11473_s23 + $0x163] sm:$0xff]  ;;  %v6768_v19 = vpop.permute.xlu0 %6767 }
 0x60a   : > { %6917 = vst.msk [vmem:[#allocation2 + $0xb8] sm:$0xff] %vm674_vm2, %v6870_v62  ;;  %v6498_v30 = vadd.f32 %v6417_v59, %v6151_v7  ;;  %10883 = vmatmul.msk.f32.gmra.mxu3 %vm410_vm1, %v5512_v25  ;;  %10925 = vmatmul.msk.f32.gmra.mxu0 %vm674_vm2, %v5858_v53  ;;  %v6210_v7 = vld [vmem:[%s11468_s20 + $0x163] sm:$0xff]  ;;  %v5457_v54 = vadd.f32 %v13652_v8, %v5107_v22  ;;  %v15619_v8 = vld [vmem:[#allocation6_spill] sm:$0xff] }
 0x60b   : > { %10967 = vmatmul.msk.f32.gmra.mxu1 %vm410_vm1, %v6208_v41  ;;  %10994 = vmatmul.msk.f32.gmra.mxu2 %vm674_vm2, %v7002_v29  ;;  %v15618_v16 = vld [vmem:[#allocation5_spill] sm:$0xff] }
 0x60c   : > { %v6543_v44 = vadd.f32 %v13745_v0, %v6498_v30  ;;  %v4761_v40 = vadd.f32 %v15618_v16, %v13465_v35  ;;  %v15620_v35 = vld [vmem:[#allocation53_spill] sm:$0xff]  ;;  %v15626_v16 = vld [vmem:[#allocation11_spill] sm:$0xff] }
 0x60d   : > { %v5723_v24 = vpop.f32.mrf.mxu3 }
 0x60e   : > { %v6584_v6 = vmax.f32 %v6543_v44, 0.0  ;;  %v5802_v1 = vadd.f32 %v5723_v24, %v5455_v12  ;;  %v14018_v26 = vpop.f32.mrf.mxu2  ;;  %v6763_v24 = vpop.permute.xlu2 %6762 }
 0x60f   : > { %v6073_v52 = vpop.f32.mrf.mxu0 }
 0x610   : > { %v6871_v14 = vmul.f32 %v6753_v10, %v6584_v6  ;;  %v6152_v21 = vadd.f32 %v6073_v52, %v5802_v1  ;;  %v6420_v2 = vpop.f32.mrf.mxu1  ;;  %v6939_v6 = vld [vmem:[#allocation2 + $0x5] sm:$0xff] }
 0x611   : > { %v7003_v37 = vld [vmem:[#allocation2 + $0xb6] sm:$0xff] }
 0x612   : > { %6918 = vst.msk [vmem:[#allocation2 + $0xc0] sm:$0xff] %vm674_vm2, %v6871_v14  ;;  %v6499_v34 = vadd.f32 %v6420_v2, %v6152_v21  ;;  %10884 = vmatmul.msk.f32.gmra.mxu3 %vm410_vm1, %v5513_v33  ;;  %10926 = vmatmul.msk.f32.gmra.mxu0 %vm674_vm2, %v5859_v57  ;;  %v6211_v33 = vld [vmem:[%s11468_s20 + $0x16b] sm:$0xf]  ;;  %v5108_v14 = vadd.f32 %v15619_v8, %v4761_v40  ;;  %v15627_v8 = vld [vmem:[#allocation12_spill] sm:$0xff] }
 0x613   : > { %10968 = vmatmul.msk.f32.gmra.mxu1 %vm410_vm1, %v6209_v20  ;;  %10995 = vmatmul.msk.f32.gmra.mxu2 %vm674_vm2, %v7003_v37 }
 0x614   : > { %v6544_v50 = vadd.f32 %v13745_v0, %v6499_v34  ;;  %v5458_v2 = vadd.f32 %v15620_v35, %v5108_v14  ;;  %v4762_v34 = vadd.f32 %v15622_v60, %v15621_v49  ;;  %v7907_v35 = vld [vmem:[#allocation2 + $0x1f] sm:$0xff]  ;;  %v15629_v60 = vld [vmem:[#allocation13_spill] sm:$0xff] }
 0x615   : > { %v5726_v55 = vpop.f32.mrf.mxu3 }
 0x616   : > { %v6585_v47 = vmax.f32 %v6544_v50, 0.0  ;;  %v5803_v42 = vadd.f32 %v5726_v55, %v5456_v38  ;;  %v14033_v5 = vpop.f32.mrf.mxu2 }
 0x617   : > { %v6076_v18 = vpop.f32.mrf.mxu0 }
 0x618   : > { %v6872_v25 = vmul.f32 %v6758_v23, %v6585_v47  ;;  %v6153_v53 = vadd.f32 %v6076_v18, %v5803_v42  ;;  %v6423_v62 = vpop.f32.mrf.mxu1  ;;  %v6940_v42 = vld [vmem:[#allocation2 + $0xd] sm:$0xff] }
 0x619   : > { %v7004_v59 = vld [vmem:[#allocation2 + $0xbe] sm:$0xff]  ;;  %v7556_v23 = vld [vmem:[#allocation2 + $0x7] sm:$0xff] }
 0x61a   : > { %6919 = vst.msk [vmem:[#allocation2 + $0xc8] sm:$0xff] %vm674_vm2, %v6872_v25  ;;  %v6500_v41 = vadd.f32 %v6423_v62, %v6153_v53  ;;  %10885 = vmatmul.msk.f32.gmra.mxu3 %vm410_vm1, %v5514_v27  ;;  %10927 = vmatmul.msk.f32.gmra.mxu0 %vm674_vm2, %v5860_v11  ;;  %v15623_v53 = vld [vmem:[#allocation9_spill] sm:$0xff] }
 0x61b   : > { %10969 = vmatmul.msk.f32.gmra.mxu1 %vm410_vm1, %v6210_v7  ;;  %10996 = vmatmul.msk.f32.gmra.mxu2 %vm674_vm2, %v7004_v59  ;;  %v5109_v62 = vadd.f32 %v15623_v53, %v4762_v34  ;;  %v7906_v7 = vld [vmem:[#allocation2 + $0x17] sm:$0xff] }
 0x61c   : > { %v6545_v32 = vadd.f32 %v13745_v0, %v6500_v41  ;;  %v15624_v59 = vld [vmem:[#allocation34_spill] sm:$0xff]  ;;  %v14074_v41 = vld [vmem:[%s15453_s5] ss:$0 sm:$0xff] }
 0x61d   : > { %v5729_v29 = vpop.f32.mrf.mxu3  ;;  %v5459_v22 = vadd.f32 %v15624_v59, %v5109_v62  ;;  %v15630_v34 = vld [vmem:[#allocation14_spill] sm:$0xff]  ;;  %v6942_v53 = vld [vmem:[#allocation2 + $0x1d] sm:$0xff] }
 0x61e   : > { %v6586_v30 = vmax.f32 %v6545_v32, 0.0  ;;  %v5804_v12 = vadd.f32 %v5729_v29, %v5457_v54  ;;  %v14048_v44 = vpop.f32.mrf.mxu2  ;;  %v15625_v29 = vld [vmem:[#allocation10_spill] sm:$0xff]  ;;  %v15631_v62 = vld [vmem:[#allocation15_spill] sm:$0xff] }
 0x61f   : > { %v6079_v56 = vpop.f32.mrf.mxu0  ;;  %v4763_v40 = vadd.f32 %v15626_v16, %v15625_v29 }
 0x620   : > { %v6873_v1 = vmul.f32 %v6763_v24, %v6586_v30  ;;  %v6154_v10 = vadd.f32 %v6079_v56, %v5804_v12  ;;  %v6426_v52 = vpop.f32.mrf.mxu1  ;;  %v6773_v56 = vpop.permute.xlu1 %6772 }
 0x621   : > { %v7005_v57 = vld [vmem:[#allocation2 + $0xc6] sm:$0xff]  ;;  %v5110_v14 = vadd.f32 %v15627_v8, %v4763_v40 }
 0x622   : > { %6920 = vst.msk [vmem:[#allocation2 + $0xd0] sm:$0xff] %vm674_vm2, %v6873_v1  ;;  %v6501_v21 = vadd.f32 %v6426_v52, %v6154_v10  ;;  %10928 = vmatmul.msk.f32.gmra.mxu0 %vm674_vm2, %v5861_v36  ;;  %11015 = vmatmul.msk.f32.vlgmr.msrb.gmra.mxu3 %vm674_vm2, %v6939_v6  ;;  %v7557_v6 = vld [vmem:[#allocation2 + $0xf] sm:$0xff]  ;;  %v15633_v40 = vld [vmem:[#allocation16_spill] sm:$0xff] }
 0x623   : > { %10970 = vmatmul.msk.f32.gmra.mxu1 %vm410_vm1, %v6211_v33  ;;  %10997 = vmatmul.msk.f32.gmra.mxu2 %vm674_vm2, %v7005_v57  ;;  %v6941_v57 = vld [vmem:[#allocation2 + $0x15] sm:$0xff]  ;;  %v6943_v8 = vld [vmem:[#allocation2 + $0x25] sm:$0xff] }
 0x624   : > { %v6546_v20 = vadd.f32 %v13745_v0, %v6501_v21 }
 0x625   : > { %v5732_v37 = vpop.f32.mrf.mxu3 }
 0x626   : > { %v6587_v38 = vmax.f32 %v6546_v20, 0.0  ;;  %v5805_v50 = vadd.f32 %v5732_v37, %v5458_v2  ;;  %v14062_v55 = vpop.f32.mrf.mxu2  ;;  %v15628_v2 = vld [vmem:[#allocation47_spill] sm:$0xff] }
 0x627   : > { %v6082_v47 = vpop.f32.mrf.mxu0  ;;  %v5460_v20 = vadd.f32 %v15628_v2, %v5110_v14  ;;  %v15635_v14 = vld [vmem:[#allocation18_spill] sm:$0xff] }
 0x628   : > { %v6874_v18 = vmul.f32 %v6768_v19, %v6587_v38  ;;  %v6155_v27 = vadd.f32 %v6082_v47, %v5805_v50  ;;  %v6429_v11 = vpop.f32.mrf.mxu1  ;;  %v4764_v38 = vadd.f32 %v15630_v34, %v15629_v60  ;;  %v15636_v34 = vld [vmem:[#allocation19_spill] sm:$0xff] }
 0x629   : > { %v7006_v25 = vld [vmem:[#allocation2 + $0xce] sm:$0xff] }
 0x62a   : > { %6921 = vst.msk [vmem:[#allocation2 + $0xd8] sm:$0xff] %vm674_vm2, %v6874_v18  ;;  %v6502_v0 = vadd.f32 %v6429_v11, %v6155_v27  ;;  %11016 = vmatmul.msk.f32.gmra.mxu3 %vm674_vm2, %v6940_v42  ;;  %11058 = vmatmul.msk.f32.vlgmr.msrb.gmra.mxu0 %vm674_vm2, %v7556_v23  ;;  %v6778_v42 = vpop.permute.xlu2 %6777 }
 0x62b   : > { %10998 = vmatmul.msk.f32.gmra.mxu2 %vm674_vm2, %v7006_v25  ;;  %11101 = vmatmul.msk.f32.vlgmr.msrb.gmra.mxu1 %vm674_vm2, %v7906_v7 }
 0x62c   : > { %v6547_v54 = vadd.f32 %v14074_v41, %v6502_v0  ;;  %v5111_v0 = vadd.f32 %v15631_v62, %v4764_v38  ;;  %v15637_v38 = vld [vmem:[#allocation20_spill] sm:$0xff]  ;;  %v6944_v62 = vld [vmem:[#allocation2 + $0x2d] sm:$0xff] }
 0x62d   : > { %v5735_v32 = vpop.f32.mrf.mxu3 }
 0x62e   : > { %v6588_v30 = vmax.f32 %v6547_v54, 0.0  ;;  %v5806_v12 = vadd.f32 %v5735_v32, %v5459_v22  ;;  %v14079_v24 = vpop.f32.mrf.mxu2  ;;  %v7908_v22 = vld [vmem:[#allocation2 + $0x27] sm:$0xff] }
 0x62f   : > { %v6085_v36 = vpop.f32.mrf.mxu0  ;;  %v15632_v54 = vld [vmem:[#allocation52_spill] sm:$0xff] }
 0x630   : > { %v6875_v1 = vmul.f32 %v6773_v56, %v6588_v30  ;;  %v6156_v10 = vadd.f32 %v6085_v36, %v5806_v12  ;;  %v6432_v52 = vpop.f32.mrf.mxu1  ;;  %v5461_v32 = vadd.f32 %v15632_v54, %v5111_v0  ;;  %v15634_v30 = vld [vmem:[#allocation17_spill] sm:$0xff]  ;;  %v7910_v54 = vld [vmem:[#allocation2 + $0x37] sm:$0xff] }
 0x631   : > { %v7007_v33 = vld [vmem:[#allocation2 + $0xd6] sm:$0xff]  ;;  %v4765_v12 = vadd.f32 %v15634_v30, %v15633_v40  ;;  %v15638_v0 = vld [vmem:[#allocation21_spill] sm:$0xff] }
 0x632   : > { %6922 = vst.msk [vmem:[#allocation2 + $0xe0] sm:$0xff] %vm674_vm2, %v6875_v1  ;;  %v6503_v21 = vadd.f32 %v6432_v52, %v6156_v10  ;;  %11017 = vmatmul.msk.f32.gmra.mxu3 %vm674_vm2, %v6941_v57  ;;  %11059 = vmatmul.msk.f32.gmra.mxu0 %vm674_vm2, %v7557_v6  ;;  %v6783_v1 = vpop.permute.xlu0 %6782  ;;  %v15639_v40 = vld [vmem:[#allocation22_spill] sm:$0xff]  ;;  %v15640_v30 = vld [vmem:[#allocation23_spill] sm:$0xff] }
 0x633   : > { %10999 = vmatmul.msk.f32.gmra.mxu2 %vm674_vm2, %v7007_v33  ;;  %11102 = vmatmul.msk.f32.gmra.mxu1 %vm674_vm2, %v7907_v35 }
 0x634   : > { %v6548_v37 = vadd.f32 %v14074_v41, %v6503_v21  ;;  %v5112_v21 = vadd.f32 %v15635_v14, %v4765_v12  ;;  %v4767_v12 = vadd.f32 %v15640_v30, %v15639_v40  ;;  %v15641_v14 = vld [vmem:[#allocation24_spill] sm:$0xff]  ;;  %v15647_v30 = vld [vmem:[#allocation29_spill] sm:$0xff] }
 0x635   : > { %v5738_v49 = vpop.f32.mrf.mxu3  ;;  %v15646_v40 = vld [vmem:[#allocation28_spill] sm:$0xff] }
 0x636   : > { %v6589_v50 = vmax.f32 %v6548_v37, 0.0  ;;  %v5807_v19 = vadd.f32 %v5738_v49, %v5460_v20  ;;  %v14091_v47 = vpop.f32.mrf.mxu2  ;;  %v7909_v20 = vld [vmem:[#allocation2 + $0x2f] sm:$0xff]  ;;  %v5462_v37 = vadd.f32 %v13762_v4, %v5112_v21  ;;  %v5114_v21 = vadd.f32 %v15641_v14, %v4767_v12 }
 0x637   : > { %v6088_v23 = vpop.f32.mrf.mxu0  ;;  %v4769_v12 = vadd.f32 %v15647_v30, %v15646_v40  ;;  %v15649_v14 = vld [vmem:[#allocation30_spill] sm:$0xff]  ;;  %v15654_v40 = vld [vmem:[#allocation37_spill] sm:$0xff]  ;;  %v15655_v30 = vld [vmem:[#allocation39_spill] sm:$0xff] }
 0x638   : > { %v6876_v18 = vmul.f32 %v6778_v42, %v6589_v50  ;;  %v6157_v27 = vadd.f32 %v6088_v23, %v5807_v19  ;;  %v6435_v11 = vpop.f32.mrf.mxu1  ;;  %v4766_v50 = vadd.f32 %v15637_v38, %v15636_v34  ;;  %v15642_v34 = vld [vmem:[#allocation25_spill] sm:$0xff]  ;;  %v15643_v38 = vld [vmem:[#allocation26_spill] sm:$0xff] }
 0x639   : > { %v7008_v25 = vld [vmem:[#allocation2 + $0xde] sm:$0xff] }
 0x63a   : > { %6923 = vst.msk [vmem:[#allocation2 + $0xe8] sm:$0xff] %vm674_vm2, %v6876_v18  ;;  %v6504_v59 = vadd.f32 %v6435_v11, %v6157_v27  ;;  %11018 = vmatmul.msk.f32.gmra.mxu3 %vm674_vm2, %v6942_v53  ;;  %11060 = vmatmul.msk.f32.gmra.mxu0 %vm674_vm2, %v7906_v7  ;;  %v6788_v18 = vpop.permute.xlu1 %6787 }
 0x63b   : > { %11000 = vmatmul.msk.f32.gmra.mxu2 %vm674_vm2, %v7008_v25  ;;  %11103 = vmatmul.msk.f32.gmra.mxu1 %vm674_vm2, %v7908_v22 }
 0x63c   : > { %v6549_v29 = vadd.f32 %v14074_v41, %v6504_v59  ;;  %v5113_v59 = vadd.f32 %v15638_v0, %v4766_v50  ;;  %v4768_v50 = vadd.f32 %v15643_v38, %v15642_v34  ;;  %v15645_v0 = vld [vmem:[#allocation27_spill] sm:$0xff]  ;;  %v15651_v38 = vld [vmem:[#allocation33_spill] sm:$0xff] }
 0x63d   : > { %v5741_v16 = vpop.f32.mrf.mxu3  ;;  %v15650_v34 = vld [vmem:[#allocation31_spill] sm:$0xff] }
 0x63e   : > { %v6590_v56 = vmax.f32 %v6549_v29, 0.0  ;;  %v5808_v36 = vadd.f32 %v5741_v16, %v5461_v32  ;;  %v14103_v6 = vpop.f32.mrf.mxu2  ;;  %v5463_v32 = vadd.f32 %v13775_v3, %v5113_v59  ;;  %v5115_v59 = vadd.f32 %v15645_v0, %v4768_v50  ;;  %v15653_v0 = vld [vmem:[#allocation35_spill] sm:$0xff] }
 0x63f   : > { %v6091_v10 = vpop.f32.mrf.mxu0  ;;  %v4770_v50 = vadd.f32 %v15651_v38, %v15650_v34  ;;  %v15658_v34 = vld [vmem:[#allocation43_spill] sm:$0xff]  ;;  %v15659_v38 = vld [vmem:[#allocation44_spill] sm:$0xff] }
 0x640   : > { %v6877_v7 = vmul.f32 %v6783_v1, %v6590_v56  ;;  %v6158_v52 = vadd.f32 %v6091_v10, %v5808_v36  ;;  %v6438_v33 = vpop.f32.mrf.mxu1  ;;  %v6793_v10 = vpop.permute.xlu2 %6792 }
 0x641   : > { %v7009_v57 = vld [vmem:[#allocation2 + $0xe6] sm:$0xff] }
 0x642   : > { %6924 = vst.msk [vmem:[#allocation2 + $0xf0] sm:$0xff] %vm674_vm2, %v6877_v7  ;;  %v6505_v2 = vadd.f32 %v6438_v33, %v6158_v52  ;;  %11019 = vmatmul.msk.f32.gmra.mxu3 %vm674_vm2, %v6943_v8  ;;  %11061 = vmatmul.msk.f32.gmra.mxu0 %vm674_vm2, %v7907_v35  ;;  %v6945_v8 = vld [vmem:[#allocation2 + $0x35] sm:$0xff] }
 0x643   : > { %11001 = vmatmul.msk.f32.gmra.mxu2 %vm674_vm2, %v7009_v57  ;;  %11104 = vmatmul.msk.f32.gmra.mxu1 %vm674_vm2, %v7909_v20 }
 0x644   : > { %v6550_v49 = vadd.f32 %v14074_v41, %v6505_v2  ;;  %v7911_v2 = vld [vmem:[#allocation2 + $0x3f] sm:$0xff] }
 0x645   : > { %v5744_v60 = vpop.f32.mrf.mxu3 }
 0x646   : > { %v6591_v19 = vmax.f32 %v6550_v49, 0.0  ;;  %v5809_v42 = vadd.f32 %v5744_v60, %v5462_v37  ;;  %v14115_v23 = vpop.f32.mrf.mxu2  ;;  %v5464_v37 = vadd.f32 %v13790_v58, %v5114_v21  ;;  %v5116_v21 = vadd.f32 %v15649_v14, %v4769_v12  ;;  %v15657_v14 = vld [vmem:[#allocation41_spill] sm:$0xff] }
 0x647   : > { %v6094_v27 = vpop.f32.mrf.mxu0  ;;  %v4771_v12 = vadd.f32 %v15655_v30, %v15654_v40  ;;  %v15662_v40 = vld [vmem:[#allocation49_spill] sm:$0xff]  ;;  %v15663_v30 = vld [vmem:[#allocation50_spill] sm:$0xff] }
 0x648   : > { %v6878_v35 = vmul.f32 %v6788_v18, %v6591_v19  ;;  %v6159_v11 = vadd.f32 %v6094_v27, %v5809_v42  ;;  %v6441_v25 = vpop.f32.mrf.mxu1  ;;  %v6798_v27 = vpop.permute.xlu0 %6797 }
 0x649   : > { %v7010_v53 = vld [vmem:[#allocation2 + $0xee] sm:$0xff] }
 0x64a   : > { %6925 = vst.msk [vmem:[#allocation2 + $0xf8] sm:$0xff] %vm674_vm2, %v6878_v35  ;;  %v6506_v4 = vadd.f32 %v6441_v25, %v6159_v11  ;;  %11020 = vmatmul.msk.f32.gmra.mxu3 %vm674_vm2, %v6944_v62  ;;  %11062 = vmatmul.msk.f32.gmra.mxu0 %vm674_vm2, %v7908_v22  ;;  %v6946_v62 = vld [vmem:[#allocation2 + $0x3d] sm:$0xff] }
 0x64b   : > { %11002 = vmatmul.msk.f32.gmra.mxu2 %vm674_vm2, %v7010_v53  ;;  %11105 = vmatmul.msk.f32.gmra.mxu1 %vm674_vm2, %v7910_v54 }
 0x64c   : > { %v6551_v29 = vadd.f32 %v14074_v41, %v6506_v4  ;;  %v7912_v4 = vld [vmem:[#allocation2 + $0x47] sm:$0xff] }
 0x64d   : > { %v5747_v16 = vpop.f32.mrf.mxu3 }
 0x64e   : > { %v6592_v56 = vmax.f32 %v6551_v29, 0.0  ;;  %v5810_v36 = vadd.f32 %v5747_v16, %v5463_v32  ;;  %v14127_v1 = vpop.f32.mrf.mxu2  ;;  %v5465_v32 = vadd.f32 %v13803_v31, %v5115_v59  ;;  %v5117_v59 = vadd.f32 %v15653_v0, %v4770_v50  ;;  %v15661_v0 = vld [vmem:[#allocation46_spill] sm:$0xff] }
 0x64f   : > { %v6097_v7 = vpop.f32.mrf.mxu0  ;;  %v4772_v50 = vadd.f32 %v15659_v38, %v15658_v34  ;;  %v15666_v34 = vld [vmem:[#allocation54_spill] sm:$0xff]  ;;  %v15667_v38 = vld [vmem:[#allocation55_spill] sm:$0xff] }
 0x650   : > { %v6879_v22 = vmul.f32 %v6793_v10, %v6592_v56  ;;  %v6160_v52 = vadd.f32 %v6097_v7, %v5810_v36  ;;  %v6444_v33 = vpop.f32.mrf.mxu1  ;;  %v6803_v7 = vpop.permute.xlu1 %6802 }
 0x651   : > { %v7011_v57 = vld [vmem:[#allocation2 + $0xf6] sm:$0xff] }
 0x652   : > { %6926 = vst.msk [vmem:[#allocation2 + $0x100] sm:$0xff] %vm674_vm2, %v6879_v22  ;;  %v6507_v3 = vadd.f32 %v6444_v33, %v6160_v52  ;;  %11021 = vmatmul.msk.f32.gmra.mxu3 %vm674_vm2, %v6945_v8  ;;  %11063 = vmatmul.msk.f32.gmra.mxu0 %vm674_vm2, %v7909_v20  ;;  %v6947_v8 = vld [vmem:[#allocation2 + $0x45] sm:$0xff] }
 0x653   : > { %11003 = vmatmul.msk.f32.gmra.mxu2 %vm674_vm2, %v7011_v57  ;;  %11106 = vmatmul.msk.f32.gmra.mxu1 %vm674_vm2, %v7911_v2 }
 0x654   : > { %v6552_v49 = vadd.f32 %v14074_v41, %v6507_v3  ;;  %v7913_v3 = vld [vmem:[#allocation2 + $0x4f] sm:$0xff] }
 0x655   : > { %v5750_v60 = vpop.f32.mrf.mxu3 }
 0x656   : > { %v6593_v19 = vmax.f32 %v6552_v49, 0.0  ;;  %v5811_v42 = vadd.f32 %v5750_v60, %v5464_v37  ;;  %v14139_v18 = vpop.f32.mrf.mxu2  ;;  %v5466_v37 = vadd.f32 %v13820_v17, %v5116_v21  ;;  %v5118_v21 = vadd.f32 %v15657_v14, %v4771_v12  ;;  %v15665_v14 = vld [vmem:[#allocation51_spill] sm:$0xff] }
 0x657   : > { %15644 = vst [vmem:[#allocation3_spill] sm:$0xff] %v14139_v18  ;;  %v6100_v35 = vpop.f32.mrf.mxu0  ;;  %v4773_v12 = vadd.f32 %v15663_v30, %v15662_v40 }
 0x658   : > { %v6880_v20 = vmul.f32 %v6798_v27, %v6593_v19  ;;  %v6161_v11 = vadd.f32 %v6100_v35, %v5811_v42  ;;  %v6447_v25 = vpop.f32.mrf.mxu1  ;;  %v6808_v35 = vpop.permute.xlu2 %6807 }
 0x659   : > { %v7012_v53 = vld [vmem:[#allocation2 + $0xfe] sm:$0xff] }
 0x65a   : > { %6927 = vst.msk [vmem:[#allocation2 + $0x108] sm:$0xff] %vm674_vm2, %v6880_v20  ;;  %v6508_v58 = vadd.f32 %v6447_v25, %v6161_v11  ;;  %11022 = vmatmul.msk.f32.gmra.mxu3 %vm674_vm2, %v6946_v62  ;;  %11064 = vmatmul.msk.f32.gmra.mxu0 %vm674_vm2, %v7910_v54  ;;  %v6948_v62 = vld [vmem:[#allocation2 + $0x4d] sm:$0xff] }
 0x65b   : > { %11004 = vmatmul.msk.f32.gmra.mxu2 %vm674_vm2, %v7012_v53  ;;  %11107 = vmatmul.msk.f32.gmra.mxu1 %vm674_vm2, %v7912_v4 }
 0x65c   : > { %v6553_v29 = vadd.f32 %v14074_v41, %v6508_v58  ;;  %v7914_v58 = vld [vmem:[#allocation2 + $0x57] sm:$0xff] }
 0x65d   : > { %v5753_v16 = vpop.f32.mrf.mxu3 }
 0x65e   : > { %v6594_v56 = vmax.f32 %v6553_v29, 0.0  ;;  %v5812_v36 = vadd.f32 %v5753_v16, %v5465_v32  ;;  %v14151_v10 = vpop.f32.mrf.mxu2  ;;  %v5467_v32 = vadd.f32 %v13833_v39, %v5117_v59  ;;  %v5119_v59 = vadd.f32 %v15661_v0, %v4772_v50  ;;  %v15669_v0 = vld [vmem:[#allocation32_spill] sm:$0xff] }
 0x65f   : > { %15648 = vst [vmem:[#allocation4_spill] sm:$0xff] %v14151_v10  ;;  %v6103_v22 = vpop.f32.mrf.mxu0  ;;  %v4774_v50 = vadd.f32 %v15667_v38, %v15666_v34  ;;  %v7919_v34 = vld [vmem:[#allocation2 + $0x7f] sm:$0xff]  ;;  %v6969_v10 = vld [vmem:[#allocation2 + $0xf5] sm:$0xff] }
 0x660   : > { %v6881_v54 = vmul.f32 %v6803_v7, %v6594_v56  ;;  %v6162_v52 = vadd.f32 %v6103_v22, %v5812_v36  ;;  %v6450_v33 = vpop.f32.mrf.mxu1  ;;  %v6813_v22 = vpop.permute.xlu0 %6812 }
 0x661   : > { %v7013_v57 = vld [vmem:[#allocation2 + $0x106] sm:$0xff] }
 0x662   : > { %6928 = vst.msk [vmem:[#allocation2 + $0x110] sm:$0xff] %vm674_vm2, %v6881_v54  ;;  %v6509_v31 = vadd.f32 %v6450_v33, %v6162_v52  ;;  %11023 = vmatmul.msk.f32.gmra.mxu3 %vm674_vm2, %v6947_v8  ;;  %11065 = vmatmul.msk.f32.gmra.mxu0 %vm674_vm2, %v7911_v2  ;;  %v6949_v8 = vld [vmem:[#allocation2 + $0x55] sm:$0xff] }
 0x663   : > { %11005 = vmatmul.msk.f32.gmra.mxu2 %vm674_vm2, %v7013_v57  ;;  %11108 = vmatmul.msk.f32.gmra.mxu1 %vm674_vm2, %v7913_v3 }
 0x664   : > { %v6554_v49 = vadd.f32 %v14074_v41, %v6509_v31  ;;  %v7915_v31 = vld [vmem:[#allocation2 + $0x5f] sm:$0xff] }
 0x665   : > { %v5756_v60 = vpop.f32.mrf.mxu3 }
 0x666   : > { %v6595_v19 = vmax.f32 %v6554_v49, 0.0  ;;  %v5813_v42 = vadd.f32 %v5756_v60, %v5466_v37  ;;  %v14163_v27 = vpop.f32.mrf.mxu2  ;;  %v5468_v37 = vadd.f32 %v13848_v61, %v5118_v21  ;;  %v5120_v21 = vadd.f32 %v15665_v14, %v4773_v12  ;;  %v15670_v12 = vld [vmem:[#allocation36_spill] sm:$0xff] }
 0x667   : > { %15652 = vst [vmem:[#allocation5_spill] sm:$0xff] %v14163_v27  ;;  %v6106_v20 = vpop.f32.mrf.mxu0 }
 0x668   : > { %v6882_v2 = vmul.f32 %v6808_v35, %v6595_v19  ;;  %v6163_v11 = vadd.f32 %v6106_v20, %v5813_v42  ;;  %v6453_v25 = vpop.f32.mrf.mxu1  ;;  %v6818_v20 = vpop.permute.xlu1 %6817 }
 0x669   : > { %v7014_v53 = vld [vmem:[#allocation2 + $0x10e] sm:$0xff] }
 0x66a   : > { %6929 = vst.msk [vmem:[#allocation2 + $0x118] sm:$0xff] %vm674_vm2, %v6882_v2  ;;  %v6510_v17 = vadd.f32 %v6453_v25, %v6163_v11  ;;  %11024 = vmatmul.msk.f32.gmra.mxu3 %vm674_vm2, %v6948_v62  ;;  %11066 = vmatmul.msk.f32.gmra.mxu0 %vm674_vm2, %v7912_v4  ;;  %v6950_v62 = vld [vmem:[#allocation2 + $0x5d] sm:$0xff] }
 0x66b   : > { %11006 = vmatmul.msk.f32.gmra.mxu2 %vm674_vm2, %v7014_v53  ;;  %11109 = vmatmul.msk.f32.gmra.mxu1 %vm674_vm2, %v7914_v58 }
 0x66c   : > { %v6555_v29 = vadd.f32 %v14074_v41, %v6510_v17  ;;  %v7916_v17 = vld [vmem:[#allocation2 + $0x67] sm:$0xff] }
 0x66d   : > { %v5759_v16 = vpop.f32.mrf.mxu3 }
 0x66e   : > { %v6596_v56 = vmax.f32 %v6555_v29, 0.0  ;;  %v5814_v36 = vadd.f32 %v5759_v16, %v5467_v32  ;;  %v14175_v7 = vpop.f32.mrf.mxu2  ;;  %v5469_v32 = vadd.f32 %v13861_v63, %v5119_v59  ;;  %v5121_v59 = vadd.f32 %v15669_v0, %v4774_v50 }
 0x66f   : > { %15656 = vst [vmem:[#allocation6_spill] sm:$0xff] %v14175_v7  ;;  %v6109_v54 = vpop.f32.mrf.mxu0 }
 0x670   : > { %v6883_v4 = vmul.f32 %v6813_v22, %v6596_v56  ;;  %v6164_v52 = vadd.f32 %v6109_v54, %v5814_v36  ;;  %v6456_v33 = vpop.f32.mrf.mxu1  ;;  %v6823_v54 = vpop.permute.xlu2 %6822  ;;  %v5471_v40 = vadd.f32 %v13891_v46, %v5121_v59  ;;  %v11271_v46 = vld [vmem:[%s15454_s6 + $0x1c] sm:$0xf] }
 0x671   : > { %v7015_v57 = vld [vmem:[#allocation2 + $0x116] sm:$0xff]  ;;  %11272 = vmatpush.msk.msra.mxu1 %vm798_vm0, %v11271_v46 }
 0x672   : > { %6930 = vst.msk [vmem:[#allocation2 + $0x120] sm:$0xff] %vm674_vm2, %v6883_v4  ;;  %v6511_v39 = vadd.f32 %v6456_v33, %v6164_v52  ;;  %11025 = vmatmul.msk.f32.gmra.mxu3 %vm674_vm2, %v6949_v8  ;;  %11067 = vmatmul.msk.f32.gmra.mxu0 %vm674_vm2, %v7913_v3  ;;  %v6951_v8 = vld [vmem:[#allocation2 + $0x65] sm:$0xff] }
 0x673   : > { %11007 = vmatmul.msk.f32.gmra.mxu2 %vm674_vm2, %v7015_v57  ;;  %11110 = vmatmul.msk.f32.gmra.mxu1 %vm674_vm2, %v7915_v31 }
 0x674   : > { %v6556_v49 = vadd.f32 %v14074_v41, %v6511_v39  ;;  %v7917_v39 = vld [vmem:[#allocation2 + $0x6f] sm:$0xff] }
 0x675   : > { %v5762_v60 = vpop.f32.mrf.mxu3 }
 0x676   : > { %v6597_v19 = vmax.f32 %v6556_v49, 0.0  ;;  %v5815_v42 = vadd.f32 %v5762_v60, %v5468_v37  ;;  %v14187_v35 = vpop.f32.mrf.mxu2  ;;  %v5470_v37 = vadd.f32 %v13878_v9, %v5120_v21 }
 0x677   : > { %15660 = vst [vmem:[#allocation53_spill] sm:$0xff] %v14187_v35  ;;  %v6112_v2 = vpop.f32.mrf.mxu0  ;;  %v6968_v35 = vld [vmem:[#allocation2 + $0xed] sm:$0xff] }
 0x678   : > { %v6884_v3 = vmul.f32 %v6818_v20, %v6597_v19  ;;  %v6165_v11 = vadd.f32 %v6112_v2, %v5815_v42  ;;  %v6459_v25 = vpop.f32.mrf.mxu1  ;;  %v6828_v2 = vpop.permute.xlu0 %6827 }
 0x679   : > { %v7016_v53 = vld [vmem:[#allocation2 + $0x11e] sm:$0xff] }
 0x67a   : > { %6931 = vst.msk [vmem:[#allocation2 + $0x128] sm:$0xff] %vm674_vm2, %v6884_v3  ;;  %v6512_v61 = vadd.f32 %v6459_v25, %v6165_v11  ;;  %11026 = vmatmul.msk.f32.gmra.mxu3 %vm674_vm2, %v6950_v62  ;;  %11068 = vmatmul.msk.f32.gmra.mxu0 %vm674_vm2, %v7914_v58  ;;  %v6952_v62 = vld [vmem:[#allocation2 + $0x6d] sm:$0xff] }
 0x67b   : > { %11008 = vmatmul.msk.f32.gmra.mxu2 %vm674_vm2, %v7016_v53  ;;  %11111 = vmatmul.msk.f32.gmra.mxu1 %vm674_vm2, %v7916_v17 }
 0x67c   : > { %v6557_v29 = vadd.f32 %v14074_v41, %v6512_v61  ;;  %v7918_v61 = vld [vmem:[#allocation2 + $0x77] sm:$0xff] }
 0x67d   : > { %v5765_v16 = vpop.f32.mrf.mxu3 }
 0x67e   : > { %v6598_v56 = vmax.f32 %v6557_v29, 0.0  ;;  %v5816_v36 = vadd.f32 %v5765_v16, %v5469_v32  ;;  %v14199_v22 = vpop.f32.mrf.mxu2  ;;  %v11185_v32 = vld [vmem:[%s15454_s6 + $0x14] sm:$0xf]  ;;  %v11314_v29 = vld [vmem:[%s15454_s6 + $0x20] sm:$0xf] }
 0x67f   : > { %15664 = vst [vmem:[#allocation7_spill] sm:$0xff] %v14199_v22  ;;  %v6115_v4 = vpop.f32.mrf.mxu0  ;;  %v11228_v16 = vld [vmem:[%s15454_s6 + $0x18] sm:$0xf]  ;;  %11186 = vmatpush.msk.msra.mxu3 %vm798_vm0, %v11185_v32  ;;  %11315 = vmatpush.msk.msra.mxu2 %vm798_vm0, %v11314_v29  ;;  %v6954_v32 = vld [vmem:[#allocation2 + $0x7d] sm:$0xff] }
 0x680   : > { %v6885_v58 = vmul.f32 %v6823_v54, %v6598_v56  ;;  %v6166_v52 = vadd.f32 %v6115_v4, %v5816_v36  ;;  %v6462_v33 = vpop.f32.mrf.mxu1  ;;  %11229 = vmatpush.msk.msra.mxu0 %vm798_vm0, %v11228_v16  ;;  %v15671_v56 = vld [vmem:[#allocation38_spill] sm:$0xff]  ;;  %v15677_v29 = vld [vmem:[#allocation48_spill] sm:$0xff] }
 0x681   : > { %v7017_v57 = vld [vmem:[#allocation2 + $0x126] sm:$0xff]  ;;  %v4775_v36 = vadd.f32 %v15671_v56, %v15670_v12 }
 0x682   : > { %6932 = vst.msk [vmem:[#allocation2 + $0x130] sm:$0xff] %vm674_vm2, %v6885_v58  ;;  %v6513_v63 = vadd.f32 %v6462_v33, %v6166_v52  ;;  %11027 = vmatmul.msk.f32.gmra.mxu3 %vm674_vm2, %v6951_v8  ;;  %11069 = vmatmul.msk.f32.gmra.mxu0 %vm674_vm2, %v7915_v31  ;;  %v6833_v52 = vpop.permute.xlu1 %6832 }
 0x683   : > { %11009 = vmatmul.msk.f32.gmra.mxu2 %vm674_vm2, %v7017_v57  ;;  %11112 = vmatmul.msk.f32.gmra.mxu1 %vm674_vm2, %v7917_v39 }
 0x684   : > { %v6558_v49 = vadd.f32 %v14074_v41, %v6513_v63  ;;  %v6953_v63 = vld [vmem:[#allocation2 + $0x75] sm:$0xff] }
 0x685   : > { %v5768_v60 = vpop.f32.mrf.mxu3 }
 0x686   : > { %v6599_v19 = vmax.f32 %v6558_v49, 0.0  ;;  %v5817_v42 = vadd.f32 %v5768_v60, %v5470_v37  ;;  %v14211_v20 = vpop.f32.mrf.mxu2  ;;  %v15673_v37 = vld [vmem:[#allocation40_spill] sm:$0xff] }
 0x687   : > { %15668 = vst [vmem:[#allocation8_spill] sm:$0xff] %v14211_v20  ;;  %v6118_v3 = vpop.f32.mrf.mxu0  ;;  %v5122_v49 = vadd.f32 %v15673_v37, %v4775_v36 }
 0x688   : > { %v6886_v31 = vmul.f32 %v6828_v2, %v6599_v19  ;;  %v6167_v11 = vadd.f32 %v6118_v3, %v5817_v42  ;;  %v6465_v25 = vpop.f32.mrf.mxu1  ;;  %v15674_v42 = vld [vmem:[#allocation42_spill] sm:$0xff]  ;;  %v15675_v2 = vld [vmem:[#allocation45_spill] sm:$0xff] }
 0x689   : > { %v7018_v53 = vld [vmem:[#allocation2 + $0x12e] sm:$0xff]  ;;  %v5472_v38 = vadd.f32 %v13906_v51, %v5122_v49  ;;  %v4776_v3 = vadd.f32 %v15675_v2, %v15674_v42  ;;  %v8256_v42 = vld [vmem:[#allocation2 + $0x18] sm:$0xff] }
 0x68a   : > { %6933 = vst.msk [vmem:[#allocation2 + $0x138] sm:$0xff] %vm674_vm2, %v6886_v31  ;;  %v6514_v9 = vadd.f32 %v6465_v25, %v6167_v11  ;;  %11028 = vmatmul.msk.f32.gmra.mxu3 %vm674_vm2, %v6952_v62  ;;  %11070 = vmatmul.msk.f32.gmra.mxu0 %vm674_vm2, %v7916_v17 }
 0x68b   : > { %11010 = vmatmul.msk.f32.gmra.mxu2 %vm674_vm2, %v7018_v53  ;;  %11113 = vmatmul.msk.f32.gmra.mxu1 %vm674_vm2, %v7918_v61  ;;  %v6838_v53 = vpop.permute.xlu2 %6837  ;;  %v5123_v16 = vadd.f32 %v15677_v29, %v4776_v3  ;;  %v6958_v29 = vld [vmem:[#allocation2 + $0x9d] sm:$0xff] }
 0x68c   : > { %v6559_v17 = vadd.f32 %v14074_v41, %v6514_v9 }
 0x68d   : > { %v5771_v30 = vpop.f32.mrf.mxu3 }
 0x68e   : > { %v6600_v54 = vmax.f32 %v6559_v17, 0.0  ;;  %v5818_v4 = vadd.f32 %v5771_v30, %v5471_v40  ;;  %v14235_v58 = vpop.f32.mrf.mxu2  ;;  %v7920_v40 = vld [vmem:[#allocation2 + $0x87] sm:$0xff]  ;;  %v5473_v17 = vadd.f32 %v13919_v43, %v5123_v16  ;;  %v7921_v43 = vld [vmem:[#allocation2 + $0x8f] sm:$0xff] }
 0x68f   : > { %15672 = vst [vmem:[#allocation9_spill] sm:$0xff] %v14235_v58  ;;  %v6121_v33 = vpop.f32.mrf.mxu0  ;;  %v7924_v16 = vld [vmem:[#allocation2 + $0xa7] sm:$0xff] }
 0x690   : > { %v6887_v57 = vmul.f32 %v6833_v52, %v6600_v54  ;;  %v6168_v8 = vadd.f32 %v6121_v33, %v5818_v4  ;;  %v6468_v14 = vpop.f32.mrf.mxu1  ;;  %v6843_v4 = vpop.permute.xlu0 %6842  ;;  %v6967_v58 = vld [vmem:[#allocation2 + $0xe5] sm:$0xff] }
 0x691   : > { %v7019_v21 = vld [vmem:[#allocation2 + $0x136] sm:$0xff] }
 0x692   : > { %6934 = vst.msk [vmem:[#allocation2 + $0x140] sm:$0xff] %vm674_vm2, %v6887_v57  ;;  %v6515_v60 = vadd.f32 %v6468_v14, %v6168_v8  ;;  %11029 = vmatmul.msk.f32.gmra.mxu3 %vm674_vm2, %v6953_v63  ;;  %11071 = vmatmul.msk.f32.gmra.mxu0 %vm674_vm2, %v7917_v39  ;;  %v6955_v8 = vld [vmem:[#allocation2 + $0x85] sm:$0xff] }
 0x693   : > { %11011 = vmatmul.msk.f32.gmra.mxu2 %vm674_vm2, %v7019_v21  ;;  %11114 = vmatmul.msk.f32.gmra.mxu1 %vm674_vm2, %v7919_v34 }
 0x694   : > { %v6560_v50 = vadd.f32 %v14074_v41, %v6515_v60  ;;  %v6848_v60 = vpop.permute.xlu1 %6847 }
 0x695   : > { %v5774_v19 = vpop.f32.mrf.mxu3 }
 0x696   : > { %v6601_v31 = vmax.f32 %v6560_v50, 0.0  ;;  %v5819_v11 = vadd.f32 %v5774_v19, %v5472_v38  ;;  %v14251_v25 = vpop.f32.mrf.mxu2 }
 0x697   : > { %15676 = vst [vmem:[#allocation34_spill] sm:$0xff] %v14251_v25  ;;  %v6124_v62 = vpop.f32.mrf.mxu0 }
 0x698   : > { %v6888_v39 = vmul.f32 %v6838_v53, %v6601_v31  ;;  %v6169_v0 = vadd.f32 %v6124_v62, %v5819_v11  ;;  %v6471_v59 = vpop.f32.mrf.mxu1  ;;  %v6957_v53 = vld [vmem:[#allocation2 + $0x95] sm:$0xff]  ;;  %v7923_v62 = vld [vmem:[#allocation2 + $0x9f] sm:$0xff] }
 0x699   : > { %v7020_v9 = vld [vmem:[#allocation2 + $0x13e] sm:$0xff] }
 0x69a   : > { %6935 = vst.msk [vmem:[#allocation2 + $0x148] sm:$0xff] %vm674_vm2, %v6888_v39  ;;  %v6516_v51 = vadd.f32 %v6471_v59, %v6169_v0  ;;  %11030 = vmatmul.msk.f32.gmra.mxu3 %vm674_vm2, %v6954_v32  ;;  %11072 = vmatmul.msk.f32.gmra.mxu0 %vm674_vm2, %v7918_v61  ;;  %v8257_v39 = vld [vmem:[#allocation2 + $0x20] sm:$0xff] }
 0x69b   : > { %11012 = vmatmul.msk.f32.gmra.mxu2 %vm674_vm2, %v7020_v9  ;;  %11115 = vmatmul.msk.f32.gmra.mxu1 %vm674_vm2, %v7920_v40 }
 0x69c   : > { %v6561_v30 = vadd.f32 %v14074_v41, %v6516_v51  ;;  %v8258_v51 = vld [vmem:[#allocation2 + $0x28] sm:$0xff] }
 0x69d   : > { %v5777_v12 = vpop.f32.mrf.mxu3 }
 0x69e   : > { %v6602_v56 = vmax.f32 %v6561_v30, 0.0  ;;  %v5820_v36 = vadd.f32 %v5777_v12, %v5473_v17  ;;  %v14261_v54 = vpop.f32.mrf.mxu2 }
 0x69f   : > { %15678 = vst [vmem:[#allocation10_spill] sm:$0xff] %v14261_v54  ;;  %v6127_v46 = vpop.f32.mrf.mxu0 }
 0x6a0   : > { %v6889_v52 = vmul.f32 %v6843_v4, %v6602_v56  ;;  %v6170_v33 = vadd.f32 %v6127_v46, %v5820_v36  ;;  %v6474_v57 = vpop.f32.mrf.mxu1  ;;  %v6959_v56 = vld [vmem:[#allocation2 + $0xa5] sm:$0xff]  ;;  %v7925_v36 = vld [vmem:[#allocation2 + $0xaf] sm:$0xff] }
 0x6a1   : > { %v7021_v61 = vld [vmem:[#allocation2 + $0x146] sm:$0xf]  ;;  %v8259_v4 = vld [vmem:[#allocation2 + $0x30] sm:$0xff] }
 0x6a2   : > { %6936 = vst.msk [vmem:[#allocation2 + $0x150] sm:$0xff] %vm674_vm2, %v6889_v52  ;;  %v6517_v14 = vadd.f32 %v6474_v57, %v6170_v33  ;;  %11031 = vmatmul.msk.f32.gmra.mxu3 %vm674_vm2, %v6955_v8  ;;  %11073 = vmatmul.msk.f32.gmra.mxu0 %vm674_vm2, %v7919_v34  ;;  %v6956_v34 = vld [vmem:[#allocation2 + $0x8d] sm:$0xff]  ;;  %v7926_v8 = vld [vmem:[#allocation2 + $0xb7] sm:$0xff] }
 0x6a3   : > { %11013 = vmatmul.msk.f32.gmra.mxu2 %vm674_vm2, %v7021_v61  ;;  %11116 = vmatmul.msk.f32.gmra.mxu1 %vm674_vm2, %v7921_v43  ;;  %v6960_v61 = vld [vmem:[#allocation2 + $0xad] sm:$0xff] }
 0x6a4   : > { %v6562_v21 = vadd.f32 %v14074_v41, %v6517_v14  ;;  %v7922_v41 = vld [vmem:[#allocation2 + $0x97] sm:$0xff] }
 0x6a5   : > { %v14269_v63 = vpop.f32.mrf.mxu3  ;;  %v8260_v14 = vld [vmem:[#allocation2 + $0x38] sm:$0xff] }
 0x6a6   : > { %v6603_v37 = vmax.f32 %v6562_v21, 0.0  ;;  %v14271_v49 = vpop.f32.mrf.mxu2 }
 0x6a7   : > { %15679 = vst [vmem:[#allocation11_spill] sm:$0xff] %v14271_v49  ;;  %v14273_v38 = vpop.f32.mrf.mxu0  ;;  %v6966_v49 = vld [vmem:[#allocation2 + $0xdd] sm:$0xff] }
 0x6a8   : > { %v6890_v50 = vmul.f32 %v6848_v60, %v6603_v37  ;;  %v14275_v19 = vpop.f32.mrf.mxu1 }
 0x6aa   : > { %6938 = vst.msk [vmem:[#allocation2 + $0x158] sm:$0xf] %vm6937_vm3, %v6890_v50  ;;  %11032 = vmatmul.msk.f32.gmra.mxu3 %vm674_vm2, %v6956_v34  ;;  %11074 = vmatmul.msk.f32.gmra.mxu0 %vm674_vm2, %v7920_v40  ;;  %v6961_v50 = vld [vmem:[#allocation2 + $0xb5] sm:$0xff]  ;;  %v7927_v34 = vld [vmem:[#allocation2 + $0xbf] sm:$0xff] }
 0x6ab   : > { %11117 = vmatmul.msk.f32.gmra.mxu1 %vm674_vm2, %v7922_v41  ;;  %11144 = vmatmul.msk.f32.vlgmr.msrb.gmra.mxu2 %vm674_vm2, %v8256_v42 }
 0x6ad   : > { %v14282_v2 = vpop.f32.mrf.mxu3 }
 0x6ae   : > { %v14284_v3 = vpop.f32.mrf.mxu2 }
 0x6af   : > { %15680 = vst [vmem:[#allocation12_spill] sm:$0xff] %v14284_v3  ;;  %v14286_v31 = vpop.f32.mrf.mxu0 }
 0x6b0   : > { %v14288_v11 = vpop.f32.mrf.mxu1 }
 0x6b2   : > { %11033 = vmatmul.msk.f32.gmra.mxu3 %vm674_vm2, %v6957_v53  ;;  %11075 = vmatmul.msk.f32.gmra.mxu0 %vm674_vm2, %v7921_v43 }
 0x6b3   : > { %11118 = vmatmul.msk.f32.gmra.mxu1 %vm674_vm2, %v7923_v62  ;;  %11145 = vmatmul.msk.f32.gmra.mxu2 %vm674_vm2, %v8257_v39 }
 0x6b5   : > { %v14294_v0 = vpop.f32.mrf.mxu3 }
 0x6b6   : > { %v14296_v59 = vpop.f32.mrf.mxu2 }
 0x6b7   : > { %15681 = vst [vmem:[#allocation47_spill] sm:$0xff] %v14296_v59  ;;  %v14298_v9 = vpop.f32.mrf.mxu0 }
 0x6b8   : > { %v14300_v32 = vpop.f32.mrf.mxu1 }
 0x6ba   : > { %11034 = vmatmul.msk.f32.gmra.mxu3 %vm674_vm2, %v6958_v29  ;;  %11076 = vmatmul.msk.f32.gmra.mxu0 %vm674_vm2, %v7922_v41  ;;  %v8261_v41 = vld [vmem:[#allocation2 + $0x40] sm:$0xff] }
 0x6bb   : > { %11119 = vmatmul.msk.f32.gmra.mxu1 %vm674_vm2, %v7924_v16  ;;  %11146 = vmatmul.msk.f32.gmra.mxu2 %vm674_vm2, %v8258_v51  ;;  %v6962_v29 = vld [vmem:[#allocation2 + $0xbd] sm:$0xff]  ;;  %v8262_v51 = vld [vmem:[#allocation2 + $0x48] sm:$0xff] }
 0x6bd   : > { %v14306_v40 = vpop.f32.mrf.mxu3 }
 0x6be   : > { %v14308_v17 = vpop.f32.mrf.mxu2 }
 0x6bf   : > { %15682 = vst [vmem:[#allocation13_spill] sm:$0xff] %v14308_v17  ;;  %v14310_v30 = vpop.f32.mrf.mxu0  ;;  %v6965_v17 = vld [vmem:[#allocation2 + $0xd5] sm:$0xff] }
 0x6c0   : > { %v14312_v12 = vpop.f32.mrf.mxu1 }
 0x6c2   : > { %11035 = vmatmul.msk.f32.gmra.mxu3 %vm674_vm2, %v6959_v56  ;;  %11077 = vmatmul.msk.f32.gmra.mxu0 %vm674_vm2, %v7923_v62 }
 0x6c3   : > { %11120 = vmatmul.msk.f32.gmra.mxu1 %vm674_vm2, %v7925_v36  ;;  %11147 = vmatmul.msk.f32.gmra.mxu2 %vm674_vm2, %v8259_v4 }
 0x6c5   : > { %v14318_v46 = vpop.f32.mrf.mxu3 }
 0x6c6   : > { %v14320_v52 = vpop.f32.mrf.mxu2 }
 0x6c7   : > { %15683 = vst [vmem:[#allocation14_spill] sm:$0xff] %v14320_v52  ;;  %v14322_v33 = vpop.f32.mrf.mxu0 }
 0x6c8   : > { %v14324_v57 = vpop.f32.mrf.mxu1 }
 0x6ca   : > { %11036 = vmatmul.msk.f32.gmra.mxu3 %vm674_vm2, %v6960_v61  ;;  %11078 = vmatmul.msk.f32.gmra.mxu0 %vm674_vm2, %v7924_v16  ;;  %v7928_v16 = vld [vmem:[#allocation2 + $0xc7] sm:$0xff] }
 0x6cb   : > { %11121 = vmatmul.msk.f32.gmra.mxu1 %vm674_vm2, %v7926_v8  ;;  %11148 = vmatmul.msk.f32.gmra.mxu2 %vm674_vm2, %v8260_v14  ;;  %v6963_v14 = vld [vmem:[#allocation2 + $0xc5] sm:$0xff] }
 0x6cd   : > { %v14330_v43 = vpop.f32.mrf.mxu3 }
 0x6ce   : > { %v14332_v21 = vpop.f32.mrf.mxu2 }
 0x6cf   : > { %15684 = vst [vmem:[#allocation15_spill] sm:$0xff] %v14332_v21  ;;  %v14334_v37 = vpop.f32.mrf.mxu0 }
 0x6d0   : > { %v14336_v60 = vpop.f32.mrf.mxu1 }
 0x6d2   : > { %11037 = vmatmul.msk.f32.gmra.mxu3 %vm674_vm2, %v6961_v50  ;;  %11079 = vmatmul.msk.f32.gmra.mxu0 %vm674_vm2, %v7925_v36  ;;  %v8263_v50 = vld [vmem:[#allocation2 + $0x50] sm:$0xff] }
 0x6d3   : > { %11122 = vmatmul.msk.f32.gmra.mxu1 %vm674_vm2, %v7927_v34  ;;  %11149 = vmatmul.msk.f32.gmra.mxu2 %vm674_vm2, %v8261_v41 }
 0x6d5   : > { %v14342_v42 = vpop.f32.mrf.mxu3 }
 0x6d6   : > { %v14344_v53 = vpop.f32.mrf.mxu2 }
 0x6d7   : > { %15685 = vst [vmem:[#allocation52_spill] sm:$0xff] %v14344_v53  ;;  %v14346_v62 = vpop.f32.mrf.mxu0  ;;  %v6964_v53 = vld [vmem:[#allocation2 + $0xcd] sm:$0xff] }
 0x6d8   : > { %v14348_v39 = vpop.f32.mrf.mxu1 }
 0x6da   : > { %11038 = vmatmul.msk.f32.gmra.mxu3 %vm674_vm2, %v6962_v29  ;;  %11080 = vmatmul.msk.f32.gmra.mxu0 %vm674_vm2, %v7926_v8  ;;  %v7929_v8 = vld [vmem:[#allocation2 + $0xcf] sm:$0xff] }
 0x6db   : > { %11123 = vmatmul.msk.f32.gmra.mxu1 %vm674_vm2, %v7928_v16  ;;  %11150 = vmatmul.msk.f32.gmra.mxu2 %vm674_vm2, %v8262_v51 }
 0x6dd   : > { %v14354_v56 = vpop.f32.mrf.mxu3 }
 0x6de   : > { %v14356_v36 = vpop.f32.mrf.mxu2 }
 0x6df   : > { %15686 = vst [vmem:[#allocation16_spill] sm:$0xff] %v14356_v36  ;;  %v14358_v4 = vpop.f32.mrf.mxu0 }
 0x6e0   : > { %v14360_v61 = vpop.f32.mrf.mxu1 }
 0x6e2   : > { %11039 = vmatmul.msk.f32.gmra.mxu3 %vm674_vm2, %v6963_v14  ;;  %11081 = vmatmul.msk.f32.gmra.mxu0 %vm674_vm2, %v7927_v34  ;;  %v7930_v34 = vld [vmem:[#allocation2 + $0xd7] sm:$0xff] }
 0x6e3   : > { %11124 = vmatmul.msk.f32.gmra.mxu1 %vm674_vm2, %v7929_v8  ;;  %11151 = vmatmul.msk.f32.gmra.mxu2 %vm674_vm2, %v8263_v50  ;;  %v8264_v14 = vld [vmem:[#allocation2 + $0x58] sm:$0xff] }
 0x6e5   : > { %v14366_v41 = vpop.f32.mrf.mxu3 }
 0x6e6   : > { %v14368_v29 = vpop.f32.mrf.mxu2 }
 0x6e7   : > { %15687 = vst [vmem:[#allocation17_spill] sm:$0xff] %v14368_v29  ;;  %v14370_v51 = vpop.f32.mrf.mxu0 }
 0x6e8   : > { %v14372_v36 = vpop.f32.mrf.mxu1 }
 0x6ea   : > { %11040 = vmatmul.msk.f32.gmra.mxu3 %vm674_vm2, %v6964_v53  ;;  %11082 = vmatmul.msk.f32.gmra.mxu0 %vm674_vm2, %v7928_v16  ;;  %v7931_v53 = vld [vmem:[#allocation2 + $0xdf] sm:$0xff] }
 0x6eb   : > { %11125 = vmatmul.msk.f32.gmra.mxu1 %vm674_vm2, %v7930_v34  ;;  %11152 = vmatmul.msk.f32.gmra.mxu2 %vm674_vm2, %v8264_v14  ;;  %v8265_v16 = vld [vmem:[#allocation2 + $0x60] sm:$0xff] }
 0x6ed   : > { %v14378_v50 = vpop.f32.mrf.mxu3 }
 0x6ee   : > { %v14380_v21 = vpop.f32.mrf.mxu2 }
 0x6ef   : > { %15688 = vst [vmem:[#allocation18_spill] sm:$0xff] %v14380_v21  ;;  %v14382_v29 = vpop.f32.mrf.mxu0 }
 0x6f0   : > { %v14384_v52 = vpop.f32.mrf.mxu1 }
 0x6f2   : > { %11041 = vmatmul.msk.f32.gmra.mxu3 %vm674_vm2, %v6965_v17  ;;  %11083 = vmatmul.msk.f32.gmra.mxu0 %vm674_vm2, %v7929_v8  ;;  %v7932_v17 = vld [vmem:[#allocation2 + $0xe7] sm:$0xff] }
 0x6f3   : > { %11126 = vmatmul.msk.f32.gmra.mxu1 %vm674_vm2, %v7931_v53  ;;  %11153 = vmatmul.msk.f32.gmra.mxu2 %vm674_vm2, %v8265_v16  ;;  %v8266_v8 = vld [vmem:[#allocation2 + $0x68] sm:$0xff] }
 0x6f5   : > { %v14390_v14 = vpop.f32.mrf.mxu3 }
 0x6f6   : > { %v14392_v59 = vpop.f32.mrf.mxu2 }
 0x6f7   : > { %15689 = vst [vmem:[#allocation19_spill] sm:$0xff] %v14392_v59  ;;  %v14394_v21 = vpop.f32.mrf.mxu0 }
 0x6f8   : > { %v14396_v3 = vpop.f32.mrf.mxu1 }
 0x6fa   : > { %11042 = vmatmul.msk.f32.gmra.mxu3 %vm674_vm2, %v6966_v49  ;;  %11084 = vmatmul.msk.f32.gmra.mxu0 %vm674_vm2, %v7930_v34  ;;  %v7933_v49 = vld [vmem:[#allocation2 + $0xef] sm:$0xff] }
 0x6fb   : > { %11127 = vmatmul.msk.f32.gmra.mxu1 %vm674_vm2, %v7932_v17  ;;  %11154 = vmatmul.msk.f32.gmra.mxu2 %vm674_vm2, %v8266_v8  ;;  %v8267_v34 = vld [vmem:[#allocation2 + $0x70] sm:$0xff] }
 0x6fd   : > { %v14402_v16 = vpop.f32.mrf.mxu3 }
 0x6fe   : > { %v14404_v54 = vpop.f32.mrf.mxu2 }
 0x6ff   : > { %15690 = vst [vmem:[#allocation20_spill] sm:$0xff] %v14404_v54  ;;  %v14406_v59 = vpop.f32.mrf.mxu0 }
 0x700   : > { %v14408_v25 = vpop.f32.mrf.mxu1 }
 0x702   : > { %11043 = vmatmul.msk.f32.gmra.mxu3 %vm674_vm2, %v6967_v58  ;;  %11085 = vmatmul.msk.f32.gmra.mxu0 %vm674_vm2, %v7931_v53  ;;  %v7934_v58 = vld [vmem:[#allocation2 + $0xf7] sm:$0xff] }
 0x703   : > { %11128 = vmatmul.msk.f32.gmra.mxu1 %vm674_vm2, %v7933_v49  ;;  %11155 = vmatmul.msk.f32.gmra.mxu2 %vm674_vm2, %v8267_v34  ;;  %v8268_v53 = vld [vmem:[#allocation2 + $0x78] sm:$0xff] }
 0x705   : > { %v14414_v8 = vpop.f32.mrf.mxu3 }
 0x706   : > { %v14416_v20 = vpop.f32.mrf.mxu2 }
 0x707   : > { %15691 = vst [vmem:[#allocation21_spill] sm:$0xff] %v14416_v20  ;;  %v14418_v54 = vpop.f32.mrf.mxu0 }
 0x708   : > { %v14420_v22 = vpop.f32.mrf.mxu1 }
 0x70a   : > { %11044 = vmatmul.msk.f32.gmra.mxu3 %vm674_vm2, %v6968_v35  ;;  %11086 = vmatmul.msk.f32.gmra.mxu0 %vm674_vm2, %v7932_v17  ;;  %v7935_v35 = vld [vmem:[#allocation2 + $0xff] sm:$0xff] }
 0x70b   : > { %11129 = vmatmul.msk.f32.gmra.mxu1 %vm674_vm2, %v7934_v58  ;;  %11156 = vmatmul.msk.f32.gmra.mxu2 %vm674_vm2, %v8268_v53  ;;  %v8269_v17 = vld [vmem:[#allocation2 + $0x80] sm:$0xff] }
 0x70d   : > { %v14426_v34 = vpop.f32.mrf.mxu3 }
 0x70e   : > { %15692 = vst [vmem:[#allocation22_spill] sm:$0xff] %v14426_v34  ;;  %v14428_v7 = vpop.f32.mrf.mxu2  ;;  %v7938_v34 = vld [vmem:[#allocation2 + $0x117] sm:$0xff] }
 0x70f   : > { %15693 = vst [vmem:[#allocation23_spill] sm:$0xff] %v14428_v7  ;;  %v14430_v20 = vpop.f32.mrf.mxu0 }
 0x710   : > { %15694 = vst [vmem:[#allocation24_spill] sm:$0xff] %v14430_v20  ;;  %v14432_v27 = vpop.f32.mrf.mxu1 }
 0x711   : > { %15695 = vst [vmem:[#allocation25_spill] sm:$0xff] %v14432_v27  ;;  %v6970_v27 = vld [vmem:[#allocation2 + $0xfd] sm:$0xff] }
 0x712   : > { %11045 = vmatmul.msk.f32.gmra.mxu3 %vm674_vm2, %v6969_v10  ;;  %11087 = vmatmul.msk.f32.gmra.mxu0 %vm674_vm2, %v7933_v49  ;;  %v7936_v10 = vld [vmem:[#allocation2 + $0x107] sm:$0xff] }
 0x713   : > { %11130 = vmatmul.msk.f32.gmra.mxu1 %vm674_vm2, %v7935_v35  ;;  %11157 = vmatmul.msk.f32.gmra.mxu2 %vm674_vm2, %v8269_v17  ;;  %v8270_v49 = vld [vmem:[#allocation2 + $0x88] sm:$0xff] }
 0x715   : > { %v14438_v53 = vpop.f32.mrf.mxu3 }
 0x716   : > { %15696 = vst [vmem:[#allocation26_spill] sm:$0xff] %v14438_v53  ;;  %v14440_v18 = vpop.f32.mrf.mxu2 }
 0x717   : > { %15697 = vst [vmem:[#allocation27_spill] sm:$0xff] %v14440_v18  ;;  %v14442_v7 = vpop.f32.mrf.mxu0 }
 0x718   : > { %15698 = vst [vmem:[#allocation28_spill] sm:$0xff] %v14442_v7  ;;  %v14444_v20 = vpop.f32.mrf.mxu1 }
 0x719   : > { %15699 = vst [vmem:[#allocation29_spill] sm:$0xff] %v14444_v20  ;;  %v6971_v20 = vld [vmem:[#allocation2 + $0x105] sm:$0xff] }
 0x71a   : > { %11046 = vmatmul.msk.f32.gmra.mxu3 %vm674_vm2, %v6970_v27  ;;  %11088 = vmatmul.msk.f32.gmra.mxu0 %vm674_vm2, %v7934_v58  ;;  %v7937_v27 = vld [vmem:[#allocation2 + $0x10f] sm:$0xff] }
 0x71b   : > { %11131 = vmatmul.msk.f32.gmra.mxu1 %vm674_vm2, %v7936_v10  ;;  %11158 = vmatmul.msk.f32.gmra.mxu2 %vm674_vm2, %v8270_v49  ;;  %v8271_v58 = vld [vmem:[#allocation2 + $0x90] sm:$0xff]  ;;  %v7434_v49 = vadd.f32 %v14269_v63, %v13937_v48  ;;  %v7437_v63 = vadd.f32 %v14282_v2, %v13956_v28 }
 0x71d   : > { %v14450_v17 = vpop.f32.mrf.mxu3 }
 0x71e   : > { %15700 = vst [vmem:[#allocation30_spill] sm:$0xff] %v14450_v17  ;;  %v14452_v53 = vpop.f32.mrf.mxu2 }
 0x71f   : > { %15701 = vst [vmem:[#allocation31_spill] sm:$0xff] %v14452_v53  ;;  %v14454_v18 = vpop.f32.mrf.mxu0 }
 0x720   : > { %15702 = vst [vmem:[#allocation33_spill] sm:$0xff] %v14454_v18  ;;  %v14456_v7 = vpop.f32.mrf.mxu1 }
 0x721   : > { %15703 = vst [vmem:[#allocation35_spill] sm:$0xff] %v14456_v7 }
 0x722   : > { %11047 = vmatmul.msk.f32.gmra.mxu3 %vm674_vm2, %v6971_v20  ;;  %11089 = vmatmul.msk.f32.gmra.mxu0 %vm674_vm2, %v7935_v35  ;;  %v7865_v20 = vadd.f32 %v14273_v38, %v7434_v49  ;;  %v6972_v35 = vld [vmem:[#allocation2 + $0x10d] sm:$0xff] }
 0x723   : > { %11132 = vmatmul.msk.f32.gmra.mxu1 %vm674_vm2, %v7937_v27  ;;  %11159 = vmatmul.msk.f32.gmra.mxu2 %vm674_vm2, %v8271_v58  ;;  %v8272_v58 = vld [vmem:[#allocation2 + $0x98] sm:$0xff] }
 0x724   : > { %v8215_v48 = vadd.f32 %v14275_v19, %v7865_v20  ;;  %v7939_v19 = vld [vmem:[#allocation2 + $0x11f] sm:$0xff] }
 0x725   : > { %v14464_v17 = vpop.f32.mrf.mxu3  ;;  %v8273_v20 = vld [vmem:[#allocation2 + $0xa0] sm:$0xff] }
 0x726   : > { %v14466_v53 = vpop.f32.mrf.mxu2 }
 0x727   : > { %15704 = vst [vmem:[#allocation37_spill] sm:$0xff] %v14466_v53  ;;  %v14468_v18 = vpop.f32.mrf.mxu0 }
 0x728   : > { %15705 = vst [vmem:[#allocation39_spill] sm:$0xff] %v14468_v18  ;;  %v14470_v7 = vpop.f32.mrf.mxu1  ;;  %v6973_v18 = vld [vmem:[#allocation2 + $0x115] sm:$0xff] }
 0x729   : > { %15706 = vst [vmem:[#allocation41_spill] sm:$0xff] %v14470_v7 }
 0x72a   : > { %11048 = vmatmul.msk.f32.gmra.mxu3 %vm674_vm2, %v6972_v35  ;;  %11090 = vmatmul.msk.f32.gmra.mxu0 %vm674_vm2, %v7936_v10  ;;  %v7866_v10 = vadd.f32 %v14286_v31, %v7437_v63  ;;  %v6974_v63 = vld [vmem:[#allocation2 + $0x11d] sm:$0xff] }
 0x72b   : > { %11133 = vmatmul.msk.f32.gmra.mxu1 %vm674_vm2, %v7938_v34  ;;  %11160 = vmatmul.msk.f32.gmra.mxu2 %vm674_vm2, %v8272_v58 }
 0x72c   : > { %v8216_v28 = vadd.f32 %v14288_v11, %v7866_v10  ;;  %v7940_v11 = vld [vmem:[#allocation2 + $0x127] sm:$0xff] }
 0x72d   : > { %v14480_v53 = vpop.f32.mrf.mxu3  ;;  %v8274_v10 = vld [vmem:[#allocation2 + $0xa8] sm:$0xff] }
 0x72e   : > { %v8442_v7 = vpop.f32.mrf.mxu2 }
 0x72f   : > { %v14482_v38 = vadd.f32 %v8442_v7, %v8215_v48  ;;  %v14484_v49 = vpop.f32.mrf.mxu0  ;;  %v7440_v7 = vadd.f32 %v14294_v0, %v13973_v45  ;;  %v7443_v0 = vadd.f32 %v14306_v40, %v13988_v15  ;;  %v7446_v40 = vadd.f32 %v14318_v46, %v14003_v13 }
 0x730   : > { %v14486_v35 = vpop.f32.mrf.mxu1  ;;  %v7449_v46 = vadd.f32 %v14330_v43, %v14018_v26  ;;  %v7452_v43 = vadd.f32 %v14342_v42, %v14033_v5  ;;  %v7455_v42 = vadd.f32 %v14354_v56, %v14048_v44  ;;  %v7458_v56 = vadd.f32 %v14366_v41, %v14062_v55 }
 0x731   : > { %v7461_v41 = vadd.f32 %v14378_v50, %v14079_v24 }
 0x732   : > { %11049 = vmatmul.msk.f32.gmra.mxu3 %vm674_vm2, %v6973_v18  ;;  %11091 = vmatmul.msk.f32.gmra.mxu0 %vm674_vm2, %v7937_v27  ;;  %v7867_v27 = vadd.f32 %v14298_v9, %v7440_v7 }
 0x733   : > { %11134 = vmatmul.msk.f32.gmra.mxu1 %vm674_vm2, %v7939_v19  ;;  %11161 = vmatmul.msk.f32.gmra.mxu2 %vm674_vm2, %v8273_v20 }
 0x734   : > { %v8217_v45 = vadd.f32 %v14300_v32, %v7867_v27  ;;  %v7941_v32 = vld [vmem:[#allocation2 + $0x12f] sm:$0xff] }
 0x735   : > { %v14496_v2 = vpop.f32.mrf.mxu3  ;;  %v8275_v27 = vld [vmem:[#allocation2 + $0xb0] sm:$0xff] }
 0x736   : > { %v8445_v58 = vpop.f32.mrf.mxu2 }
 0x737   : > { %v14498_v31 = vadd.f32 %v8445_v58, %v8216_v28  ;;  %v14500_v48 = vpop.f32.mrf.mxu0 }
 0x738   : > { %v14502_v18 = vpop.f32.mrf.mxu1 }
 0x73a   : > { %11050 = vmatmul.msk.f32.gmra.mxu3 %vm674_vm2, %v6974_v63  ;;  %11092 = vmatmul.msk.f32.gmra.mxu0 %vm674_vm2, %v7938_v34  ;;  %v7868_v34 = vadd.f32 %v14310_v30, %v7443_v0  ;;  %v6975_v63 = vld [vmem:[#allocation2 + $0x125] sm:$0xff] }
 0x73b   : > { %11135 = vmatmul.msk.f32.gmra.mxu1 %vm674_vm2, %v7940_v11  ;;  %11162 = vmatmul.msk.f32.gmra.mxu2 %vm674_vm2, %v8274_v10 }
 0x73c   : > { %v8218_v15 = vadd.f32 %v14312_v12, %v7868_v34  ;;  %v7942_v12 = vld [vmem:[#allocation2 + $0x137] sm:$0xff] }
 0x73d   : > { %v14512_v20 = vpop.f32.mrf.mxu3  ;;  %v8276_v34 = vld [vmem:[#allocation2 + $0xb8] sm:$0xff] }
 0x73e   : > { %v8448_v28 = vpop.f32.mrf.mxu2 }
 0x73f   : > { %v14514_v9 = vadd.f32 %v8448_v28, %v8217_v45  ;;  %v14516_v7 = vpop.f32.mrf.mxu0 }
 0x740   : > { %v14518_v58 = vpop.f32.mrf.mxu1 }
 0x742   : > { %11051 = vmatmul.msk.f32.gmra.mxu3 %vm674_vm2, %v6975_v63  ;;  %11093 = vmatmul.msk.f32.gmra.mxu0 %vm674_vm2, %v7939_v19  ;;  %v7869_v19 = vadd.f32 %v14322_v33, %v7446_v40  ;;  %v6976_v63 = vld [vmem:[#allocation2 + $0x12d] sm:$0xff] }
 0x743   : > { %11136 = vmatmul.msk.f32.gmra.mxu1 %vm674_vm2, %v7941_v32  ;;  %11163 = vmatmul.msk.f32.gmra.mxu2 %vm674_vm2, %v8275_v27 }
 0x744   : > { %v8219_v13 = vadd.f32 %v14324_v57, %v7869_v19  ;;  %v7943_v57 = vld [vmem:[#allocation2 + $0x13f] sm:$0xff] }
 0x745   : > { %v14528_v10 = vpop.f32.mrf.mxu3  ;;  %v8277_v19 = vld [vmem:[#allocation2 + $0xc0] sm:$0xff] }
 0x746   : > { %v8451_v45 = vpop.f32.mrf.mxu2 }
 0x747   : > { %v14530_v30 = vadd.f32 %v8451_v45, %v8218_v15  ;;  %v14532_v0 = vpop.f32.mrf.mxu0 }
 0x748   : > { %v14534_v28 = vpop.f32.mrf.mxu1 }
 0x74a   : > { %11052 = vmatmul.msk.f32.gmra.mxu3 %vm674_vm2, %v6976_v63  ;;  %11094 = vmatmul.msk.f32.gmra.mxu0 %vm674_vm2, %v7940_v11  ;;  %v7870_v11 = vadd.f32 %v14334_v37, %v7449_v46  ;;  %v6977_v63 = vld [vmem:[#allocation2 + $0x135] sm:$0xff] }
 0x74b   : > { %11137 = vmatmul.msk.f32.gmra.mxu1 %vm674_vm2, %v7942_v12  ;;  %11164 = vmatmul.msk.f32.gmra.mxu2 %vm674_vm2, %v8276_v34 }
 0x74c   : > { %v8220_v26 = vadd.f32 %v14336_v60, %v7870_v11  ;;  %v7944_v60 = vld [vmem:[#allocation2 + $0x147] sm:$0xff] }
 0x74d   : > { %v14544_v27 = vpop.f32.mrf.mxu3  ;;  %v8278_v11 = vld [vmem:[#allocation2 + $0xc8] sm:$0xff] }
 0x74e   : > { %v8454_v15 = vpop.f32.mrf.mxu2 }
 0x74f   : > { %v14546_v33 = vadd.f32 %v8454_v15, %v8219_v13  ;;  %v14548_v40 = vpop.f32.mrf.mxu0 }
 0x750   : > { %v14550_v45 = vpop.f32.mrf.mxu1 }
 0x752   : > { %11053 = vmatmul.msk.f32.gmra.mxu3 %vm674_vm2, %v6977_v63  ;;  %11095 = vmatmul.msk.f32.gmra.mxu0 %vm674_vm2, %v7941_v32  ;;  %v7871_v32 = vadd.f32 %v14346_v62, %v7452_v43  ;;  %v6978_v63 = vld [vmem:[#allocation2 + $0x13d] sm:$0xff] }
 0x753   : > { %11138 = vmatmul.msk.f32.gmra.mxu1 %vm674_vm2, %v7943_v57  ;;  %11165 = vmatmul.msk.f32.gmra.mxu2 %vm674_vm2, %v8277_v19 }
 0x754   : > { %v8221_v5 = vadd.f32 %v14348_v39, %v7871_v32  ;;  %v7945_v39 = vld [vmem:[#allocation2 + $0x14f] sm:$0xff] }
 0x755   : > { %v14560_v34 = vpop.f32.mrf.mxu3  ;;  %v8279_v32 = vld [vmem:[#allocation2 + $0xd0] sm:$0xff] }
 0x756   : > { %v8457_v13 = vpop.f32.mrf.mxu2 }
 0x757   : > { %v14562_v37 = vadd.f32 %v8457_v13, %v8220_v26  ;;  %v14564_v46 = vpop.f32.mrf.mxu0 }
 0x758   : > { %v14566_v15 = vpop.f32.mrf.mxu1 }
 0x75a   : > { %11054 = vmatmul.msk.f32.gmra.mxu3 %vm674_vm2, %v6978_v63  ;;  %11096 = vmatmul.msk.f32.gmra.mxu0 %vm674_vm2, %v7942_v12  ;;  %v7872_v12 = vadd.f32 %v14358_v4, %v7455_v42  ;;  %v6979_v63 = vld [vmem:[#allocation2 + $0x145] sm:$0xf] }
 0x75b   : > { %11139 = vmatmul.msk.f32.gmra.mxu1 %vm674_vm2, %v7944_v60  ;;  %11166 = vmatmul.msk.f32.gmra.mxu2 %vm674_vm2, %v8278_v11 }
 0x75c   : > { %v8222_v44 = vadd.f32 %v14360_v61, %v7872_v12  ;;  %v8280_v61 = vld [vmem:[#allocation2 + $0xd8] sm:$0xff] }
 0x75d   : > { %v14576_v19 = vpop.f32.mrf.mxu3 }
 0x75e   : > { %v8460_v26 = vpop.f32.mrf.mxu2 }
 0x75f   : > { %v14578_v62 = vadd.f32 %v8460_v26, %v8221_v5  ;;  %v14580_v43 = vpop.f32.mrf.mxu0  ;;  %v7596_v26 = vld [vmem:[#allocation2 + $0x147] sm:$0xf] }
 0x760   : > { %v14582_v13 = vpop.f32.mrf.mxu1 }
 0x761   : > { %15707 = vst [vmem:[#allocation43_spill] sm:$0xff] %v14578_v62  ;;  %v8963_v62 = vld [vmem:[#allocation2 + $0x61] sm:$0xff] }
 0x762   : > { %11055 = vmatmul.msk.f32.gmra.mxu3 %vm674_vm2, %v6979_v63  ;;  %11097 = vmatmul.msk.f32.gmra.mxu0 %vm674_vm2, %v7943_v57  ;;  %v7873_v57 = vadd.f32 %v14370_v51, %v7458_v56  ;;  %v8606_v63 = vld [vmem:[#allocation2 + $0x19] sm:$0xff]  ;;  %v8607_v56 = vld [vmem:[#allocation2 + $0x21] sm:$0xff] }
 0x763   : > { %11140 = vmatmul.msk.f32.gmra.mxu1 %vm674_vm2, %v7945_v39  ;;  %11167 = vmatmul.msk.f32.gmra.mxu2 %vm674_vm2, %v8279_v32  ;;  %v7946_v39 = vld [vmem:[#allocation2 + $0x157] sm:$0xf] }
 0x764   : > { %v8223_v55 = vadd.f32 %v14372_v36, %v7873_v57  ;;  %v9306_v36 = vld [vmem:[#allocation2 + $0x2a] sm:$0xff] }
 0x765   : > { %v14592_v60 = vpop.f32.mrf.mxu3 }
 0x766   : > { %v8463_v11 = vpop.f32.mrf.mxu2 }
 0x767   : > { %v14594_v4 = vadd.f32 %v8463_v11, %v8222_v44  ;;  %v14596_v5 = vpop.f32.mrf.mxu0  ;;  %v7874_v44 = vadd.f32 %v14382_v29, %v7461_v41  ;;  %v8956_v11 = vld [vmem:[#allocation2 + $0x29] sm:$0xff]  ;;  %v7464_v29 = vadd.f32 %v14390_v14, %v14091_v47  ;;  %v8957_v41 = vld [vmem:[#allocation2 + $0x31] sm:$0xff]  ;;  %v7467_v14 = vadd.f32 %v14402_v16, %v14103_v6 }
 0x768   : > { %v14599_v42 = vpop.f32.mrf.mxu1 }
 0x769   : > { %15708 = vst [vmem:[#allocation44_spill] sm:$0xff] %v14594_v4  ;;  %v8224_v24 = vadd.f32 %v14384_v52, %v7874_v44  ;;  %v8287_v4 = vld [vmem:[#allocation2 + $0x110] sm:$0xff] }
 0x76a   : > { %11098 = vmatmul.msk.f32.gmra.mxu0 %vm674_vm2, %v7596_v26  ;;  %11187 = vmatmul.msk.f32.vlgmr.msra.gmra.mxu3 %vm674_vm2, %v8606_v63  ;;  %v8281_v63 = vld [vmem:[#allocation2 + $0xe0] sm:$0xff] }
 0x76b   : > { %11141 = vmatmul.msk.f32.gmra.mxu1 %vm674_vm2, %v7946_v39  ;;  %11168 = vmatmul.msk.f32.gmra.mxu2 %vm674_vm2, %v8280_v61 }
 0x76d   : > { %v14608_v51 = vpop.f32.mrf.mxu3 }
 0x76e   : > { %v8466_v12 = vpop.f32.mrf.mxu2 }
 0x76f   : > { %v14610_v32 = vadd.f32 %v8466_v12, %v8223_v55  ;;  %v14613_v26 = vpop.f32.mrf.mxu0  ;;  %v7875_v55 = vadd.f32 %v14394_v21, %v7464_v29  ;;  %v8282_v12 = vld [vmem:[#allocation2 + $0xe8] sm:$0xff]  ;;  %v8283_v29 = vld [vmem:[#allocation2 + $0xf0] sm:$0xff] }
 0x770   : > { %v14617_v57 = vpop.f32.mrf.mxu1 }
 0x771   : > { %15709 = vst [vmem:[#allocation46_spill] sm:$0xff] %v14610_v32  ;;  %v8225_v47 = vadd.f32 %v14396_v3, %v7875_v55  ;;  %v7470_v3 = vadd.f32 %v14414_v8, %v14115_v23  ;;  %v15713_v8 = vld [vmem:[#allocation22_spill] sm:$0xff]  ;;  %v8962_v32 = vld [vmem:[#allocation2 + $0x59] sm:$0xff] }
 0x772   : > { %11188 = vmatmul.msk.f32.gmra.mxu3 %vm674_vm2, %v8607_v56  ;;  %11230 = vmatmul.msk.f32.vlgmr.msra.gmra.mxu0 %vm674_vm2, %v8956_v11  ;;  %v9307_v56 = vld [vmem:[#allocation2 + $0x32] sm:$0xff] }
 0x773   : > { %11169 = vmatmul.msk.f32.gmra.mxu2 %vm674_vm2, %v8281_v63  ;;  %11273 = vmatmul.msk.f32.vlgmr.msra.gmra.mxu1 %vm674_vm2, %v9306_v36  ;;  %v7876_v36 = vadd.f32 %v14406_v59, %v7467_v14  ;;  %v8284_v14 = vld [vmem:[#allocation2 + $0xf8] sm:$0xff] }
 0x775   : > { %v14624_v50 = vpop.f32.mrf.mxu3  ;;  %v8226_v6 = vadd.f32 %v14408_v25, %v7876_v36  ;;  %v9309_v25 = vld [vmem:[#allocation2 + $0x42] sm:$0xff] }
 0x776   : > { %v8469_v39 = vpop.f32.mrf.mxu2 }
 0x777   : > { %v14626_v61 = vadd.f32 %v8469_v39, %v8224_v24  ;;  %v14633_v52 = vpop.f32.mrf.mxu0  ;;  %v8958_v24 = vld [vmem:[#allocation2 + $0x39] sm:$0xff] }
 0x778   : > { %v14638_v44 = vpop.f32.mrf.mxu1  ;;  %v9308_v39 = vld [vmem:[#allocation2 + $0x3a] sm:$0xff] }
 0x779   : > { %15710 = vst [vmem:[#allocation49_spill] sm:$0xff] %v14626_v61  ;;  %v8286_v61 = vld [vmem:[#allocation2 + $0x108] sm:$0xff] }
 0x77a   : > { %11189 = vmatmul.msk.f32.gmra.mxu3 %vm674_vm2, %v8956_v11  ;;  %11231 = vmatmul.msk.f32.gmra.mxu0 %vm674_vm2, %v8957_v41 }
 0x77b   : > { %11170 = vmatmul.msk.f32.gmra.mxu2 %vm674_vm2, %v8282_v12  ;;  %11274 = vmatmul.msk.f32.gmra.mxu1 %vm674_vm2, %v9307_v56  ;;  %v7877_v56 = vadd.f32 %v14418_v54, %v7470_v3 }
 0x77d   : > { %v14640_v21 = vpop.f32.mrf.mxu3  ;;  %v8227_v23 = vadd.f32 %v14420_v22, %v7877_v56  ;;  %v9310_v22 = vld [vmem:[#allocation2 + $0x4a] sm:$0xff] }
 0x77e   : > { %v8472_v63 = vpop.f32.mrf.mxu2 }
 0x77f   : > { %v14642_v11 = vadd.f32 %v8472_v63, %v8225_v47  ;;  %v14654_v55 = vpop.f32.mrf.mxu0  ;;  %v8959_v47 = vld [vmem:[#allocation2 + $0x41] sm:$0xff]  ;;  %v7473_v63 = vadd.f32 %v15713_v8, %v14127_v1 }
 0x780   : > { %v14656_v12 = vpop.f32.mrf.mxu1  ;;  %v15716_v1 = vld [vmem:[#allocation25_spill] sm:$0xff] }
 0x781   : > { %15711 = vst [vmem:[#allocation50_spill] sm:$0xff] %v14642_v11 }
 0x782   : > { %11190 = vmatmul.msk.f32.gmra.mxu3 %vm674_vm2, %v8957_v41  ;;  %11232 = vmatmul.msk.f32.gmra.mxu0 %vm674_vm2, %v8958_v24 }
 0x783   : > { %11171 = vmatmul.msk.f32.gmra.mxu2 %vm674_vm2, %v8283_v29  ;;  %11275 = vmatmul.msk.f32.gmra.mxu1 %vm674_vm2, %v9308_v39 }
 0x785   : > { %v14652_v16 = vpop.f32.mrf.mxu3 }
 0x786   : > { %v8475_v59 = vpop.f32.mrf.mxu2 }
 0x787   : > { %v14658_v41 = vadd.f32 %v8475_v59, %v8226_v6  ;;  %v14672_v39 = vpop.f32.mrf.mxu0  ;;  %v8960_v59 = vld [vmem:[#allocation2 + $0x49] sm:$0xff] }
 0x788   : > { %v14675_v3 = vpop.f32.mrf.mxu1 }
 0x789   : > { %15712 = vst [vmem:[#allocation51_spill] sm:$0xff] %v14658_v41 }
 0x78a   : > { %11191 = vmatmul.msk.f32.gmra.mxu3 %vm674_vm2, %v8958_v24  ;;  %11233 = vmatmul.msk.f32.gmra.mxu0 %vm674_vm2, %v8959_v47  ;;  %v15715_v24 = vld [vmem:[#allocation24_spill] sm:$0xff] }
 0x78b   : > { %11172 = vmatmul.msk.f32.gmra.mxu2 %vm674_vm2, %v8284_v14  ;;  %11276 = vmatmul.msk.f32.gmra.mxu1 %vm674_vm2, %v9309_v25  ;;  %v7878_v6 = vadd.f32 %v15715_v24, %v7473_v63  ;;  %v8285_v14 = vld [vmem:[#allocation2 + $0x100] sm:$0xff]  ;;  %v15717_v25 = vld [vmem:[#allocation3_spill] sm:$0xff] }
 0x78d   : > { %v14668_v36 = vpop.f32.mrf.mxu3  ;;  %v8228_v56 = vadd.f32 %v15716_v1, %v7878_v6 }
 0x78e   : > { %v8478_v29 = vpop.f32.mrf.mxu2 }
 0x78f   : > { %v14670_v54 = vadd.f32 %v8478_v29, %v8227_v23  ;;  %v15718_v23 = vld [vmem:[#allocation26_spill] sm:$0xff]  ;;  %v14689_v11 = vpop.f32.mrf.mxu0 }
 0x790   : > { %v7476_v8 = vadd.f32 %v15718_v23, %v15717_v25  ;;  %v14693_v6 = vpop.f32.mrf.mxu1  ;;  %v15723_v25 = vld [vmem:[#allocation30_spill] sm:$0xff] }
 0x791   : > { %15714 = vst [vmem:[#allocation54_spill] sm:$0xff] %v14670_v54  ;;  %v15720_v54 = vld [vmem:[#allocation28_spill] sm:$0xff] }
 0x792   : > { %11192 = vmatmul.msk.f32.gmra.mxu3 %vm674_vm2, %v8959_v47  ;;  %11234 = vmatmul.msk.f32.gmra.mxu0 %vm674_vm2, %v8960_v59  ;;  %v7879_v41 = vadd.f32 %v15720_v54, %v7476_v8  ;;  %v8961_v47 = vld [vmem:[#allocation2 + $0x51] sm:$0xff] }
 0x793   : > { %11173 = vmatmul.msk.f32.gmra.mxu2 %vm674_vm2, %v8285_v14  ;;  %11277 = vmatmul.msk.f32.gmra.mxu1 %vm674_vm2, %v9310_v22  ;;  %v9311_v14 = vld [vmem:[#allocation2 + $0x52] sm:$0xff]  ;;  %v15721_v22 = vld [vmem:[#allocation29_spill] sm:$0xff] }
 0x794   : > { %v8229_v1 = vadd.f32 %v15721_v22, %v7879_v41 }
 0x795   : > { %v14684_v29 = vpop.f32.mrf.mxu3 }
 0x796   : > { %v8481_v63 = vpop.f32.mrf.mxu2 }
 0x797   : > { %v14686_v24 = vadd.f32 %v8481_v63, %v8228_v56  ;;  %v15722_v56 = vld [vmem:[#allocation4_spill] sm:$0xff]  ;;  %v14709_v41 = vpop.f32.mrf.mxu0 }
 0x798   : > { %v7479_v54 = vadd.f32 %v15723_v25, %v15722_v56  ;;  %v15727_v56 = vld [vmem:[#allocation5_spill] sm:$0xff]  ;;  %v14714_v25 = vpop.f32.mrf.mxu1 }
 0x799   : > { %15719 = vst [vmem:[#allocation55_spill] sm:$0xff] %v14686_v24 }
 0x79a   : > { %11193 = vmatmul.msk.f32.gmra.mxu3 %vm674_vm2, %v8960_v59  ;;  %11235 = vmatmul.msk.f32.gmra.mxu0 %vm674_vm2, %v8961_v47  ;;  %v15725_v59 = vld [vmem:[#allocation33_spill] sm:$0xff] }
 0x79b   : > { %11174 = vmatmul.msk.f32.gmra.mxu2 %vm674_vm2, %v8286_v61  ;;  %11278 = vmatmul.msk.f32.gmra.mxu1 %vm674_vm2, %v9311_v14  ;;  %v7880_v24 = vadd.f32 %v15725_v59, %v7479_v54  ;;  %v9312_v61 = vld [vmem:[#allocation2 + $0x5a] sm:$0xff] }
 0x79c   : > { %v15726_v14 = vld [vmem:[#allocation35_spill] sm:$0xff] }
 0x79d   : > { %v14700_v23 = vpop.f32.mrf.mxu3  ;;  %v8230_v22 = vadd.f32 %v15726_v14, %v7880_v24  ;;  %v15730_v59 = vld [vmem:[#allocation39_spill] sm:$0xff]  ;;  %v15732_v14 = vld [vmem:[#allocation6_spill] sm:$0xff] }
 0x79e   : > { %v8484_v8 = vpop.f32.mrf.mxu2 }
 0x79f   : > { %v14702_v63 = vadd.f32 %v8484_v8, %v8229_v1  ;;  %v7482_v1 = vadd.f32 %v14464_v17, %v15727_v56  ;;  %v15731_v17 = vld [vmem:[#allocation41_spill] sm:$0xff]  ;;  %v7485_v56 = vadd.f32 %v14480_v53, %v15732_v14 }
 0x7a1   : > { %15724 = vst [vmem:[#allocation32_spill] sm:$0xff] %v14702_v63  ;;  %v7881_v63 = vadd.f32 %v15730_v59, %v7482_v1  ;;  %v14732_v59 = vpop.f32.mrf.mxu1 }
 0x7a2   : > { %11194 = vmatmul.msk.f32.gmra.mxu3 %vm674_vm2, %v8961_v47  ;;  %11236 = vmatmul.msk.f32.gmra.mxu0 %vm674_vm2, %v8962_v32 }
 0x7a3   : > { %11175 = vmatmul.msk.f32.gmra.mxu2 %vm674_vm2, %v8287_v4  ;;  %11279 = vmatmul.msk.f32.gmra.mxu1 %vm674_vm2, %v9312_v61  ;;  %v8288_v4 = vld [vmem:[#allocation2 + $0x118] sm:$0xff]  ;;  %v9313_v61 = vld [vmem:[#allocation2 + $0x62] sm:$0xff]  ;;  %v8231_v24 = vadd.f32 %v15731_v17, %v7881_v63  ;;  %v9314_v63 = vld [vmem:[#allocation2 + $0x6a] sm:$0xff] }
 0x7a5   : > { %v14716_v54 = vpop.f32.mrf.mxu3 }
 0x7a6   : > { %15728 = vst [vmem:[#allocation36_spill] sm:$0xff] %v14716_v54  ;;  %v8487_v8 = vpop.f32.mrf.mxu2  ;;  %v8964_v54 = vld [vmem:[#allocation2 + $0x69] sm:$0xff] }
 0x7a7   : > { %v14718_v47 = vadd.f32 %v8487_v8, %v8230_v22  ;;  %v14730_v8 = vpop.f32.mrf.mxu0 }
 0x7a9   : > { %15729 = vst [vmem:[#allocation38_spill] sm:$0xff] %v14718_v47  ;;  %v7882_v47 = vadd.f32 %v14484_v49, %v7485_v56 }
 0x7aa   : > { %11195 = vmatmul.msk.f32.gmra.mxu3 %vm674_vm2, %v8962_v32  ;;  %11237 = vmatmul.msk.f32.gmra.mxu0 %vm674_vm2, %v8963_v62 }
 0x7ab   : > { %11176 = vmatmul.msk.f32.gmra.mxu2 %vm674_vm2, %v8288_v4  ;;  %11280 = vmatmul.msk.f32.gmra.mxu1 %vm674_vm2, %v9313_v61  ;;  %v8289_v4 = vld [vmem:[#allocation2 + $0x120] sm:$0xff]  ;;  %v8232_v53 = vadd.f32 %v14486_v35, %v7882_v47  ;;  %v15734_v61 = vld [vmem:[#allocation53_spill] sm:$0xff]  ;;  %v9315_v35 = vld [vmem:[#allocation2 + $0x72] sm:$0xff] }
 0x7ac   : > { %v7488_v17 = vadd.f32 %v14496_v2, %v15734_v61  ;;  %v15736_v47 = vld [vmem:[#allocation7_spill] sm:$0xff] }
 0x7ad   : > { %v14728_v22 = vpop.f32.mrf.mxu3 }
 0x7ae   : > { %v8490_v1 = vpop.f32.mrf.mxu2 }
 0x7af   : > { %v14734_v32 = vadd.f32 %v8490_v1, %v8231_v24  ;;  %v14748_v56 = vpop.f32.mrf.mxu0  ;;  %v14751_v1 = vpop.f32.mrf.mxu1 }
 0x7b1   : > { %15733 = vst [vmem:[#allocation40_spill] sm:$0xff] %v14734_v32  ;;  %v8965_v32 = vld [vmem:[#allocation2 + $0x71] sm:$0xff] }
 0x7b2   : > { %11196 = vmatmul.msk.f32.gmra.mxu3 %vm674_vm2, %v8963_v62  ;;  %11238 = vmatmul.msk.f32.gmra.mxu0 %vm674_vm2, %v8964_v54  ;;  %v7883_v62 = vadd.f32 %v14500_v48, %v7488_v17 }
 0x7b3   : > { %11177 = vmatmul.msk.f32.gmra.mxu2 %vm674_vm2, %v8289_v4  ;;  %11281 = vmatmul.msk.f32.gmra.mxu1 %vm674_vm2, %v9314_v63  ;;  %v8290_v4 = vld [vmem:[#allocation2 + $0x128] sm:$0xff]  ;;  %v7491_v63 = vadd.f32 %v14512_v20, %v15736_v47 }
 0x7b4   : > { %v8233_v2 = vadd.f32 %v14502_v18, %v7883_v62  ;;  %v15737_v62 = vld [vmem:[#allocation8_spill] sm:$0xff] }
 0x7b5   : > { %v14744_v24 = vpop.f32.mrf.mxu3  ;;  %v7884_v17 = vadd.f32 %v14516_v7, %v7491_v63  ;;  %v7494_v7 = vadd.f32 %v14528_v10, %v15737_v62  ;;  %v8967_v63 = vld [vmem:[#allocation2 + $0x81] sm:$0xff] }
 0x7b6   : > { %v8493_v14 = vpop.f32.mrf.mxu2 }
 0x7b7   : > { %v14746_v49 = vadd.f32 %v8493_v14, %v8232_v53  ;;  %v14765_v14 = vpop.f32.mrf.mxu0  ;;  %v14769_v18 = vpop.f32.mrf.mxu1  ;;  %v8234_v20 = vadd.f32 %v14518_v58, %v7884_v17  ;;  %v15738_v17 = vld [vmem:[#allocation9_spill] sm:$0xff] }
 0x7b9   : > { %15735 = vst [vmem:[#allocation42_spill] sm:$0xff] %v14746_v49  ;;  %v8291_v49 = vld [vmem:[#allocation2 + $0x130] sm:$0xff] }
 0x7ba   : > { %11197 = vmatmul.msk.f32.gmra.mxu3 %vm674_vm2, %v8964_v54  ;;  %11239 = vmatmul.msk.f32.gmra.mxu0 %vm674_vm2, %v8965_v32  ;;  %v8966_v54 = vld [vmem:[#allocation2 + $0x79] sm:$0xff] }
 0x7bb   : > { %11178 = vmatmul.msk.f32.gmra.mxu2 %vm674_vm2, %v8290_v4  ;;  %11282 = vmatmul.msk.f32.gmra.mxu1 %vm674_vm2, %v9315_v35  ;;  %v9316_v4 = vld [vmem:[#allocation2 + $0x7a] sm:$0xff] }
 0x7bd   : > { %v14760_v53 = vpop.f32.mrf.mxu3 }
 0x7be   : > { %v8496_v48 = vpop.f32.mrf.mxu2 }
 0x7bf   : > { %v14762_v61 = vadd.f32 %v8496_v48, %v8233_v2  ;;  %v8292_v48 = vld [vmem:[#allocation2 + $0x138] sm:$0xff]  ;;  %v14785_v58 = vpop.f32.mrf.mxu0 }
 0x7c2   : > { %11198 = vmatmul.msk.f32.gmra.mxu3 %vm674_vm2, %v8965_v32  ;;  %11240 = vmatmul.msk.f32.gmra.mxu0 %vm674_vm2, %v8966_v54  ;;  %v7885_v32 = vadd.f32 %v14532_v0, %v7494_v7 }
 0x7c3   : > { %11179 = vmatmul.msk.f32.gmra.mxu2 %vm674_vm2, %v8291_v49  ;;  %11283 = vmatmul.msk.f32.gmra.mxu1 %vm674_vm2, %v9316_v4  ;;  %v9317_v49 = vld [vmem:[#allocation2 + $0x82] sm:$0xff]  ;;  %v7497_v4 = vadd.f32 %v14544_v27, %v15738_v17  ;;  %v15740_v27 = vld [vmem:[#allocation34_spill] sm:$0xff] }
 0x7c4   : > { %v8235_v10 = vadd.f32 %v14534_v28, %v7885_v32  ;;  %v7500_v32 = vadd.f32 %v14560_v34, %v15740_v27 }
 0x7c5   : > { %v14776_v35 = vpop.f32.mrf.mxu3  ;;  %v7886_v7 = vadd.f32 %v14548_v40, %v7497_v4 }
 0x7c6   : > { %v8499_v2 = vpop.f32.mrf.mxu2 }
 0x7c7   : > { %v14778_v47 = vadd.f32 %v8499_v2, %v8234_v20  ;;  %v14790_v20 = vpop.f32.mrf.mxu1  ;;  %v8968_v2 = vld [vmem:[#allocation2 + $0x89] sm:$0xff]  ;;  %v8236_v28 = vadd.f32 %v14550_v45, %v7886_v7  ;;  %v14806_v17 = vpop.f32.mrf.mxu0  ;;  %v9319_v45 = vld [vmem:[#allocation2 + $0x92] sm:$0xff] }
 0x7c8   : > { %v15742_v7 = vld [vmem:[#allocation10_spill] sm:$0xff] }
 0x7ca   : > { %11199 = vmatmul.msk.f32.gmra.mxu3 %vm674_vm2, %v8966_v54  ;;  %11241 = vmatmul.msk.f32.gmra.mxu0 %vm674_vm2, %v8967_v63 }
 0x7cb   : > { %11180 = vmatmul.msk.f32.gmra.mxu2 %vm674_vm2, %v8292_v48  ;;  %11284 = vmatmul.msk.f32.gmra.mxu1 %vm674_vm2, %v9317_v49  ;;  %v8293_v48 = vld [vmem:[#allocation2 + $0x140] sm:$0xff]  ;;  %v9318_v49 = vld [vmem:[#allocation2 + $0x8a] sm:$0xff] }
 0x7cd   : > { %v14792_v0 = vpop.f32.mrf.mxu3 }
 0x7ce   : > { %v8502_v62 = vpop.f32.mrf.mxu2 }
 0x7cf   : > { %v14794_v54 = vadd.f32 %v8502_v62, %v8235_v10  ;;  %v14808_v4 = vpop.f32.mrf.mxu1  ;;  %v7887_v62 = vadd.f32 %v14564_v46, %v7500_v32  ;;  %v14824_v32 = vpop.f32.mrf.mxu0 }
 0x7d1   : > { %15739 = vst [vmem:[#allocation45_spill] sm:$0xff] %v14794_v54  ;;  %v8969_v54 = vld [vmem:[#allocation2 + $0x91] sm:$0xff]  ;;  %v8237_v34 = vadd.f32 %v14566_v15, %v7887_v62  ;;  %v9320_v15 = vld [vmem:[#allocation2 + $0x9a] sm:$0xff] }
 0x7d2   : > { %11200 = vmatmul.msk.f32.gmra.mxu3 %vm674_vm2, %v8967_v63  ;;  %11242 = vmatmul.msk.f32.gmra.mxu0 %vm674_vm2, %v8968_v2  ;;  %v15744_v62 = vld [vmem:[#allocation11_spill] sm:$0xff] }
 0x7d3   : > { %11181 = vmatmul.msk.f32.gmra.mxu2 %vm674_vm2, %v8293_v48  ;;  %11285 = vmatmul.msk.f32.gmra.mxu1 %vm674_vm2, %v9318_v49  ;;  %v8294_v48 = vld [vmem:[#allocation2 + $0x148] sm:$0xff]  ;;  %v7503_v49 = vadd.f32 %v14576_v19, %v15742_v7 }
 0x7d5   : > { %v14804_v10 = vpop.f32.mrf.mxu3 }
 0x7d6   : > { %v8505_v40 = vpop.f32.mrf.mxu2 }
 0x7d7   : > { %v14810_v63 = vadd.f32 %v8505_v40, %v8236_v28  ;;  %v14827_v40 = vpop.f32.mrf.mxu1 }
 0x7d9   : > { %15741 = vst [vmem:[#allocation48_spill] sm:$0xff] %v14810_v63  ;;  %v8970_v63 = vld [vmem:[#allocation2 + $0x99] sm:$0xff] }
 0x7da   : > { %11201 = vmatmul.msk.f32.gmra.mxu3 %vm674_vm2, %v8968_v2  ;;  %11243 = vmatmul.msk.f32.gmra.mxu0 %vm674_vm2, %v8969_v54  ;;  %v7888_v2 = vadd.f32 %v14580_v43, %v7503_v49 }
 0x7db   : > { %11182 = vmatmul.msk.f32.gmra.mxu2 %vm674_vm2, %v8294_v48  ;;  %11286 = vmatmul.msk.f32.gmra.mxu1 %vm674_vm2, %v9319_v45  ;;  %v8295_v48 = vld [vmem:[#allocation2 + $0x150] sm:$0xff]  ;;  %v7506_v45 = vadd.f32 %v14592_v60, %v15744_v62 }
 0x7dc   : > { %v8238_v19 = vadd.f32 %v14582_v13, %v7888_v2  ;;  %v15745_v2 = vld [vmem:[#allocation12_spill] sm:$0xff] }
 0x7dd   : > { %v14820_v28 = vpop.f32.mrf.mxu3  ;;  %v7889_v49 = vadd.f32 %v14596_v5, %v7506_v45  ;;  %v7509_v5 = vadd.f32 %v14608_v51, %v15745_v2  ;;  %v15746_v51 = vld [vmem:[#allocation47_spill] sm:$0xff] }
 0x7de   : > { %v8508_v27 = vpop.f32.mrf.mxu2 }
 0x7df   : > { %v14822_v46 = vadd.f32 %v8508_v27, %v8237_v34  ;;  %v14841_v27 = vpop.f32.mrf.mxu0  ;;  %v14845_v13 = vpop.f32.mrf.mxu1  ;;  %v8239_v60 = vadd.f32 %v14599_v42, %v7889_v49  ;;  %v7890_v45 = vadd.f32 %v14613_v26, %v7509_v5  ;;  %v7512_v49 = vadd.f32 %v14624_v50, %v15746_v51 }
 0x7e1   : > { %15743 = vst [vmem:[#allocation22_spill] sm:$0xff] %v14822_v46  ;;  %v8296_v46 = vld [vmem:[#allocation2 + $0x158] sm:$0xf] }
 0x7e2   : > { %11202 = vmatmul.msk.f32.gmra.mxu3 %vm674_vm2, %v8969_v54  ;;  %11244 = vmatmul.msk.f32.gmra.mxu0 %vm674_vm2, %v8970_v63  ;;  %v8971_v54 = vld [vmem:[#allocation2 + $0xa1] sm:$0xff] }
 0x7e3   : > { %11183 = vmatmul.msk.f32.gmra.mxu2 %vm674_vm2, %v8295_v48  ;;  %11287 = vmatmul.msk.f32.gmra.mxu1 %vm674_vm2, %v9320_v15  ;;  %v9321_v48 = vld [vmem:[#allocation2 + $0xa2] sm:$0xff] }
 0x7e5   : > { %v14836_v34 = vpop.f32.mrf.mxu3 }
 0x7e6   : > { %v8511_v43 = vpop.f32.mrf.mxu2 }
 0x7e7   : > { %v14838_v7 = vadd.f32 %v8511_v43, %v8238_v19  ;;  %v8972_v43 = vld [vmem:[#allocation2 + $0xa9] sm:$0xff]  ;;  %v14862_v42 = vpop.f32.mrf.mxu0 }
 0x7ea   : > { %11203 = vmatmul.msk.f32.gmra.mxu3 %vm674_vm2, %v8970_v63  ;;  %11245 = vmatmul.msk.f32.gmra.mxu0 %vm674_vm2, %v8971_v54 }
 0x7eb   : > { %11184 = vmatmul.msk.f32.gmra.mxu2 %vm674_vm2, %v8296_v46  ;;  %11288 = vmatmul.msk.f32.gmra.mxu1 %vm674_vm2, %v9321_v48  ;;  %v9322_v46 = vld [vmem:[#allocation2 + $0xaa] sm:$0xff] }
 0x7ec   : > { %v9656_v48 = vld [vmem:[#allocation2 + $0x2b] sm:$0xff] }
 0x7ed   : > { %v8792_v15 = vpop.f32.mrf.mxu3 }
 0x7ee   : > { %v8514_v19 = vpop.f32.mrf.mxu2  ;;  %v14853_v62 = vadd.f32 %v8792_v15, %v14482_v38  ;;  %v8240_v38 = vadd.f32 %v14617_v57, %v7890_v45  ;;  %v7891_v15 = vadd.f32 %v14633_v52, %v7512_v49  ;;  %v9323_v57 = vld [vmem:[#allocation2 + $0xb2] sm:$0xff] }
 0x7ef   : > { %v14855_v63 = vadd.f32 %v8514_v19, %v8239_v60  ;;  %v14867_v60 = vpop.f32.mrf.mxu1  ;;  %v8973_v19 = vld [vmem:[#allocation2 + $0xb1] sm:$0xff] }
 0x7f0   : > { %v9657_v45 = vld [vmem:[#allocation2 + $0x33] sm:$0xff]  ;;  %v8241_v50 = vadd.f32 %v14638_v44, %v7891_v15 }
 0x7f1   : > { %v9324_v44 = vld [vmem:[#allocation2 + $0xba] sm:$0xff]  ;;  %v15748_v15 = vld [vmem:[#allocation14_spill] sm:$0xff] }
 0x7f2   : > { %11204 = vmatmul.msk.f32.gmra.mxu3 %vm674_vm2, %v8971_v54  ;;  %11246 = vmatmul.msk.f32.gmra.mxu0 %vm674_vm2, %v8972_v43 }
 0x7f3   : > { %11289 = vmatmul.msk.f32.gmra.mxu1 %vm674_vm2, %v9322_v46  ;;  %11316 = vmatmul.msk.f32.vlgmr.msra.gmra.mxu2 %vm674_vm2, %v9656_v48  ;;  %v15747_v46 = vld [vmem:[#allocation13_spill] sm:$0xff] }
 0x7f5   : > { %v8795_v26 = vpop.f32.mrf.mxu3 }
 0x7f6   : > { %v8517_v2 = vpop.f32.mrf.mxu2  ;;  %v14870_v54 = vadd.f32 %v8795_v26, %v14498_v31  ;;  %v7515_v31 = vadd.f32 %v14640_v21, %v15747_v46  ;;  %v9658_v21 = vld [vmem:[#allocation2 + $0x3b] sm:$0xff] }
 0x7f7   : > { %v14872_v5 = vadd.f32 %v8517_v2, %v8240_v38  ;;  %v14882_v38 = vpop.f32.mrf.mxu0  ;;  %v8974_v2 = vld [vmem:[#allocation2 + $0xb9] sm:$0xff] }
 0x7f8   : > { %v7892_v26 = vadd.f32 %v14654_v55, %v7515_v31 }
 0x7fa   : > { %11205 = vmatmul.msk.f32.gmra.mxu3 %vm674_vm2, %v8972_v43  ;;  %11247 = vmatmul.msk.f32.gmra.mxu0 %vm674_vm2, %v8973_v19  ;;  %v14887_v43 = vpop.f32.mrf.mxu1 }
 0x7fb   : > { %11290 = vmatmul.msk.f32.gmra.mxu1 %vm674_vm2, %v9323_v57  ;;  %11317 = vmatmul.msk.f32.gmra.mxu2 %vm674_vm2, %v9657_v45  ;;  %v7518_v57 = vadd.f32 %v14652_v16, %v15748_v15  ;;  %v9659_v16 = vld [vmem:[#allocation2 + $0x43] sm:$0xff] }
 0x7fd   : > { %v8798_v48 = vpop.f32.mrf.mxu3  ;;  %v7893_v31 = vadd.f32 %v14672_v39, %v7518_v57  ;;  %v8976_v57 = vld [vmem:[#allocation2 + $0xc9] sm:$0xff] }
 0x7fe   : > { %v8520_v52 = vpop.f32.mrf.mxu2  ;;  %v14885_v51 = vadd.f32 %v8798_v48, %v14514_v9  ;;  %v8242_v9 = vadd.f32 %v14656_v12, %v7892_v26  ;;  %v9325_v12 = vld [vmem:[#allocation2 + $0xc2] sm:$0xff]  ;;  %v15749_v26 = vld [vmem:[#allocation15_spill] sm:$0xff] }
 0x7ff   : > { %v14889_v49 = vadd.f32 %v8520_v52, %v8241_v50  ;;  %v8975_v52 = vld [vmem:[#allocation2 + $0xc1] sm:$0xff] }
 0x802   : > { %11206 = vmatmul.msk.f32.gmra.mxu3 %vm674_vm2, %v8973_v19  ;;  %11248 = vmatmul.msk.f32.gmra.mxu0 %vm674_vm2, %v8974_v2  ;;  %v14904_v19 = vpop.f32.mrf.mxu0  ;;  %v14907_v48 = vpop.f32.mrf.mxu1 }
 0x803   : > { %11291 = vmatmul.msk.f32.gmra.mxu1 %vm674_vm2, %v9324_v44  ;;  %11318 = vmatmul.msk.f32.gmra.mxu2 %vm674_vm2, %v9658_v21  ;;  %v7521_v44 = vadd.f32 %v14668_v36, %v15749_v26  ;;  %v15750_v36 = vld [vmem:[#allocation52_spill] sm:$0xff] }
 0x805   : > { %v8801_v45 = vpop.f32.mrf.mxu3 }
 0x806   : > { %v8523_v50 = vpop.f32.mrf.mxu2  ;;  %v14900_v55 = vadd.f32 %v8801_v45, %v14530_v30  ;;  %v8243_v30 = vadd.f32 %v14675_v3, %v7893_v31  ;;  %v9326_v3 = vld [vmem:[#allocation2 + $0xca] sm:$0xff] }
 0x807   : > { %v14902_v46 = vadd.f32 %v8523_v50, %v8242_v9  ;;  %v9660_v50 = vld [vmem:[#allocation2 + $0x4b] sm:$0xff] }
 0x80a   : > { %11207 = vmatmul.msk.f32.gmra.mxu3 %vm674_vm2, %v8974_v2  ;;  %11249 = vmatmul.msk.f32.gmra.mxu0 %vm674_vm2, %v8975_v52  ;;  %v7894_v2 = vadd.f32 %v14689_v11, %v7521_v44  ;;  %v14922_v45 = vpop.f32.mrf.mxu0  ;;  %v14926_v31 = vpop.f32.mrf.mxu1  ;;  %v7524_v11 = vadd.f32 %v14684_v29, %v15750_v36  ;;  %v8977_v44 = vld [vmem:[#allocation2 + $0xd1] sm:$0xff] }
 0x80b   : > { %11292 = vmatmul.msk.f32.gmra.mxu1 %vm674_vm2, %v9325_v12  ;;  %11319 = vmatmul.msk.f32.gmra.mxu2 %vm674_vm2, %v9659_v16 }
 0x80c   : > { %v7895_v26 = vadd.f32 %v14709_v41, %v7524_v11 }
 0x80d   : > { %v8804_v21 = vpop.f32.mrf.mxu3 }
 0x80e   : > { %v8526_v39 = vpop.f32.mrf.mxu2  ;;  %v14917_v9 = vadd.f32 %v8804_v21, %v14546_v33  ;;  %v8244_v33 = vadd.f32 %v14693_v6, %v7894_v2  ;;  %v9327_v21 = vld [vmem:[#allocation2 + $0xd2] sm:$0xff]  ;;  %v15751_v6 = vld [vmem:[#allocation16_spill] sm:$0xff] }
 0x80f   : > { %v14919_v15 = vadd.f32 %v8526_v39, %v8243_v30  ;;  %v9661_v39 = vld [vmem:[#allocation2 + $0x53] sm:$0xff]  ;;  %v7527_v2 = vadd.f32 %v14700_v23, %v15751_v6 }
 0x811   : > { %v7896_v11 = vadd.f32 %v14730_v8, %v7527_v2  ;;  %v15755_v2 = vld [vmem:[#allocation44_spill] sm:$0xff] }
 0x812   : > { %11208 = vmatmul.msk.f32.gmra.mxu3 %vm674_vm2, %v8975_v52  ;;  %11250 = vmatmul.msk.f32.gmra.mxu0 %vm674_vm2, %v8976_v57  ;;  %v14943_v29 = vpop.f32.mrf.mxu0 }
 0x813   : > { %11293 = vmatmul.msk.f32.gmra.mxu1 %vm674_vm2, %v9326_v3  ;;  %11320 = vmatmul.msk.f32.gmra.mxu2 %vm674_vm2, %v9660_v50  ;;  %v14948_v3 = vpop.f32.mrf.mxu1  ;;  %v8246_v23 = vadd.f32 %v14732_v59, %v7896_v11  ;;  %v9329_v59 = vld [vmem:[#allocation2 + $0xe2] sm:$0xff] }
 0x814   : > { %v9663_v11 = vld [vmem:[#allocation2 + $0x63] sm:$0xff] }
 0x815   : > { %v8807_v12 = vpop.f32.mrf.mxu3 }
 0x816   : > { %v8529_v16 = vpop.f32.mrf.mxu2  ;;  %v14934_v30 = vadd.f32 %v8807_v12, %v14562_v37  ;;  %v8245_v37 = vadd.f32 %v14714_v25, %v7895_v26  ;;  %v8978_v12 = vld [vmem:[#allocation2 + $0xd9] sm:$0xff]  ;;  %v15753_v26 = vld [vmem:[#allocation17_spill] sm:$0xff] }
 0x817   : > { %v14936_v52 = vadd.f32 %v8529_v16, %v8244_v33  ;;  %v9328_v25 = vld [vmem:[#allocation2 + $0xda] sm:$0xff] }
 0x818   : > { %v9662_v16 = vld [vmem:[#allocation2 + $0x5b] sm:$0xff] }
 0x81a   : > { %11209 = vmatmul.msk.f32.gmra.mxu3 %vm674_vm2, %v8976_v57  ;;  %11251 = vmatmul.msk.f32.gmra.mxu0 %vm674_vm2, %v8977_v44  ;;  %v15752_v57 = vld [vmem:[#allocation43_spill] sm:$0xff]  ;;  %v14963_v6 = vpop.f32.mrf.mxu0 }
 0x81b   : > { %11294 = vmatmul.msk.f32.gmra.mxu1 %vm674_vm2, %v9327_v21  ;;  %11321 = vmatmul.msk.f32.gmra.mxu2 %vm674_vm2, %v9661_v39  ;;  %v15754_v21 = vld [vmem:[#allocation36_spill] sm:$0xff] }
 0x81c   : > { %v7530_v39 = vadd.f32 %v15754_v21, %v15753_v26  ;;  %v15757_v26 = vld [vmem:[#allocation18_spill] sm:$0xff] }
 0x81d   : > { %v8810_v41 = vpop.f32.mrf.mxu3  ;;  %v7533_v21 = vadd.f32 %v14728_v22, %v15757_v26  ;;  %v9664_v22 = vld [vmem:[#allocation2 + $0x6b] sm:$0xff] }
 0x81e   : > { %v8532_v50 = vpop.f32.mrf.mxu2  ;;  %v14951_v33 = vadd.f32 %v8810_v41, %v15752_v57  ;;  %v7897_v57 = vadd.f32 %v14748_v56, %v7530_v39 }
 0x81f   : > { %v14953_v36 = vadd.f32 %v8532_v50, %v8245_v37 }
 0x822   : > { %11210 = vmatmul.msk.f32.gmra.mxu3 %vm674_vm2, %v8977_v44  ;;  %11252 = vmatmul.msk.f32.gmra.mxu0 %vm674_vm2, %v8978_v12  ;;  %v14968_v44 = vpop.f32.mrf.mxu1 }
 0x823   : > { %11295 = vmatmul.msk.f32.gmra.mxu1 %vm674_vm2, %v9328_v25  ;;  %11322 = vmatmul.msk.f32.gmra.mxu2 %vm674_vm2, %v9662_v16  ;;  %v8979_v25 = vld [vmem:[#allocation2 + $0xe1] sm:$0xff]  ;;  %v8247_v16 = vadd.f32 %v14751_v1, %v7897_v57  ;;  %v9330_v1 = vld [vmem:[#allocation2 + $0xea] sm:$0xff] }
 0x825   : > { %v8813_v37 = vpop.f32.mrf.mxu3 }
 0x826   : > { %v8535_v8 = vpop.f32.mrf.mxu2  ;;  %v14966_v41 = vadd.f32 %v8813_v37, %v15755_v2  ;;  %v7898_v2 = vadd.f32 %v14765_v14, %v7533_v21  ;;  %v15761_v21 = vld [vmem:[#allocation49_spill] sm:$0xff] }
 0x827   : > { %v14970_v50 = vadd.f32 %v8535_v8, %v8246_v23  ;;  %v15758_v8 = vld [vmem:[#allocation46_spill] sm:$0xff] }
 0x828   : > { %v8248_v57 = vadd.f32 %v14769_v18, %v7898_v2  ;;  %v9331_v18 = vld [vmem:[#allocation2 + $0xf2] sm:$0xff] }
 0x829   : > { %15756 = vst [vmem:[#allocation24_spill] sm:$0xff] %v14970_v50  ;;  %v9665_v2 = vld [vmem:[#allocation2 + $0x73] sm:$0xff] }
 0x82a   : > { %11211 = vmatmul.msk.f32.gmra.mxu3 %vm674_vm2, %v8978_v12  ;;  %11253 = vmatmul.msk.f32.gmra.mxu0 %vm674_vm2, %v8979_v25  ;;  %v14985_v12 = vpop.f32.mrf.mxu0  ;;  %v14988_v50 = vpop.f32.mrf.mxu1 }
 0x82b   : > { %11296 = vmatmul.msk.f32.gmra.mxu1 %vm674_vm2, %v9329_v59  ;;  %11323 = vmatmul.msk.f32.gmra.mxu2 %vm674_vm2, %v9663_v11  ;;  %v8980_v59 = vld [vmem:[#allocation2 + $0xe9] sm:$0xff]  ;;  %v15760_v11 = vld [vmem:[#allocation19_spill] sm:$0xff] }
 0x82d   : > { %v8816_v23 = vpop.f32.mrf.mxu3 }
 0x82e   : > { %v8538_v37 = vpop.f32.mrf.mxu2  ;;  %v14981_v56 = vadd.f32 %v8816_v23, %v15758_v8  ;;  %v8981_v8 = vld [vmem:[#allocation2 + $0xf1] sm:$0xff] }
 0x82f   : > { %v14983_v39 = vadd.f32 %v8538_v37, %v8247_v16  ;;  %v7536_v16 = vadd.f32 %v14744_v24, %v15760_v11 }
 0x831   : > { %15759 = vst [vmem:[#allocation25_spill] sm:$0xff] %v14983_v39 }
 0x832   : > { %11212 = vmatmul.msk.f32.gmra.mxu3 %vm674_vm2, %v8979_v25  ;;  %11254 = vmatmul.msk.f32.gmra.mxu0 %vm674_vm2, %v8980_v59  ;;  %v7899_v25 = vadd.f32 %v14785_v58, %v7536_v16  ;;  %v15003_v39 = vpop.f32.mrf.mxu0  ;;  %v15763_v16 = vld [vmem:[#allocation50_spill] sm:$0xff] }
 0x833   : > { %11297 = vmatmul.msk.f32.gmra.mxu1 %vm674_vm2, %v9330_v1  ;;  %11324 = vmatmul.msk.f32.gmra.mxu2 %vm674_vm2, %v9664_v22  ;;  %v15007_v1 = vpop.f32.mrf.mxu1  ;;  %v15762_v22 = vld [vmem:[#allocation20_spill] sm:$0xff] }
 0x834   : > { %v8249_v24 = vadd.f32 %v14790_v20, %v7899_v25  ;;  %v7539_v58 = vadd.f32 %v14760_v53, %v15762_v22  ;;  %v15764_v25 = vld [vmem:[#allocation21_spill] sm:$0xff] }
 0x835   : > { %v8819_v26 = vpop.f32.mrf.mxu3 }
 0x836   : > { %v8541_v14 = vpop.f32.mrf.mxu2  ;;  %v14998_v23 = vadd.f32 %v8819_v26, %v15761_v21  ;;  %v8982_v21 = vld [vmem:[#allocation2 + $0xf9] sm:$0xff] }
 0x837   : > { %v15000_v37 = vadd.f32 %v8541_v14, %v8248_v57  ;;  %v7900_v14 = vadd.f32 %v14806_v17, %v7539_v58 }
 0x839   : > { %v8250_v20 = vadd.f32 %v14808_v4, %v7900_v14  ;;  %v9333_v4 = vld [vmem:[#allocation2 + $0x102] sm:$0xff] }
 0x83a   : > { %11213 = vmatmul.msk.f32.gmra.mxu3 %vm674_vm2, %v8980_v59  ;;  %11255 = vmatmul.msk.f32.gmra.mxu0 %vm674_vm2, %v8981_v8  ;;  %v15024_v53 = vpop.f32.mrf.mxu0  ;;  %v9667_v14 = vld [vmem:[#allocation2 + $0x83] sm:$0xff] }
 0x83b   : > { %11298 = vmatmul.msk.f32.gmra.mxu1 %vm674_vm2, %v9331_v18  ;;  %11325 = vmatmul.msk.f32.gmra.mxu2 %vm674_vm2, %v9665_v2  ;;  %v9332_v18 = vld [vmem:[#allocation2 + $0xfa] sm:$0xff]  ;;  %v15029_v22 = vpop.f32.mrf.mxu1 }
 0x83c   : > { %v9666_v2 = vld [vmem:[#allocation2 + $0x7b] sm:$0xff] }
 0x83d   : > { %v8822_v57 = vpop.f32.mrf.mxu3 }
 0x83e   : > { %v8544_v11 = vpop.f32.mrf.mxu2  ;;  %v15015_v26 = vadd.f32 %v8822_v57, %v15763_v16 }
 0x83f   : > { %v15017_v59 = vadd.f32 %v8544_v11, %v8249_v24  ;;  %v7542_v24 = vadd.f32 %v14776_v35, %v15764_v25 }
 0x841   : > { %v7901_v16 = vadd.f32 %v14824_v32, %v7542_v24  ;;  %v15768_v24 = vld [vmem:[#allocation54_spill] sm:$0xff] }
 0x842   : > { %11214 = vmatmul.msk.f32.gmra.mxu3 %vm674_vm2, %v8981_v8  ;;  %11256 = vmatmul.msk.f32.gmra.mxu0 %vm674_vm2, %v8982_v21  ;;  %v15765_v8 = vld [vmem:[#allocation51_spill] sm:$0xff] }
 0x843   : > { %11299 = vmatmul.msk.f32.gmra.mxu1 %vm674_vm2, %v9332_v18  ;;  %11326 = vmatmul.msk.f32.gmra.mxu2 %vm674_vm2, %v9666_v2  ;;  %v8983_v18 = vld [vmem:[#allocation2 + $0x101] sm:$0xff]  ;;  %v8251_v35 = vadd.f32 %v14827_v40, %v7901_v16  ;;  %v15767_v2 = vld [vmem:[#allocation23_spill] sm:$0xff]  ;;  %v9334_v40 = vld [vmem:[#allocation2 + $0x10a] sm:$0xff] }
 0x844   : > { %v7545_v25 = vadd.f32 %v14792_v0, %v15767_v2  ;;  %v9668_v0 = vld [vmem:[#allocation2 + $0x8b] sm:$0xff] }
 0x845   : > { %v8825_v17 = vpop.f32.mrf.mxu3 }
 0x846   : > { %v8547_v58 = vpop.f32.mrf.mxu2  ;;  %v15032_v57 = vadd.f32 %v8825_v17, %v15765_v8  ;;  %v15044_v17 = vpop.f32.mrf.mxu0 }
 0x847   : > { %v15034_v11 = vadd.f32 %v8547_v58, %v8250_v20 }
 0x849   : > { %15766 = vst [vmem:[#allocation3_spill] sm:$0xff] %v15034_v11  ;;  %v8984_v11 = vld [vmem:[#allocation2 + $0x109] sm:$0xff] }
 0x84a   : > { %11215 = vmatmul.msk.f32.gmra.mxu3 %vm674_vm2, %v8982_v21  ;;  %11257 = vmatmul.msk.f32.gmra.mxu0 %vm674_vm2, %v8983_v18  ;;  %v15049_v21 = vpop.f32.mrf.mxu1 }
 0x84b   : > { %11300 = vmatmul.msk.f32.gmra.mxu1 %vm674_vm2, %v9333_v4  ;;  %11327 = vmatmul.msk.f32.gmra.mxu2 %vm674_vm2, %v9667_v14  ;;  %v7902_v4 = vadd.f32 %v14841_v27, %v7545_v25  ;;  %v15770_v14 = vld [vmem:[#allocation27_spill] sm:$0xff] }
 0x84c   : > { %v7548_v2 = vadd.f32 %v14804_v10, %v15770_v14  ;;  %v9669_v10 = vld [vmem:[#allocation2 + $0x93] sm:$0xff] }
 0x84d   : > { %v8828_v20 = vpop.f32.mrf.mxu3  ;;  %v8252_v16 = vadd.f32 %v14845_v13, %v7902_v4  ;;  %v9335_v13 = vld [vmem:[#allocation2 + $0x112] sm:$0xff] }
 0x84e   : > { %v8550_v32 = vpop.f32.mrf.mxu2  ;;  %v15047_v58 = vadd.f32 %v8828_v20, %v15768_v24  ;;  %v7903_v24 = vadd.f32 %v14862_v42, %v7548_v2  ;;  %v15774_v2 = vld [vmem:[#allocation32_spill] sm:$0xff] }
 0x84f   : > { %v15051_v8 = vadd.f32 %v8550_v32, %v8251_v35  ;;  %v15771_v32 = vld [vmem:[#allocation55_spill] sm:$0xff] }
 0x850   : > { %v8253_v4 = vadd.f32 %v14867_v60, %v7903_v24  ;;  %v9336_v60 = vld [vmem:[#allocation2 + $0x11a] sm:$0xff] }
 0x851   : > { %15769 = vst [vmem:[#allocation26_spill] sm:$0xff] %v15051_v8  ;;  %v9670_v24 = vld [vmem:[#allocation2 + $0x9b] sm:$0xff] }
 0x852   : > { %11216 = vmatmul.msk.f32.gmra.mxu3 %vm674_vm2, %v8983_v18  ;;  %11258 = vmatmul.msk.f32.gmra.mxu0 %vm674_vm2, %v8984_v11  ;;  %v15066_v18 = vpop.f32.mrf.mxu0  ;;  %v15069_v8 = vpop.f32.mrf.mxu1 }
 0x853   : > { %11301 = vmatmul.msk.f32.gmra.mxu1 %vm674_vm2, %v9334_v40  ;;  %11328 = vmatmul.msk.f32.gmra.mxu2 %vm674_vm2, %v9668_v0  ;;  %v8985_v40 = vld [vmem:[#allocation2 + $0x111] sm:$0xff] }
 0x854   : > { %v15773_v0 = vld [vmem:[#allocation31_spill] sm:$0xff] }
 0x855   : > { %v8831_v35 = vpop.f32.mrf.mxu3 }
 0x856   : > { %v8553_v20 = vpop.f32.mrf.mxu2  ;;  %v15062_v27 = vadd.f32 %v8831_v35, %v15771_v32  ;;  %v8986_v32 = vld [vmem:[#allocation2 + $0x119] sm:$0xff] }
 0x857   : > { %v15064_v25 = vadd.f32 %v8553_v20, %v8252_v16  ;;  %v7551_v16 = vadd.f32 %v14820_v28, %v15773_v0 }
 0x859   : > { %15772 = vst [vmem:[#allocation28_spill] sm:$0xff] %v15064_v25 }
 0x85a   : > { %11217 = vmatmul.msk.f32.gmra.mxu3 %vm674_vm2, %v8984_v11  ;;  %11259 = vmatmul.msk.f32.gmra.mxu0 %vm674_vm2, %v8985_v40  ;;  %v7904_v11 = vadd.f32 %v14882_v38, %v7551_v16  ;;  %v15084_v25 = vpop.f32.mrf.mxu0  ;;  %v15776_v16 = vld [vmem:[#allocation38_spill] sm:$0xff] }
 0x85b   : > { %11302 = vmatmul.msk.f32.gmra.mxu1 %vm674_vm2, %v9335_v13  ;;  %11329 = vmatmul.msk.f32.gmra.mxu2 %vm674_vm2, %v9669_v10  ;;  %v15088_v13 = vpop.f32.mrf.mxu1  ;;  %v15775_v10 = vld [vmem:[#allocation37_spill] sm:$0xff] }
 0x85c   : > { %v8254_v28 = vadd.f32 %v14887_v43, %v7904_v11  ;;  %v7554_v38 = vadd.f32 %v14836_v34, %v15775_v10  ;;  %v15777_v10 = vld [vmem:[#allocation40_spill] sm:$0xff] }
 0x85d   : > { %v8834_v14 = vpop.f32.mrf.mxu3 }
 0x85e   : > { %v8556_v42 = vpop.f32.mrf.mxu2  ;;  %v15079_v35 = vadd.f32 %v8834_v14, %v15774_v2  ;;  %v8987_v2 = vld [vmem:[#allocation2 + $0x121] sm:$0xff] }
 0x85f   : > { %v15081_v20 = vadd.f32 %v8556_v42, %v8253_v4  ;;  %v7905_v42 = vadd.f32 %v14904_v19, %v7554_v38 }
 0x861   : > { %v8255_v43 = vadd.f32 %v14907_v48, %v7905_v42  ;;  %v9672_v48 = vld [vmem:[#allocation2 + $0xab] sm:$0xff] }
 0x862   : > { %11218 = vmatmul.msk.f32.gmra.mxu3 %vm674_vm2, %v8985_v40  ;;  %11260 = vmatmul.msk.f32.gmra.mxu0 %vm674_vm2, %v8986_v32  ;;  %v15105_v34 = vpop.f32.mrf.mxu0 }
 0x863   : > { %11303 = vmatmul.msk.f32.gmra.mxu1 %vm674_vm2, %v9336_v60  ;;  %11330 = vmatmul.msk.f32.gmra.mxu2 %vm674_vm2, %v9670_v24  ;;  %v9337_v60 = vld [vmem:[#allocation2 + $0x122] sm:$0xff]  ;;  %v15108_v11 = vpop.f32.mrf.mxu1 }
 0x864   : > { %v9671_v24 = vld [vmem:[#allocation2 + $0xa3] sm:$0xff] }
 0x865   : > { %v8837_v4 = vpop.f32.mrf.mxu3 }
 0x866   : > { %v8559_v0 = vpop.f32.mrf.mxu2  ;;  %v15096_v14 = vadd.f32 %v8837_v4, %v15776_v16  ;;  %v9265_v4 = vadd.f32 %v14922_v45, %v14853_v62  ;;  %v9338_v16 = vld [vmem:[#allocation2 + $0x12a] sm:$0xff] }
 0x867   : > { %v15098_v40 = vadd.f32 %v8559_v0, %v8254_v28  ;;  %v8988_v0 = vld [vmem:[#allocation2 + $0x129] sm:$0xff] }
 0x868   : > { %v9615_v42 = vadd.f32 %v14926_v31, %v9265_v4  ;;  %v9339_v31 = vld [vmem:[#allocation2 + $0x132] sm:$0xff] }
 0x86a   : > { %11219 = vmatmul.msk.f32.gmra.mxu3 %vm674_vm2, %v8986_v32  ;;  %11261 = vmatmul.msk.f32.gmra.mxu0 %vm674_vm2, %v8987_v2 }
 0x86b   : > { %11304 = vmatmul.msk.f32.gmra.mxu1 %vm674_vm2, %v9337_v60  ;;  %11331 = vmatmul.msk.f32.gmra.mxu2 %vm674_vm2, %v9671_v24  ;;  %v15125_v60 = vld [vmem:[%s15455_s7] ss:$0 sm:$0xff]  ;;  %v15127_v24 = vpop.f32.mrf.mxu0  ;;  %v15130_v45 = vpop.f32.mrf.mxu1 }
 0x86d   : > { %v8840_v28 = vpop.f32.mrf.mxu3 }
 0x86e   : > { %v8562_v19 = vpop.f32.mrf.mxu2  ;;  %v15111_v38 = vadd.f32 %v8840_v28, %v15777_v10  ;;  %v9673_v10 = vld [vmem:[#allocation2 + $0xb3] sm:$0xff] }
 0x86f   : > { %v15113_v32 = vadd.f32 %v8562_v19, %v8255_v43  ;;  %v9266_v43 = vadd.f32 %v14943_v29, %v14870_v54  ;;  %v8989_v19 = vld [vmem:[#allocation2 + $0x131] sm:$0xff] }
 0x871   : > { %v9616_v54 = vadd.f32 %v14948_v3, %v9266_v43  ;;  %v9340_v3 = vld [vmem:[#allocation2 + $0x13a] sm:$0xff] }
 0x872   : > { %11220 = vmatmul.msk.f32.gmra.mxu3 %vm674_vm2, %v8987_v2  ;;  %11262 = vmatmul.msk.f32.gmra.mxu0 %vm674_vm2, %v8988_v0  ;;  %v9674_v43 = vld [vmem:[#allocation2 + $0xbb] sm:$0xff] }
 0x873   : > { %11305 = vmatmul.msk.f32.gmra.mxu1 %vm674_vm2, %v9338_v16  ;;  %11332 = vmatmul.msk.f32.gmra.mxu2 %vm674_vm2, %v9672_v48  ;;  %v15147_v48 = vpop.f32.mrf.mxu0 }
 0x876   : > { %v9842_v62 = vpop.f32.mrf.mxu2 }
 0x877   : > { %v9965_v2 = vadd.f32 %v9842_v62, %v9615_v42  ;;  %v15151_v42 = vpop.f32.mrf.mxu1 }
 0x879   : > { %v10010_v28 = vadd.f32 %v15125_v60, %v9965_v2  ;;  %v8990_v2 = vld [vmem:[#allocation2 + $0x139] sm:$0xff] }
 0x87a   : > { %11221 = vmatmul.msk.f32.gmra.mxu3 %vm674_vm2, %v8988_v0  ;;  %11263 = vmatmul.msk.f32.gmra.mxu0 %vm674_vm2, %v8989_v19  ;;  %v9267_v0 = vadd.f32 %v14963_v6, %v14885_v51 }
 0x87b   : > { %v10051_v4 = vmax.f32 %v10010_v28, 0.0  ;;  %11306 = vmatmul.msk.f32.gmra.mxu1 %vm674_vm2, %v9339_v31  ;;  %11333 = vmatmul.msk.f32.gmra.mxu2 %vm674_vm2, %v9673_v10  ;;  %v9268_v10 = vadd.f32 %v14985_v12, %v14900_v55 }
 0x87c   : > { %v9617_v31 = vadd.f32 %v14968_v44, %v9267_v0 }
 0x87d   : > { %10092 = vst.msk [vmem:[%s15138_s11] sm:$0xff] %vm674_vm2, %v10051_v4  ;;  %v8991_v4 = vld [vmem:[#allocation2 + $0x141] sm:$0xff]  ;;  %v9618_v55 = vadd.f32 %v14988_v50, %v9268_v10 }
 0x87e   : > { %v9845_v29 = vpop.f32.mrf.mxu2 }
 0x87f   : > { %v9966_v16 = vadd.f32 %v9845_v29, %v9616_v54  ;;  %v15164_v54 = vpop.f32.mrf.mxu0  ;;  %v9341_v29 = vld [vmem:[#allocation2 + $0x142] sm:$0xff]  ;;  %v15168_v44 = vpop.f32.mrf.mxu1 }
 0x881   : > { %v10011_v62 = vadd.f32 %v15125_v60, %v9966_v16  ;;  %v9675_v16 = vld [vmem:[#allocation2 + $0xc3] sm:$0xff] }
 0x882   : > { %11222 = vmatmul.msk.f32.gmra.mxu3 %vm674_vm2, %v8989_v19  ;;  %11264 = vmatmul.msk.f32.gmra.mxu0 %vm674_vm2, %v8990_v2 }
 0x883   : > { %v10052_v28 = vmax.f32 %v10011_v62, 0.0  ;;  %11307 = vmatmul.msk.f32.gmra.mxu1 %vm674_vm2, %v9340_v3  ;;  %11334 = vmatmul.msk.f32.gmra.mxu2 %vm674_vm2, %v9674_v43  ;;  %v8992_v43 = vld [vmem:[#allocation2 + $0x149] sm:$0xff] }
 0x885   : > { %10093 = vst.msk [vmem:[%s15138_s11 + $0x8] sm:$0xff] %vm674_vm2, %v10052_v28  ;;  %v9342_v28 = vld [vmem:[#allocation2 + $0x14a] sm:$0xff] }
 0x886   : > { %v9848_v51 = vpop.f32.mrf.mxu2 }
 0x887   : > { %v9967_v6 = vadd.f32 %v9848_v51, %v9617_v31  ;;  %v9676_v31 = vld [vmem:[#allocation2 + $0xcb] sm:$0xff]  ;;  %v15182_v50 = vpop.f32.mrf.mxu0 }
 0x889   : > { %v10012_v19 = vadd.f32 %v15125_v60, %v9967_v6 }
 0x88a   : > { %11223 = vmatmul.msk.f32.gmra.mxu3 %vm674_vm2, %v8990_v2  ;;  %11265 = vmatmul.msk.f32.gmra.mxu0 %vm674_vm2, %v8991_v4  ;;  %v9269_v2 = vadd.f32 %v15003_v39, %v14917_v9  ;;  %v15185_v9 = vpop.f32.mrf.mxu1 }
 0x88b   : > { %v10053_v0 = vmax.f32 %v10012_v19, 0.0  ;;  %11308 = vmatmul.msk.f32.gmra.mxu1 %vm674_vm2, %v9341_v29  ;;  %11335 = vmatmul.msk.f32.gmra.mxu2 %vm674_vm2, %v9675_v16  ;;  %v9270_v19 = vadd.f32 %v15024_v53, %v14934_v30  ;;  %v8993_v29 = vld [vmem:[#allocation2 + $0x151] sm:$0xff] }
 0x88c   : > { %v9619_v6 = vadd.f32 %v15007_v1, %v9269_v2  ;;  %v9343_v16 = vld [vmem:[#allocation2 + $0x152] sm:$0xff]  ;;  %v9271_v2 = vadd.f32 %v15044_v17, %v14951_v33  ;;  %v8995_v17 = vld [vmem:[#allocation2 + $0x161] sm:$0xff] }
 0x88d   : > { %10094 = vst.msk [vmem:[%s15138_s11 + $0x10] sm:$0xff] %vm674_vm2, %v10053_v0  ;;  %v9677_v0 = vld [vmem:[#allocation2 + $0xd3] sm:$0xff] }
 0x88e   : > { %v9851_v12 = vpop.f32.mrf.mxu2 }
 0x88f   : > { %v9968_v62 = vadd.f32 %v9851_v12, %v9618_v55  ;;  %v9620_v55 = vadd.f32 %v15029_v22, %v9270_v19  ;;  %v15199_v30 = vpop.f32.mrf.mxu0  ;;  %v9344_v22 = vld [vmem:[#allocation2 + $0x15a] sm:$0xff]  ;;  %v9272_v19 = vadd.f32 %v15066_v18, %v14966_v41 }
 0x891   : > { %v10013_v3 = vadd.f32 %v15125_v60, %v9968_v62 }
 0x892   : > { %11224 = vmatmul.msk.f32.gmra.mxu3 %vm674_vm2, %v8991_v4  ;;  %11266 = vmatmul.msk.f32.gmra.mxu0 %vm674_vm2, %v8992_v43  ;;  %v15201_v12 = vpop.f32.mrf.mxu1 }
 0x893   : > { %v10054_v51 = vmax.f32 %v10013_v3, 0.0  ;;  %11309 = vmatmul.msk.f32.gmra.mxu1 %vm674_vm2, %v9342_v28  ;;  %11336 = vmatmul.msk.f32.gmra.mxu2 %vm674_vm2, %v9676_v31  ;;  %v9678_v28 = vld [vmem:[#allocation2 + $0xdb] sm:$0xff] }
 0x895   : > { %10095 = vst.msk [vmem:[%s15138_s11 + $0x18] sm:$0xff] %vm674_vm2, %v10054_v51  ;;  %v9621_v51 = vadd.f32 %v15049_v21, %v9271_v2  ;;  %v9679_v21 = vld [vmem:[#allocation2 + $0xe3] sm:$0xff] }
 0x896   : > { %v9854_v39 = vpop.f32.mrf.mxu2 }
 0x897   : > { %v9969_v10 = vadd.f32 %v9854_v39, %v9619_v6  ;;  %v15213_v39 = vpop.f32.mrf.mxu0 }
 0x899   : > { %v10014_v4 = vadd.f32 %v15125_v60, %v9969_v10  ;;  %v9345_v10 = vld [vmem:[#allocation2 + $0x162] sm:$0xff] }
 0x89a   : > { %11225 = vmatmul.msk.f32.gmra.mxu3 %vm674_vm2, %v8992_v43  ;;  %11267 = vmatmul.msk.f32.gmra.mxu0 %vm674_vm2, %v8993_v29  ;;  %v8994_v43 = vld [vmem:[#allocation2 + $0x159] sm:$0xff] }
 0x89b   : > { %v10055_v1 = vmax.f32 %v10014_v4, 0.0  ;;  %11310 = vmatmul.msk.f32.gmra.mxu1 %vm674_vm2, %v9343_v16  ;;  %11337 = vmatmul.msk.f32.gmra.mxu2 %vm674_vm2, %v9677_v0  ;;  %v15217_v4 = vpop.f32.mrf.mxu1  ;;  %v8646_v16 = vld [vmem:[#allocation2 + $0x159] sm:$0xf] }
 0x89d   : > { %10096 = vst.msk [vmem:[%s15138_s11 + $0x20] sm:$0xff] %vm674_vm2, %v10055_v1  ;;  %v9622_v1 = vadd.f32 %v15069_v8, %v9272_v19  ;;  %v9275_v19 = vadd.f32 %v15127_v24, %v15015_v26  ;;  %v9276_v26 = vadd.f32 %v15147_v48, %v15032_v57  ;;  %v9277_v57 = vadd.f32 %v15164_v54, %v15047_v58 }
 0x89e   : > { %v9857_v53 = vpop.f32.mrf.mxu2  ;;  %v9278_v58 = vadd.f32 %v15182_v50, %v15062_v27 }
 0x89f   : > { %v9970_v62 = vadd.f32 %v9857_v53, %v9620_v55  ;;  %v8996_v55 = vld [vmem:[#allocation2 + $0x169] sm:$0xf] }
 0x8a0   : > { %v9346_v53 = vld [vmem:[#allocation2 + $0x16a] sm:$0xf] }
 0x8a1   : > { %v10015_v3 = vadd.f32 %v15125_v60, %v9970_v62  ;;  %v9273_v62 = vadd.f32 %v15084_v25, %v14981_v56 }
 0x8a2   : > { %11226 = vmatmul.msk.f32.gmra.mxu3 %vm674_vm2, %v8993_v29  ;;  %11268 = vmatmul.msk.f32.gmra.mxu0 %vm674_vm2, %v8994_v43  ;;  %v9680_v43 = vld [vmem:[#allocation2 + $0xeb] sm:$0xff] }
 0x8a3   : > { %v10056_v31 = vmax.f32 %v10015_v3, 0.0  ;;  %11311 = vmatmul.msk.f32.gmra.mxu1 %vm674_vm2, %v9344_v22  ;;  %11338 = vmatmul.msk.f32.gmra.mxu2 %vm674_vm2, %v9678_v28  ;;  %v15230_v3 = vpop.f32.mrf.mxu0  ;;  %v15233_v22 = vpop.f32.mrf.mxu1  ;;  %v9623_v28 = vadd.f32 %v15088_v13, %v9273_v62 }
 0x8a5   : > { %10097 = vst.msk [vmem:[%s15138_s11 + $0x28] sm:$0xff] %vm674_vm2, %v10056_v31  ;;  %v9274_v31 = vadd.f32 %v15105_v34, %v14998_v23  ;;  %v15251_v34 = vpop.f32.mrf.mxu3 }
 0x8a6   : > { %v9860_v6 = vpop.f32.mrf.mxu2 }
 0x8a7   : > { %v9971_v33 = vadd.f32 %v9860_v6, %v9621_v51  ;;  %v9681_v6 = vld [vmem:[#allocation2 + $0xf3] sm:$0xff] }
 0x8a9   : > { %v10016_v29 = vadd.f32 %v15125_v60, %v9971_v33 }
 0x8aa   : > { %11227 = vmatmul.msk.f32.gmra.mxu3 %vm674_vm2, %v8646_v16  ;;  %11269 = vmatmul.msk.f32.gmra.mxu0 %vm674_vm2, %v8995_v17  ;;  %v9624_v17 = vadd.f32 %v15108_v11, %v9274_v31  ;;  %v9682_v16 = vld [vmem:[#allocation2 + $0xfb] sm:$0xff] }
 0x8ab   : > { %v10057_v0 = vmax.f32 %v10016_v29, 0.0  ;;  %11339 = vmatmul.msk.f32.gmra.mxu2 %vm674_vm2, %v9679_v21  ;;  %11312 = vmatmul.msk.f32.gmra.mxu1 %vm674_vm2, %v9345_v10  ;;  %v9625_v21 = vadd.f32 %v15130_v45, %v9275_v19  ;;  %v9279_v19 = vadd.f32 %v15199_v30, %v15079_v35  ;;  %v9280_v35 = vadd.f32 %v15213_v39, %v15096_v14 }
 0x8ac   : > { %v9281_v14 = vadd.f32 %v15230_v3, %v15111_v38 }
 0x8ad   : > { %10098 = vst.msk [vmem:[%s15138_s11 + $0x30] sm:$0xff] %vm674_vm2, %v10057_v0  ;;  %v15267_v45 = vpop.f32.mrf.mxu3 }
 0x8ae   : > { %v9863_v41 = vpop.f32.mrf.mxu2 }
 0x8af   : > { %v9972_v18 = vadd.f32 %v9863_v41, %v9622_v1  ;;  %v15256_v1 = vpop.f32.mrf.mxu0  ;;  %v9683_v41 = vld [vmem:[#allocation2 + $0x103] sm:$0xff] }
 0x8b1   : > { %v10017_v2 = vadd.f32 %v15125_v60, %v9972_v18 }
 0x8b2   : > { %11270 = vmatmul.msk.f32.gmra.mxu0 %vm674_vm2, %v8996_v55  ;;  %v9626_v55 = vadd.f32 %v15151_v42, %v9276_v26  ;;  %v9627_v42 = vadd.f32 %v15168_v44, %v9277_v57  ;;  %v9628_v44 = vadd.f32 %v15185_v9, %v9278_v58  ;;  %v9629_v9 = vadd.f32 %v15201_v12, %v9279_v19  ;;  %v9687_v26 = vld [vmem:[#allocation2 + $0x123] sm:$0xff]  ;;  %v9688_v57 = vld [vmem:[#allocation2 + $0x12b] sm:$0xff] }
 0x8b3   : > { %v10058_v8 = vmax.f32 %v10017_v2, 0.0  ;;  %11340 = vmatmul.msk.f32.gmra.mxu2 %vm674_vm2, %v9680_v43  ;;  %11313 = vmatmul.msk.f32.gmra.mxu1 %vm674_vm2, %v9346_v53  ;;  %v15263_v53 = vpop.f32.mrf.mxu1  ;;  %v9630_v12 = vadd.f32 %v15217_v4, %v9280_v35 }
 0x8b5   : > { %10099 = vst.msk [vmem:[%s15138_s11 + $0x38] sm:$0xff] %vm674_vm2, %v10058_v8  ;;  %v9684_v8 = vld [vmem:[#allocation2 + $0x10b] sm:$0xff] }
 0x8b6   : > { %v9866_v56 = vpop.f32.mrf.mxu2 }
 0x8b7   : > { %v9973_v25 = vadd.f32 %v9866_v56, %v9623_v28  ;;  %v15272_v43 = vpop.f32.mrf.mxu0 }
 0x8b9   : > { %v10018_v51 = vadd.f32 %v15125_v60, %v9973_v25 }
 0x8bb   : > { %v10059_v33 = vmax.f32 %v10018_v51, 0.0  ;;  %11341 = vmatmul.msk.f32.gmra.mxu2 %vm674_vm2, %v9681_v6  ;;  %v15278_v25 = vpop.f32.mrf.mxu1  ;;  %v15280_v51 = vpop.f32.mrf.mxu3  ;;  %v9685_v6 = vld [vmem:[#allocation2 + $0x113] sm:$0xff] }
 0x8bd   : > { %10100 = vst.msk [vmem:[%s15138_s11 + $0x40] sm:$0xff] %vm674_vm2, %v10059_v33 }
 0x8be   : > { %v9869_v10 = vpop.f32.mrf.mxu2 }
 0x8bf   : > { %v9974_v13 = vadd.f32 %v9869_v10, %v9624_v17  ;;  %v15286_v17 = vpop.f32.mrf.mxu0 }
 0x8c1   : > { %v10019_v29 = vadd.f32 %v15125_v60, %v9974_v13 }
 0x8c3   : > { %v10060_v23 = vmax.f32 %v10019_v29, 0.0  ;;  %11342 = vmatmul.msk.f32.gmra.mxu2 %vm674_vm2, %v9682_v16  ;;  %v15293_v29 = vpop.f32.mrf.mxu1  ;;  %v15296_v50 = vpop.f32.mrf.mxu3  ;;  %v9686_v16 = vld [vmem:[#allocation2 + $0x11b] sm:$0xff] }
 0x8c5   : > { %10101 = vst.msk [vmem:[%s15138_s11 + $0x48] sm:$0xff] %vm674_vm2, %v10060_v23 }
 0x8c6   : > { %v9872_v11 = vpop.f32.mrf.mxu2 }
 0x8c7   : > { %v9975_v0 = vadd.f32 %v9872_v11, %v9625_v21  ;;  %v15302_v21 = vpop.f32.mrf.mxu0 }
 0x8c9   : > { %v10020_v24 = vadd.f32 %v15125_v60, %v9975_v0 }
 0x8cb   : > { %v10061_v18 = vmax.f32 %v10020_v24, 0.0  ;;  %11343 = vmatmul.msk.f32.gmra.mxu2 %vm674_vm2, %v9683_v41  ;;  %v15307_v24 = vpop.f32.mrf.mxu1 }
 0x8cd   : > { %10102 = vst.msk [vmem:[%s15138_s11 + $0x50] sm:$0xff] %vm674_vm2, %v10061_v18  ;;  %v15310_v18 = vpop.f32.mrf.mxu3 }
 0x8ce   : > { %v9875_v62 = vpop.f32.mrf.mxu2 }
 0x8cf   : > { %v9976_v2 = vadd.f32 %v9875_v62, %v9626_v55 }
 0x8d1   : > { %v10021_v48 = vadd.f32 %v15125_v60, %v9976_v2  ;;  %v15315_v2 = vpop.f32.mrf.mxu0 }
 0x8d3   : > { %v10062_v28 = vmax.f32 %v10021_v48, 0.0  ;;  %11344 = vmatmul.msk.f32.gmra.mxu2 %vm674_vm2, %v9684_v8  ;;  %v9631_v8 = vadd.f32 %v15233_v22, %v9281_v14 }
 0x8d5   : > { %10103 = vst.msk [vmem:[%s15138_s11 + $0x58] sm:$0xff] %vm674_vm2, %v10062_v28  ;;  %v15778_v28 = vld [vmem:[#allocation42_spill] sm:$0xff] }
 0x8d6   : > { %v9878_v56 = vpop.f32.mrf.mxu2  ;;  %v8932_v4 = vadd.f32 %v15251_v34, %v15778_v28  ;;  %v8933_v34 = vadd.f32 %v15267_v45, %v14762_v61  ;;  %v8934_v61 = vadd.f32 %v15280_v51, %v14778_v47  ;;  %v15780_v28 = vld [vmem:[#allocation48_spill] sm:$0xff] }
 0x8d7   : > { %v9977_v31 = vadd.f32 %v9878_v56, %v9627_v42  ;;  %v9555_v42 = vpop.f32.mrf.mxu1  ;;  %v8858_v56 = vpop.f32.mrf.mxu3 }
 0x8d8   : > { %v9282_v38 = vadd.f32 %v15256_v1, %v8932_v4  ;;  %v9283_v1 = vadd.f32 %v15272_v43, %v8933_v34 }
 0x8d9   : > { %v10022_v54 = vadd.f32 %v15125_v60, %v9977_v31 }
 0x8da   : > { %v9632_v22 = vadd.f32 %v15263_v53, %v9282_v38  ;;  %v9633_v53 = vadd.f32 %v15278_v25, %v9283_v1 }
 0x8db   : > { %v10063_v33 = vmax.f32 %v10022_v54, 0.0  ;;  %11345 = vmatmul.msk.f32.gmra.mxu2 %vm674_vm2, %v9685_v6  ;;  %v9208_v54 = vpop.f32.mrf.mxu0  ;;  %v9689_v6 = vld [vmem:[#allocation2 + $0x133] sm:$0xff] }
 0x8dd   : > { %10104 = vst.msk [vmem:[%s15138_s11 + $0x60] sm:$0xff] %vm674_vm2, %v10063_v33 }
 0x8de   : > { %v9881_v10 = vpop.f32.mrf.mxu2 }
 0x8df   : > { %v9978_v13 = vadd.f32 %v9881_v10, %v9628_v44  ;;  %v9558_v10 = vpop.f32.mrf.mxu1  ;;  %v8861_v19 = vpop.f32.mrf.mxu3 }
 0x8e1   : > { %v10023_v27 = vadd.f32 %v15125_v60, %v9978_v13 }
 0x8e3   : > { %v10064_v23 = vmax.f32 %v10023_v27, 0.0  ;;  %11346 = vmatmul.msk.f32.gmra.mxu2 %vm674_vm2, %v9686_v16  ;;  %v9690_v16 = vld [vmem:[#allocation2 + $0x13b] sm:$0xff] }
 0x8e5   : > { %10105 = vst.msk [vmem:[%s15138_s11 + $0x68] sm:$0xff] %vm674_vm2, %v10064_v23 }
 0x8e6   : > { %v9884_v11 = vpop.f32.mrf.mxu2 }
 0x8e7   : > { %v9979_v0 = vadd.f32 %v9884_v11, %v9629_v9  ;;  %v9211_v9 = vpop.f32.mrf.mxu0  ;;  %v9561_v43 = vpop.f32.mrf.mxu1 }
 0x8e9   : > { %v10024_v30 = vadd.f32 %v15125_v60, %v9979_v0  ;;  %v9284_v0 = vadd.f32 %v15286_v17, %v8934_v61 }
 0x8eb   : > { %v10065_v41 = vmax.f32 %v10024_v30, 0.0  ;;  %11347 = vmatmul.msk.f32.gmra.mxu2 %vm674_vm2, %v9687_v26  ;;  %v8864_v30 = vpop.f32.mrf.mxu3  ;;  %v9691_v26 = vld [vmem:[#allocation2 + $0x143] sm:$0xff]  ;;  %v9634_v25 = vadd.f32 %v15293_v29, %v9284_v0 }
 0x8ec   : > { %v9695_v0 = vld [vmem:[#allocation2 + $0x163] sm:$0xff] }
 0x8ed   : > { %10106 = vst.msk [vmem:[%s15138_s11 + $0x70] sm:$0xff] %vm674_vm2, %v10065_v41 }
 0x8ee   : > { %v9887_v55 = vpop.f32.mrf.mxu2 }
 0x8ef   : > { %v9980_v62 = vadd.f32 %v9887_v55, %v9630_v12  ;;  %v15779_v12 = vld [vmem:[#allocation45_spill] sm:$0xff]  ;;  %v9214_v51 = vpop.f32.mrf.mxu0 }
 0x8f0   : > { %v8935_v47 = vadd.f32 %v15296_v50, %v15779_v12  ;;  %v8936_v50 = vadd.f32 %v15310_v18, %v15780_v28  ;;  %v9696_v12 = vld [vmem:[#allocation2 + $0x16b] sm:$0xf] }
 0x8f1   : > { %v10025_v39 = vadd.f32 %v15125_v60, %v9980_v62 }
 0x8f2   : > { %v9285_v17 = vadd.f32 %v15302_v21, %v8935_v47  ;;  %v9286_v21 = vadd.f32 %v15315_v2, %v8936_v50 }
 0x8f3   : > { %v10066_v48 = vmax.f32 %v10025_v39, 0.0  ;;  %11348 = vmatmul.msk.f32.gmra.mxu2 %vm674_vm2, %v9688_v57  ;;  %v9692_v39 = vld [vmem:[#allocation2 + $0x14b] sm:$0xff]  ;;  %v9564_v57 = vpop.f32.mrf.mxu1 }
 0x8f4   : > { %v9635_v29 = vadd.f32 %v15307_v24, %v9285_v17 }
 0x8f5   : > { %10107 = vst.msk [vmem:[%s15138_s11 + $0x78] sm:$0xff] %vm674_vm2, %v10066_v48 }
 0x8f6   : > { %v9890_v31 = vpop.f32.mrf.mxu2 }
 0x8f7   : > { %v9981_v58 = vadd.f32 %v9890_v31, %v9631_v8  ;;  %v8867_v8 = vpop.f32.mrf.mxu3 }
 0x8f9   : > { %v10026_v3 = vadd.f32 %v15125_v60, %v9981_v58  ;;  %v9217_v58 = vpop.f32.mrf.mxu0 }
 0x8fb   : > { %v10067_v33 = vmax.f32 %v10026_v3, 0.0  ;;  %11349 = vmatmul.msk.f32.gmra.mxu2 %vm674_vm2, %v9689_v6  ;;  %v9693_v3 = vld [vmem:[#allocation2 + $0x153] sm:$0xff]  ;;  %v9567_v34 = vpop.f32.mrf.mxu1 }
 0x8fd   : > { %10108 = vst.msk [vmem:[%s15138_s11 + $0x80] sm:$0xff] %vm674_vm2, %v10067_v33  ;;  %v9636_v33 = vadd.f32 %v9555_v42, %v9286_v21  ;;  %v8938_v42 = vadd.f32 %v8861_v19, %v14838_v7 }
 0x8fe   : > { %v9893_v44 = vpop.f32.mrf.mxu2 }
 0x8ff   : > { %v9982_v13 = vadd.f32 %v9893_v44, %v9632_v22  ;;  %v15781_v22 = vld [vmem:[#allocation22_spill] sm:$0xff]  ;;  %v8870_v18 = vpop.f32.mrf.mxu3 }
 0x900   : > { %v8937_v24 = vadd.f32 %v8858_v56, %v15781_v22 }
 0x901   : > { %v10027_v27 = vadd.f32 %v15125_v60, %v9982_v13  ;;  %v9220_v2 = vpop.f32.mrf.mxu0 }
 0x902   : > { %v9287_v1 = vadd.f32 %v9208_v54, %v8937_v24 }
 0x903   : > { %v10068_v23 = vmax.f32 %v10027_v27, 0.0  ;;  %11350 = vmatmul.msk.f32.gmra.mxu2 %vm674_vm2, %v9690_v16  ;;  %v9694_v16 = vld [vmem:[#allocation2 + $0x15b] sm:$0xff]  ;;  %v9570_v61 = vpop.f32.mrf.mxu1 }
 0x905   : > { %10109 = vst.msk [vmem:[%s15138_s11 + $0x88] sm:$0xff] %vm674_vm2, %v10068_v23 }
 0x906   : > { %v9896_v45 = vpop.f32.mrf.mxu2 }
 0x907   : > { %v9983_v11 = vadd.f32 %v9896_v45, %v9633_v53  ;;  %v9637_v53 = vadd.f32 %v9558_v10, %v9287_v1  ;;  %v8939_v10 = vadd.f32 %v8864_v30, %v14855_v63 }
 0x909   : > { %v10028_v35 = vadd.f32 %v15125_v60, %v9983_v11  ;;  %v8873_v11 = vpop.f32.mrf.mxu3  ;;  %v9289_v47 = vadd.f32 %v9214_v51, %v8939_v10 }
 0x90b   : > { %v10069_v41 = vmax.f32 %v10028_v35, 0.0  ;;  %11351 = vmatmul.msk.f32.gmra.mxu2 %vm674_vm2, %v9691_v26  ;;  %v9288_v35 = vadd.f32 %v9211_v9, %v8938_v42 }
 0x90d   : > { %10110 = vst.msk [vmem:[%s15138_s11 + $0x90] sm:$0xff] %vm674_vm2, %v10069_v41  ;;  %v9223_v41 = vpop.f32.mrf.mxu0 }
 0x90e   : > { %v9899_v55 = vpop.f32.mrf.mxu2 }
 0x90f   : > { %v9984_v62 = vadd.f32 %v9899_v55, %v9634_v25  ;;  %v9638_v25 = vadd.f32 %v9561_v43, %v9288_v35  ;;  %v9573_v55 = vpop.f32.mrf.mxu1 }
 0x911   : > { %v10029_v14 = vadd.f32 %v15125_v60, %v9984_v62  ;;  %v8876_v9 = vpop.f32.mrf.mxu3 }
 0x913   : > { %v10070_v48 = vmax.f32 %v10029_v14, 0.0  ;;  %11352 = vmatmul.msk.f32.gmra.mxu2 %vm674_vm2, %v9692_v39  ;;  %v9639_v14 = vadd.f32 %v9564_v57, %v9289_v47  ;;  %v8940_v39 = vadd.f32 %v8867_v8, %v14872_v5 }
 0x915   : > { %10111 = vst.msk [vmem:[%s15138_s11 + $0x98] sm:$0xff] %vm674_vm2, %v10070_v48  ;;  %v9226_v63 = vpop.f32.mrf.mxu0  ;;  %v9290_v48 = vadd.f32 %v9217_v58, %v8940_v39  ;;  %v15782_v39 = vld [vmem:[#allocation24_spill] sm:$0xff] }
 0x916   : > { %v9902_v4 = vpop.f32.mrf.mxu2 }
 0x917   : > { %v9985_v31 = vadd.f32 %v9902_v4, %v9635_v29  ;;  %v9576_v51 = vpop.f32.mrf.mxu1  ;;  %v9640_v4 = vadd.f32 %v9567_v34, %v9290_v48 }
 0x919   : > { %v10030_v38 = vadd.f32 %v15125_v60, %v9985_v31  ;;  %v8879_v50 = vpop.f32.mrf.mxu3  ;;  %v8941_v31 = vadd.f32 %v8870_v18, %v14889_v49 }
 0x91b   : > { %v10071_v6 = vmax.f32 %v10030_v38, 0.0  ;;  %11353 = vmatmul.msk.f32.gmra.mxu2 %vm674_vm2, %v9693_v3  ;;  %v9291_v8 = vadd.f32 %v9220_v2, %v8941_v31 }
 0x91d   : > { %10112 = vst.msk [vmem:[%s15138_s11 + $0xa0] sm:$0xff] %vm674_vm2, %v10071_v6  ;;  %v9229_v5 = vpop.f32.mrf.mxu0  ;;  %v9641_v58 = vadd.f32 %v9570_v61, %v9291_v8  ;;  %v8942_v6 = vadd.f32 %v8873_v11, %v14902_v46  ;;  %v8944_v11 = vadd.f32 %v8879_v50, %v14936_v52  ;;  %v15783_v50 = vld [vmem:[#allocation25_spill] sm:$0xff] }
 0x91e   : > { %v9905_v44 = vpop.f32.mrf.mxu2 }
 0x91f   : > { %v9986_v13 = vadd.f32 %v9905_v44, %v9636_v33  ;;  %v9579_v33 = vpop.f32.mrf.mxu1  ;;  %v9292_v49 = vadd.f32 %v9223_v41, %v8942_v6 }
 0x921   : > { %v10031_v27 = vadd.f32 %v15125_v60, %v9986_v13  ;;  %v8882_v22 = vpop.f32.mrf.mxu3  ;;  %v9642_v1 = vadd.f32 %v9573_v55, %v9292_v49 }
 0x923   : > { %v10072_v23 = vmax.f32 %v10031_v27, 0.0  ;;  %11354 = vmatmul.msk.f32.gmra.mxu2 %vm674_vm2, %v9694_v16  ;;  %v8943_v27 = vadd.f32 %v8876_v9, %v14919_v15  ;;  %v9294_v15 = vadd.f32 %v9229_v5, %v8944_v11 }
 0x925   : > { %10113 = vst.msk [vmem:[%s15138_s11 + $0xa8] sm:$0xff] %vm674_vm2, %v10072_v23  ;;  %v9232_v44 = vpop.f32.mrf.mxu0  ;;  %v9644_v10 = vadd.f32 %v9579_v33, %v9294_v15 }
 0x926   : > { %v9908_v56 = vpop.f32.mrf.mxu2 }
 0x927   : > { %v9987_v45 = vadd.f32 %v9908_v56, %v9637_v53  ;;  %v9582_v16 = vpop.f32.mrf.mxu1  ;;  %v9293_v53 = vadd.f32 %v9226_v63, %v8943_v27 }
 0x929   : > { %v10032_v54 = vadd.f32 %v15125_v60, %v9987_v45  ;;  %v8885_v23 = vpop.f32.mrf.mxu3  ;;  %v9643_v45 = vadd.f32 %v9576_v51, %v9293_v53 }
 0x92a   : > { %v8946_v63 = vadd.f32 %v8885_v23, %v15782_v39 }
 0x92b   : > { %v10073_v26 = vmax.f32 %v10032_v54, 0.0  ;;  %11355 = vmatmul.msk.f32.gmra.mxu2 %vm674_vm2, %v9695_v0 }
 0x92d   : > { %10114 = vst.msk [vmem:[%s15138_s11 + $0xb0] sm:$0xff] %vm674_vm2, %v10073_v26  ;;  %v9235_v61 = vpop.f32.mrf.mxu0 }
 0x92e   : > { %v9911_v7 = vpop.f32.mrf.mxu2  ;;  %v9296_v48 = vadd.f32 %v9235_v61, %v8946_v63 }
 0x92f   : > { %v9988_v19 = vadd.f32 %v9911_v7, %v9638_v25  ;;  %v9585_v54 = vpop.f32.mrf.mxu1  ;;  %v8945_v7 = vadd.f32 %v8882_v22, %v14953_v36 }
 0x931   : > { %v10033_v62 = vadd.f32 %v15125_v60, %v9988_v19  ;;  %v8888_v41 = vpop.f32.mrf.mxu3  ;;  %v9295_v52 = vadd.f32 %v9232_v44, %v8945_v7  ;;  %v15785_v7 = vld [vmem:[#allocation26_spill] sm:$0xff] }
 0x933   : > { %v10074_v17 = vmax.f32 %v10033_v62, 0.0  ;;  %11356 = vmatmul.msk.f32.gmra.mxu2 %vm674_vm2, %v9696_v12 }
 0x935   : > { %10115 = vst.msk [vmem:[%s15138_s11 + $0xb8] sm:$0xff] %vm674_vm2, %v10074_v17  ;;  %v9238_v19 = vpop.f32.mrf.mxu0 }
 0x936   : > { %v9914_v43 = vpop.f32.mrf.mxu2 }
 0x937   : > { %v9989_v30 = vadd.f32 %v9914_v43, %v9639_v14  ;;  %v9588_v62 = vpop.f32.mrf.mxu1  ;;  %v9645_v14 = vadd.f32 %v9582_v16, %v9295_v52 }
 0x939   : > { %v10034_v29 = vadd.f32 %v15125_v60, %v9989_v30  ;;  %v8891_v17 = vpop.f32.mrf.mxu3 }
 0x93a   : > { %v8948_v33 = vadd.f32 %v8891_v17, %v15000_v37 }
 0x93b   : > { %v10075_v28 = vmax.f32 %v10034_v29, 0.0 }
 0x93d   : > { %10116 = vst.msk [vmem:[%s15138_s11 + $0xc0] sm:$0xff] %vm674_vm2, %v10075_v28  ;;  %v9241_v36 = vpop.f32.mrf.mxu0  ;;  %v9646_v28 = vadd.f32 %v9585_v54, %v9296_v48 }
 0x93e   : > { %v9917_v57 = vpop.f32.mrf.mxu2 }
 0x93f   : > { %v9990_v21 = vadd.f32 %v9917_v57, %v9640_v4  ;;  %v8947_v4 = vadd.f32 %v8888_v41, %v15783_v50  ;;  %v9591_v31 = vpop.f32.mrf.mxu1 }
 0x941   : > { %v10035_v38 = vadd.f32 %v15125_v60, %v9990_v21  ;;  %v8894_v57 = vpop.f32.mrf.mxu3  ;;  %v9297_v8 = vadd.f32 %v9238_v19, %v8947_v4 }
 0x943   : > { %v10076_v3 = vmax.f32 %v10035_v38, 0.0  ;;  %v9647_v6 = vadd.f32 %v9588_v62, %v9297_v8 }
 0x945   : > { %10117 = vst.msk [vmem:[%s15138_s11 + $0xc8] sm:$0xff] %vm674_vm2, %v10076_v3  ;;  %v9244_v3 = vpop.f32.mrf.mxu0 }
 0x946   : > { %v9920_v24 = vpop.f32.mrf.mxu2 }
 0x947   : > { %v9991_v34 = vadd.f32 %v9920_v24, %v9641_v58  ;;  %v9594_v24 = vpop.f32.mrf.mxu1 }
 0x949   : > { %v10036_v18 = vadd.f32 %v15125_v60, %v9991_v34  ;;  %v8897_v49 = vpop.f32.mrf.mxu3 }
 0x94b   : > { %v10077_v13 = vmax.f32 %v10036_v18, 0.0  ;;  %v9298_v18 = vadd.f32 %v9241_v36, %v8948_v33 }
 0x94d   : > { %10118 = vst.msk [vmem:[%s15138_s11 + $0xd0] sm:$0xff] %vm674_vm2, %v10077_v13  ;;  %v9648_v27 = vadd.f32 %v9591_v31, %v9298_v18 }
 0x94e   : > { %v9923_v2 = vpop.f32.mrf.mxu2 }
 0x94f   : > { %v9992_v46 = vadd.f32 %v9923_v2, %v9642_v1  ;;  %v9247_v1 = vpop.f32.mrf.mxu0  ;;  %v8949_v2 = vadd.f32 %v8894_v57, %v15017_v59  ;;  %v9597_v23 = vpop.f32.mrf.mxu1 }
 0x951   : > { %v10037_v42 = vadd.f32 %v15125_v60, %v9992_v46  ;;  %v9299_v37 = vadd.f32 %v9244_v3, %v8949_v2 }
 0x953   : > { %v10078_v56 = vmax.f32 %v10037_v42, 0.0  ;;  %v8900_v42 = vpop.f32.mrf.mxu3  ;;  %v9649_v61 = vadd.f32 %v9594_v24, %v9299_v37 }
 0x954   : > { %v8951_v19 = vadd.f32 %v8900_v42, %v15785_v7 }
 0x955   : > { %10119 = vst.msk [vmem:[%s15138_s11 + $0xd8] sm:$0xff] %vm674_vm2, %v10078_v56 }
 0x956   : > { %v9926_v0 = vpop.f32.mrf.mxu2 }
 0x957   : > { %v9993_v35 = vadd.f32 %v9926_v0, %v9643_v45  ;;  %v15784_v45 = vld [vmem:[#allocation3_spill] sm:$0xff]  ;;  %v9250_v0 = vpop.f32.mrf.mxu0 }
 0x958   : > { %v8950_v11 = vadd.f32 %v8897_v49, %v15784_v45 }
 0x959   : > { %v10038_v26 = vadd.f32 %v15125_v60, %v9993_v35 }
 0x95a   : > { %v9300_v59 = vadd.f32 %v9247_v1, %v8950_v11 }
 0x95b   : > { %v10079_v25 = vmax.f32 %v10038_v26, 0.0  ;;  %v9600_v26 = vpop.f32.mrf.mxu1 }
 0x95d   : > { %10120 = vst.msk [vmem:[%s15138_s11 + $0xe0] sm:$0xff] %vm674_vm2, %v10079_v25  ;;  %v8903_v25 = vpop.f32.mrf.mxu3 }
 0x95e   : > { %v9929_v12 = vpop.f32.mrf.mxu2 }
 0x95f   : > { %v9994_v47 = vadd.f32 %v9929_v12, %v9644_v10  ;;  %v9650_v10 = vadd.f32 %v9597_v23, %v9300_v59  ;;  %v9253_v52 = vpop.f32.mrf.mxu0 }
 0x961   : > { %v10039_v55 = vadd.f32 %v15125_v60, %v9994_v47 }
 0x963   : > { %v10080_v9 = vmax.f32 %v10039_v55, 0.0  ;;  %v9301_v55 = vadd.f32 %v9250_v0, %v8951_v19  ;;  %v9603_v63 = vpop.f32.mrf.mxu1 }
 0x965   : > { %10121 = vst.msk [vmem:[%s15138_s11 + $0xe8] sm:$0xff] %vm674_vm2, %v10080_v9  ;;  %v9651_v17 = vadd.f32 %v9600_v26, %v9301_v55 }
 0x966   : > { %v9932_v43 = vpop.f32.mrf.mxu2 }
 0x967   : > { %v9995_v30 = vadd.f32 %v9932_v43, %v9645_v14  ;;  %v15786_v14 = vld [vmem:[#allocation28_spill] sm:$0xff]  ;;  %v8906_v43 = vpop.f32.mrf.mxu3 }
 0x968   : > { %v8952_v39 = vadd.f32 %v8903_v25, %v15786_v14  ;;  %v8953_v4 = vadd.f32 %v8906_v43, %v15081_v20 }
 0x969   : > { %v10040_v29 = vadd.f32 %v15125_v60, %v9995_v30 }
 0x96a   : > { %v9302_v48 = vadd.f32 %v9253_v52, %v8952_v39 }
 0x96b   : > { %v10081_v51 = vmax.f32 %v10040_v29, 0.0 }
 0x96c   : > { %v9652_v50 = vadd.f32 %v9603_v63, %v9302_v48 }
 0x96d   : > { %10122 = vst.msk [vmem:[%s15138_s11 + $0xf0] sm:$0xff] %vm674_vm2, %v10081_v51  ;;  %v9256_v51 = vpop.f32.mrf.mxu0 }
 0x96e   : > { %v9935_v21 = vpop.f32.mrf.mxu2  ;;  %v9303_v8 = vadd.f32 %v9256_v51, %v8953_v4 }
 0x96f   : > { %v9996_v5 = vadd.f32 %v9935_v21, %v9646_v28  ;;  %v9606_v21 = vpop.f32.mrf.mxu1 }
 0x971   : > { %v10041_v38 = vadd.f32 %v15125_v60, %v9996_v5  ;;  %v8909_v5 = vpop.f32.mrf.mxu3 }
 0x972   : > { %v8954_v33 = vadd.f32 %v8909_v5, %v15098_v40 }
 0x973   : > { %v10082_v58 = vmax.f32 %v10041_v38, 0.0 }
 0x975   : > { %10123 = vst.msk [vmem:[%s15138_s11 + $0xf8] sm:$0xff] %vm674_vm2, %v10082_v58  ;;  %v9259_v58 = vpop.f32.mrf.mxu0 }
 0x976   : > { %v9938_v22 = vpop.f32.mrf.mxu2 }
 0x977   : > { %v9997_v34 = vadd.f32 %v9938_v22, %v9647_v6  ;;  %v9653_v6 = vadd.f32 %v9606_v21, %v9303_v8  ;;  %v9609_v20 = vpop.f32.mrf.mxu1 }
 0x979   : > { %v10042_v44 = vadd.f32 %v15125_v60, %v9997_v34  ;;  %v9304_v34 = vadd.f32 %v9259_v58, %v8954_v33  ;;  %v8912_v18 = vpop.f32.mrf.mxu3 }
 0x97a   : > { %v8955_v1 = vadd.f32 %v8912_v18, %v15113_v32 }
 0x97b   : > { %v10083_v13 = vmax.f32 %v10042_v44, 0.0 }
 0x97d   : > { %10124 = vst.msk [vmem:[%s15138_s11 + $0x100] sm:$0xff] %vm674_vm2, %v10083_v13  ;;  %v9654_v13 = vadd.f32 %v9609_v20, %v9304_v34 }
 0x97e   : > { %v9941_v16 = vpop.f32.mrf.mxu2 }
 0x97f   : > { %v9998_v46 = vadd.f32 %v9941_v16, %v9648_v27  ;;  %v9262_v27 = vpop.f32.mrf.mxu0  ;;  %v9612_v37 = vpop.f32.mrf.mxu1 }
 0x980   : > { %v9305_v16 = vadd.f32 %v9262_v27, %v8955_v1 }
 0x981   : > { %v10043_v53 = vadd.f32 %v15125_v60, %v9998_v46 }
 0x983   : > { %v10084_v56 = vmax.f32 %v10043_v53, 0.0  ;;  %v9655_v53 = vadd.f32 %v9612_v37, %v9305_v16 }
 0x985   : > { %10125 = vst.msk [vmem:[%s15138_s11 + $0x108] sm:$0xff] %vm674_vm2, %v10084_v56 }
 0x986   : > { %v9944_v35 = vpop.f32.mrf.mxu2 }
 0x987   : > { %v9999_v15 = vadd.f32 %v9944_v35, %v9649_v61 }
 0x989   : > { %v10044_v54 = vadd.f32 %v15125_v60, %v9999_v15 }
 0x98b   : > { %v10085_v41 = vmax.f32 %v10044_v54, 0.0 }
 0x98d   : > { %10126 = vst.msk [vmem:[%s15138_s11 + $0x110] sm:$0xff] %vm674_vm2, %v10085_v41 }
 0x98e   : > { %v9947_v12 = vpop.f32.mrf.mxu2 }
 0x98f   : > { %v10000_v47 = vadd.f32 %v9947_v12, %v9650_v10 }
 0x991   : > { %v10045_v62 = vadd.f32 %v15125_v60, %v10000_v47 }
 0x993   : > { %v10086_v9 = vmax.f32 %v10045_v62, 0.0 }
 0x995   : > { %10127 = vst.msk [vmem:[%s15138_s11 + $0x118] sm:$0xff] %vm674_vm2, %v10086_v9 }
 0x996   : > { %v9950_v30 = vpop.f32.mrf.mxu2 }
 0x997   : > { %v10001_v36 = vadd.f32 %v9950_v30, %v9651_v17 }
 0x999   : > { %v10046_v29 = vadd.f32 %v15125_v60, %v10001_v36 }
 0x99b   : > { %v10087_v28 = vmax.f32 %v10046_v29, 0.0 }
 0x99d   : > { %10128 = vst.msk [vmem:[%s15138_s11 + $0x120] sm:$0xff] %vm674_vm2, %v10087_v28 }
 0x99e   : > { %v9953_v31 = vpop.f32.mrf.mxu2 }
 0x99f   : > { %v10002_v57 = vadd.f32 %v9953_v31, %v9652_v50 }
 0x9a1   : > { %v10047_v38 = vadd.f32 %v15125_v60, %v10002_v57 }
 0x9a3   : > { %v10088_v3 = vmax.f32 %v10047_v38, 0.0 }
 0x9a5   : > { %10129 = vst.msk [vmem:[%s15138_s11 + $0x128] sm:$0xff] %vm674_vm2, %v10088_v3 }
 0x9a6   : > { %v9956_v22 = vpop.f32.mrf.mxu2 }
 0x9a7   : > { %v10003_v24 = vadd.f32 %v9956_v22, %v9653_v6 }
 0x9a9   : > { %v10048_v49 = vadd.f32 %v15125_v60, %v10003_v24 }
 0x9ab   : > { %v10089_v44 = vmax.f32 %v10048_v49, 0.0 }
 0x9ad   : > { %10130 = vst.msk [vmem:[%s15138_s11 + $0x130] sm:$0xff] %vm674_vm2, %v10089_v44 }
 0x9ae   : > { %v9959_v2 = vpop.f32.mrf.mxu2 }
 0x9af   : > { %v10004_v40 = vadd.f32 %v9959_v2, %v9654_v13 }
 0x9b1   : > { %v10049_v46 = vadd.f32 %v15125_v60, %v10004_v40 }
 0x9b3   : > { %v10090_v23 = vmax.f32 %v10049_v46, 0.0 }
 0x9b5   : > { %10131 = vst.msk [vmem:[%s15138_s11 + $0x138] sm:$0xff] %vm674_vm2, %v10090_v23 }
 0x9b6   : > { %v9962_v42 = vpop.f32.mrf.mxu2 }
 0x9b7   : > { %v10005_v56 = vadd.f32 %v9962_v42, %v9655_v53 }
 0x9b9   : > { %v10050_v61 = vadd.f32 %v15125_v60, %v10005_v56 }
 0x9bb   : > { %v10091_v45 = vmax.f32 %v10050_v61, 0.0 }
 0x9bd   : > { %10132 = vst.msk [vmem:[%s15138_s11 + $0x140] sm:$0xf] %vm6937_vm3, %v10091_v45 }
 0x9be PF: > { %s18_s27 = sadd.s32 1, %s11386_s27  }
 0x9bf   : > { %p15_p4 = scmp.ge.s32.totalorder %s18_s27, 4  }
 0x9c1   :  { %17 = sbr.rel (!%p15_p4) target bundleno = 1 (0x1), region = 109 }

</bundles_post_ra>
